<compile_context>
chip_gen: v5e
topology: v5e:2x2
jax: 0.10.0
libtpu: 0.0.40
codegen_flags: <defaults>
</compile_context>

<pallas_src>
import jax
import jax.numpy as jnp
from jax import lax
from jax.experimental import pallas as pl
from jax.experimental.pallas import tpu as pltpu


def _round_up(x, m):
    return ((x + m - 1) // m) * m


# ----------------------------------------------------------------------------
# Pallas kernel: LSTM recurrence (input projection pre-hoisted) + MLP heads.
# Layout: batch on the 128-lane axis, hidden/gates on sublanes.
# ----------------------------------------------------------------------------
def _gdisc_kernel(gx_ref, zt_ref, whh_ref, wenc_ref, benc_ref,
                  w1z_ref, w1x_ref, b1_ref, w2_ref, b2_ref, out_ref,
                  h_scr, c_scr):
    Tc = gx_ref.shape[0]          # steps in this T-chunk (static)
    H = whh_ref.shape[1]
    tc = pl.program_id(1)         # T-chunk index ("arbitrary" axis)

    @pl.when(tc == 0)
    def _():
        h_scr[...] = jnp.zeros_like(h_scr)
        c_scr[...] = jnp.zeros_like(c_scr)

    whh = whh_ref[...]            # [4H, H] bf16, hoisted out of the loop

    def step(t, carry):
        h, c = carry
        # Only h @ W_hh is on the serial chain; x @ W_ih + biases precomputed.
        gates = gx_ref[t].astype(jnp.float32) + jnp.dot(
            whh, h.astype(jnp.bfloat16), preferred_element_type=jnp.float32)
        # PyTorch nn.LSTM gate order: i, f, g, o.  With batch-on-lanes each
        # gate slab is a sublane-aligned [H, b_tile] full-lane-width tile:
        # full 128-lane EUP occupancy, zero lane relayout.
        i_g = jax.nn.sigmoid(gates[0 * H:1 * H])
        f_g = jax.nn.sigmoid(gates[1 * H:2 * H])
        g_g = jnp.tanh(gates[2 * H:3 * H])
        o_g = jax.nn.sigmoid(gates[3 * H:4 * H])
        c_new = f_g * c + i_g * g_g
        h_new = o_g * jnp.tanh(c_new)
        return h_new, c_new

    # Full unroll for small chunks (LLO overlap of MXU push/pop with EUP of the
    # previous step); partial unroll for large T to avoid i-mem blowup.
    h, c = lax.fori_loop(0, Tc, step, (h_scr[...], c_scr[...]),
                         unroll=Tc if Tc <= 32 else 8)
    h_scr[...] = h
    c_scr[...] = c

    @pl.when(tc == pl.num_programs(1) - 1)
    def _():
        # LSTMEncoder.main: Linear(H, H) -> ReLU      (transposed, batch on lanes)
        enc = jnp.maximum(
            jnp.dot(wenc_ref[...], h, preferred_element_type=jnp.float32)
            + benc_ref[...], 0.0)
        # GlobalDiscriminator.main: Linear(2H,H) -> ReLU -> Linear(H,1).
        # cat([z, enc]) @ W1  ==  W1[:H]^T @ z^T + W1[H:]^T @ enc^T  (no concat).
        hid = jnp.maximum(
            jnp.dot(w1z_ref[...], zt_ref[...], preferred_element_type=jnp.float32)
            + jnp.dot(w1x_ref[...], enc, preferred_element_type=jnp.float32)
            + b1_ref[...], 0.0)
        # Final Linear(H, 1): VPU multiply + sublane reduce -> lane-dense
        # [1, b_tile] store (no underfilled 1-column MXU pop, no masked store).
        out_ref[...] = (jnp.sum(hid * w2_ref[...], axis=0, keepdims=True)
                        + b2_ref[...])


def global_discriminator_pallas(gates_x, zt, whh_t, wenc_t, benc_t,
                                w1z_t, w1x_t, b1_t, w2, b2, max_t_chunk=None):
    """gates_x: [T, 4H, B] bf16 precomputed x@W_ih + (b_ih+b_hh); zt: [H, B].
    Returns [B, 1]."""
    T, G, B = gates_x.shape
    H = whh_t.shape[1]
    assert G == 4 * H

    # Batch lives on the 128-lane axis.  Use 128-wide tiles until the batch is
    # big enough that 256-wide tiles fill the v6e/v7x MXU *and* still leave
    # >= 2 grid steps for the v7x 2-TensorCore "parallel" split.
    b_tile = 128 if B <= 3 * 128 else 256
    B_pad = _round_up(max(B, b_tile), b_tile)
    if B_pad != B:
        gates_x = jnp.pad(gates_x, ((0, 0), (0, 0), (0, B_pad - B)))
        zt = jnp.pad(zt, ((0, 0), (0, B_pad - B)))

    # Chunk T so the double-buffered gates_x tile stays <= ~16 MiB of VMEM
    # (safe under the 32 MiB scoped default and v7x's 64 MiB physical VMEM).
    # h/c are carried across chunks in VMEM scratch.
    bytes_per_step = G * b_tile * gates_x.dtype.itemsize
    t_cap = max(1, (8 * 1024 * 1024) // bytes_per_step)
    if max_t_chunk is not None:
        t_cap = min(t_cap, max_t_chunk)
    t_chunk = T if T <= t_cap else max(
        d for d in range(1, t_cap + 1) if T % d == 0)
    n_chunks = T // t_chunk

    out = pl.pallas_call(
        _gdisc_kernel,
        out_shape=jax.ShapeDtypeStruct((1, B_pad), jnp.float32),
        grid=(B_pad // b_tile, n_chunks),
        in_specs=[
            pl.BlockSpec((t_chunk, G, b_tile), lambda b, t: (t, 0, b)),  # gates_x
            pl.BlockSpec((H, b_tile), lambda b, t: (0, b)),              # z^T
            pl.BlockSpec((G, H), lambda b, t: (0, 0)),                   # W_hh^T
            pl.BlockSpec((H, H), lambda b, t: (0, 0)),                   # W_enc^T
            pl.BlockSpec((H, 1), lambda b, t: (0, 0)),                   # b_enc^T
            pl.BlockSpec((H, H), lambda b, t: (0, 0)),                   # W1[:H]^T
            pl.BlockSpec((H, H), lambda b, t: (0, 0)),                   # W1[H:]^T
            pl.BlockSpec((H, 1), lambda b, t: (0, 0)),                   # b1^T
            pl.BlockSpec((H, 1), lambda b, t: (0, 0)),                   # W2
            pl.BlockSpec((1, 1), lambda b, t: (0, 0)),                   # b2
        ],
        out_specs=pl.BlockSpec((1, b_tile), lambda b, t: (0, b)),
        scratch_shapes=[pltpu.VMEM((H, b_tile), jnp.float32),   # h carry
                        pltpu.VMEM((H, b_tile), jnp.float32)],  # c carry
        compiler_params=pltpu.CompilerParams(
            dimension_semantics=("parallel", "arbitrary")),
    )(gates_x, zt, whh_t, wenc_t, benc_t, w1z_t, w1x_t, b1_t, w2, b2)
    return out[:, :B].T                         # [B, 1]


# ----------------------------------------------------------------------------
# Plain-JAX glue reproducing GlobalDiscriminator.forward semantics.
# ----------------------------------------------------------------------------
def global_discriminator_forward(params, z, cat, cont, max_t_chunk=None):
    """z: [B, H]; cat: [B, T, n_cat] int32 (or None); cont: [B, T, cont_dim]."""
    if cat is not None:
        embs = [jnp.take(tbl, cat[:, :, i], axis=0)
                for i, tbl in enumerate(params["emb_tables"])]
        x = jnp.concatenate(embs + [cont], axis=2)            # [B, T, n_input]
    else:
        x = cont
    x = jnp.transpose(x, (1, 0, 2))                           # [T, B, n_input]
    # Hoisted LSTM input projection, produced directly time-major AND
    # batch-on-lanes: gates_x[t, g, b] = (x[t] @ W_ih + b_ih + b_hh)[b, g].
    # Streamed as bf16 (halves the dominant HBM stream; f32 accumulate in-kernel).
    gates_x = (jnp.einsum("tbd,dg->tgb", x, params["wih"])
               + params["bias"].T[None]).astype(jnp.bfloat16)
    H = params["whh"].shape[0]
    return global_discriminator_pallas(
        gates_x,
        z.T,                                                  # [H, B]
        params["whh"].T.astype(jnp.bfloat16),                 # [4H, H]
        params["w_enc"].T, params["b_enc"].T,
        params["w1"][:H].T, params["w1"][H:].T, params["b1"].T,
        params["w2"], params["b2"],
        max_t_chunk=max_t_chunk)


# Pure-JAX f32 reference (same math) for correctness checking.
def global_discriminator_reference(params, z, cat, cont):
    if cat is not None:
        embs = [jnp.take(tbl, cat[:, :, i], axis=0)
                for i, tbl in enumerate(params["emb_tables"])]
        x = jnp.concatenate(embs + [cont], axis=2)
    else:
        x = cont
    x = jnp.transpose(x, (1, 0, 2))                           # [T, B, D]
    B = z.shape[0]
    H = params["whh"].shape[0]

    def step(carry, x_t):
        h, c = carry
        gates = x_t @ params["wih"] + h @ params["whh"] + params["bias"]
        i_g = jax.nn.sigmoid(gates[:, :H])
        f_g = jax.nn.sigmoid(gates[:, H:2 * H])
        g_g = jnp.tanh(gates[:, 2 * H:3 * H])
        o_g = jax.nn.sigmoid(gates[:, 3 * H:])
        c = f_g * c + i_g * g_g
        h = o_g * jnp.tanh(c)
        return (h, c), None

    (h, _), _ = lax.scan(step,
                         (jnp.zeros((B, H), jnp.float32),
                          jnp.zeros((B, H), jnp.float32)), x)
    enc = jnp.maximum(h @ params["w_enc"] + params["b_enc"], 0.0)
    zx = jnp.concatenate([z, enc], axis=1)
    hid = jnp.maximum(zx @ params["w1"] + params["b1"], 0.0)
    return hid @ params["w2"] + params["b2"]


# ----------------------------------------------------------------------------
# Deterministic parameter init (shapes follow GlobalDiscriminator.__init__).
# Note: W_ih/W_hh are stored pre-transposed [in, 4H]; bias = b_ih + b_hh.
# ----------------------------------------------------------------------------
def init_params(key, cat_dims, emb_dims, cont_dim, n_hidden):
    cat_dims = [c + 1 for c in cat_dims]                      # module does cat_dims += 1
    n_input = int(sum(emb_dims) + cont_dim)
    ks = jax.random.split(key, 10 + len(cat_dims))
    s = 0.1
    params = {
        "emb_tables": [s * jax.random.normal(ks[i], (cd, ed), jnp.float32)
                       for i, (cd, ed) in enumerate(zip(cat_dims, emb_dims))],
        "wih": s * jax.random.normal(ks[-10], (n_input, 4 * n_hidden), jnp.float32),
        "whh": s * jax.random.normal(ks[-9], (n_hidden, 4 * n_hidden), jnp.float32),
        "bias": s * jax.random.normal(ks[-8], (1, 4 * n_hidden), jnp.float32),
        "w_enc": s * jax.random.normal(ks[-7], (n_hidden, n_hidden), jnp.float32),
        "b_enc": s * jax.random.normal(ks[-6], (1, n_hidden), jnp.float32),
        "w1": s * jax.random.normal(ks[-5], (2 * n_hidden, n_hidden), jnp.float32),
        "b1": s * jax.random.normal(ks[-4], (1, n_hidden), jnp.float32),
        "w2": s * jax.random.normal(ks[-3], (n_hidden, 1), jnp.float32),
        "b2": s * jax.random.normal(ks[-2], (1, 1), jnp.float32),
    }
    return params, cat_dims, n_input


if __name__ == "__main__":
    key = jax.random.PRNGKey(0)
    k_p, k_data = jax.random.split(key)

    raw_cat_dims = [5, 7]
    emb_dims = [3, 4]
    cont_dim = 5
    n_hidden = 32

    params, cat_dims, n_input = init_params(k_p, raw_cat_dims, emb_dims,
                                            cont_dim, n_hidden)

    def make_inputs(k, batch, seq_len):
        k_cat, k_cont, k_z = jax.random.split(k, 3)
        cat = jnp.stack(
            [jax.random.randint(jax.random.fold_in(k_cat, i),
                                (batch, seq_len), 0, cat_dims[i], dtype=jnp.int32)
             for i in range(len(cat_dims))], axis=2)          # [B, T, n_cat]
        cont = jax.random.normal(k_cont, (batch, seq_len, cont_dim), jnp.float32)
        z = jax.random.normal(k_z, (batch, n_hidden), jnp.float32)
        return z, cat, cont

    # Test 1: small batch / short sequence (single batch tile, single T chunk).
    z, cat, cont = make_inputs(jax.random.fold_in(k_data, 0), 8, 16)
    out = jax.block_until_ready(global_discriminator_forward(params, z, cat, cont))
    ref = global_discriminator_reference(params, z, cat, cont)
    assert out.shape == (8, 1), out.shape
    # bf16 gate stream + bf16 recurrent matmul inputs -> loosened tolerance.
    assert jnp.allclose(out, ref, rtol=2e-2, atol=3e-2), (out, ref)

    # Test 2: multi batch-tile grid + forced T chunking (h/c carried in scratch).
    z, cat, cont = make_inputs(jax.random.fold_in(k_data, 1), 200, 16)
    out = jax.block_until_ready(
        global_discriminator_forward(params, z, cat, cont, max_t_chunk=4))
    ref = global_discriminator_reference(params, z, cat, cont)
    assert out.shape == (200, 1), out.shape
    assert jnp.allclose(out, ref, rtol=2e-2, atol=3e-2), (out, ref)

    print("KERNEL_OK")
</pallas_src>

<mosaic_0001>
module attributes {stable_mosaic.version = 11 : i64} {
  func.func @_gdisc_kernel(%arg0: i32, %arg1: i32, %arg2: memref<16x128x128xbf16, #tpu.memory_space<vmem>>, %arg3: memref<32x128xf32, #tpu.memory_space<vmem>>, %arg4: memref<128x32xbf16, #tpu.memory_space<vmem>>, %arg5: memref<32x32xf32, #tpu.memory_space<vmem>>, %arg6: memref<32x1xf32, #tpu.memory_space<vmem>>, %arg7: memref<32x32xf32, #tpu.memory_space<vmem>>, %arg8: memref<32x32xf32, #tpu.memory_space<vmem>>, %arg9: memref<32x1xf32, #tpu.memory_space<vmem>>, %arg10: memref<32x1xf32, #tpu.memory_space<vmem>>, %arg11: memref<1x1xf32, #tpu.memory_space<vmem>>, %arg12: memref<1x128xf32, #tpu.memory_space<vmem>>, %arg13: memref<32x128xf32, #tpu.memory_space<vmem>>, %arg14: memref<32x128xf32, #tpu.memory_space<vmem>>) attributes {dimension_semantics = [#tpu.dimension_semantics<parallel>, #tpu.dimension_semantics<arbitrary>], iteration_bounds = array<i64: 1, 1>, scalar_prefetch = 0 : i64, scratch_operands = 2 : i64, tpu.core_type = #tpu.core_type<tc>, window_params = [{transform_indices = @transform_0, window_bounds = array<i64: 16, 128, 128>}, {transform_indices = @transform_1, window_bounds = array<i64: 32, 128>}, {pipeline_mode = #tpu.pipeline_mode<synchronous>, transform_indices = @transform_2, window_bounds = array<i64: 128, 32>}, {pipeline_mode = #tpu.pipeline_mode<synchronous>, transform_indices = @transform_3, window_bounds = array<i64: 32, 32>}, {pipeline_mode = #tpu.pipeline_mode<synchronous>, transform_indices = @transform_4, window_bounds = array<i64: 32, 1>}, {pipeline_mode = #tpu.pipeline_mode<synchronous>, transform_indices = @transform_5, window_bounds = array<i64: 32, 32>}, {pipeline_mode = #tpu.pipeline_mode<synchronous>, transform_indices = @transform_6, window_bounds = array<i64: 32, 32>}, {pipeline_mode = #tpu.pipeline_mode<synchronous>, transform_indices = @transform_7, window_bounds = array<i64: 32, 1>}, {pipeline_mode = #tpu.pipeline_mode<synchronous>, transform_indices = @transform_8, window_bounds = array<i64: 32, 1>}, {pipeline_mode = #tpu.pipeline_mode<synchronous>, transform_indices = @transform_9, window_bounds = array<i64: 1, 1>}, {transform_indices = @transform_10, window_bounds = array<i64: 1, 128>}]} {
    %c0_i32 = arith.constant 0 : i32
    %0 = arith.cmpi eq, %arg1, %c0_i32 : i32
    %1 = arith.extui %0 : i1 to i32
    %c0_i32_0 = arith.constant 0 : i32
    %2 = arith.cmpi ne, %1, %c0_i32_0 : i32
    scf.if %2 {
      %cst_108 = arith.constant 0.000000e+00 : f32
      %523 = vector.broadcast %cst_108 : f32 to vector<32x128xf32>
      %c0_109 = arith.constant 0 : index
      %c0_110 = arith.constant 0 : index
      %524 = vector.load %arg13[%c0_109, %c0_110] : memref<32x128xf32, #tpu.memory_space<vmem>>, vector<32x128xf32>
      tpu.vector_store %arg13[%c0_109, %c0_110], %523 {strides = array<i32>} : memref<32x128xf32, #tpu.memory_space<vmem>>, vector<32x128xf32>,
      %cst_111 = arith.constant 0.000000e+00 : f32
      %525 = vector.broadcast %cst_111 : f32 to vector<32x128xf32>
      %c0_112 = arith.constant 0 : index
      %c0_113 = arith.constant 0 : index
      %526 = vector.load %arg14[%c0_112, %c0_113] : memref<32x128xf32, #tpu.memory_space<vmem>>, vector<32x128xf32>
      tpu.vector_store %arg14[%c0_112, %c0_113], %525 {strides = array<i32>} : memref<32x128xf32, #tpu.memory_space<vmem>>, vector<32x128xf32>,
    } else {
    }
    %c0 = arith.constant 0 : index
    %c0_1 = arith.constant 0 : index
    %3 = vector.load %arg4[%c0, %c0_1] : memref<128x32xbf16, #tpu.memory_space<vmem>>, vector<128x32xbf16>
    %c0_2 = arith.constant 0 : index
    %c0_3 = arith.constant 0 : index
    %4 = vector.load %arg13[%c0_2, %c0_3] : memref<32x128xf32, #tpu.memory_space<vmem>>, vector<32x128xf32>
    %c0_4 = arith.constant 0 : index
    %c0_5 = arith.constant 0 : index
    %5 = vector.load %arg14[%c0_4, %c0_5] : memref<32x128xf32, #tpu.memory_space<vmem>>, vector<32x128xf32>
    %c0_i32_6 = arith.constant 0 : i32
    %6 = arith.index_cast %c0_i32_6 : i32 to index
    %c0_7 = arith.constant 0 : index
    %c0_8 = arith.constant 0 : index
    %7 = vector.load %arg2[%6, %c0_7, %c0_8] : memref<16x128x128xbf16, #tpu.memory_space<vmem>>, vector<1x128x128xbf16>
    %8 = vector.shape_cast %7 : vector<1x128x128xbf16> to vector<128x128xbf16>
    %9 = arith.extf %8 : vector<128x128xbf16> to vector<128x128xf32>
    %10 = arith.truncf %4 : vector<32x128xf32> to vector<32x128xbf16>
    %cst = arith.constant dense<0.000000e+00> : vector<128x128xf32>
    %11 = tpu.matmul %3, %10, %cst {dimension_numbers = #tpu.dot_dimension_numbers<[1], [0], [0], [1], [0, 0, 1, 1], [], []>} : vector<128x32xbf16>, vector<32x128xbf16>, vector<128x128xf32> -> vector<128x128xf32>
    %12 = arith.addf %9, %11 : vector<128x128xf32>
    %13 = vector.extract_strided_slice %12 {offsets = [0, 0], sizes = [32, 128], strides = [1, 1]} : vector<128x128xf32> to vector<32x128xf32>
    %14 = arith.negf %13 : vector<32x128xf32>
    %15 = math.exp %14 : vector<32x128xf32>
    %cst_9 = arith.constant 1.000000e+00 : f32
    %16 = vector.broadcast %cst_9 : f32 to vector<32x128xf32>
    %17 = arith.addf %16, %15 : vector<32x128xf32>
    %18 = arith.divf %16, %17 : vector<32x128xf32>
    %19 = vector.extract_strided_slice %12 {offsets = [32, 0], sizes = [32, 128], strides = [1, 1]} : vector<128x128xf32> to vector<32x128xf32>
    %20 = arith.negf %19 : vector<32x128xf32>
    %21 = math.exp %20 : vector<32x128xf32>
    %cst_10 = arith.constant 1.000000e+00 : f32
    %22 = vector.broadcast %cst_10 : f32 to vector<32x128xf32>
    %23 = arith.addf %22, %21 : vector<32x128xf32>
    %24 = arith.divf %22, %23 : vector<32x128xf32>
    %25 = vector.extract_strided_slice %12 {offsets = [64, 0], sizes = [32, 128], strides = [1, 1]} : vector<128x128xf32> to vector<32x128xf32>
    %26 = math.tanh %25 : vector<32x128xf32>
    %27 = vector.extract_strided_slice %12 {offsets = [96, 0], sizes = [32, 128], strides = [1, 1]} : vector<128x128xf32> to vector<32x128xf32>
    %28 = arith.negf %27 : vector<32x128xf32>
    %29 = math.exp %28 : vector<32x128xf32>
    %cst_11 = arith.constant 1.000000e+00 : f32
    %30 = vector.broadcast %cst_11 : f32 to vector<32x128xf32>
    %31 = arith.addf %30, %29 : vector<32x128xf32>
    %32 = arith.divf %30, %31 : vector<32x128xf32>
    %33 = arith.mulf %24, %5 : vector<32x128xf32>
    %34 = arith.mulf %18, %26 : vector<32x128xf32>
    %35 = arith.addf %33, %34 : vector<32x128xf32>
    %36 = math.tanh %35 : vector<32x128xf32>
    %37 = arith.mulf %32, %36 : vector<32x128xf32>
    %c1_i32 = arith.constant 1 : i32
    %38 = arith.index_cast %c1_i32 : i32 to index
    %c0_12 = arith.constant 0 : index
    %c0_13 = arith.constant 0 : index
    %39 = vector.load %arg2[%38, %c0_12, %c0_13] : memref<16x128x128xbf16, #tpu.memory_space<vmem>>, vector<1x128x128xbf16>
    %40 = vector.shape_cast %39 : vector<1x128x128xbf16> to vector<128x128xbf16>
    %41 = arith.extf %40 : vector<128x128xbf16> to vector<128x128xf32>
    %42 = arith.truncf %37 : vector<32x128xf32> to vector<32x128xbf16>
    %cst_14 = arith.constant dense<0.000000e+00> : vector<128x128xf32>
    %43 = tpu.matmul %3, %42, %cst_14 {dimension_numbers = #tpu.dot_dimension_numbers<[1], [0], [0], [1], [0, 0, 1, 1], [], []>} : vector<128x32xbf16>, vector<32x128xbf16>, vector<128x128xf32> -> vector<128x128xf32>
    %44 = arith.addf %41, %43 : vector<128x128xf32>
    %45 = vector.extract_strided_slice %44 {offsets = [0, 0], sizes = [32, 128], strides = [1, 1]} : vector<128x128xf32> to vector<32x128xf32>
    %46 = arith.negf %45 : vector<32x128xf32>
    %47 = math.exp %46 : vector<32x128xf32>
    %cst_15 = arith.constant 1.000000e+00 : f32
    %48 = vector.broadcast %cst_15 : f32 to vector<32x128xf32>
    %49 = arith.addf %48, %47 : vector<32x128xf32>
    %50 = arith.divf %48, %49 : vector<32x128xf32>
    %51 = vector.extract_strided_slice %44 {offsets = [32, 0], sizes = [32, 128], strides = [1, 1]} : vector<128x128xf32> to vector<32x128xf32>
    %52 = arith.negf %51 : vector<32x128xf32>
    %53 = math.exp %52 : vector<32x128xf32>
    %cst_16 = arith.constant 1.000000e+00 : f32
    %54 = vector.broadcast %cst_16 : f32 to vector<32x128xf32>
    %55 = arith.addf %54, %53 : vector<32x128xf32>
    %56 = arith.divf %54, %55 : vector<32x128xf32>
    %57 = vector.extract_strided_slice %44 {offsets = [64, 0], sizes = [32, 128], strides = [1, 1]} : vector<128x128xf32> to vector<32x128xf32>
    %58 = math.tanh %57 : vector<32x128xf32>
    %59 = vector.extract_strided_slice %44 {offsets = [96, 0], sizes = [32, 128], strides = [1, 1]} : vector<128x128xf32> to vector<32x128xf32>
    %60 = arith.negf %59 : vector<32x128xf32>
    %61 = math.exp %60 : vector<32x128xf32>
    %cst_17 = arith.constant 1.000000e+00 : f32
    %62 = vector.broadcast %cst_17 : f32 to vector<32x128xf32>
    %63 = arith.addf %62, %61 : vector<32x128xf32>
    %64 = arith.divf %62, %63 : vector<32x128xf32>
    %65 = arith.mulf %56, %35 : vector<32x128xf32>
    %66 = arith.mulf %50, %58 : vector<32x128xf32>
    %67 = arith.addf %65, %66 : vector<32x128xf32>
    %68 = math.tanh %67 : vector<32x128xf32>
    %69 = arith.mulf %64, %68 : vector<32x128xf32>
    %c2_i32 = arith.constant 2 : i32
    %70 = arith.index_cast %c2_i32 : i32 to index
    %c0_18 = arith.constant 0 : index
    %c0_19 = arith.constant 0 : index
    %71 = vector.load %arg2[%70, %c0_18, %c0_19] : memref<16x128x128xbf16, #tpu.memory_space<vmem>>, vector<1x128x128xbf16>
    %72 = vector.shape_cast %71 : vector<1x128x128xbf16> to vector<128x128xbf16>
    %73 = arith.extf %72 : vector<128x128xbf16> to vector<128x128xf32>
    %74 = arith.truncf %69 : vector<32x128xf32> to vector<32x128xbf16>
    %cst_20 = arith.constant dense<0.000000e+00> : vector<128x128xf32>
    %75 = tpu.matmul %3, %74, %cst_20 {dimension_numbers = #tpu.dot_dimension_numbers<[1], [0], [0], [1], [0, 0, 1, 1], [], []>} : vector<128x32xbf16>, vector<32x128xbf16>, vector<128x128xf32> -> vector<128x128xf32>
    %76 = arith.addf %73, %75 : vector<128x128xf32>
    %77 = vector.extract_strided_slice %76 {offsets = [0, 0], sizes = [32, 128], strides = [1, 1]} : vector<128x128xf32> to vector<32x128xf32>
    %78 = arith.negf %77 : vector<32x128xf32>
    %79 = math.exp %78 : vector<32x128xf32>
    %cst_21 = arith.constant 1.000000e+00 : f32
    %80 = vector.broadcast %cst_21 : f32 to vector<32x128xf32>
    %81 = arith.addf %80, %79 : vector<32x128xf32>
    %82 = arith.divf %80, %81 : vector<32x128xf32>
    %83 = vector.extract_strided_slice %76 {offsets = [32, 0], sizes = [32, 128], strides = [1, 1]} : vector<128x128xf32> to vector<32x128xf32>
    %84 = arith.negf %83 : vector<32x128xf32>
    %85 = math.exp %84 : vector<32x128xf32>
    %cst_22 = arith.constant 1.000000e+00 : f32
    %86 = vector.broadcast %cst_22 : f32 to vector<32x128xf32>
    %87 = arith.addf %86, %85 : vector<32x128xf32>
    %88 = arith.divf %86, %87 : vector<32x128xf32>
    %89 = vector.extract_strided_slice %76 {offsets = [64, 0], sizes = [32, 128], strides = [1, 1]} : vector<128x128xf32> to vector<32x128xf32>
    %90 = math.tanh %89 : vector<32x128xf32>
    %91 = vector.extract_strided_slice %76 {offsets = [96, 0], sizes = [32, 128], strides = [1, 1]} : vector<128x128xf32> to vector<32x128xf32>
    %92 = arith.negf %91 : vector<32x128xf32>
    %93 = math.exp %92 : vector<32x128xf32>
    %cst_23 = arith.constant 1.000000e+00 : f32
    %94 = vector.broadcast %cst_23 : f32 to vector<32x128xf32>
    %95 = arith.addf %94, %93 : vector<32x128xf32>
    %96 = arith.divf %94, %95 : vector<32x128xf32>
    %97 = arith.mulf %88, %67 : vector<32x128xf32>
    %98 = arith.mulf %82, %90 : vector<32x128xf32>
    %99 = arith.addf %97, %98 : vector<32x128xf32>
    %100 = math.tanh %99 : vector<32x128xf32>
    %101 = arith.mulf %96, %100 : vector<32x128xf32>
    %c3_i32 = arith.constant 3 : i32
    %102 = arith.index_cast %c3_i32 : i32 to index
    %c0_24 = arith.constant 0 : index
    %c0_25 = arith.constant 0 : index
    %103 = vector.load %arg2[%102, %c0_24, %c0_25] : memref<16x128x128xbf16, #tpu.memory_space<vmem>>, vector<1x128x128xbf16>
    %104 = vector.shape_cast %103 : vector<1x128x128xbf16> to vector<128x128xbf16>
    %105 = arith.extf %104 : vector<128x128xbf16> to vector<128x128xf32>
    %106 = arith.truncf %101 : vector<32x128xf32> to vector<32x128xbf16>
    %cst_26 = arith.constant dense<0.000000e+00> : vector<128x128xf32>
    %107 = tpu.matmul %3, %106, %cst_26 {dimension_numbers = #tpu.dot_dimension_numbers<[1], [0], [0], [1], [0, 0, 1, 1], [], []>} : vector<128x32xbf16>, vector<32x128xbf16>, vector<128x128xf32> -> vector<128x128xf32>
    %108 = arith.addf %105, %107 : vector<128x128xf32>
    %109 = vector.extract_strided_slice %108 {offsets = [0, 0], sizes = [32, 128], strides = [1, 1]} : vector<128x128xf32> to vector<32x128xf32>
    %110 = arith.negf %109 : vector<32x128xf32>
    %111 = math.exp %110 : vector<32x128xf32>
    %cst_27 = arith.constant 1.000000e+00 : f32
    %112 = vector.broadcast %cst_27 : f32 to vector<32x128xf32>
    %113 = arith.addf %112, %111 : vector<32x128xf32>
    %114 = arith.divf %112, %113 : vector<32x128xf32>
    %115 = vector.extract_strided_slice %108 {offsets = [32, 0], sizes = [32, 128], strides = [1, 1]} : vector<128x128xf32> to vector<32x128xf32>
    %116 = arith.negf %115 : vector<32x128xf32>
    %117 = math.exp %116 : vector<32x128xf32>
    %cst_28 = arith.constant 1.000000e+00 : f32
    %118 = vector.broadcast %cst_28 : f32 to vector<32x128xf32>
    %119 = arith.addf %118, %117 : vector<32x128xf32>
    %120 = arith.divf %118, %119 : vector<32x128xf32>
    %121 = vector.extract_strided_slice %108 {offsets = [64, 0], sizes = [32, 128], strides = [1, 1]} : vector<128x128xf32> to vector<32x128xf32>
    %122 = math.tanh %121 : vector<32x128xf32>
    %123 = vector.extract_strided_slice %108 {offsets = [96, 0], sizes = [32, 128], strides = [1, 1]} : vector<128x128xf32> to vector<32x128xf32>
    %124 = arith.negf %123 : vector<32x128xf32>
    %125 = math.exp %124 : vector<32x128xf32>
    %cst_29 = arith.constant 1.000000e+00 : f32
    %126 = vector.broadcast %cst_29 : f32 to vector<32x128xf32>
    %127 = arith.addf %126, %125 : vector<32x128xf32>
    %128 = arith.divf %126, %127 : vector<32x128xf32>
    %129 = arith.mulf %120, %99 : vector<32x128xf32>
    %130 = arith.mulf %114, %122 : vector<32x128xf32>
    %131 = arith.addf %129, %130 : vector<32x128xf32>
    %132 = math.tanh %131 : vector<32x128xf32>
    %133 = arith.mulf %128, %132 : vector<32x128xf32>
    %c4_i32 = arith.constant 4 : i32
    %134 = arith.index_cast %c4_i32 : i32 to index
    %c0_30 = arith.constant 0 : index
    %c0_31 = arith.constant 0 : index
    %135 = vector.load %arg2[%134, %c0_30, %c0_31] : memref<16x128x128xbf16, #tpu.memory_space<vmem>>, vector<1x128x128xbf16>
    %136 = vector.shape_cast %135 : vector<1x128x128xbf16> to vector<128x128xbf16>
    %137 = arith.extf %136 : vector<128x128xbf16> to vector<128x128xf32>
    %138 = arith.truncf %133 : vector<32x128xf32> to vector<32x128xbf16>
    %cst_32 = arith.constant dense<0.000000e+00> : vector<128x128xf32>
    %139 = tpu.matmul %3, %138, %cst_32 {dimension_numbers = #tpu.dot_dimension_numbers<[1], [0], [0], [1], [0, 0, 1, 1], [], []>} : vector<128x32xbf16>, vector<32x128xbf16>, vector<128x128xf32> -> vector<128x128xf32>
    %140 = arith.addf %137, %139 : vector<128x128xf32>
    %141 = vector.extract_strided_slice %140 {offsets = [0, 0], sizes = [32, 128], strides = [1, 1]} : vector<128x128xf32> to vector<32x128xf32>
    %142 = arith.negf %141 : vector<32x128xf32>
    %143 = math.exp %142 : vector<32x128xf32>
    %cst_33 = arith.constant 1.000000e+00 : f32
    %144 = vector.broadcast %cst_33 : f32 to vector<32x128xf32>
    %145 = arith.addf %144, %143 : vector<32x128xf32>
    %146 = arith.divf %144, %145 : vector<32x128xf32>
    %147 = vector.extract_strided_slice %140 {offsets = [32, 0], sizes = [32, 128], strides = [1, 1]} : vector<128x128xf32> to vector<32x128xf32>
    %148 = arith.negf %147 : vector<32x128xf32>
    %149 = math.exp %148 : vector<32x128xf32>
    %cst_34 = arith.constant 1.000000e+00 : f32
    %150 = vector.broadcast %cst_34 : f32 to vector<32x128xf32>
    %151 = arith.addf %150, %149 : vector<32x128xf32>
    %152 = arith.divf %150, %151 : vector<32x128xf32>
    %153 = vector.extract_strided_slice %140 {offsets = [64, 0], sizes = [32, 128], strides = [1, 1]} : vector<128x128xf32> to vector<32x128xf32>
    %154 = math.tanh %153 : vector<32x128xf32>
    %155 = vector.extract_strided_slice %140 {offsets = [96, 0], sizes = [32, 128], strides = [1, 1]} : vector<128x128xf32> to vector<32x128xf32>
    %156 = arith.negf %155 : vector<32x128xf32>
    %157 = math.exp %156 : vector<32x128xf32>
    %cst_35 = arith.constant 1.000000e+00 : f32
    %158 = vector.broadcast %cst_35 : f32 to vector<32x128xf32>
    %159 = arith.addf %158, %157 : vector<32x128xf32>
    %160 = arith.divf %158, %159 : vector<32x128xf32>
    %161 = arith.mulf %152, %131 : vector<32x128xf32>
    %162 = arith.mulf %146, %154 : vector<32x128xf32>
    %163 = arith.addf %161, %162 : vector<32x128xf32>
    %164 = math.tanh %163 : vector<32x128xf32>
    %165 = arith.mulf %160, %164 : vector<32x128xf32>
    %c5_i32 = arith.constant 5 : i32
    %166 = arith.index_cast %c5_i32 : i32 to index
    %c0_36 = arith.constant 0 : index
    %c0_37 = arith.constant 0 : index
    %167 = vector.load %arg2[%166, %c0_36, %c0_37] : memref<16x128x128xbf16, #tpu.memory_space<vmem>>, vector<1x128x128xbf16>
    %168 = vector.shape_cast %167 : vector<1x128x128xbf16> to vector<128x128xbf16>
    %169 = arith.extf %168 : vector<128x128xbf16> to vector<128x128xf32>
    %170 = arith.truncf %165 : vector<32x128xf32> to vector<32x128xbf16>
    %cst_38 = arith.constant dense<0.000000e+00> : vector<128x128xf32>
    %171 = tpu.matmul %3, %170, %cst_38 {dimension_numbers = #tpu.dot_dimension_numbers<[1], [0], [0], [1], [0, 0, 1, 1], [], []>} : vector<128x32xbf16>, vector<32x128xbf16>, vector<128x128xf32> -> vector<128x128xf32>
    %172 = arith.addf %169, %171 : vector<128x128xf32>
    %173 = vector.extract_strided_slice %172 {offsets = [0, 0], sizes = [32, 128], strides = [1, 1]} : vector<128x128xf32> to vector<32x128xf32>
    %174 = arith.negf %173 : vector<32x128xf32>
    %175 = math.exp %174 : vector<32x128xf32>
    %cst_39 = arith.constant 1.000000e+00 : f32
    %176 = vector.broadcast %cst_39 : f32 to vector<32x128xf32>
    %177 = arith.addf %176, %175 : vector<32x128xf32>
    %178 = arith.divf %176, %177 : vector<32x128xf32>
    %179 = vector.extract_strided_slice %172 {offsets = [32, 0], sizes = [32, 128], strides = [1, 1]} : vector<128x128xf32> to vector<32x128xf32>
    %180 = arith.negf %179 : vector<32x128xf32>
    %181 = math.exp %180 : vector<32x128xf32>
    %cst_40 = arith.constant 1.000000e+00 : f32
    %182 = vector.broadcast %cst_40 : f32 to vector<32x128xf32>
    %183 = arith.addf %182, %181 : vector<32x128xf32>
    %184 = arith.divf %182, %183 : vector<32x128xf32>
    %185 = vector.extract_strided_slice %172 {offsets = [64, 0], sizes = [32, 128], strides = [1, 1]} : vector<128x128xf32> to vector<32x128xf32>
    %186 = math.tanh %185 : vector<32x128xf32>
    %187 = vector.extract_strided_slice %172 {offsets = [96, 0], sizes = [32, 128], strides = [1, 1]} : vector<128x128xf32> to vector<32x128xf32>
    %188 = arith.negf %187 : vector<32x128xf32>
    %189 = math.exp %188 : vector<32x128xf32>
    %cst_41 = arith.constant 1.000000e+00 : f32
    %190 = vector.broadcast %cst_41 : f32 to vector<32x128xf32>
    %191 = arith.addf %190, %189 : vector<32x128xf32>
    %192 = arith.divf %190, %191 : vector<32x128xf32>
    %193 = arith.mulf %184, %163 : vector<32x128xf32>
    %194 = arith.mulf %178, %186 : vector<32x128xf32>
    %195 = arith.addf %193, %194 : vector<32x128xf32>
    %196 = math.tanh %195 : vector<32x128xf32>
    %197 = arith.mulf %192, %196 : vector<32x128xf32>
    %c6_i32 = arith.constant 6 : i32
    %198 = arith.index_cast %c6_i32 : i32 to index
    %c0_42 = arith.constant 0 : index
    %c0_43 = arith.constant 0 : index
    %199 = vector.load %arg2[%198, %c0_42, %c0_43] : memref<16x128x128xbf16, #tpu.memory_space<vmem>>, vector<1x128x128xbf16>
    %200 = vector.shape_cast %199 : vector<1x128x128xbf16> to vector<128x128xbf16>
    %201 = arith.extf %200 : vector<128x128xbf16> to vector<128x128xf32>
    %202 = arith.truncf %197 : vector<32x128xf32> to vector<32x128xbf16>
    %cst_44 = arith.constant dense<0.000000e+00> : vector<128x128xf32>
    %203 = tpu.matmul %3, %202, %cst_44 {dimension_numbers = #tpu.dot_dimension_numbers<[1], [0], [0], [1], [0, 0, 1, 1], [], []>} : vector<128x32xbf16>, vector<32x128xbf16>, vector<128x128xf32> -> vector<128x128xf32>
    %204 = arith.addf %201, %203 : vector<128x128xf32>
    %205 = vector.extract_strided_slice %204 {offsets = [0, 0], sizes = [32, 128], strides = [1, 1]} : vector<128x128xf32> to vector<32x128xf32>
    %206 = arith.negf %205 : vector<32x128xf32>
    %207 = math.exp %206 : vector<32x128xf32>
    %cst_45 = arith.constant 1.000000e+00 : f32
    %208 = vector.broadcast %cst_45 : f32 to vector<32x128xf32>
    %209 = arith.addf %208, %207 : vector<32x128xf32>
    %210 = arith.divf %208, %209 : vector<32x128xf32>
    %211 = vector.extract_strided_slice %204 {offsets = [32, 0], sizes = [32, 128], strides = [1, 1]} : vector<128x128xf32> to vector<32x128xf32>
    %212 = arith.negf %211 : vector<32x128xf32>
    %213 = math.exp %212 : vector<32x128xf32>
    %cst_46 = arith.constant 1.000000e+00 : f32
    %214 = vector.broadcast %cst_46 : f32 to vector<32x128xf32>
    %215 = arith.addf %214, %213 : vector<32x128xf32>
    %216 = arith.divf %214, %215 : vector<32x128xf32>
    %217 = vector.extract_strided_slice %204 {offsets = [64, 0], sizes = [32, 128], strides = [1, 1]} : vector<128x128xf32> to vector<32x128xf32>
    %218 = math.tanh %217 : vector<32x128xf32>
    %219 = vector.extract_strided_slice %204 {offsets = [96, 0], sizes = [32, 128], strides = [1, 1]} : vector<128x128xf32> to vector<32x128xf32>
    %220 = arith.negf %219 : vector<32x128xf32>
    %221 = math.exp %220 : vector<32x128xf32>
    %cst_47 = arith.constant 1.000000e+00 : f32
    %222 = vector.broadcast %cst_47 : f32 to vector<32x128xf32>
    %223 = arith.addf %222, %221 : vector<32x128xf32>
    %224 = arith.divf %222, %223 : vector<32x128xf32>
    %225 = arith.mulf %216, %195 : vector<32x128xf32>
    %226 = arith.mulf %210, %218 : vector<32x128xf32>
    %227 = arith.addf %225, %226 : vector<32x128xf32>
    %228 = math.tanh %227 : vector<32x128xf32>
    %229 = arith.mulf %224, %228 : vector<32x128xf32>
    %c7_i32 = arith.constant 7 : i32
    %230 = arith.index_cast %c7_i32 : i32 to index
    %c0_48 = arith.constant 0 : index
    %c0_49 = arith.constant 0 : index
    %231 = vector.load %arg2[%230, %c0_48, %c0_49] : memref<16x128x128xbf16, #tpu.memory_space<vmem>>, vector<1x128x128xbf16>
    %232 = vector.shape_cast %231 : vector<1x128x128xbf16> to vector<128x128xbf16>
    %233 = arith.extf %232 : vector<128x128xbf16> to vector<128x128xf32>
    %234 = arith.truncf %229 : vector<32x128xf32> to vector<32x128xbf16>
    %cst_50 = arith.constant dense<0.000000e+00> : vector<128x128xf32>
    %235 = tpu.matmul %3, %234, %cst_50 {dimension_numbers = #tpu.dot_dimension_numbers<[1], [0], [0], [1], [0, 0, 1, 1], [], []>} : vector<128x32xbf16>, vector<32x128xbf16>, vector<128x128xf32> -> vector<128x128xf32>
    %236 = arith.addf %233, %235 : vector<128x128xf32>
    %237 = vector.extract_strided_slice %236 {offsets = [0, 0], sizes = [32, 128], strides = [1, 1]} : vector<128x128xf32> to vector<32x128xf32>
    %238 = arith.negf %237 : vector<32x128xf32>
    %239 = math.exp %238 : vector<32x128xf32>
    %cst_51 = arith.constant 1.000000e+00 : f32
    %240 = vector.broadcast %cst_51 : f32 to vector<32x128xf32>
    %241 = arith.addf %240, %239 : vector<32x128xf32>
    %242 = arith.divf %240, %241 : vector<32x128xf32>
    %243 = vector.extract_strided_slice %236 {offsets = [32, 0], sizes = [32, 128], strides = [1, 1]} : vector<128x128xf32> to vector<32x128xf32>
    %244 = arith.negf %243 : vector<32x128xf32>
    %245 = math.exp %244 : vector<32x128xf32>
    %cst_52 = arith.constant 1.000000e+00 : f32
    %246 = vector.broadcast %cst_52 : f32 to vector<32x128xf32>
    %247 = arith.addf %246, %245 : vector<32x128xf32>
    %248 = arith.divf %246, %247 : vector<32x128xf32>
    %249 = vector.extract_strided_slice %236 {offsets = [64, 0], sizes = [32, 128], strides = [1, 1]} : vector<128x128xf32> to vector<32x128xf32>
    %250 = math.tanh %249 : vector<32x128xf32>
    %251 = vector.extract_strided_slice %236 {offsets = [96, 0], sizes = [32, 128], strides = [1, 1]} : vector<128x128xf32> to vector<32x128xf32>
    %252 = arith.negf %251 : vector<32x128xf32>
    %253 = math.exp %252 : vector<32x128xf32>
    %cst_53 = arith.constant 1.000000e+00 : f32
    %254 = vector.broadcast %cst_53 : f32 to vector<32x128xf32>
    %255 = arith.addf %254, %253 : vector<32x128xf32>
    %256 = arith.divf %254, %255 : vector<32x128xf32>
    %257 = arith.mulf %248, %227 : vector<32x128xf32>
    %258 = arith.mulf %242, %250 : vector<32x128xf32>
    %259 = arith.addf %257, %258 : vector<32x128xf32>
    %260 = math.tanh %259 : vector<32x128xf32>
    %261 = arith.mulf %256, %260 : vector<32x128xf32>
    %c8_i32 = arith.constant 8 : i32
    %262 = arith.index_cast %c8_i32 : i32 to index
    %c0_54 = arith.constant 0 : index
    %c0_55 = arith.constant 0 : index
    %263 = vector.load %arg2[%262, %c0_54, %c0_55] : memref<16x128x128xbf16, #tpu.memory_space<vmem>>, vector<1x128x128xbf16>
    %264 = vector.shape_cast %263 : vector<1x128x128xbf16> to vector<128x128xbf16>
    %265 = arith.extf %264 : vector<128x128xbf16> to vector<128x128xf32>
    %266 = arith.truncf %261 : vector<32x128xf32> to vector<32x128xbf16>
    %cst_56 = arith.constant dense<0.000000e+00> : vector<128x128xf32>
    %267 = tpu.matmul %3, %266, %cst_56 {dimension_numbers = #tpu.dot_dimension_numbers<[1], [0], [0], [1], [0, 0, 1, 1], [], []>} : vector<128x32xbf16>, vector<32x128xbf16>, vector<128x128xf32> -> vector<128x128xf32>
    %268 = arith.addf %265, %267 : vector<128x128xf32>
    %269 = vector.extract_strided_slice %268 {offsets = [0, 0], sizes = [32, 128], strides = [1, 1]} : vector<128x128xf32> to vector<32x128xf32>
    %270 = arith.negf %269 : vector<32x128xf32>
    %271 = math.exp %270 : vector<32x128xf32>
    %cst_57 = arith.constant 1.000000e+00 : f32
    %272 = vector.broadcast %cst_57 : f32 to vector<32x128xf32>
    %273 = arith.addf %272, %271 : vector<32x128xf32>
    %274 = arith.divf %272, %273 : vector<32x128xf32>
    %275 = vector.extract_strided_slice %268 {offsets = [32, 0], sizes = [32, 128], strides = [1, 1]} : vector<128x128xf32> to vector<32x128xf32>
    %276 = arith.negf %275 : vector<32x128xf32>
    %277 = math.exp %276 : vector<32x128xf32>
    %cst_58 = arith.constant 1.000000e+00 : f32
    %278 = vector.broadcast %cst_58 : f32 to vector<32x128xf32>
    %279 = arith.addf %278, %277 : vector<32x128xf32>
    %280 = arith.divf %278, %279 : vector<32x128xf32>
    %281 = vector.extract_strided_slice %268 {offsets = [64, 0], sizes = [32, 128], strides = [1, 1]} : vector<128x128xf32> to vector<32x128xf32>
    %282 = math.tanh %281 : vector<32x128xf32>
    %283 = vector.extract_strided_slice %268 {offsets = [96, 0], sizes = [32, 128], strides = [1, 1]} : vector<128x128xf32> to vector<32x128xf32>
    %284 = arith.negf %283 : vector<32x128xf32>
    %285 = math.exp %284 : vector<32x128xf32>
    %cst_59 = arith.constant 1.000000e+00 : f32
    %286 = vector.broadcast %cst_59 : f32 to vector<32x128xf32>
    %287 = arith.addf %286, %285 : vector<32x128xf32>
    %288 = arith.divf %286, %287 : vector<32x128xf32>
    %289 = arith.mulf %280, %259 : vector<32x128xf32>
    %290 = arith.mulf %274, %282 : vector<32x128xf32>
    %291 = arith.addf %289, %290 : vector<32x128xf32>
    %292 = math.tanh %291 : vector<32x128xf32>
    %293 = arith.mulf %288, %292 : vector<32x128xf32>
    %c9_i32 = arith.constant 9 : i32
    %294 = arith.index_cast %c9_i32 : i32 to index
    %c0_60 = arith.constant 0 : index
    %c0_61 = arith.constant 0 : index
    %295 = vector.load %arg2[%294, %c0_60, %c0_61] : memref<16x128x128xbf16, #tpu.memory_space<vmem>>, vector<1x128x128xbf16>
    %296 = vector.shape_cast %295 : vector<1x128x128xbf16> to vector<128x128xbf16>
    %297 = arith.extf %296 : vector<128x128xbf16> to vector<128x128xf32>
    %298 = arith.truncf %293 : vector<32x128xf32> to vector<32x128xbf16>
    %cst_62 = arith.constant dense<0.000000e+00> : vector<128x128xf32>
    %299 = tpu.matmul %3, %298, %cst_62 {dimension_numbers = #tpu.dot_dimension_numbers<[1], [0], [0], [1], [0, 0, 1, 1], [], []>} : vector<128x32xbf16>, vector<32x128xbf16>, vector<128x128xf32> -> vector<128x128xf32>
    %300 = arith.addf %297, %299 : vector<128x128xf32>
    %301 = vector.extract_strided_slice %300 {offsets = [0, 0], sizes = [32, 128], strides = [1, 1]} : vector<128x128xf32> to vector<32x128xf32>
    %302 = arith.negf %301 : vector<32x128xf32>
    %303 = math.exp %302 : vector<32x128xf32>
    %cst_63 = arith.constant 1.000000e+00 : f32
    %304 = vector.broadcast %cst_63 : f32 to vector<32x128xf32>
    %305 = arith.addf %304, %303 : vector<32x128xf32>
    %306 = arith.divf %304, %305 : vector<32x128xf32>
    %307 = vector.extract_strided_slice %300 {offsets = [32, 0], sizes = [32, 128], strides = [1, 1]} : vector<128x128xf32> to vector<32x128xf32>
    %308 = arith.negf %307 : vector<32x128xf32>
    %309 = math.exp %308 : vector<32x128xf32>
    %cst_64 = arith.constant 1.000000e+00 : f32
    %310 = vector.broadcast %cst_64 : f32 to vector<32x128xf32>
    %311 = arith.addf %310, %309 : vector<32x128xf32>
    %312 = arith.divf %310, %311 : vector<32x128xf32>
    %313 = vector.extract_strided_slice %300 {offsets = [64, 0], sizes = [32, 128], strides = [1, 1]} : vector<128x128xf32> to vector<32x128xf32>
    %314 = math.tanh %313 : vector<32x128xf32>
    %315 = vector.extract_strided_slice %300 {offsets = [96, 0], sizes = [32, 128], strides = [1, 1]} : vector<128x128xf32> to vector<32x128xf32>
    %316 = arith.negf %315 : vector<32x128xf32>
    %317 = math.exp %316 : vector<32x128xf32>
    %cst_65 = arith.constant 1.000000e+00 : f32
    %318 = vector.broadcast %cst_65 : f32 to vector<32x128xf32>
    %319 = arith.addf %318, %317 : vector<32x128xf32>
    %320 = arith.divf %318, %319 : vector<32x128xf32>
    %321 = arith.mulf %312, %291 : vector<32x128xf32>
    %322 = arith.mulf %306, %314 : vector<32x128xf32>
    %323 = arith.addf %321, %322 : vector<32x128xf32>
    %324 = math.tanh %323 : vector<32x128xf32>
    %325 = arith.mulf %320, %324 : vector<32x128xf32>
    %c10_i32 = arith.constant 10 : i32
    %326 = arith.index_cast %c10_i32 : i32 to index
    %c0_66 = arith.constant 0 : index
    %c0_67 = arith.constant 0 : index
    %327 = vector.load %arg2[%326, %c0_66, %c0_67] : memref<16x128x128xbf16, #tpu.memory_space<vmem>>, vector<1x128x128xbf16>
    %328 = vector.shape_cast %327 : vector<1x128x128xbf16> to vector<128x128xbf16>
    %329 = arith.extf %328 : vector<128x128xbf16> to vector<128x128xf32>
    %330 = arith.truncf %325 : vector<32x128xf32> to vector<32x128xbf16>
    %cst_68 = arith.constant dense<0.000000e+00> : vector<128x128xf32>
    %331 = tpu.matmul %3, %330, %cst_68 {dimension_numbers = #tpu.dot_dimension_numbers<[1], [0], [0], [1], [0, 0, 1, 1], [], []>} : vector<128x32xbf16>, vector<32x128xbf16>, vector<128x128xf32> -> vector<128x128xf32>
    %332 = arith.addf %329, %331 : vector<128x128xf32>
    %333 = vector.extract_strided_slice %332 {offsets = [0, 0], sizes = [32, 128], strides = [1, 1]} : vector<128x128xf32> to vector<32x128xf32>
    %334 = arith.negf %333 : vector<32x128xf32>
    %335 = math.exp %334 : vector<32x128xf32>
    %cst_69 = arith.constant 1.000000e+00 : f32
    %336 = vector.broadcast %cst_69 : f32 to vector<32x128xf32>
    %337 = arith.addf %336, %335 : vector<32x128xf32>
    %338 = arith.divf %336, %337 : vector<32x128xf32>
    %339 = vector.extract_strided_slice %332 {offsets = [32, 0], sizes = [32, 128], strides = [1, 1]} : vector<128x128xf32> to vector<32x128xf32>
    %340 = arith.negf %339 : vector<32x128xf32>
    %341 = math.exp %340 : vector<32x128xf32>
    %cst_70 = arith.constant 1.000000e+00 : f32
    %342 = vector.broadcast %cst_70 : f32 to vector<32x128xf32>
    %343 = arith.addf %342, %341 : vector<32x128xf32>
    %344 = arith.divf %342, %343 : vector<32x128xf32>
    %345 = vector.extract_strided_slice %332 {offsets = [64, 0], sizes = [32, 128], strides = [1, 1]} : vector<128x128xf32> to vector<32x128xf32>
    %346 = math.tanh %345 : vector<32x128xf32>
    %347 = vector.extract_strided_slice %332 {offsets = [96, 0], sizes = [32, 128], strides = [1, 1]} : vector<128x128xf32> to vector<32x128xf32>
    %348 = arith.negf %347 : vector<32x128xf32>
    %349 = math.exp %348 : vector<32x128xf32>
    %cst_71 = arith.constant 1.000000e+00 : f32
    %350 = vector.broadcast %cst_71 : f32 to vector<32x128xf32>
    %351 = arith.addf %350, %349 : vector<32x128xf32>
    %352 = arith.divf %350, %351 : vector<32x128xf32>
    %353 = arith.mulf %344, %323 : vector<32x128xf32>
    %354 = arith.mulf %338, %346 : vector<32x128xf32>
    %355 = arith.addf %353, %354 : vector<32x128xf32>
    %356 = math.tanh %355 : vector<32x128xf32>
    %357 = arith.mulf %352, %356 : vector<32x128xf32>
    %c11_i32 = arith.constant 11 : i32
    %358 = arith.index_cast %c11_i32 : i32 to index
    %c0_72 = arith.constant 0 : index
    %c0_73 = arith.constant 0 : index
    %359 = vector.load %arg2[%358, %c0_72, %c0_73] : memref<16x128x128xbf16, #tpu.memory_space<vmem>>, vector<1x128x128xbf16>
    %360 = vector.shape_cast %359 : vector<1x128x128xbf16> to vector<128x128xbf16>
    %361 = arith.extf %360 : vector<128x128xbf16> to vector<128x128xf32>
    %362 = arith.truncf %357 : vector<32x128xf32> to vector<32x128xbf16>
    %cst_74 = arith.constant dense<0.000000e+00> : vector<128x128xf32>
    %363 = tpu.matmul %3, %362, %cst_74 {dimension_numbers = #tpu.dot_dimension_numbers<[1], [0], [0], [1], [0, 0, 1, 1], [], []>} : vector<128x32xbf16>, vector<32x128xbf16>, vector<128x128xf32> -> vector<128x128xf32>
    %364 = arith.addf %361, %363 : vector<128x128xf32>
    %365 = vector.extract_strided_slice %364 {offsets = [0, 0], sizes = [32, 128], strides = [1, 1]} : vector<128x128xf32> to vector<32x128xf32>
    %366 = arith.negf %365 : vector<32x128xf32>
    %367 = math.exp %366 : vector<32x128xf32>
    %cst_75 = arith.constant 1.000000e+00 : f32
    %368 = vector.broadcast %cst_75 : f32 to vector<32x128xf32>
    %369 = arith.addf %368, %367 : vector<32x128xf32>
    %370 = arith.divf %368, %369 : vector<32x128xf32>
    %371 = vector.extract_strided_slice %364 {offsets = [32, 0], sizes = [32, 128], strides = [1, 1]} : vector<128x128xf32> to vector<32x128xf32>
    %372 = arith.negf %371 : vector<32x128xf32>
    %373 = math.exp %372 : vector<32x128xf32>
    %cst_76 = arith.constant 1.000000e+00 : f32
    %374 = vector.broadcast %cst_76 : f32 to vector<32x128xf32>
    %375 = arith.addf %374, %373 : vector<32x128xf32>
    %376 = arith.divf %374, %375 : vector<32x128xf32>
    %377 = vector.extract_strided_slice %364 {offsets = [64, 0], sizes = [32, 128], strides = [1, 1]} : vector<128x128xf32> to vector<32x128xf32>
    %378 = math.tanh %377 : vector<32x128xf32>
    %379 = vector.extract_strided_slice %364 {offsets = [96, 0], sizes = [32, 128], strides = [1, 1]} : vector<128x128xf32> to vector<32x128xf32>
    %380 = arith.negf %379 : vector<32x128xf32>
    %381 = math.exp %380 : vector<32x128xf32>
    %cst_77 = arith.constant 1.000000e+00 : f32
    %382 = vector.broadcast %cst_77 : f32 to vector<32x128xf32>
    %383 = arith.addf %382, %381 : vector<32x128xf32>
    %384 = arith.divf %382, %383 : vector<32x128xf32>
    %385 = arith.mulf %376, %355 : vector<32x128xf32>
    %386 = arith.mulf %370, %378 : vector<32x128xf32>
    %387 = arith.addf %385, %386 : vector<32x128xf32>
    %388 = math.tanh %387 : vector<32x128xf32>
    %389 = arith.mulf %384, %388 : vector<32x128xf32>
    %c12_i32 = arith.constant 12 : i32
    %390 = arith.index_cast %c12_i32 : i32 to index
    %c0_78 = arith.constant 0 : index
    %c0_79 = arith.constant 0 : index
    %391 = vector.load %arg2[%390, %c0_78, %c0_79] : memref<16x128x128xbf16, #tpu.memory_space<vmem>>, vector<1x128x128xbf16>
    %392 = vector.shape_cast %391 : vector<1x128x128xbf16> to vector<128x128xbf16>
    %393 = arith.extf %392 : vector<128x128xbf16> to vector<128x128xf32>
    %394 = arith.truncf %389 : vector<32x128xf32> to vector<32x128xbf16>
    %cst_80 = arith.constant dense<0.000000e+00> : vector<128x128xf32>
    %395 = tpu.matmul %3, %394, %cst_80 {dimension_numbers = #tpu.dot_dimension_numbers<[1], [0], [0], [1], [0, 0, 1, 1], [], []>} : vector<128x32xbf16>, vector<32x128xbf16>, vector<128x128xf32> -> vector<128x128xf32>
    %396 = arith.addf %393, %395 : vector<128x128xf32>
    %397 = vector.extract_strided_slice %396 {offsets = [0, 0], sizes = [32, 128], strides = [1, 1]} : vector<128x128xf32> to vector<32x128xf32>
    %398 = arith.negf %397 : vector<32x128xf32>
    %399 = math.exp %398 : vector<32x128xf32>
    %cst_81 = arith.constant 1.000000e+00 : f32
    %400 = vector.broadcast %cst_81 : f32 to vector<32x128xf32>
    %401 = arith.addf %400, %399 : vector<32x128xf32>
    %402 = arith.divf %400, %401 : vector<32x128xf32>
    %403 = vector.extract_strided_slice %396 {offsets = [32, 0], sizes = [32, 128], strides = [1, 1]} : vector<128x128xf32> to vector<32x128xf32>
    %404 = arith.negf %403 : vector<32x128xf32>
    %405 = math.exp %404 : vector<32x128xf32>
    %cst_82 = arith.constant 1.000000e+00 : f32
    %406 = vector.broadcast %cst_82 : f32 to vector<32x128xf32>
    %407 = arith.addf %406, %405 : vector<32x128xf32>
    %408 = arith.divf %406, %407 : vector<32x128xf32>
    %409 = vector.extract_strided_slice %396 {offsets = [64, 0], sizes = [32, 128], strides = [1, 1]} : vector<128x128xf32> to vector<32x128xf32>
    %410 = math.tanh %409 : vector<32x128xf32>
    %411 = vector.extract_strided_slice %396 {offsets = [96, 0], sizes = [32, 128], strides = [1, 1]} : vector<128x128xf32> to vector<32x128xf32>
    %412 = arith.negf %411 : vector<32x128xf32>
    %413 = math.exp %412 : vector<32x128xf32>
    %cst_83 = arith.constant 1.000000e+00 : f32
    %414 = vector.broadcast %cst_83 : f32 to vector<32x128xf32>
    %415 = arith.addf %414, %413 : vector<32x128xf32>
    %416 = arith.divf %414, %415 : vector<32x128xf32>
    %417 = arith.mulf %408, %387 : vector<32x128xf32>
    %418 = arith.mulf %402, %410 : vector<32x128xf32>
    %419 = arith.addf %417, %418 : vector<32x128xf32>
    %420 = math.tanh %419 : vector<32x128xf32>
    %421 = arith.mulf %416, %420 : vector<32x128xf32>
    %c13_i32 = arith.constant 13 : i32
    %422 = arith.index_cast %c13_i32 : i32 to index
    %c0_84 = arith.constant 0 : index
    %c0_85 = arith.constant 0 : index
    %423 = vector.load %arg2[%422, %c0_84, %c0_85] : memref<16x128x128xbf16, #tpu.memory_space<vmem>>, vector<1x128x128xbf16>
    %424 = vector.shape_cast %423 : vector<1x128x128xbf16> to vector<128x128xbf16>
    %425 = arith.extf %424 : vector<128x128xbf16> to vector<128x128xf32>
    %426 = arith.truncf %421 : vector<32x128xf32> to vector<32x128xbf16>
    %cst_86 = arith.constant dense<0.000000e+00> : vector<128x128xf32>
    %427 = tpu.matmul %3, %426, %cst_86 {dimension_numbers = #tpu.dot_dimension_numbers<[1], [0], [0], [1], [0, 0, 1, 1], [], []>} : vector<128x32xbf16>, vector<32x128xbf16>, vector<128x128xf32> -> vector<128x128xf32>
    %428 = arith.addf %425, %427 : vector<128x128xf32>
    %429 = vector.extract_strided_slice %428 {offsets = [0, 0], sizes = [32, 128], strides = [1, 1]} : vector<128x128xf32> to vector<32x128xf32>
    %430 = arith.negf %429 : vector<32x128xf32>
    %431 = math.exp %430 : vector<32x128xf32>
    %cst_87 = arith.constant 1.000000e+00 : f32
    %432 = vector.broadcast %cst_87 : f32 to vector<32x128xf32>
    %433 = arith.addf %432, %431 : vector<32x128xf32>
    %434 = arith.divf %432, %433 : vector<32x128xf32>
    %435 = vector.extract_strided_slice %428 {offsets = [32, 0], sizes = [32, 128], strides = [1, 1]} : vector<128x128xf32> to vector<32x128xf32>
    %436 = arith.negf %435 : vector<32x128xf32>
    %437 = math.exp %436 : vector<32x128xf32>
    %cst_88 = arith.constant 1.000000e+00 : f32
    %438 = vector.broadcast %cst_88 : f32 to vector<32x128xf32>
    %439 = arith.addf %438, %437 : vector<32x128xf32>
    %440 = arith.divf %438, %439 : vector<32x128xf32>
    %441 = vector.extract_strided_slice %428 {offsets = [64, 0], sizes = [32, 128], strides = [1, 1]} : vector<128x128xf32> to vector<32x128xf32>
    %442 = math.tanh %441 : vector<32x128xf32>
    %443 = vector.extract_strided_slice %428 {offsets = [96, 0], sizes = [32, 128], strides = [1, 1]} : vector<128x128xf32> to vector<32x128xf32>
    %444 = arith.negf %443 : vector<32x128xf32>
    %445 = math.exp %444 : vector<32x128xf32>
    %cst_89 = arith.constant 1.000000e+00 : f32
    %446 = vector.broadcast %cst_89 : f32 to vector<32x128xf32>
    %447 = arith.addf %446, %445 : vector<32x128xf32>
    %448 = arith.divf %446, %447 : vector<32x128xf32>
    %449 = arith.mulf %440, %419 : vector<32x128xf32>
    %450 = arith.mulf %434, %442 : vector<32x128xf32>
    %451 = arith.addf %449, %450 : vector<32x128xf32>
    %452 = math.tanh %451 : vector<32x128xf32>
    %453 = arith.mulf %448, %452 : vector<32x128xf32>
    %c14_i32 = arith.constant 14 : i32
    %454 = arith.index_cast %c14_i32 : i32 to index
    %c0_90 = arith.constant 0 : index
    %c0_91 = arith.constant 0 : index
    %455 = vector.load %arg2[%454, %c0_90, %c0_91] : memref<16x128x128xbf16, #tpu.memory_space<vmem>>, vector<1x128x128xbf16>
    %456 = vector.shape_cast %455 : vector<1x128x128xbf16> to vector<128x128xbf16>
    %457 = arith.extf %456 : vector<128x128xbf16> to vector<128x128xf32>
    %458 = arith.truncf %453 : vector<32x128xf32> to vector<32x128xbf16>
    %cst_92 = arith.constant dense<0.000000e+00> : vector<128x128xf32>
    %459 = tpu.matmul %3, %458, %cst_92 {dimension_numbers = #tpu.dot_dimension_numbers<[1], [0], [0], [1], [0, 0, 1, 1], [], []>} : vector<128x32xbf16>, vector<32x128xbf16>, vector<128x128xf32> -> vector<128x128xf32>
    %460 = arith.addf %457, %459 : vector<128x128xf32>
    %461 = vector.extract_strided_slice %460 {offsets = [0, 0], sizes = [32, 128], strides = [1, 1]} : vector<128x128xf32> to vector<32x128xf32>
    %462 = arith.negf %461 : vector<32x128xf32>
    %463 = math.exp %462 : vector<32x128xf32>
    %cst_93 = arith.constant 1.000000e+00 : f32
    %464 = vector.broadcast %cst_93 : f32 to vector<32x128xf32>
    %465 = arith.addf %464, %463 : vector<32x128xf32>
    %466 = arith.divf %464, %465 : vector<32x128xf32>
    %467 = vector.extract_strided_slice %460 {offsets = [32, 0], sizes = [32, 128], strides = [1, 1]} : vector<128x128xf32> to vector<32x128xf32>
    %468 = arith.negf %467 : vector<32x128xf32>
    %469 = math.exp %468 : vector<32x128xf32>
    %cst_94 = arith.constant 1.000000e+00 : f32
    %470 = vector.broadcast %cst_94 : f32 to vector<32x128xf32>
    %471 = arith.addf %470, %469 : vector<32x128xf32>
    %472 = arith.divf %470, %471 : vector<32x128xf32>
    %473 = vector.extract_strided_slice %460 {offsets = [64, 0], sizes = [32, 128], strides = [1, 1]} : vector<128x128xf32> to vector<32x128xf32>
    %474 = math.tanh %473 : vector<32x128xf32>
    %475 = vector.extract_strided_slice %460 {offsets = [96, 0], sizes = [32, 128], strides = [1, 1]} : vector<128x128xf32> to vector<32x128xf32>
    %476 = arith.negf %475 : vector<32x128xf32>
    %477 = math.exp %476 : vector<32x128xf32>
    %cst_95 = arith.constant 1.000000e+00 : f32
    %478 = vector.broadcast %cst_95 : f32 to vector<32x128xf32>
    %479 = arith.addf %478, %477 : vector<32x128xf32>
    %480 = arith.divf %478, %479 : vector<32x128xf32>
    %481 = arith.mulf %472, %451 : vector<32x128xf32>
    %482 = arith.mulf %466, %474 : vector<32x128xf32>
    %483 = arith.addf %481, %482 : vector<32x128xf32>
    %484 = math.tanh %483 : vector<32x128xf32>
    %485 = arith.mulf %480, %484 : vector<32x128xf32>
    %c15_i32 = arith.constant 15 : i32
    %486 = arith.index_cast %c15_i32 : i32 to index
    %c0_96 = arith.constant 0 : index
    %c0_97 = arith.constant 0 : index
    %487 = vector.load %arg2[%486, %c0_96, %c0_97] : memref<16x128x128xbf16, #tpu.memory_space<vmem>>, vector<1x128x128xbf16>
    %488 = vector.shape_cast %487 : vector<1x128x128xbf16> to vector<128x128xbf16>
    %489 = arith.extf %488 : vector<128x128xbf16> to vector<128x128xf32>
    %490 = arith.truncf %485 : vector<32x128xf32> to vector<32x128xbf16>
    %cst_98 = arith.constant dense<0.000000e+00> : vector<128x128xf32>
    %491 = tpu.matmul %3, %490, %cst_98 {dimension_numbers = #tpu.dot_dimension_numbers<[1], [0], [0], [1], [0, 0, 1, 1], [], []>} : vector<128x32xbf16>, vector<32x128xbf16>, vector<128x128xf32> -> vector<128x128xf32>
    %492 = arith.addf %489, %491 : vector<128x128xf32>
    %493 = vector.extract_strided_slice %492 {offsets = [0, 0], sizes = [32, 128], strides = [1, 1]} : vector<128x128xf32> to vector<32x128xf32>
    %494 = arith.negf %493 : vector<32x128xf32>
    %495 = math.exp %494 : vector<32x128xf32>
    %cst_99 = arith.constant 1.000000e+00 : f32
    %496 = vector.broadcast %cst_99 : f32 to vector<32x128xf32>
    %497 = arith.addf %496, %495 : vector<32x128xf32>
    %498 = arith.divf %496, %497 : vector<32x128xf32>
    %499 = vector.extract_strided_slice %492 {offsets = [32, 0], sizes = [32, 128], strides = [1, 1]} : vector<128x128xf32> to vector<32x128xf32>
    %500 = arith.negf %499 : vector<32x128xf32>
    %501 = math.exp %500 : vector<32x128xf32>
    %cst_100 = arith.constant 1.000000e+00 : f32
    %502 = vector.broadcast %cst_100 : f32 to vector<32x128xf32>
    %503 = arith.addf %502, %501 : vector<32x128xf32>
    %504 = arith.divf %502, %503 : vector<32x128xf32>
    %505 = vector.extract_strided_slice %492 {offsets = [64, 0], sizes = [32, 128], strides = [1, 1]} : vector<128x128xf32> to vector<32x128xf32>
    %506 = math.tanh %505 : vector<32x128xf32>
    %507 = vector.extract_strided_slice %492 {offsets = [96, 0], sizes = [32, 128], strides = [1, 1]} : vector<128x128xf32> to vector<32x128xf32>
    %508 = arith.negf %507 : vector<32x128xf32>
    %509 = math.exp %508 : vector<32x128xf32>
    %cst_101 = arith.constant 1.000000e+00 : f32
    %510 = vector.broadcast %cst_101 : f32 to vector<32x128xf32>
    %511 = arith.addf %510, %509 : vector<32x128xf32>
    %512 = arith.divf %510, %511 : vector<32x128xf32>
    %513 = arith.mulf %504, %483 : vector<32x128xf32>
    %514 = arith.mulf %498, %506 : vector<32x128xf32>
    %515 = arith.addf %513, %514 : vector<32x128xf32>
    %516 = math.tanh %515 : vector<32x128xf32>
    %517 = arith.mulf %512, %516 : vector<32x128xf32>
    %c16_i32 = arith.constant 16 : i32
    %c0_102 = arith.constant 0 : index
    %c0_103 = arith.constant 0 : index
    %518 = vector.load %arg13[%c0_102, %c0_103] : memref<32x128xf32, #tpu.memory_space<vmem>>, vector<32x128xf32>
    tpu.vector_store %arg13[%c0_102, %c0_103], %517 {strides = array<i32>} : memref<32x128xf32, #tpu.memory_space<vmem>>, vector<32x128xf32>,
    %c0_104 = arith.constant 0 : index
    %c0_105 = arith.constant 0 : index
    %519 = vector.load %arg14[%c0_104, %c0_105] : memref<32x128xf32, #tpu.memory_space<vmem>>, vector<32x128xf32>
    tpu.vector_store %arg14[%c0_104, %c0_105], %515 {strides = array<i32>} : memref<32x128xf32, #tpu.memory_space<vmem>>, vector<32x128xf32>,
    %c0_i32_106 = arith.constant 0 : i32
    %520 = arith.cmpi eq, %arg1, %c0_i32_106 : i32
    %521 = arith.extui %520 : i1 to i32
    %c0_i32_107 = arith.constant 0 : i32
    %522 = arith.cmpi ne, %521, %c0_i32_107 : i32
    scf.if %522 {
      %c0_108 = arith.constant 0 : index
      %c0_109 = arith.constant 0 : index
      %523 = vector.load %arg5[%c0_108, %c0_109] : memref<32x32xf32, #tpu.memory_space<vmem>>, vector<32x32xf32>
      %cst_110 = arith.constant dense<0.000000e+00> : vector<32x128xf32>
      %524 = tpu.matmul %523, %517, %cst_110 {dimension_numbers = #tpu.dot_dimension_numbers<[1], [0], [0], [1], [0, 0, 1, 1], [], []>} : vector<32x32xf32>, vector<32x128xf32>, vector<32x128xf32> -> vector<32x128xf32>
      %c0_111 = arith.constant 0 : index
      %c0_112 = arith.constant 0 : index
      %525 = vector.load %arg6[%c0_111, %c0_112] : memref<32x1xf32, #tpu.memory_space<vmem>>, vector<32x1xf32>
      %526 = vector.broadcast %525 : vector<32x1xf32> to vector<32x128xf32>
      %527 = arith.addf %524, %526 : vector<32x128xf32>
      %cst_113 = arith.constant 0.000000e+00 : f32
      %528 = vector.broadcast %cst_113 : f32 to vector<32x128xf32>
      %529 = arith.maximumf %527, %528 : vector<32x128xf32>
      %c0_114 = arith.constant 0 : index
      %c0_115 = arith.constant 0 : index
      %530 = vector.load %arg7[%c0_114, %c0_115] : memref<32x32xf32, #tpu.memory_space<vmem>>, vector<32x32xf32>
      %c0_116 = arith.constant 0 : index
      %c0_117 = arith.constant 0 : index
      %531 = vector.load %arg3[%c0_116, %c0_117] : memref<32x128xf32, #tpu.memory_space<vmem>>, vector<32x128xf32>
      %cst_118 = arith.constant dense<0.000000e+00> : vector<32x128xf32>
      %532 = tpu.matmul %530, %531, %cst_118 {dimension_numbers = #tpu.dot_dimension_numbers<[1], [0], [0], [1], [0, 0, 1, 1], [], []>} : vector<32x32xf32>, vector<32x128xf32>, vector<32x128xf32> -> vector<32x128xf32>
      %c0_119 = arith.constant 0 : index
      %c0_120 = arith.constant 0 : index
      %533 = vector.load %arg8[%c0_119, %c0_120] : memref<32x32xf32, #tpu.memory_space<vmem>>, vector<32x32xf32>
      %cst_121 = arith.constant dense<0.000000e+00> : vector<32x128xf32>
      %534 = tpu.matmul %533, %529, %cst_121 {dimension_numbers = #tpu.dot_dimension_numbers<[1], [0], [0], [1], [0, 0, 1, 1], [], []>} : vector<32x32xf32>, vector<32x128xf32>, vector<32x128xf32> -> vector<32x128xf32>
      %535 = arith.addf %532, %534 : vector<32x128xf32>
      %c0_122 = arith.constant 0 : index
      %c0_123 = arith.constant 0 : index
      %536 = vector.load %arg9[%c0_122, %c0_123] : memref<32x1xf32, #tpu.memory_space<vmem>>, vector<32x1xf32>
      %537 = vector.broadcast %536 : vector<32x1xf32> to vector<32x128xf32>
      %538 = arith.addf %535, %537 : vector<32x128xf32>
      %cst_124 = arith.constant 0.000000e+00 : f32
      %539 = vector.broadcast %cst_124 : f32 to vector<32x128xf32>
      %540 = arith.maximumf %538, %539 : vector<32x128xf32>
      %c0_125 = arith.constant 0 : index
      %c0_126 = arith.constant 0 : index
      %541 = vector.load %arg10[%c0_125, %c0_126] : memref<32x1xf32, #tpu.memory_space<vmem>>, vector<32x1xf32>
      %542 = vector.broadcast %541 : vector<32x1xf32> to vector<32x128xf32>
      %543 = arith.mulf %540, %542 : vector<32x128xf32>
      %cst_127 = arith.constant dense<0.000000e+00> : vector<128xf32>
      %544 = vector.multi_reduction <add>, %543, %cst_127 [0] : vector<32x128xf32> to vector<128xf32>
      %545 = vector.shape_cast %544 : vector<128xf32> to vector<1x128xf32>
      %c0_128 = arith.constant 0 : index
      %c0_129 = arith.constant 0 : index
      %546 = vector.load %arg11[%c0_128, %c0_129] : memref<1x1xf32, #tpu.memory_space<vmem>>, vector<1x1xf32>
      %547 = vector.broadcast %546 : vector<1x1xf32> to vector<1x128xf32>
      %548 = arith.addf %545, %547 : vector<1x128xf32>
      %c0_130 = arith.constant 0 : index
      %c0_131 = arith.constant 0 : index
      %549 = vector.load %arg12[%c0_130, %c0_131] : memref<1x128xf32, #tpu.memory_space<vmem>>, vector<1x128xf32>
      tpu.vector_store %arg12[%c0_130, %c0_131], %548 {strides = array<i32>} : memref<1x128xf32, #tpu.memory_space<vmem>>, vector<1x128xf32>,
    } else {
    }
    return
  }
  func.func @transform_0(%arg0: i32, %arg1: i32) -> (i32, i32, i32) {
    %c0_i32 = arith.constant 0 : i32
    %c0_i32_0 = arith.constant 0 : i32
    return %arg1, %c0_i32, %arg0 : i32, i32, i32
  }
  func.func @transform_1(%arg0: i32, %arg1: i32) -> (i32, i32) {
    %c0_i32 = arith.constant 0 : i32
    %c0_i32_0 = arith.constant 0 : i32
    return %c0_i32, %arg0 : i32, i32
  }
  func.func @transform_2(%arg0: i32, %arg1: i32) -> (i32, i32) {
    %c0_i32 = arith.constant 0 : i32
    %c0_i32_0 = arith.constant 0 : i32
    %c0_i32_1 = arith.constant 0 : i32
    return %c0_i32, %c0_i32_0 : i32, i32
  }
  func.func @transform_3(%arg0: i32, %arg1: i32) -> (i32, i32) {
    %c0_i32 = arith.constant 0 : i32
    %c0_i32_0 = arith.constant 0 : i32
    %c0_i32_1 = arith.constant 0 : i32
    return %c0_i32, %c0_i32_0 : i32, i32
  }
  func.func @transform_4(%arg0: i32, %arg1: i32) -> (i32, i32) {
    %c0_i32 = arith.constant 0 : i32
    %c0_i32_0 = arith.constant 0 : i32
    %c0_i32_1 = arith.constant 0 : i32
    return %c0_i32, %c0_i32_0 : i32, i32
  }
  func.func @transform_5(%arg0: i32, %arg1: i32) -> (i32, i32) {
    %c0_i32 = arith.constant 0 : i32
    %c0_i32_0 = arith.constant 0 : i32
    %c0_i32_1 = arith.constant 0 : i32
    return %c0_i32, %c0_i32_0 : i32, i32
  }
  func.func @transform_6(%arg0: i32, %arg1: i32) -> (i32, i32) {
    %c0_i32 = arith.constant 0 : i32
    %c0_i32_0 = arith.constant 0 : i32
    %c0_i32_1 = arith.constant 0 : i32
    return %c0_i32, %c0_i32_0 : i32, i32
  }
  func.func @transform_7(%arg0: i32, %arg1: i32) -> (i32, i32) {
    %c0_i32 = arith.constant 0 : i32
    %c0_i32_0 = arith.constant 0 : i32
    %c0_i32_1 = arith.constant 0 : i32
    return %c0_i32, %c0_i32_0 : i32, i32
  }
  func.func @transform_8(%arg0: i32, %arg1: i32) -> (i32, i32) {
    %c0_i32 = arith.constant 0 : i32
    %c0_i32_0 = arith.constant 0 : i32
    %c0_i32_1 = arith.constant 0 : i32
    return %c0_i32, %c0_i32_0 : i32, i32
  }
  func.func @transform_9(%arg0: i32, %arg1: i32) -> (i32, i32) {
    %c0_i32 = arith.constant 0 : i32
    %c0_i32_0 = arith.constant 0 : i32
    %c0_i32_1 = arith.constant 0 : i32
    return %c0_i32, %c0_i32_0 : i32, i32
  }
  func.func @transform_10(%arg0: i32, %arg1: i32) -> (i32, i32) {
    %c0_i32 = arith.constant 0 : i32
    %c0_i32_0 = arith.constant 0 : i32
    return %c0_i32, %arg0 : i32, i32
  }
}

</mosaic_0001>

<bundles_post_ra>
// kernel: tpu_custom_call.1
= control target key start
LH: loop header
LB: loop body
LE: loop exit
PB: predicated region body
PF: predicated region fallthrough
CT: control target
= control target key end

     0   :  { %s12914_s0 = inlined_call_operand.hbm [shape: bf16[16,128,128], index: 0, kind: input, shape index: {}]   ;;  %s12915_s1 = inlined_call_operand.vmem [shape: f32[32,128], index: 1, kind: input, shape index: {}]   ;;  %s12916_s2 = inlined_call_operand.vmem [shape: bf16[128,32], index: 2, kind: input, shape index: {}]   ;;  %s12917_s3 = inlined_call_operand.vmem [shape: f32[32,32], index: 3, kind: input, shape index: {}]   ;;  %s12918_s4 = inlined_call_operand.vmem [shape: f32[32,1], index: 4, kind: input, shape index: {}]   ;;  %s12919_s5 = inlined_call_operand.vmem [shape: f32[32,32], index: 5, kind: input, shape index: {}]   ;;  %s12920_s6 = inlined_call_operand.vmem [shape: f32[32,32], index: 6, kind: input, shape index: {}]   ;;  %s12921_s7 = inlined_call_operand.vmem [shape: f32[32,1], index: 7, kind: input, shape index: {}]   ;;  %s12922_s8 = inlined_call_operand.vmem [shape: f32[32,1], index: 8, kind: input, shape index: {}]   ;;  %s12923_s9 = inlined_call_operand.<no memory space> [shape: f32[1,1], index: 9, kind: input, shape index: {}]   ;;  %s12924_s10 = inlined_call_operand.hbm [shape: f32[1,128], index: 10, kind: output, shape index: {}]  }
   0x1   :  { %v15_v0 = vstv %s12923_s9 }
   0x2   :  { %16 = vst [vmem:[#allocation4] sm:$0x1] %v15_v0 }
   0x3   :  { %17 = vsyncpa [#allocation6], 0 }
   0x4   :  { %18 = vsyncpa [#allocation7], 0  ;;  %s23_s17 = sshll.u32 %s12914_s0, 4  ;;  %s8205_s18 = smov [#allocation5]   ;;  %s24_s17 = int_to_ptr.hbm [resolvable:$true] %s23_s17 }
   0x5   :  { %s25_s19 = sshll.u32 %s8205_s18, 4  ;;  %s8206_s20 = smov 64   ;;  %s26_s19 = int_to_ptr.vmem [resolvable:$true] %s25_s19 }
   0x6   :  { %s8207_s21 = smov 4  }
   0x7   :  { %31 = dma.hbm_to_vmem [thread:$0]  %s24_s17, 16384, %s26_s19, [#allocation6], %s8206_s20, %s8206_s20, %s8207_s21  }
   0x8   :  { %8201 = dma.done.wait [#allocation6], 16384  }
   0x9   :  { %8202 = vsyncadd [#allocation6], 4294950912  ;;  %v8208_v1 = vmov 0.0|0.0   ;;  %vm165_vm0 = vcmask 261120   ;;  %v8275_v2 = vld [vmem:[%s12916_s2] sm:$0xff]  ;;  %v8282_v3 = vld [vmem:[%s12916_s2 + $0x8] sm:$0xff] }
   0xa   :  { %197 = vmatpush.bf16.msra.mxu0 %v8208_v1  ;;  %v8289_v4 = vld [vmem:[%s12916_s2 + $0x10] sm:$0xff]  ;;  %v8296_v5 = vld [vmem:[%s12916_s2 + $0x18] sm:$0xff]  ;;  %v8303_v6 = vld [vmem:[%s12916_s2 + $0x20] sm:$0xff]  ;;  %s6050_s22 = sshll.u32 %s12924_s10, 4  ;;  %s6051_s22 = int_to_ptr.hbm [resolvable:$true] %s6050_s22 }
   0xb   :  { %v8310_v7 = vld [vmem:[%s12916_s2 + $0x28] sm:$0xff]  ;;  %v8317_v8 = vld [vmem:[%s12916_s2 + $0x30] sm:$0xff]  ;;  %v8324_v9 = vld [vmem:[%s12916_s2 + $0x38] sm:$0xff] }
   0xc   :  { %v6433_v13 = vld [vmem:[#allocation5] sm:$0xff]   ;;  %v8330_v17 = vld [vmem:[#allocation5 + $0x10] sm:$0xff]   ;;  %v6944_v45 = vld [vmem:[#allocation5 + $0x8] sm:$0xff]  }
   0xd   :  { %6092 = vmatmul.msk.bf16.vlgmr.msra.gmra.mxu0 %vm165_vm0, %v8275_v2  ;;  %v6434_v14 = vunpack.c.l.bf16 %v6433_v13  ;;  %v6442_v19 = vunpack.c.l.bf16 %v8330_v17  ;;  %v8335_v36 = vld [vmem:[#allocation5 + $0x20] sm:$0xff]   ;;  %v6435_v40 = vunpack.c.h.bf16 %v6433_v13  ;;  %v6438_v52 = vunpack.c.l.bf16 %v6944_v45  ;;  %v6946_v1 = vld [vmem:[#allocation5 + $0x18] sm:$0xff]  }
   0xe   :  { %v6450_v38 = vunpack.c.l.bf16 %v8335_v36  ;;  %v6439_v62 = vunpack.c.h.bf16 %v6944_v45  ;;  %v6443_v13 = vunpack.c.h.bf16 %v8330_v17 }
  0x1d   :  { %6093 = vmatmul.msk.bf16.gmra.mxu0 %vm165_vm0, %v8282_v3 }
  0x2d   :  { %6094 = vmatmul.msk.bf16.gmra.mxu0 %vm165_vm0, %v8289_v4 }
  0x3d   :  { %6095 = vmatmul.msk.bf16.gmra.mxu0 %vm165_vm0, %v8296_v5 }
  0x4d   :  { %6096 = vmatmul.msk.bf16.gmra.mxu0 %vm165_vm0, %v8303_v6 }
  0x5d   :  { %6097 = vmatmul.msk.bf16.gmra.mxu0 %vm165_vm0, %v8310_v7 }
  0x6d   :  { %6098 = vmatmul.msk.bf16.gmra.mxu0 %vm165_vm0, %v8317_v8 }
  0x7d   :  { %6099 = vmatmul.msk.bf16.gmra.mxu0 %vm165_vm0, %v8324_v9 }
  0x8a   :  { %v199_v10 = vpop.f32.mrf.mxu0 }
  0x8b   :  { %v239_v15 = vadd.f32 %v6434_v14, %v199_v10 }
  0x8d   :  { %v6100_v18 = vmul.f32 -1.442695, %v239_v15  ;;  %v6446_v15 = vunpack.c.l.bf16 %v6946_v1 }
  0x8f   :  { %7073 = vpow2.f32 %v6100_v18  ;;  %v6447_v18 = vunpack.c.h.bf16 %v6946_v1  ;;  %v6948_v1 = vld [vmem:[#allocation5 + $0x28] sm:$0xff]  }
  0x92   :  { %v201_v11 = vpop.f32.mrf.mxu0 }
  0x93   :  { %v240_v48 = vadd.f32 %v6435_v40, %v201_v11 }
  0x95   :  { %v7074_v23 = vpop.eup %7073  ;;  %v6101_v55 = vmul.f32 -1.442695, %v240_v48 }
  0x96   :  { %v267_v25 = vadd.f32 1.0, %v7074_v23 }
  0x98   :  { %v282_v49 = vand.u32 2147483648, %v267_v25  ;;  %vm276_vm5 = vweird.f32 %v267_v25  ;;  %v280_v50 = vand.u32 2147483647, %v267_v25 }
  0x9a   :  { %v204_v12 = vpop.f32.mrf.mxu0  ;;  %v283_v56 = vor.u32 1.1754944e-38, %v282_v49  ;;  %vm281_vm8 = vcmp.eq.f32.partialorder %v280_v50, 8.507059e+37 }
  0x9b   :  { %v241_v60 = vadd.f32 %v6438_v52, %v204_v12 }
  0x9d   :  { %v6102_v11 = vmul.f32 -1.442695, %v241_v60 }
  0xa2   :  { %v8328_v16 = vpop.f32.mrf.mxu0 }
  0xa3   :  { %v242_v14 = vadd.f32 %v6439_v62, %v8328_v16 }
  0xaa   :  { %v209_v20 = vpop.f32.mrf.mxu0 }
  0xab   :  { %v243_v21 = vadd.f32 %v6442_v19, %v209_v20 }
  0xad   :  { %v6104_v22 = vmul.f32 -1.442695, %v243_v21  ;;  %v6103_v21 = vmul.f32 -1.442695, %v242_v14 }
  0xaf   :  { %7075 = vpow2.f32 %v6104_v22 }
  0xb0   :  { %7077 = vrcp.f32 %v267_v25 }
  0xb2   :  { %v8333_v24 = vpop.f32.mrf.mxu0 }
  0xb3   :  { %v244_v12 = vadd.f32 %v6443_v13, %v8333_v24 }
  0xb5   :  { %v7076_v26 = vpop.eup %7075 }
  0xb6   :  { %v343_v27 = vadd.f32 1.0, %v7076_v26  ;;  %v7078_v29 = vpop.eup %7077  ;;  %v6105_v26 = vmul.f32 -1.442695, %v244_v12 }
  0xb7   :  { %v272_v32 = vmul.f32 %v7078_v29, %v267_v25  ;;  %vm277_vm3 = vweird.f32 %v7078_v29 }
  0xb8   :  { %7079 = vrcp.f32 %v343_v27  ;;  %v358_v43 = vand.u32 2147483648, %v343_v27  ;;  %vm352_vm2 = vweird.f32 %v343_v27  ;;  %v356_v47 = vand.u32 2147483647, %v343_v27  ;;  %vm278_vm6 = vmor %vm276_vm5, %vm277_vm3 }
  0xb9   :  { %v273_v35 = vsub.f32 1.0, %v272_v32 }
  0xba   :  { %v214_v28 = vpop.f32.mrf.mxu0  ;;  %v359_v53 = vor.u32 1.1754944e-38, %v358_v43  ;;  %vm357_vm7 = vcmp.eq.f32.partialorder %v356_v47, 8.507059e+37 }
  0xbb   :  { %v274_v39 = vmul.f32 %v7078_v29, %v273_v35  ;;  %v245_v22 = vadd.f32 %v6446_v15, %v214_v28 }
  0xbd   :  { %v275_v46 = vadd.f32 %v7078_v29, %v274_v39 }
  0xbe   :  { %v7080_v30 = vpop.eup %7079 }
  0xbf   :  { %v348_v31 = vmul.f32 %v7080_v30, %v343_v27  ;;  %vm353_vm1 = vweird.f32 %v7080_v30  ;;  %v279_v54 = vsel %vm278_vm6, %v7078_v29, %v275_v46  ;;  %v6106_v27 = vmul.f32 -1.442695, %v245_v22 }
  0xc0   :  { %vm354_vm4 = vmor %vm352_vm2, %vm353_vm1  ;;  %v284_v61 = vsel %vm281_vm8, %v283_v56, %v279_v54 }
  0xc1   :  { %v349_v33 = vsub.f32 1.0, %v348_v31 }
  0xc2   :  { %v216_v34 = vpop.f32.mrf.mxu0 }
  0xc3   :  { %v350_v37 = vmul.f32 %v7080_v30, %v349_v33  ;;  %v246_v23 = vadd.f32 %v6447_v18, %v216_v34  ;;  %v6949_v33 = vld [vmem:[#allocation5 + $0x30] sm:$0xff]  }
  0xc4   :  { %v6458_v40 = vunpack.c.l.bf16 %v6949_v33 }
  0xc5   :  { %v351_v42 = vadd.f32 %v7080_v30, %v350_v37  ;;  %v6107_v17 = vmul.f32 -1.442695, %v246_v23 }
  0xc7   :  { %v355_v51 = vsel %vm354_vm4, %v7080_v30, %v351_v42 }
  0xc8   :  { %v360_v57 = vsel %vm357_vm7, %v359_v53, %v355_v51  ;;  %v8378_v53 = vld [vmem:[#allocation5 + $0x38] sm:$0xff]  }
  0xc9   :  { %v487_v63 = vmul.f32 0.0, %v360_v57  ;;  %v6462_v62 = vunpack.c.l.bf16 %v8378_v53 }
  0xca   :  { %v219_v41 = vpop.f32.mrf.mxu0 }
  0xcb   :  { %v247_v44 = vadd.f32 %v6450_v38, %v219_v41 }
  0xcd   :  { %7081 = vtanh.f32 %v247_v44  ;;  %v6459_v44 = vunpack.c.h.bf16 %v6949_v33 }
  0xce   :  { %7083 = vpow2.f32 %v6101_v55 }
  0xcf   :  { %7085 = vpow2.f32 %v6102_v11 }
  0xd0   :  { %7087 = vpow2.f32 %v6103_v21 }
  0xd2   :  { %v8338_v58 = vpop.f32.mrf.mxu0 }
  0xd3   :  { %v7082_v59 = vpop.eup %7081 }
  0xd4   :  { %v491_v0 = vmul.f32 %v7082_v59, %v284_v61  ;;  %v7084_v20 = vpop.eup %7083 }
  0xd5   :  { %v8347_v25 = vadd.f32 1.0, %v7084_v20  ;;  %v7086_v29 = vpop.eup %7085  ;;  %v6451_v20 = vunpack.c.h.bf16 %v8335_v36 }
  0xd6   :  { %v8340_v10 = vadd.f32 %v491_v0, %v487_v63  ;;  %v8352_v30 = vadd.f32 1.0, %v7086_v29  ;;  %v7088_v24 = vpop.eup %7087 }
  0xd7   :  { %7089 = vrcp.f32 %v8347_v25  ;;  %v8357_v32 = vadd.f32 1.0, %v7088_v24  ;;  %v295_v59 = vand.u32 2147483647, %v8347_v25  ;;  %v297_v61 = vand.u32 2147483648, %v8347_v25 }
  0xd8   :  { %7091 = vpow2.f32 %v6105_v26  ;;  %v312_v11 = vand.u32 2147483648, %v8352_v30  ;;  %vm291_vm10 = vweird.f32 %v8347_v25  ;;  %v6454_v26 = vunpack.c.l.bf16 %v6948_v1 }
  0xd9   :  { %7093 = vpow2.f32 %v6106_v27  ;;  %vm8401_vm11 = vcmp.eq.f32.partialorder %v295_v59, 8.507059e+37  ;;  %vm306_vm13 = vweird.f32 %v8352_v30  ;;  %v310_v36 = vand.u32 2147483647, %v8352_v30 }
  0xda   :  { %v8344_v19 = vpop.f32.mrf.mxu0  ;;  %7095 = vpow2.f32 %v6107_v17  ;;  %v8416_v17 = vor.u32 1.1754944e-38, %v312_v11  ;;  %vm321_vm1 = vweird.f32 %v8357_v32 }
  0xdb   :  { %7097 = vrcp.f32 %v8352_v30  ;;  %vm8449_vm2 = vcmp.eq.f32.partialorder %v310_v36, 8.507059e+37 }
  0xdc   :  { %7099 = vrcp.f32 %v8357_v32 }
  0xdd   :  { %v8354_v31 = vpop.eup %7089 }
  0xde   :  { %v7092_v28 = vpop.eup %7091  ;;  %v287_v38 = vmul.f32 %v8354_v31, %v8347_v25  ;;  %vm292_vm9 = vweird.f32 %v8354_v31  ;;  %v298_v25 = vor.u32 1.1754944e-38, %v297_v61 }
  0xdf   :  { %v7094_v34 = vpop.eup %7093  ;;  %v8361_v39 = vadd.f32 1.0, %v7092_v28  ;;  %vm8407_vm12 = vmor %vm291_vm10, %vm292_vm9 }
  0xe0   :  { %v7096_v37 = vpop.eup %7095  ;;  %v8364_v41 = vadd.f32 1.0, %v7094_v34  ;;  %v288_v45 = vsub.f32 1.0, %v287_v38  ;;  %v248_v38 = vadd.f32 %v6451_v20, %v8338_v58  ;;  %v325_v58 = vand.u32 2147483647, %v8357_v32 }
  0xe1   :  { %v8366_v42 = vpop.eup %7097  ;;  %v8368_v43 = vadd.f32 1.0, %v7096_v37  ;;  %7101 = vrcp.f32 %v8361_v39  ;;  %vm367_vm4 = vweird.f32 %v8361_v39 }
  0xe2   :  { %v8350_v16 = vpop.f32.mrf.mxu0  ;;  %v302_v47 = vmul.f32 %v8366_v42, %v8352_v30  ;;  %7103 = vrcp.f32 %v8364_v41  ;;  %v8375_v49 = vpop.eup %7099  ;;  %v289_v51 = vmul.f32 %v8354_v31, %v288_v45  ;;  %vm307_vm14 = vweird.f32 %v8366_v42 }
  0xe3   :  { %7105 = vrcp.f32 %v8368_v43  ;;  %v317_v57 = vmul.f32 %v8375_v49, %v8357_v32  ;;  %v249_v45 = vadd.f32 %v6454_v26, %v8344_v19  ;;  %vm8432_vm15 = vmor %vm306_vm13, %vm307_vm14  ;;  %vm322_vm3 = vweird.f32 %v8375_v49 }
  0xe4   :  { %v303_v54 = vsub.f32 1.0, %v302_v47  ;;  %v290_v0 = vadd.f32 %v8354_v31, %v289_v51  ;;  %vm8473_vm7 = vmor %vm321_vm1, %vm322_vm3  ;;  %vm382_vm9 = vweird.f32 %v8364_v41  ;;  %vm326_vm13 = vcmp.eq.f32.partialorder %v325_v58, 8.507059e+37 }
  0xe5   :  { %v318_v15 = vsub.f32 1.0, %v317_v57 }
  0xe6   :  { %v304_v14 = vmul.f32 %v8366_v42, %v303_v54  ;;  %v294_v29 = vsel %vm8407_vm12, %v8354_v31, %v290_v0  ;;  %v371_v0 = vand.u32 2147483647, %v8361_v39 }
  0xe7   :  { %v8380_v56 = vpop.eup %7101  ;;  %v319_v31 = vmul.f32 %v8375_v49, %v318_v15  ;;  %v8428_v47 = vsel %vm8401_vm11, %v298_v25, %v294_v29  ;;  %v388_v15 = vand.u32 2147483648, %v8364_v41  ;;  %vm397_vm11 = vweird.f32 %v8368_v43 }
  0xe8   :  { %v8385_v60 = vpop.eup %7103  ;;  %v363_v13 = vmul.f32 %v8380_v56, %v8361_v39  ;;  %v8419_v33 = vadd.f32 %v8366_v42, %v304_v14  ;;  %vm368_vm5 = vweird.f32 %v8380_v56 }
  0xe9   :  { %v8389_v63 = vpop.eup %7105  ;;  %v378_v18 = vmul.f32 %v8385_v60, %v8364_v41  ;;  %vm383_vm6 = vweird.f32 %v8385_v60  ;;  %vm8485_vm10 = vmor %vm367_vm4, %vm368_vm5 }
  0xea   :  { %v229_v35 = vpop.f32.mrf.mxu0  ;;  %v393_v22 = vmul.f32 %v8389_v63, %v8368_v43  ;;  %v364_v28 = vsub.f32 1.0, %v363_v13  ;;  %v309_v51 = vsel %vm8432_vm15, %v8366_v42, %v8419_v33  ;;  %v320_v42 = vadd.f32 %v8375_v49, %v319_v31  ;;  %vm8497_vm12 = vmor %vm382_vm9, %vm383_vm6 }
  0xeb   :  { %v251_v46 = vadd.f32 %v6458_v40, %v229_v35  ;;  %v379_v37 = vsub.f32 1.0, %v378_v18  ;;  %v6455_v40 = vunpack.c.h.bf16 %v6948_v1  ;;  %vm398_vm8 = vweird.f32 %v8389_v63 }
  0xec   :  { %v365_v19 = vmul.f32 %v8380_v56, %v364_v28  ;;  %vm8512_vm14 = vmor %vm397_vm11, %vm398_vm8  ;;  %vm372_vm15 = vcmp.eq.f32.partialorder %v371_v0, 8.507059e+37 }
  0xed   :  { %v6108_v52 = vmul.f32 -1.442695, %v251_v46  ;;  %v6463_v46 = vunpack.c.h.bf16 %v8378_v53  ;;  %v380_v53 = vmul.f32 %v8385_v60, %v379_v37 }
  0xef   :  { %v381_v13 = vadd.f32 %v8385_v60, %v380_v53 }
  0xf1   :  { %v385_v36 = vsel %vm8497_vm12, %v8385_v60, %v381_v13 }
  0xf2   :  { %v231_v48 = vpop.f32.mrf.mxu0 }
  0xf3   :  { %v252_v50 = vadd.f32 %v6459_v44, %v231_v48  ;;  %v394_v44 = vsub.f32 1.0, %v393_v22  ;;  %v386_v22 = vand.u32 2147483647, %v8364_v41  ;;  %v401_v41 = vand.u32 2147483647, %v8368_v43 }
  0xf5   :  { %v6109_v55 = vmul.f32 -1.442695, %v252_v50  ;;  %v395_v59 = vmul.f32 %v8389_v63, %v394_v44  ;;  %vm387_vm1 = vcmp.eq.f32.partialorder %v386_v22, 8.507059e+37  ;;  %vm402_vm3 = vcmp.eq.f32.partialorder %v401_v41, 8.507059e+37 }
  0xf7   :  { %7107 = vpow2.f32 %v6109_v55  ;;  %v250_v55 = vadd.f32 %v6455_v40, %v8350_v16  ;;  %v366_v16 = vadd.f32 %v8380_v56, %v365_v19  ;;  %v396_v20 = vadd.f32 %v8389_v63, %v395_v59 }
  0xf8   :  { %7109 = vpow2.f32 %v6108_v52  ;;  %v327_v52 = vand.u32 2147483648, %v8357_v32 }
  0xf9   :  { %v370_v25 = vsel %vm8485_vm10, %v8380_v56, %v366_v16  ;;  %v400_v60 = vsel %vm8512_vm14, %v8389_v63, %v396_v20 }
  0xfa   :  { %v234_v21 = vpop.f32.mrf.mxu0  ;;  %v328_v56 = vor.u32 1.1754944e-38, %v327_v52 }
  0xfb   :  { %v253_v27 = vadd.f32 %v6462_v62, %v234_v21  ;;  %v373_v62 = vand.u32 2147483648, %v8361_v39  ;;  %v403_v21 = vand.u32 2147483648, %v8368_v43  ;;  %v324_v39 = vsel %vm8473_vm7, %v8375_v49, %v320_v42 }
  0xfc   :  { %v389_v49 = vor.u32 1.1754944e-38, %v388_v15  ;;  %v314_v43 = vsel %vm8449_vm2, %v8416_v17, %v309_v51  ;;  %v329_v37 = vsel %vm326_vm13, %v328_v56, %v324_v39 }
  0xfd   :  { %v7108_v24 = vpop.eup %7107  ;;  %v6110_v34 = vmul.f32 -1.442695, %v253_v27  ;;  %v374_v29 = vor.u32 1.1754944e-38, %v373_v62 }
  0xfe   :  { %v7110_v35 = vpop.eup %7109  ;;  %v8438_v50 = vadd.f32 1.0, %v7108_v24  ;;  %v390_v31 = vsel %vm387_vm1, %v389_v49, %v385_v36 }
  0xff   :  { %7111 = vpow2.f32 %v6110_v34  ;;  %v8446_v30 = vadd.f32 1.0, %v7110_v35  ;;  %v404_v34 = vor.u32 1.1754944e-38, %v403_v21  ;;  %v375_v35 = vsel %vm372_vm15, %v374_v29, %v370_v25 }
 0x100   :  { %7113 = vtanh.f32 %v248_v38  ;;  %v488_v58 = vmul.f32 0.0, %v375_v35  ;;  %v489_v52 = vmul.f32 0.0, %v390_v31  ;;  %vm447_vm5 = vweird.f32 %v8438_v50 }
 0x101   :  { %7115 = vtanh.f32 %v249_v45  ;;  %v405_v48 = vsel %vm402_vm3, %v404_v34, %v400_v60  ;;  %v451_v22 = vand.u32 2147483647, %v8438_v50  ;;  %vm432_vm10 = vweird.f32 %v8446_v30 }
 0x102   :  { %v236_v57 = vpop.f32.mrf.mxu0  ;;  %7117 = vrcp.f32 %v8438_v50  ;;  %v490_v54 = vmul.f32 0.0, %v405_v48  ;;  %v436_v36 = vand.u32 2147483647, %v8446_v30  ;;  %v438_v56 = vand.u32 2147483648, %v8446_v30 }
 0x103   :  { %v254_v61 = vadd.f32 %v6463_v46, %v236_v57  ;;  %7119 = vrcp.f32 %v8446_v30  ;;  %vm452_vm3 = vcmp.eq.f32.partialorder %v451_v22, 8.507059e+37 }
 0x104   :  { %7121 = vtanh.f32 %v250_v55 }
 0x105   :  { %v7112_v1 = vpop.eup %7111  ;;  %v6111_v11 = vmul.f32 -1.442695, %v254_v61 }
 0x106   :  { %v8466_v14 = vadd.f32 1.0, %v7112_v1  ;;  %v7114_v12 = vpop.eup %7113 }
 0x107   :  { %7123 = vpow2.f32 %v6111_v11  ;;  %v7116_v23 = vpop.eup %7115  ;;  %v492_v40 = vmul.f32 %v7114_v12, %v8428_v47  ;;  %v8605_v12 = vld [vmem:[#allocation5 + $0x60] sm:$0xff]  }
 0x108   :  { %7125 = vrcp.f32 %v8466_v14  ;;  %v8505_v27 = vpop.eup %7117  ;;  %v493_v46 = vmul.f32 %v7116_v23, %v314_v43  ;;  %v468_v13 = vand.u32 2147483648, %v8466_v14  ;;  %vm462_vm7 = vweird.f32 %v8466_v14 }
 0x109   :  { %v8516_v28 = vpop.eup %7119  ;;  %v443_v44 = vmul.f32 %v8505_v27, %v8438_v50  ;;  %v8530_v53 = vadd.f32 %v492_v40, %v488_v58  ;;  %vm448_vm6 = vweird.f32 %v8505_v27  ;;  %v466_v15 = vand.u32 2147483647, %v8466_v14 }
 0x10a   :  { %v7122_v33 = vpop.eup %7121  ;;  %v428_v63 = vmul.f32 %v8516_v28, %v8446_v30  ;;  %v8532_v57 = vadd.f32 %v493_v46, %v489_v52  ;;  %vm433_vm4 = vweird.f32 %v8516_v28  ;;  %v453_v23 = vand.u32 2147483648, %v8438_v50  ;;  %vm8564_vm11 = vmor %vm447_vm5, %vm448_vm6 }
 0x10b   :  { %v494_v19 = vmul.f32 %v7122_v33, %v329_v37  ;;  %v444_v55 = vsub.f32 1.0, %v443_v44  ;;  %v469_v29 = vor.u32 1.1754944e-38, %v468_v13  ;;  %vm467_vm12 = vcmp.eq.f32.partialorder %v466_v15, 8.507059e+37  ;;  %vm8570_vm14 = vmor %vm432_vm10, %vm433_vm4 }
 0x10c   :  { %v429_v59 = vsub.f32 1.0, %v428_v63  ;;  %v454_v34 = vor.u32 1.1754944e-38, %v453_v23  ;;  %v439_v40 = vor.u32 1.1754944e-38, %v438_v56 }
 0x10d   :  { %v7124_v38 = vpop.eup %7123  ;;  %v8534_v61 = vadd.f32 %v494_v19, %v490_v54  ;;  %v445_v62 = vmul.f32 %v8505_v27, %v444_v55  ;;  %v6465_v19 = vld [vmem:[#allocation5 + $0x40] sm:$0xff]  }
 0x10e   :  { %v7126_v45 = vpop.eup %7125  ;;  %v426_v17 = vadd.f32 1.0, %v7124_v38  ;;  %v430_v1 = vmul.f32 %v8516_v28, %v429_v59  ;;  %v6467_v23 = vunpack.c.h.bf16 %v6465_v19 }
 0x10f   :  { %v458_v51 = vmul.f32 %v7126_v45, %v8466_v14  ;;  %vm463_vm2 = vweird.f32 %v7126_v45  ;;  %v446_v20 = vadd.f32 %v8505_v27, %v445_v62 }
 0x110   :  { %7127 = vrcp.f32 %v426_v17  ;;  %vm8548_vm8 = vmor %vm462_vm7, %vm463_vm2  ;;  %v483_v21 = vand.u32 2147483648, %v426_v17  ;;  %v431_v32 = vadd.f32 %v8516_v28, %v430_v1  ;;  %v481_v14 = vand.u32 2147483647, %v426_v17 }
 0x111   :  { %v459_v47 = vsub.f32 1.0, %v458_v51  ;;  %7129 = vtanh.f32 %v8530_v53  ;;  %vm477_vm13 = vweird.f32 %v426_v17  ;;  %v450_v30 = vsel %vm8564_vm11, %v8505_v27, %v446_v20 }
 0x112   :  { %7131 = vtanh.f32 %v8532_v57  ;;  %v484_v50 = vor.u32 1.1754944e-38, %v483_v21  ;;  %vm482_vm1 = vcmp.eq.f32.partialorder %v481_v14, 8.507059e+37  ;;  %v435_v37 = vsel %vm8570_vm14, %v8516_v28, %v431_v32 }
 0x113   :  { %v460_v42 = vmul.f32 %v7126_v45, %v459_v47  ;;  %7133 = vtanh.f32 %v8534_v61  ;;  %v455_v31 = vsel %vm452_vm3, %v454_v34, %v450_v30  ;;  %vm437_vm2 = vcmp.eq.f32.partialorder %v436_v36, 8.507059e+37 }
 0x114   :  { %7135 = vtanh.f32 %v8340_v10  ;;  %v440_v27 = vsel %vm437_vm2, %v439_v40, %v435_v37  ;;  %v6482_v32 = vunpack.c.l.bf16 %v8605_v12 }
 0x115   :  { %v461_v16 = vadd.f32 %v7126_v45, %v460_v42 }
 0x116   :  { %v7128_v0 = vpop.eup %7127 }
 0x117   :  { %v473_v11 = vmul.f32 %v7128_v0, %v426_v17  ;;  %v7130_v25 = vpop.eup %7129  ;;  %v465_v26 = vsel %vm8548_vm8, %v7126_v45, %v461_v16  ;;  %vm478_vm9 = vweird.f32 %v7128_v0 }
 0x118   :  { %v7132_v41 = vpop.eup %7131  ;;  %v470_v33 = vsel %vm467_vm12, %v469_v29, %v465_v26  ;;  %vm479_vm15 = vmor %vm477_vm13, %vm478_vm9  ;;  %v504_v17 = vmul.f32 %v7130_v25, %v455_v31 }
 0x119   :  { %v474_v18 = vsub.f32 1.0, %v473_v11  ;;  %v7134_v49 = vpop.eup %7133  ;;  %v505_v44 = vmul.f32 %v7132_v41, %v470_v33  ;;  %v6951_v41 = vld [vmem:[#allocation5 + $0x48] sm:$0xff]  }
 0x11a   :  { %v7136_v48 = vpop.eup %7135  ;;  %v6470_v60 = vunpack.c.l.bf16 %v6951_v41 }
 0x11b   :  { %v475_v39 = vmul.f32 %v7128_v0, %v474_v18  ;;  %v503_v63 = vmul.f32 %v7136_v48, %v440_v27 }
 0x11d   :  { %v476_v43 = vadd.f32 %v7128_v0, %v475_v39  ;;  %v540_v58 = vpack.c.bf16 %v504_v17, %v503_v63 }
 0x11f   :  { %v480_v35 = vsel %vm479_vm15, %v7128_v0, %v476_v43 }
 0x120   :  { %v485_v38 = vsel %vm482_vm1, %v484_v50, %v480_v35 }
 0x121   :  { %v506_v45 = vmul.f32 %v7134_v49, %v485_v38 }
 0x123   :  { %v541_v46 = vpack.c.bf16 %v506_v45, %v505_v44  ;;  %v6471_v44 = vunpack.c.h.bf16 %v6951_v41 }
 0x125   :  { %548 = vmatpush.bf16.msra.mxu1 %v541_v46  ;;  %v6953_v46 = vld [vmem:[#allocation5 + $0x58] sm:$0xff]  }
 0x129   :  { %549 = vmatpush.bf16.msra.mxu1 %v540_v58 }
 0x12c   :  { %6112 = vmatmul.msk.bf16.vlgmr.msra.gmra.mxu1 %vm165_vm0, %v8275_v2 }
 0x13c   :  { %6113 = vmatmul.msk.bf16.gmra.mxu1 %vm165_vm0, %v8282_v3 }
 0x14c   :  { %6114 = vmatmul.msk.bf16.gmra.mxu1 %vm165_vm0, %v8289_v4  ;;  %v6466_v4 = vunpack.c.l.bf16 %v6465_v19 }
 0x15c   :  { %6115 = vmatmul.msk.bf16.gmra.mxu1 %vm165_vm0, %v8296_v5  ;;  %v8600_v5 = vld [vmem:[#allocation5 + $0x50] sm:$0xff]  }
 0x15d   :  { %v6474_v47 = vunpack.c.l.bf16 %v8600_v5  ;;  %v6475_v63 = vunpack.c.h.bf16 %v8600_v5 }
 0x16c   :  { %6116 = vmatmul.msk.bf16.gmra.mxu1 %vm165_vm0, %v8303_v6 }
 0x17c   :  { %6117 = vmatmul.msk.bf16.gmra.mxu1 %vm165_vm0, %v8310_v7 }
 0x18c   :  { %6118 = vmatmul.msk.bf16.gmra.mxu1 %vm165_vm0, %v8317_v8 }
 0x19c   :  { %6119 = vmatmul.msk.bf16.gmra.mxu1 %vm165_vm0, %v8324_v9 }
 0x1a9   :  { %v551_v2 = vpop.f32.mrf.mxu1 }
 0x1aa   :  { %v591_v51 = vadd.f32 %v6466_v4, %v551_v2  ;;  %v6478_v2 = vunpack.c.l.bf16 %v6953_v46 }
 0x1ac   :  { %v6120_v6 = vmul.f32 -1.442695, %v591_v51 }
 0x1ae   :  { %7137 = vpow2.f32 %v6120_v6 }
 0x1b1   :  { %v553_v3 = vpop.f32.mrf.mxu1 }
 0x1b2   :  { %v592_v56 = vadd.f32 %v6467_v23, %v553_v3  ;;  %v6479_v3 = vunpack.c.h.bf16 %v6953_v46 }
 0x1b4   :  { %v7138_v55 = vpop.eup %7137  ;;  %v6121_v50 = vmul.f32 -1.442695, %v592_v56  ;;  %v8649_v56 = vld [vmem:[#allocation5 + $0x78] sm:$0xff]  }
 0x1b5   :  { %v619_v59 = vadd.f32 1.0, %v7138_v55 }
 0x1b7   :  { %v634_v24 = vand.u32 2147483648, %v619_v59  ;;  %vm628_vm8 = vweird.f32 %v619_v59  ;;  %v632_v49 = vand.u32 2147483647, %v619_v59 }
 0x1b9   :  { %v556_v28 = vpop.f32.mrf.mxu1  ;;  %v635_v34 = vor.u32 1.1754944e-38, %v634_v24  ;;  %vm633_vm11 = vcmp.eq.f32.partialorder %v632_v49, 8.507059e+37 }
 0x1ba   :  { %v593_v40 = vadd.f32 %v6470_v60, %v556_v28 }
 0x1bc   :  { %v6122_v48 = vmul.f32 -1.442695, %v593_v40  ;;  %v6955_v40 = vld [vmem:[#allocation5 + $0x68] sm:$0xff]  }
 0x1c1   :  { %v8598_v52 = vpop.f32.mrf.mxu1 }
 0x1c2   :  { %v594_v58 = vadd.f32 %v6471_v44, %v8598_v52 }
 0x1c4   :  { %v6123_v51 = vmul.f32 -1.442695, %v594_v58 }
 0x1c9   :  { %v561_v7 = vpop.f32.mrf.mxu1 }
 0x1ca   :  { %v595_v54 = vadd.f32 %v6474_v47, %v561_v7 }
 0x1cc   :  { %v6124_v8 = vmul.f32 -1.442695, %v595_v54 }
 0x1ce   :  { %7139 = vpow2.f32 %v6124_v8 }
 0x1cf   :  { %7141 = vrcp.f32 %v619_v59 }
 0x1d1   :  { %v8603_v9 = vpop.f32.mrf.mxu1 }
 0x1d2   :  { %v596_v28 = vadd.f32 %v6475_v63, %v8603_v9 }
 0x1d4   :  { %v7140_v42 = vpop.eup %7139  ;;  %v6125_v7 = vmul.f32 -1.442695, %v596_v28  ;;  %v6486_v28 = vunpack.c.l.bf16 %v6955_v40 }
 0x1d5   :  { %v695_v62 = vadd.f32 1.0, %v7140_v42  ;;  %v7142_v1 = vpop.eup %7141 }
 0x1d6   :  { %v624_v13 = vmul.f32 %v7142_v1, %v619_v59  ;;  %vm629_vm6 = vweird.f32 %v7142_v1 }
 0x1d7   :  { %7143 = vrcp.f32 %v695_v62  ;;  %v710_v39 = vand.u32 2147483648, %v695_v62  ;;  %vm704_vm5 = vweird.f32 %v695_v62  ;;  %v708_v36 = vand.u32 2147483647, %v695_v62  ;;  %vm630_vm9 = vmor %vm628_vm8, %vm629_vm6 }
 0x1d8   :  { %v625_v20 = vsub.f32 1.0, %v624_v13 }
 0x1d9   :  { %v566_v0 = vpop.f32.mrf.mxu1  ;;  %v711_v30 = vor.u32 1.1754944e-38, %v710_v39  ;;  %vm709_vm10 = vcmp.eq.f32.partialorder %v708_v36, 8.507059e+37 }
 0x1da   :  { %v626_v22 = vmul.f32 %v7142_v1, %v625_v20 }
 0x1dc   :  { %v627_v29 = vadd.f32 %v7142_v1, %v626_v22 }
 0x1dd   :  { %v7144_v16 = vpop.eup %7143 }
 0x1de   :  { %v700_v11 = vmul.f32 %v7144_v16, %v695_v62  ;;  %vm705_vm4 = vweird.f32 %v7144_v16  ;;  %v631_v33 = vsel %vm630_vm9, %v7142_v1, %v627_v29 }
 0x1df   :  { %vm706_vm7 = vmor %vm704_vm5, %vm705_vm4  ;;  %v636_v31 = vsel %vm633_vm11, %v635_v34, %v631_v33  ;;  %v6494_v34 = vunpack.c.l.bf16 %v8649_v56 }
 0x1e0   :  { %v701_v15 = vsub.f32 1.0, %v700_v11 }
 0x1e1   :  { %v568_v18 = vpop.f32.mrf.mxu1 }
 0x1e2   :  { %v702_v21 = vmul.f32 %v7144_v16, %v701_v15  ;;  %v598_v6 = vadd.f32 %v6479_v3, %v568_v18 }
 0x1e4   :  { %v703_v26 = vadd.f32 %v7144_v16, %v702_v21  ;;  %v6127_v5 = vmul.f32 -1.442695, %v598_v6 }
 0x1e6   :  { %v707_v43 = vsel %vm706_vm7, %v7144_v16, %v703_v26 }
 0x1e7   :  { %v712_v35 = vsel %vm709_vm10, %v711_v30, %v707_v43 }
 0x1e8   :  { %v839_v45 = vmul.f32 %v712_v35, %v8340_v10  ;;  %v597_v10 = vadd.f32 %v6478_v2, %v566_v0  ;;  %v6956_v0 = vld [vmem:[#allocation5 + $0x70] sm:$0xff]  }
 0x1e9   :  { %v571_v25 = vpop.f32.mrf.mxu1  ;;  %v6490_v18 = vunpack.c.l.bf16 %v6956_v0  ;;  %v6491_v22 = vunpack.c.h.bf16 %v6956_v0  ;;  %v6487_v0 = vunpack.c.h.bf16 %v6955_v40 }
 0x1ea   :  { %v599_v14 = vadd.f32 %v6482_v32, %v571_v25  ;;  %v6126_v54 = vmul.f32 -1.442695, %v597_v10 }
 0x1ec   :  { %7145 = vtanh.f32 %v599_v14 }
 0x1ed   :  { %7147 = vpow2.f32 %v6121_v50 }
 0x1ee   :  { %7149 = vpow2.f32 %v6122_v48  ;;  %v6483_v48 = vunpack.c.h.bf16 %v8605_v12 }
 0x1ef   :  { %7151 = vpow2.f32 %v6123_v51 }
 0x1f1   :  { %v8608_v37 = vpop.f32.mrf.mxu1 }
 0x1f2   :  { %v7146_v38 = vpop.eup %7145 }
 0x1f3   :  { %v843_v27 = vmul.f32 %v7146_v38, %v636_v31  ;;  %v7148_v4 = vpop.eup %7147 }
 0x1f4   :  { %v8618_v47 = vadd.f32 1.0, %v7148_v4  ;;  %v7150_v8 = vpop.eup %7149 }
 0x1f5   :  { %v8611_v17 = vadd.f32 %v843_v27, %v839_v45  ;;  %v8623_v55 = vadd.f32 1.0, %v7150_v8  ;;  %v7152_v9 = vpop.eup %7151 }
 0x1f6   :  { %7153 = vrcp.f32 %v8618_v47  ;;  %v8628_v62 = vadd.f32 1.0, %v7152_v9  ;;  %v647_v30 = vand.u32 2147483647, %v8618_v47  ;;  %v649_v50 = vand.u32 2147483648, %v8618_v47 }
 0x1f7   :  { %7155 = vpow2.f32 %v6125_v7  ;;  %v664_v31 = vand.u32 2147483648, %v8623_v55  ;;  %vm643_vm13 = vweird.f32 %v8618_v47  ;;  %vm658_vm1 = vweird.f32 %v8623_v55 }
 0x1f8   :  { %7157 = vpow2.f32 %v6126_v54  ;;  %vm8672_vm14 = vcmp.eq.f32.partialorder %v647_v30, 8.507059e+37  ;;  %v650_v4 = vor.u32 1.1754944e-38, %v649_v50  ;;  %v662_v12 = vand.u32 2147483647, %v8623_v55 }
 0x1f9   :  { %v8615_v19 = vpop.f32.mrf.mxu1  ;;  %7159 = vpow2.f32 %v6127_v5  ;;  %v8687_v6 = vor.u32 1.1754944e-38, %v664_v31  ;;  %vm673_vm4 = vweird.f32 %v8628_v62 }
 0x1fa   :  { %7161 = vrcp.f32 %v8623_v55  ;;  %vm8720_vm5 = vcmp.eq.f32.partialorder %v662_v12, 8.507059e+37 }
 0x1fb   :  { %7163 = vrcp.f32 %v8628_v62 }
 0x1fc   :  { %v8625_v59 = vpop.eup %7153 }
 0x1fd   :  { %v7156_v42 = vpop.eup %7155  ;;  %v639_v13 = vmul.f32 %v8625_v59, %v8618_v47  ;;  %vm644_vm12 = vweird.f32 %v8625_v59 }
 0x1fe   :  { %v7158_v1 = vpop.eup %7157  ;;  %v8632_v15 = vadd.f32 1.0, %v7156_v42  ;;  %vm8678_vm15 = vmor %vm643_vm13, %vm644_vm12  ;;  %v600_v42 = vadd.f32 %v6483_v48, %v8608_v37  ;;  %v677_v37 = vand.u32 2147483647, %v8628_v62 }
 0x1ff   :  { %v7160_v11 = vpop.eup %7159  ;;  %v8635_v20 = vadd.f32 1.0, %v7158_v1  ;;  %v640_v23 = vsub.f32 1.0, %v639_v13 }
 0x200   :  { %v8637_v21 = vpop.eup %7161  ;;  %v8639_v32 = vadd.f32 1.0, %v7160_v11  ;;  %7165 = vrcp.f32 %v8632_v15  ;;  %v6495_v11 = vunpack.c.h.bf16 %v8649_v56  ;;  %vm719_vm7 = vweird.f32 %v8632_v15 }
 0x201   :  { %v8621_v52 = vpop.f32.mrf.mxu1  ;;  %v654_v26 = vmul.f32 %v8637_v21, %v8623_v55  ;;  %7167 = vrcp.f32 %v8635_v20  ;;  %v8646_v14 = vpop.eup %7163  ;;  %v641_v29 = vmul.f32 %v8625_v59, %v640_v23  ;;  %vm659_vm3 = vweird.f32 %v8637_v21 }
 0x202   :  { %7169 = vrcp.f32 %v8639_v32  ;;  %v669_v60 = vmul.f32 %v8646_v14, %v8628_v62  ;;  %vm8703_vm2 = vmor %vm658_vm1, %vm659_vm3  ;;  %vm674_vm6 = vweird.f32 %v8646_v14  ;;  %vm734_vm13 = vweird.f32 %v8635_v20 }
 0x203   :  { %v655_v24 = vsub.f32 1.0, %v654_v26  ;;  %v642_v38 = vadd.f32 %v8625_v59, %v641_v29  ;;  %vm8745_vm11 = vmor %vm673_vm4, %vm674_vm6  ;;  %vm678_vm3 = vcmp.eq.f32.partialorder %v677_v37, 8.507059e+37 }
 0x204   :  { %v670_v27 = vsub.f32 1.0, %v669_v60 }
 0x205   :  { %v656_v45 = vmul.f32 %v8637_v21, %v655_v24  ;;  %v646_v10 = vsel %vm8678_vm15, %v8625_v59, %v642_v38  ;;  %v725_v24 = vand.u32 2147483648, %v8632_v15  ;;  %v740_v38 = vand.u32 2147483648, %v8635_v20 }
 0x206   :  { %v8651_v43 = vpop.eup %7165  ;;  %v671_v59 = vmul.f32 %v8646_v14, %v670_v27  ;;  %v8699_v13 = vsel %vm8672_vm14, %v650_v4, %v646_v10  ;;  %v755_v27 = vand.u32 2147483648, %v8639_v32  ;;  %vm749_vm15 = vweird.f32 %v8639_v32 }
 0x207   :  { %v8656_v33 = vpop.eup %7167  ;;  %v715_v44 = vmul.f32 %v8651_v43, %v8632_v15  ;;  %v8690_v54 = vadd.f32 %v8637_v21, %v656_v45  ;;  %vm720_vm8 = vweird.f32 %v8651_v43 }
 0x208   :  { %v8660_v35 = vpop.eup %7169  ;;  %v730_v46 = vmul.f32 %v8656_v33, %v8635_v20  ;;  %vm735_vm9 = vweird.f32 %v8656_v33  ;;  %vm8752_vm12 = vmor %vm719_vm7, %vm720_vm8  ;;  %v756_v12 = vor.u32 1.1754944e-38, %v755_v27 }
 0x209   :  { %v581_v16 = vpop.f32.mrf.mxu1  ;;  %v745_v2 = vmul.f32 %v8660_v35, %v8639_v32  ;;  %v716_v7 = vsub.f32 1.0, %v715_v44  ;;  %v661_v23 = vsel %vm8703_vm2, %v8637_v21, %v8690_v54  ;;  %v672_v21 = vadd.f32 %v8646_v14, %v671_v59  ;;  %vm8762_vm14 = vmor %vm734_vm13, %vm735_vm9 }
 0x20a   :  { %v603_v25 = vadd.f32 %v6490_v18, %v581_v16  ;;  %v731_v9 = vsub.f32 1.0, %v730_v46  ;;  %v601_v16 = vadd.f32 %v6486_v28, %v8615_v19  ;;  %vm750_vm10 = vweird.f32 %v8660_v35 }
 0x20b   :  { %v746_v1 = vsub.f32 1.0, %v745_v2  ;;  %v717_v19 = vmul.f32 %v8651_v43, %v716_v7  ;;  %v676_v63 = vsel %vm8745_vm11, %v8646_v14, %v672_v21  ;;  %v726_v2 = vor.u32 1.1754944e-38, %v725_v24  ;;  %vm8778_vm1 = vmor %vm749_vm15, %vm750_vm10 }
 0x20c   :  { %v6128_v36 = vmul.f32 -1.442695, %v603_v25  ;;  %v679_v25 = vand.u32 2147483648, %v8628_v62  ;;  %v732_v26 = vmul.f32 %v8656_v33, %v731_v9  ;;  %v738_v62 = vand.u32 2147483647, %v8635_v20 }
 0x20d   :  { %v753_v20 = vand.u32 2147483647, %v8639_v32  ;;  %v741_v14 = vor.u32 1.1754944e-38, %v740_v38  ;;  %v666_v32 = vsel %vm8720_vm5, %v8687_v6, %v661_v23 }
 0x20e   :  { %v733_v50 = vadd.f32 %v8656_v33, %v732_v26  ;;  %vm739_vm4 = vcmp.eq.f32.partialorder %v738_v62, 8.507059e+37 }
 0x20f   :  { %vm754_vm6 = vcmp.eq.f32.partialorder %v753_v20, 8.507059e+37 }
 0x210   :  { %v737_v4 = vsel %vm8762_vm14, %v8656_v33, %v733_v50 }
 0x211   :  { %v583_v39 = vpop.f32.mrf.mxu1 }
 0x212   :  { %v604_v41 = vadd.f32 %v6491_v22, %v583_v39 }
 0x214   :  { %v6129_v49 = vmul.f32 -1.442695, %v604_v41  ;;  %v602_v41 = vadd.f32 %v6487_v0, %v8621_v52  ;;  %v718_v52 = vadd.f32 %v8651_v43, %v717_v19 }
 0x216   :  { %7171 = vpow2.f32 %v6129_v49  ;;  %v723_v49 = vand.u32 2147483647, %v8632_v15  ;;  %v722_v15 = vsel %vm8752_vm12, %v8651_v43, %v718_v52  ;;  %v680_v43 = vor.u32 1.1754944e-38, %v679_v25 }
 0x217   :  { %7173 = vpow2.f32 %v6128_v36  ;;  %v747_v36 = vmul.f32 %v8660_v35, %v746_v1 }
 0x218   :  { %vm724_vm2 = vcmp.eq.f32.partialorder %v723_v49, 8.507059e+37  ;;  %v681_v7 = vsel %vm678_vm3, %v680_v43, %v676_v63 }
 0x219   :  { %v586_v58 = vpop.f32.mrf.mxu1  ;;  %v748_v31 = vadd.f32 %v8660_v35, %v747_v36 }
 0x21a   :  { %v605_v51 = vadd.f32 %v6494_v34, %v586_v58 }
 0x21c   :  { %v7172_v47 = vpop.eup %7171  ;;  %v6130_v8 = vmul.f32 -1.442695, %v605_v51  ;;  %v752_v51 = vsel %vm8778_vm1, %v8660_v35, %v748_v31 }
 0x21d   :  { %v7174_v5 = vpop.eup %7173  ;;  %v8709_v22 = vadd.f32 1.0, %v7172_v47  ;;  %v727_v47 = vsel %vm724_vm2, %v726_v2, %v722_v15  ;;  %v757_v0 = vsel %vm754_vm6, %v756_v12, %v752_v51 }
 0x21e   :  { %7175 = vpow2.f32 %v6130_v8  ;;  %v8717_v55 = vadd.f32 1.0, %v7174_v5  ;;  %v742_v8 = vsel %vm739_vm4, %v741_v14, %v737_v4  ;;  %v840_v59 = vmul.f32 %v727_v47, %v8530_v53 }
 0x21f   :  { %7177 = vtanh.f32 %v600_v42  ;;  %v842_v37 = vmul.f32 %v757_v0, %v8534_v61  ;;  %vm799_vm8 = vweird.f32 %v8709_v22  ;;  %v805_v50 = vand.u32 2147483648, %v8709_v22  ;;  %v8899_v0 = vld [vmem:[%s12916_s2 + $0x30] sm:$0xff] }
 0x220   :  { %7179 = vtanh.f32 %v601_v16  ;;  %vm784_vm13 = vweird.f32 %v8717_v55  ;;  %v788_v27 = vand.u32 2147483647, %v8717_v55  ;;  %v790_v62 = vand.u32 2147483648, %v8717_v55 }
 0x221   :  { %v588_v29 = vpop.f32.mrf.mxu1  ;;  %7181 = vrcp.f32 %v8709_v22  ;;  %v806_v2 = vor.u32 1.1754944e-38, %v805_v50 }
 0x222   :  { %v606_v56 = vadd.f32 %v6495_v11, %v588_v29  ;;  %7183 = vrcp.f32 %v8717_v55  ;;  %v841_v11 = vmul.f32 %v742_v8, %v8532_v57  ;;  %v791_v14 = vor.u32 1.1754944e-38, %v790_v62  ;;  %v8857_v8 = vld [vmem:[%s12916_s2] sm:$0xff] }
 0x223   :  { %7185 = vtanh.f32 %v602_v41 }
 0x224   :  { %v7176_v60 = vpop.eup %7175  ;;  %v6131_v30 = vmul.f32 -1.442695, %v606_v56 }
 0x225   :  { %v8737_v34 = vadd.f32 1.0, %v7176_v60  ;;  %v7178_v44 = vpop.eup %7177 }
 0x226   :  { %7187 = vpow2.f32 %v6131_v30  ;;  %v7180_v46 = vpop.eup %7179  ;;  %v844_v54 = vmul.f32 %v7178_v44, %v8699_v13  ;;  %v803_v30 = vand.u32 2147483647, %v8709_v22 }
 0x227   :  { %7189 = vrcp.f32 %v8737_v34  ;;  %v8774_v58 = vpop.eup %7181  ;;  %v845_v42 = vmul.f32 %v7180_v46, %v666_v32  ;;  %v820_v61 = vand.u32 2147483648, %v8737_v34  ;;  %vm814_vm10 = vweird.f32 %v8737_v34 }
 0x228   :  { %v8785_v28 = vpop.eup %7183  ;;  %v795_v5 = vmul.f32 %v8774_v58, %v8709_v22  ;;  %v8801_v13 = vadd.f32 %v844_v54, %v840_v59  ;;  %vm800_vm9 = vweird.f32 %v8774_v58  ;;  %v818_v21 = vand.u32 2147483647, %v8737_v34 }
 0x229   :  { %v7186_v10 = vpop.eup %7185  ;;  %v780_v35 = vmul.f32 %v8785_v28, %v8717_v55  ;;  %v8804_v23 = vadd.f32 %v845_v42, %v841_v11  ;;  %vm785_vm7 = vweird.f32 %v8785_v28  ;;  %v821_v45 = vor.u32 1.1754944e-38, %v820_v61  ;;  %vm8836_vm14 = vmor %vm799_vm8, %vm800_vm9  ;;  %v8885_v42 = vld [vmem:[%s12916_s2 + $0x20] sm:$0xff] }
 0x22a   :  { %v846_v1 = vmul.f32 %v7186_v10, %v681_v7  ;;  %v796_v19 = vsub.f32 1.0, %v795_v5  ;;  %vm819_vm15 = vcmp.eq.f32.partialorder %v818_v21, 8.507059e+37  ;;  %vm8842_vm3 = vmor %vm784_vm13, %vm785_vm7  ;;  %vm804_vm6 = vcmp.eq.f32.partialorder %v803_v30, 8.507059e+37  ;;  %v8871_v5 = vld [vmem:[%s12916_s2 + $0x10] sm:$0xff]  ;;  %v6497_v11 = vld [vmem:[#allocation5 + $0x80] sm:$0xff]  }
 0x22b   :  { %v781_v25 = vsub.f32 1.0, %v780_v35  ;;  %v8906_v35 = vld [vmem:[%s12916_s2 + $0x38] sm:$0xff]  ;;  %v6499_v62 = vunpack.c.h.bf16 %v6497_v11 }
 0x22c   :  { %v7188_v33 = vpop.eup %7187  ;;  %v8806_v39 = vadd.f32 %v846_v1, %v842_v37  ;;  %v797_v53 = vmul.f32 %v8774_v58, %v796_v19 }
 0x22d   :  { %v7190_v9 = vpop.eup %7189  ;;  %v778_v6 = vadd.f32 1.0, %v7188_v33  ;;  %v782_v57 = vmul.f32 %v8785_v28, %v781_v25  ;;  %v8912_v25 = vld [vmem:[#allocation5 + $0x90] sm:$0xff]  }
 0x22e   :  { %v810_v16 = vmul.f32 %v7190_v9, %v8737_v34  ;;  %vm815_vm5 = vweird.f32 %v7190_v9  ;;  %v798_v24 = vadd.f32 %v8774_v58, %v797_v53  ;;  %v6506_v53 = vunpack.c.l.bf16 %v8912_v25 }
 0x22f   :  { %7191 = vrcp.f32 %v778_v6  ;;  %vm8820_vm11 = vmor %vm814_vm10, %vm815_vm5  ;;  %v835_v60 = vand.u32 2147483648, %v778_v6  ;;  %v783_v52 = vadd.f32 %v8785_v28, %v782_v57  ;;  %v833_v34 = vand.u32 2147483647, %v778_v6 }
 0x230   :  { %v811_v18 = vsub.f32 1.0, %v810_v16  ;;  %7193 = vtanh.f32 %v8801_v13  ;;  %vm829_vm1 = vweird.f32 %v778_v6  ;;  %v802_v55 = vsel %vm8836_vm14, %v8774_v58, %v798_v24 }
 0x231   :  { %7195 = vtanh.f32 %v8804_v23  ;;  %v836_v22 = vor.u32 1.1754944e-38, %v835_v60  ;;  %vm834_vm4 = vcmp.eq.f32.partialorder %v833_v34, 8.507059e+37  ;;  %v787_v4 = vsel %vm8842_vm3, %v8785_v28, %v783_v52  ;;  %v8864_v28 = vld [vmem:[%s12916_s2 + $0x8] sm:$0xff] }
 0x232   :  { %v812_v26 = vmul.f32 %v7190_v9, %v811_v18  ;;  %7197 = vtanh.f32 %v8806_v39  ;;  %v807_v32 = vsel %vm804_vm6, %v806_v2, %v802_v55  ;;  %vm789_vm5 = vcmp.eq.f32.partialorder %v788_v27, 8.507059e+37  ;;  %v8917_v34 = vld [vmem:[#allocation5 + $0xa0] sm:$0xff]   ;;  %v6958_v55 = vld [vmem:[#allocation5 + $0x88] sm:$0xff]  }
 0x233   :  { %7199 = vtanh.f32 %v8611_v17  ;;  %v792_v58 = vsel %vm789_vm5, %v791_v14, %v787_v4  ;;  %v6498_v18 = vunpack.c.l.bf16 %v6497_v11  ;;  %v6502_v14 = vunpack.c.l.bf16 %v6958_v55 }
 0x234   :  { %v813_v29 = vadd.f32 %v7190_v9, %v812_v26 }
 0x235   :  { %v7192_v41 = vpop.eup %7191 }
 0x236   :  { %v825_v36 = vmul.f32 %v7192_v41, %v778_v6  ;;  %v7194_v38 = vpop.eup %7193  ;;  %v817_v40 = vsel %vm8820_vm11, %v7190_v9, %v813_v29  ;;  %vm830_vm12 = vweird.f32 %v7192_v41  ;;  %v8878_v9 = vld [vmem:[%s12916_s2 + $0x18] sm:$0xff]  ;;  %v8892_v6 = vld [vmem:[%s12916_s2 + $0x28] sm:$0xff] }
 0x237   :  { %v7196_v44 = vpop.eup %7195  ;;  %v822_v20 = vsel %vm819_vm15, %v821_v45, %v817_v40  ;;  %vm831_vm2 = vmor %vm829_vm1, %vm830_vm12  ;;  %v856_v47 = vmul.f32 %v7194_v38, %v807_v32  ;;  %v6514_v45 = vunpack.c.l.bf16 %v8917_v34 }
 0x238   :  { %v826_v56 = vsub.f32 1.0, %v825_v36  ;;  %v7198_v48 = vpop.eup %7197  ;;  %v857_v51 = vmul.f32 %v7196_v44, %v822_v20 }
 0x239   :  { %v7200_v7 = vpop.eup %7199 }
 0x23a   :  { %v827_v31 = vmul.f32 %v7192_v41, %v826_v56  ;;  %v855_v33 = vmul.f32 %v7200_v7, %v792_v58 }
 0x23c   :  { %v828_v15 = vadd.f32 %v7192_v41, %v827_v31  ;;  %v892_v54 = vpack.c.bf16 %v856_v47, %v855_v33 }
 0x23e   :  { %v832_v3 = vsel %vm831_vm2, %v7192_v41, %v828_v15 }
 0x23f   :  { %v837_v43 = vsel %vm834_vm4, %v836_v22, %v832_v3 }
 0x240   :  { %v858_v10 = vmul.f32 %v7198_v48, %v837_v43 }
 0x242   :  { %v893_v12 = vpack.c.bf16 %v858_v10, %v857_v51 }
 0x244   :  { %900 = vmatpush.bf16.msra.mxu2 %v893_v12 }
 0x248   :  { %901 = vmatpush.bf16.msra.mxu2 %v892_v54 }
 0x24b   :  { %6132 = vmatmul.msk.bf16.vlgmr.msra.gmra.mxu2 %vm165_vm0, %v8857_v8 }
 0x25b   :  { %6133 = vmatmul.msk.bf16.gmra.mxu2 %vm165_vm0, %v8864_v28 }
 0x26b   :  { %6134 = vmatmul.msk.bf16.gmra.mxu2 %vm165_vm0, %v8871_v5 }
 0x27b   :  { %6135 = vmatmul.msk.bf16.gmra.mxu2 %vm165_vm0, %v8878_v9 }
 0x28b   :  { %6136 = vmatmul.msk.bf16.gmra.mxu2 %vm165_vm0, %v8885_v42 }
 0x29b   :  { %6137 = vmatmul.msk.bf16.gmra.mxu2 %vm165_vm0, %v8892_v6 }
 0x2ab   :  { %6138 = vmatmul.msk.bf16.gmra.mxu2 %vm165_vm0, %v8899_v0 }
 0x2bb   :  { %6139 = vmatmul.msk.bf16.gmra.mxu2 %vm165_vm0, %v8906_v35 }
 0x2ce   :  { %v903_v59 = vpop.f32.mrf.mxu2 }
 0x2cf   :  { %v943_v37 = vadd.f32 %v6498_v18, %v903_v59  ;;  %v6503_v59 = vunpack.c.h.bf16 %v6958_v55  ;;  %v6960_v18 = vld [vmem:[#allocation5 + $0x98] sm:$0xff]  }
 0x2d1   :  { %v6140_v26 = vmul.f32 -1.442695, %v943_v37 }
 0x2d3   :  { %7201 = vpow2.f32 %v6140_v26 }
 0x2d6   :  { %v905_v1 = vpop.f32.mrf.mxu2 }
 0x2d7   :  { %v944_v2 = vadd.f32 %v6499_v62, %v905_v1 }
 0x2d9   :  { %v7202_v36 = vpop.eup %7201  ;;  %v6141_v10 = vmul.f32 -1.442695, %v944_v2 }
 0x2da   :  { %v971_v21 = vadd.f32 1.0, %v7202_v36 }
 0x2dc   :  { %v986_v3 = vand.u32 2147483648, %v971_v21  ;;  %vm980_vm11 = vweird.f32 %v971_v21  ;;  %v984_v4 = vand.u32 2147483647, %v971_v21 }
 0x2de   :  { %v908_v16 = vpop.f32.mrf.mxu2  ;;  %v987_v58 = vor.u32 1.1754944e-38, %v986_v3  ;;  %vm985_vm14 = vcmp.eq.f32.partialorder %v984_v4, 8.507059e+37 }
 0x2df   :  { %v945_v33 = vadd.f32 %v6502_v14, %v908_v16 }
 0x2e1   :  { %v6142_v26 = vmul.f32 -1.442695, %v945_v33 }
 0x2e6   :  { %v8910_v19 = vpop.f32.mrf.mxu2 }
 0x2ee   :  { %v913_v41 = vpop.f32.mrf.mxu2 }
 0x2ef   :  { %v947_v57 = vadd.f32 %v6506_v53, %v913_v41  ;;  %v6507_v53 = vunpack.c.h.bf16 %v8912_v25  ;;  %v946_v41 = vadd.f32 %v6503_v59, %v8910_v19 }
 0x2f1   :  { %v6144_v29 = vmul.f32 -1.442695, %v947_v57  ;;  %v6510_v57 = vunpack.c.l.bf16 %v6960_v18 }
 0x2f3   :  { %7203 = vpow2.f32 %v6144_v29  ;;  %v6511_v29 = vunpack.c.h.bf16 %v6960_v18 }
 0x2f4   :  { %7205 = vrcp.f32 %v971_v21 }
 0x2f6   :  { %v8915_v61 = vpop.f32.mrf.mxu2 }
 0x2f7   :  { %v948_v16 = vadd.f32 %v6507_v53, %v8915_v61 }
 0x2f9   :  { %v7204_v56 = vpop.eup %7203 }
 0x2fa   :  { %v1047_v24 = vadd.f32 1.0, %v7204_v56  ;;  %v7206_v60 = vpop.eup %7205  ;;  %v6143_v56 = vmul.f32 -1.442695, %v946_v41  ;;  %v6962_v41 = vld [vmem:[#allocation5 + $0xa8] sm:$0xff]  }
 0x2fb   :  { %v976_v50 = vmul.f32 %v7206_v60, %v971_v21  ;;  %vm981_vm9 = vweird.f32 %v7206_v60 }
 0x2fc   :  { %7207 = vrcp.f32 %v1047_v24  ;;  %v1062_v15 = vand.u32 2147483648, %v1047_v24  ;;  %vm1056_vm8 = vweird.f32 %v1047_v24  ;;  %v1060_v22 = vand.u32 2147483647, %v1047_v24  ;;  %vm982_vm12 = vmor %vm980_vm11, %vm981_vm9 }
 0x2fd   :  { %v977_v31 = vsub.f32 1.0, %v976_v50 }
 0x2fe   :  { %v918_v49 = vpop.f32.mrf.mxu2  ;;  %v1063_v32 = vor.u32 1.1754944e-38, %v1062_v15  ;;  %vm1061_vm13 = vcmp.eq.f32.partialorder %v1060_v22, 8.507059e+37 }
 0x2ff   :  { %v978_v27 = vmul.f32 %v7206_v60, %v977_v31 }
 0x301   :  { %v979_v20 = vadd.f32 %v7206_v60, %v978_v27 }
 0x302   :  { %v7208_v52 = vpop.eup %7207 }
 0x303   :  { %v1052_v30 = vmul.f32 %v7208_v52, %v1047_v24  ;;  %vm1057_vm7 = vweird.f32 %v7208_v52  ;;  %v983_v51 = vsel %vm982_vm12, %v7206_v60, %v979_v20 }
 0x304   :  { %vm1058_vm10 = vmor %vm1056_vm8, %vm1057_vm7  ;;  %v988_v54 = vsel %vm985_vm14, %v987_v58, %v983_v51  ;;  %v8961_v58 = vld [vmem:[#allocation5 + $0xb8] sm:$0xff]  }
 0x305   :  { %v1053_v38 = vsub.f32 1.0, %v1052_v30  ;;  %v6526_v18 = vunpack.c.l.bf16 %v8961_v58 }
 0x306   :  { %v920_v40 = vpop.f32.mrf.mxu2 }
 0x307   :  { %v1054_v44 = vmul.f32 %v7208_v52, %v1053_v38  ;;  %v950_v24 = vadd.f32 %v6511_v29, %v920_v40 }
 0x309   :  { %v1055_v48 = vadd.f32 %v7208_v52, %v1054_v44  ;;  %v6147_v25 = vmul.f32 -1.442695, %v950_v24  ;;  %v6963_v44 = vld [vmem:[#allocation5 + $0xb0] sm:$0xff]  }
 0x30a   :  { %v6522_v15 = vunpack.c.l.bf16 %v6963_v44  ;;  %v6523_v22 = vunpack.c.h.bf16 %v6963_v44 }
 0x30b   :  { %v1059_v43 = vsel %vm1058_vm10, %v7208_v52, %v1055_v48  ;;  %v6145_v52 = vmul.f32 -1.442695, %v948_v16 }
 0x30c   :  { %v1064_v12 = vsel %vm1061_vm13, %v1063_v32, %v1059_v43 }
 0x30d   :  { %v1191_v1 = vmul.f32 %v1064_v12, %v8611_v17  ;;  %v949_v17 = vadd.f32 %v6510_v57, %v918_v49 }
 0x30e   :  { %v923_v46 = vpop.f32.mrf.mxu2 }
 0x30f   :  { %v951_v63 = vadd.f32 %v6514_v45, %v923_v46  ;;  %v6146_v30 = vmul.f32 -1.442695, %v949_v17  ;;  %v6515_v17 = vunpack.c.h.bf16 %v8917_v34 }
 0x311   :  { %7209 = vtanh.f32 %v951_v63 }
 0x312   :  { %7211 = vpow2.f32 %v6141_v10 }
 0x313   :  { %7213 = vpow2.f32 %v6142_v26 }
 0x314   :  { %7215 = vpow2.f32 %v6143_v56 }
 0x316   :  { %v8920_v47 = vpop.f32.mrf.mxu2 }
 0x317   :  { %v7210_v7 = vpop.eup %7209 }
 0x318   :  { %v1195_v11 = vmul.f32 %v7210_v7, %v988_v54  ;;  %v7212_v21 = vpop.eup %7211 }
 0x319   :  { %v8930_v60 = vadd.f32 1.0, %v7212_v21  ;;  %v7214_v50 = vpop.eup %7213 }
 0x31a   :  { %v8923_v37 = vadd.f32 %v1195_v11, %v1191_v1  ;;  %v8935_v38 = vadd.f32 1.0, %v7214_v50  ;;  %v7216_v61 = vpop.eup %7215 }
 0x31b   :  { %7217 = vrcp.f32 %v8930_v60  ;;  %v8940_v40 = vadd.f32 1.0, %v7216_v61  ;;  %v999_v59 = vand.u32 2147483647, %v8930_v60  ;;  %v1001_v11 = vand.u32 2147483648, %v8930_v60 }
 0x31c   :  { %7219 = vpow2.f32 %v6145_v52  ;;  %v1016_v57 = vand.u32 2147483648, %v8935_v38  ;;  %vm995_vm1 = vweird.f32 %v8930_v60  ;;  %vm1010_vm4 = vweird.f32 %v8935_v38 }
 0x31d   :  { %7221 = vpow2.f32 %v6146_v30  ;;  %vm8984_vm3 = vcmp.eq.f32.partialorder %v999_v59, 8.507059e+37  ;;  %v1014_v34 = vand.u32 2147483647, %v8935_v38  ;;  %vm1025_vm7 = vweird.f32 %v8940_v40 }
 0x31e   :  { %v8927_v36 = vpop.f32.mrf.mxu2  ;;  %7223 = vpow2.f32 %v6147_v25  ;;  %v6518_v25 = vunpack.c.l.bf16 %v6962_v41  ;;  %v8999_v44 = vor.u32 1.1754944e-38, %v1016_v57 }
 0x31f   :  { %7225 = vrcp.f32 %v8935_v38  ;;  %vm9032_vm8 = vcmp.eq.f32.partialorder %v1014_v34, 8.507059e+37 }
 0x320   :  { %7227 = vrcp.f32 %v8940_v40 }
 0x321   :  { %v8937_v31 = vpop.eup %7217 }
 0x322   :  { %v7220_v49 = vpop.eup %7219  ;;  %v991_v46 = vmul.f32 %v8937_v31, %v8930_v60  ;;  %vm996_vm15 = vweird.f32 %v8937_v31  ;;  %v1002_v60 = vor.u32 1.1754944e-38, %v1001_v11 }
 0x323   :  { %v7222_v45 = vpop.eup %7221  ;;  %v8944_v48 = vadd.f32 1.0, %v7220_v49  ;;  %vm8990_vm2 = vmor %vm995_vm1, %vm996_vm15 }
 0x324   :  { %v7224_v62 = vpop.eup %7223  ;;  %v8947_v63 = vadd.f32 1.0, %v7222_v45  ;;  %v992_v2 = vsub.f32 1.0, %v991_v46 }
 0x325   :  { %v8949_v55 = vpop.eup %7225  ;;  %v8951_v20 = vadd.f32 1.0, %v7224_v62  ;;  %7229 = vrcp.f32 %v8944_v48  ;;  %vm1071_vm10 = vweird.f32 %v8944_v48  ;;  %v1077_v57 = vand.u32 2147483648, %v8944_v48 }
 0x326   :  { %v8933_v19 = vpop.f32.mrf.mxu2  ;;  %v1006_v4 = vmul.f32 %v8949_v55, %v8935_v38  ;;  %7231 = vrcp.f32 %v8947_v63  ;;  %v8958_v14 = vpop.eup %7227  ;;  %v993_v51 = vmul.f32 %v8937_v31, %v992_v2  ;;  %vm1011_vm6 = vweird.f32 %v8949_v55 }
 0x327   :  { %7233 = vrcp.f32 %v8951_v20  ;;  %v1021_v54 = vmul.f32 %v8958_v14, %v8940_v40  ;;  %v952_v2 = vadd.f32 %v6515_v17, %v8920_v47  ;;  %vm9015_vm5 = vmor %vm1010_vm4, %vm1011_vm6  ;;  %v1029_v47 = vand.u32 2147483647, %v8940_v40 }
 0x328   :  { %v1007_v12 = vsub.f32 1.0, %v1006_v4  ;;  %v994_v53 = vadd.f32 %v8937_v31, %v993_v51  ;;  %vm1026_vm9 = vweird.f32 %v8958_v14  ;;  %v1092_v24 = vand.u32 2147483648, %v8947_v63 }
 0x329   :  { %v1022_v16 = vsub.f32 1.0, %v1021_v54  ;;  %vm9057_vm14 = vmor %vm1025_vm7, %vm1026_vm9  ;;  %vm1086_vm1 = vweird.f32 %v8947_v63  ;;  %vm1030_vm6 = vcmp.eq.f32.partialorder %v1029_v47, 8.507059e+37 }
 0x32a   :  { %v1008_v21 = vmul.f32 %v8949_v55, %v1007_v12  ;;  %v998_v49 = vsel %vm8990_vm2, %v8937_v31, %v994_v53  ;;  %vm1101_vm2 = vweird.f32 %v8951_v20 }
 0x32b   :  { %v8963_v33 = vpop.eup %7229  ;;  %v1023_v31 = vmul.f32 %v8958_v14, %v1022_v16  ;;  %v9011_v51 = vsel %vm8984_vm3, %v1002_v60, %v998_v49 }
 0x32c   :  { %v8968_v1 = vpop.eup %7231  ;;  %v1067_v29 = vmul.f32 %v8963_v33, %v8944_v48  ;;  %v9002_v62 = vadd.f32 %v8949_v55, %v1008_v21  ;;  %vm1072_vm11 = vweird.f32 %v8963_v33 }
 0x32d   :  { %v8972_v26 = vpop.eup %7233  ;;  %v1082_v56 = vmul.f32 %v8968_v1, %v8947_v63  ;;  %vm1087_vm12 = vweird.f32 %v8968_v1  ;;  %vm9064_vm15 = vmor %vm1071_vm10, %vm1072_vm11 }
 0x32e   :  { %v933_v27 = vpop.f32.mrf.mxu2  ;;  %v1097_v30 = vmul.f32 %v8972_v26, %v8951_v20  ;;  %vm1102_vm13 = vweird.f32 %v8972_v26  ;;  %vm9074_vm3 = vmor %vm1086_vm1, %vm1087_vm12 }
 0x32f   :  { %v955_v3 = vadd.f32 %v6522_v15, %v933_v27  ;;  %v1068_v27 = vsub.f32 1.0, %v1067_v29  ;;  %v1075_v29 = vand.u32 2147483647, %v8944_v48  ;;  %vm9090_vm4 = vmor %vm1101_vm2, %vm1102_vm13 }
 0x330   :  { %v1098_v4 = vsub.f32 1.0, %v1097_v30 }
 0x331   :  { %v6148_v10 = vmul.f32 -1.442695, %v955_v3  ;;  %v6519_v3 = vunpack.c.h.bf16 %v6962_v41 }
 0x332   :  { %v1099_v53 = vmul.f32 %v8972_v26, %v1098_v4 }
 0x333   :  { %v954_v11 = vadd.f32 %v6519_v3, %v8933_v19 }
 0x334   :  { %v1100_v30 = vadd.f32 %v8972_v26, %v1099_v53 }
 0x336   :  { %v935_v43 = vpop.f32.mrf.mxu2 }
 0x337   :  { %v956_v32 = vadd.f32 %v6523_v22, %v935_v43  ;;  %v1083_v22 = vsub.f32 1.0, %v1082_v56  ;;  %v953_v43 = vadd.f32 %v6518_v25, %v8927_v36  ;;  %v1069_v36 = vmul.f32 %v8963_v33, %v1068_v27 }
 0x338   :  { %v1107_v25 = vand.u32 2147483648, %v8951_v20  ;;  %v1078_v27 = vor.u32 1.1754944e-38, %v1077_v57 }
 0x339   :  { %v6149_v7 = vmul.f32 -1.442695, %v956_v32  ;;  %v6527_v32 = vunpack.c.h.bf16 %v8961_v58  ;;  %v1013_v58 = vsel %vm9015_vm5, %v8949_v55, %v9002_v62  ;;  %v1084_v54 = vmul.f32 %v8968_v1, %v1083_v22 }
 0x33a   :  { %v1024_v55 = vadd.f32 %v8958_v14, %v1023_v31  ;;  %v1070_v19 = vadd.f32 %v8963_v33, %v1069_v36  ;;  %vm1076_vm5 = vcmp.eq.f32.partialorder %v1075_v29, 8.507059e+37  ;;  %v1104_v22 = vsel %vm9090_vm4, %v8972_v26, %v1100_v30 }
 0x33b   :  { %7235 = vpow2.f32 %v6149_v7  ;;  %v1031_v7 = vand.u32 2147483648, %v8940_v40  ;;  %v1085_v56 = vadd.f32 %v8968_v1, %v1084_v54  ;;  %v1090_v40 = vand.u32 2147483647, %v8947_v63 }
 0x33c   :  { %7237 = vpow2.f32 %v6148_v10  ;;  %v1074_v48 = vsel %vm9064_vm15, %v8963_v33, %v1070_v19  ;;  %v1028_v34 = vsel %vm9057_vm14, %v8958_v14, %v1024_v55  ;;  %v1105_v63 = vand.u32 2147483647, %v8951_v20 }
 0x33d   :  { %v1032_v33 = vor.u32 1.1754944e-38, %v1031_v7  ;;  %v1093_v14 = vor.u32 1.1754944e-38, %v1092_v24  ;;  %v1018_v20 = vsel %vm9032_vm8, %v8999_v44, %v1013_v58  ;;  %v1108_v3 = vor.u32 1.1754944e-38, %v1107_v25 }
 0x33e   :  { %v938_v52 = vpop.f32.mrf.mxu2  ;;  %v1079_v31 = vsel %vm1076_vm5, %v1078_v27, %v1074_v48  ;;  %vm1091_vm7 = vcmp.eq.f32.partialorder %v1090_v40, 8.507059e+37  ;;  %vm1106_vm9 = vcmp.eq.f32.partialorder %v1105_v63, 8.507059e+37 }
 0x33f   :  { %v957_v61 = vadd.f32 %v6526_v18, %v938_v52  ;;  %v1033_v4 = vsel %vm1030_vm6, %v1032_v33, %v1028_v34  ;;  %v1109_v58 = vsel %vm1106_vm9, %v1108_v3, %v1104_v22  ;;  %v1192_v7 = vmul.f32 %v1079_v31, %v8801_v13 }
 0x340   :  { %v1194_v53 = vmul.f32 %v1109_v58, %v8806_v39 }
 0x341   :  { %v7236_v45 = vpop.eup %7235  ;;  %v6150_v46 = vmul.f32 -1.442695, %v957_v61 }
 0x342   :  { %v7238_v15 = vpop.eup %7237  ;;  %v9021_v12 = vadd.f32 1.0, %v7236_v45 }
 0x343   :  { %7239 = vpow2.f32 %v6150_v46  ;;  %v9029_v38 = vadd.f32 1.0, %v7238_v15  ;;  %v1089_v46 = vsel %vm9074_vm3, %v8968_v1, %v1085_v56 }
 0x344   :  { %7241 = vtanh.f32 %v952_v2  ;;  %vm1151_vm11 = vweird.f32 %v9021_v12  ;;  %v1155_v40 = vand.u32 2147483647, %v9021_v12 }
 0x345   :  { %7243 = vtanh.f32 %v953_v43  ;;  %vm1136_vm1 = vweird.f32 %v9029_v38  ;;  %v1140_v62 = vand.u32 2147483647, %v9029_v38 }
 0x346   :  { %v940_v18 = vpop.f32.mrf.mxu2  ;;  %7245 = vrcp.f32 %v9021_v12  ;;  %vm1156_vm9 = vcmp.eq.f32.partialorder %v1155_v40, 8.507059e+37 }
 0x347   :  { %v958_v41 = vadd.f32 %v6527_v32, %v940_v18  ;;  %7247 = vrcp.f32 %v9029_v38  ;;  %v1094_v32 = vsel %vm1091_vm7, %v1093_v14, %v1089_v46  ;;  %v1142_v46 = vand.u32 2147483648, %v9029_v38 }
 0x348   :  { %7249 = vtanh.f32 %v954_v11  ;;  %v1193_v11 = vmul.f32 %v1094_v32, %v8804_v23 }
 0x349   :  { %v7240_v21 = vpop.eup %7239  ;;  %v6151_v16 = vmul.f32 -1.442695, %v958_v41 }
 0x34a   :  { %v9049_v17 = vadd.f32 1.0, %v7240_v21  ;;  %v7242_v50 = vpop.eup %7241 }
 0x34b   :  { %7251 = vpow2.f32 %v6151_v16  ;;  %v7244_v61 = vpop.eup %7243  ;;  %v1196_v43 = vmul.f32 %v7242_v50, %v9011_v51  ;;  %v9189_v50 = vld [vmem:[#allocation5 + $0xe0] sm:$0xff]  }
 0x34c   :  { %7253 = vrcp.f32 %v9049_v17  ;;  %v9086_v45 = vpop.eup %7245  ;;  %v1197_v36 = vmul.f32 %v7244_v61, %v1018_v20  ;;  %v1172_v39 = vand.u32 2147483648, %v9049_v17  ;;  %vm1166_vm13 = vweird.f32 %v9049_v17 }
 0x34d   :  { %v9097_v15 = vpop.eup %7247  ;;  %v1147_v10 = vmul.f32 %v9086_v45, %v9021_v12  ;;  %v9113_v51 = vadd.f32 %v1196_v43, %v1192_v7  ;;  %vm1152_vm12 = vweird.f32 %v9086_v45  ;;  %v1170_v24 = vand.u32 2147483647, %v9049_v17 }
 0x34e   :  { %v7250_v2 = vpop.eup %7249  ;;  %v1132_v26 = vmul.f32 %v9097_v15, %v9029_v38  ;;  %v9116_v41 = vadd.f32 %v1197_v36, %v1193_v11  ;;  %vm1137_vm10 = vweird.f32 %v9097_v15  ;;  %v1157_v61 = vand.u32 2147483648, %v9021_v12  ;;  %vm9148_vm3 = vmor %vm1151_vm11, %vm1152_vm12 }
 0x34f   :  { %v1198_v54 = vmul.f32 %v7250_v2, %v1033_v4  ;;  %v1148_v55 = vsub.f32 1.0, %v1147_v10  ;;  %v1173_v27 = vor.u32 1.1754944e-38, %v1172_v39  ;;  %vm1171_vm2 = vcmp.eq.f32.partialorder %v1170_v24, 8.507059e+37  ;;  %vm9154_vm6 = vmor %vm1136_vm1, %vm1137_vm10 }
 0x350   :  { %v1133_v57 = vsub.f32 1.0, %v1132_v26  ;;  %v1158_v3 = vor.u32 1.1754944e-38, %v1157_v61  ;;  %v1143_v43 = vor.u32 1.1754944e-38, %v1142_v46 }
 0x351   :  { %v7252_v1 = vpop.eup %7251  ;;  %v9118_v21 = vadd.f32 %v1198_v54, %v1194_v53  ;;  %v1149_v13 = vmul.f32 %v9086_v45, %v1148_v55  ;;  %v6529_v54 = vld [vmem:[#allocation5 + $0xc0] sm:$0xff]  }
 0x352   :  { %v7254_v47 = vpop.eup %7253  ;;  %v1130_v44 = vadd.f32 1.0, %v7252_v1  ;;  %v1134_v23 = vmul.f32 %v9097_v15, %v1133_v57  ;;  %v6531_v61 = vunpack.c.h.bf16 %v6529_v54 }
 0x353   :  { %v1162_v59 = vmul.f32 %v7254_v47, %v9049_v17  ;;  %vm1167_vm8 = vweird.f32 %v7254_v47  ;;  %v1150_v30 = vadd.f32 %v9086_v45, %v1149_v13 }
 0x354   :  { %7255 = vrcp.f32 %v1130_v44  ;;  %vm9132_vm14 = vmor %vm1166_vm13, %vm1167_vm8  ;;  %v1187_v60 = vand.u32 2147483648, %v1130_v44  ;;  %v1135_v25 = vadd.f32 %v9097_v15, %v1134_v23  ;;  %v1185_v17 = vand.u32 2147483647, %v1130_v44 }
 0x355   :  { %v1163_v18 = vsub.f32 1.0, %v1162_v59  ;;  %7257 = vtanh.f32 %v9113_v51  ;;  %vm1181_vm4 = vweird.f32 %v1130_v44  ;;  %v1154_v38 = vsel %vm9148_vm3, %v9086_v45, %v1150_v30 }
 0x356   :  { %7259 = vtanh.f32 %v9116_v41  ;;  %v1188_v12 = vor.u32 1.1754944e-38, %v1187_v60  ;;  %vm1186_vm7 = vcmp.eq.f32.partialorder %v1185_v17, 8.507059e+37  ;;  %v1139_v4 = vsel %vm9154_vm6, %v9097_v15, %v1135_v25 }
 0x357   :  { %v1164_v29 = vmul.f32 %v7254_v47, %v1163_v18  ;;  %7261 = vtanh.f32 %v9118_v21  ;;  %v1159_v32 = vsel %vm1156_vm9, %v1158_v3, %v1154_v38  ;;  %vm1141_vm8 = vcmp.eq.f32.partialorder %v1140_v62, 8.507059e+37 }
 0x358   :  { %7263 = vtanh.f32 %v8923_v37  ;;  %v1144_v45 = vsel %vm1141_vm8, %v1143_v43, %v1139_v4  ;;  %v6546_v25 = vunpack.c.l.bf16 %v9189_v50 }
 0x359   :  { %v1165_v16 = vadd.f32 %v7254_v47, %v1164_v29 }
 0x35a   :  { %v7256_v19 = vpop.eup %7255 }
 0x35b   :  { %v1177_v56 = vmul.f32 %v7256_v19, %v1130_v44  ;;  %v7258_v49 = vpop.eup %7257  ;;  %v1169_v48 = vsel %vm9132_vm14, %v7254_v47, %v1165_v16  ;;  %vm1182_vm15 = vweird.f32 %v7256_v19 }
 0x35c   :  { %v7260_v63 = vpop.eup %7259  ;;  %v1174_v2 = vsel %vm1171_vm2, %v1173_v27, %v1169_v48  ;;  %vm1183_vm5 = vmor %vm1181_vm4, %vm1182_vm15  ;;  %v1208_v44 = vmul.f32 %v7258_v49, %v1159_v32 }
 0x35d   :  { %v1178_v52 = vsub.f32 1.0, %v1177_v56  ;;  %v7262_v14 = vpop.eup %7261  ;;  %v1209_v10 = vmul.f32 %v7260_v63, %v1174_v2  ;;  %v6965_v63 = vld [vmem:[#allocation5 + $0xc8] sm:$0xff]  }
 0x35e   :  { %v7264_v58 = vpop.eup %7263  ;;  %v6534_v22 = vunpack.c.l.bf16 %v6965_v63 }
 0x35f   :  { %v1179_v34 = vmul.f32 %v7256_v19, %v1178_v52  ;;  %v1207_v26 = vmul.f32 %v7264_v58, %v1144_v45 }
 0x361   :  { %v1180_v20 = vadd.f32 %v7256_v19, %v1179_v34  ;;  %v1244_v7 = vpack.c.bf16 %v1208_v44, %v1207_v26 }
 0x363   :  { %v1184_v31 = vsel %vm1183_vm5, %v7256_v19, %v1180_v20 }
 0x364   :  { %v1189_v1 = vsel %vm1186_vm7, %v1188_v12, %v1184_v31 }
 0x365   :  { %v1210_v47 = vmul.f32 %v7262_v14, %v1189_v1 }
 0x367   :  { %v1245_v36 = vpack.c.bf16 %v1210_v47, %v1209_v10  ;;  %v6535_v10 = vunpack.c.h.bf16 %v6965_v63 }
 0x369   :  { %1252 = vmatpush.bf16.msra.mxu3 %v1245_v36  ;;  %v6967_v36 = vld [vmem:[#allocation5 + $0xd8] sm:$0xff]  }
 0x36d   :  { %1253 = vmatpush.bf16.msra.mxu3 %v1244_v7 }
 0x370   :  { %6152 = vmatmul.msk.bf16.vlgmr.msra.gmra.mxu3 %vm165_vm0, %v8857_v8 }
 0x380   :  { %6153 = vmatmul.msk.bf16.gmra.mxu3 %vm165_vm0, %v8864_v28 }
 0x390   :  { %6154 = vmatmul.msk.bf16.gmra.mxu3 %vm165_vm0, %v8871_v5  ;;  %v6530_v5 = vunpack.c.l.bf16 %v6529_v54 }
 0x3a0   :  { %6155 = vmatmul.msk.bf16.gmra.mxu3 %vm165_vm0, %v8878_v9  ;;  %v9184_v9 = vld [vmem:[#allocation5 + $0xd0] sm:$0xff]  }
 0x3a1   :  { %v6538_v18 = vunpack.c.l.bf16 %v9184_v9  ;;  %v6539_v26 = vunpack.c.h.bf16 %v9184_v9 }
 0x3b0   :  { %6156 = vmatmul.msk.bf16.gmra.mxu3 %vm165_vm0, %v8885_v42 }
 0x3c0   :  { %6157 = vmatmul.msk.bf16.gmra.mxu3 %vm165_vm0, %v8892_v6 }
 0x3d0   :  { %6158 = vmatmul.msk.bf16.gmra.mxu3 %vm165_vm0, %v8899_v0 }
 0x3e0   :  { %6159 = vmatmul.msk.bf16.gmra.mxu3 %vm165_vm0, %v8906_v35 }
 0x3f3   :  { %v1255_v8 = vpop.f32.mrf.mxu3 }
 0x3f4   :  { %v1295_v59 = vadd.f32 %v6530_v5, %v1255_v8  ;;  %v6542_v8 = vunpack.c.l.bf16 %v6967_v36 }
 0x3f6   :  { %v6160_v42 = vmul.f32 -1.442695, %v1295_v59 }
 0x3f8   :  { %7265 = vpow2.f32 %v6160_v42 }
 0x3fb   :  { %v1257_v28 = vpop.f32.mrf.mxu3 }
 0x3fc   :  { %v1296_v46 = vadd.f32 %v6531_v61, %v1257_v28  ;;  %v6543_v28 = vunpack.c.h.bf16 %v6967_v36 }
 0x3fe   :  { %v7266_v55 = vpop.eup %7265  ;;  %v6161_v12 = vmul.f32 -1.442695, %v1296_v46  ;;  %v9233_v46 = vld [vmem:[#allocation5 + $0xf8] sm:$0xff]  }
 0x3ff   :  { %v1323_v57 = vadd.f32 1.0, %v7266_v55 }
 0x401   :  { %v1338_v33 = vand.u32 2147483648, %v1323_v57  ;;  %vm1332_vm14 = vweird.f32 %v1323_v57  ;;  %v1336_v14 = vand.u32 2147483647, %v1323_v57 }
 0x403   :  { %v1260_v15 = vpop.f32.mrf.mxu3  ;;  %v1339_v3 = vor.u32 1.1754944e-38, %v1338_v33  ;;  %vm1337_vm3 = vcmp.eq.f32.partialorder %v1336_v14, 8.507059e+37 }
 0x404   :  { %v1297_v43 = vadd.f32 %v6534_v22, %v1260_v15 }
 0x406   :  { %v6162_v58 = vmul.f32 -1.442695, %v1297_v43  ;;  %v6969_v43 = vld [vmem:[#allocation5 + $0xe8] sm:$0xff]  }
 0x40b   :  { %v9182_v11 = vpop.f32.mrf.mxu3 }
 0x40c   :  { %v1298_v7 = vadd.f32 %v6535_v10, %v9182_v11 }
 0x40e   :  { %v6163_v59 = vmul.f32 -1.442695, %v1298_v7 }
 0x413   :  { %v1265_v6 = vpop.f32.mrf.mxu3 }
 0x414   :  { %v1299_v53 = vadd.f32 %v6538_v18, %v1265_v6 }
 0x416   :  { %v6164_v0 = vmul.f32 -1.442695, %v1299_v53 }
 0x418   :  { %7267 = vpow2.f32 %v6164_v0 }
 0x419   :  { %7269 = vrcp.f32 %v1323_v57 }
 0x41b   :  { %v9187_v35 = vpop.f32.mrf.mxu3 }
 0x41c   :  { %v1300_v15 = vadd.f32 %v6539_v26, %v9187_v35 }
 0x41e   :  { %v7268_v29 = vpop.eup %7267  ;;  %v6165_v6 = vmul.f32 -1.442695, %v1300_v15  ;;  %v6550_v15 = vunpack.c.l.bf16 %v6969_v43 }
 0x41f   :  { %v1399_v13 = vadd.f32 1.0, %v7268_v29  ;;  %v7270_v23 = vpop.eup %7269 }
 0x420   :  { %v1328_v39 = vmul.f32 %v7270_v23, %v1323_v57  ;;  %vm1333_vm12 = vweird.f32 %v7270_v23 }
 0x421   :  { %7271 = vrcp.f32 %v1399_v13  ;;  %v1414_v34 = vand.u32 2147483648, %v1399_v13  ;;  %vm1408_vm11 = vweird.f32 %v1399_v13  ;;  %v1412_v62 = vand.u32 2147483647, %v1399_v13  ;;  %vm1334_vm15 = vmor %vm1332_vm14, %vm1333_vm12 }
 0x422   :  { %v1329_v30 = vsub.f32 1.0, %v1328_v39 }
 0x423   :  { %v1270_v19 = vpop.f32.mrf.mxu3  ;;  %v1415_v38 = vor.u32 1.1754944e-38, %v1414_v34  ;;  %vm1413_vm1 = vcmp.eq.f32.partialorder %v1412_v62, 8.507059e+37 }
 0x424   :  { %v1330_v40 = vmul.f32 %v7270_v23, %v1329_v30 }
 0x426   :  { %v1331_v27 = vadd.f32 %v7270_v23, %v1330_v40 }
 0x427   :  { %v7272_v16 = vpop.eup %7271 }
 0x428   :  { %v1404_v56 = vmul.f32 %v7272_v16, %v1399_v13  ;;  %vm1409_vm10 = vweird.f32 %v7272_v16  ;;  %v1335_v2 = vsel %vm1334_vm15, %v7270_v23, %v1331_v27 }
 0x429   :  { %vm1410_vm13 = vmor %vm1408_vm11, %vm1409_vm10  ;;  %v1340_v32 = vsel %vm1337_vm3, %v1339_v3, %v1335_v2  ;;  %v6558_v3 = vunpack.c.l.bf16 %v9233_v46 }
 0x42a   :  { %v1405_v24 = vsub.f32 1.0, %v1404_v56 }
 0x42b   :  { %v1272_v52 = vpop.f32.mrf.mxu3 }
 0x42c   :  { %v1406_v60 = vmul.f32 %v7272_v16, %v1405_v24  ;;  %v1302_v42 = vadd.f32 %v6543_v28, %v1272_v52 }
 0x42e   :  { %v1407_v48 = vadd.f32 %v7272_v16, %v1406_v60  ;;  %v6167_v9 = vmul.f32 -1.442695, %v1302_v42 }
 0x430   :  { %v1411_v20 = vsel %vm1410_vm13, %v7272_v16, %v1407_v48 }
 0x431   :  { %v1416_v31 = vsel %vm1413_vm1, %v1415_v38, %v1411_v20 }
 0x432   :  { %v1543_v47 = vmul.f32 %v1416_v31, %v8923_v37  ;;  %v1301_v37 = vadd.f32 %v6542_v8, %v1270_v19  ;;  %v6970_v19 = vld [vmem:[#allocation5 + $0xf0] sm:$0xff]  }
 0x433   :  { %v1275_v49 = vpop.f32.mrf.mxu3  ;;  %v6554_v52 = vunpack.c.l.bf16 %v6970_v19  ;;  %v6555_v40 = vunpack.c.h.bf16 %v6970_v19  ;;  %v6551_v19 = vunpack.c.h.bf16 %v6969_v43 }
 0x434   :  { %v1303_v17 = vadd.f32 %v6546_v25, %v1275_v49  ;;  %v6166_v53 = vmul.f32 -1.442695, %v1301_v37 }
 0x436   :  { %7273 = vtanh.f32 %v1303_v17 }
 0x437   :  { %7275 = vpow2.f32 %v6161_v12 }
 0x438   :  { %7277 = vpow2.f32 %v6162_v58  ;;  %v6547_v58 = vunpack.c.h.bf16 %v9189_v50 }
 0x439   :  { %7279 = vpow2.f32 %v6163_v59 }
 0x43b   :  { %v9192_v4 = vpop.f32.mrf.mxu3 }
 0x43c   :  { %v7274_v1 = vpop.eup %7273 }
 0x43d   :  { %v1547_v45 = vmul.f32 %v7274_v1, %v1340_v32  ;;  %v7276_v5 = vpop.eup %7275 }
 0x43e   :  { %v9202_v18 = vadd.f32 1.0, %v7276_v5  ;;  %v7278_v0 = vpop.eup %7277 }
 0x43f   :  { %v9195_v44 = vadd.f32 %v1547_v45, %v1543_v47  ;;  %v9207_v55 = vadd.f32 1.0, %v7278_v0  ;;  %v7280_v35 = vpop.eup %7279 }
 0x440   :  { %7281 = vrcp.f32 %v9202_v18  ;;  %v9212_v13 = vadd.f32 1.0, %v7280_v35  ;;  %v1351_v38 = vand.u32 2147483647, %v9202_v18  ;;  %v1353_v12 = vand.u32 2147483648, %v9202_v18 }
 0x441   :  { %7283 = vpow2.f32 %v6165_v6  ;;  %v1368_v32 = vand.u32 2147483648, %v9207_v55  ;;  %vm1347_vm4 = vweird.f32 %v9202_v18  ;;  %vm1362_vm7 = vweird.f32 %v9207_v55 }
 0x442   :  { %7285 = vpow2.f32 %v6166_v53  ;;  %vm9256_vm6 = vcmp.eq.f32.partialorder %v1351_v38, 8.507059e+37  ;;  %v1354_v5 = vor.u32 1.1754944e-38, %v1353_v12  ;;  %v1366_v50 = vand.u32 2147483647, %v9207_v55 }
 0x443   :  { %v9199_v54 = vpop.f32.mrf.mxu3  ;;  %7287 = vpow2.f32 %v6167_v9  ;;  %v9271_v42 = vor.u32 1.1754944e-38, %v1368_v32  ;;  %vm1377_vm10 = vweird.f32 %v9212_v13 }
 0x444   :  { %7289 = vrcp.f32 %v9207_v55  ;;  %vm9304_vm11 = vcmp.eq.f32.partialorder %v1366_v50, 8.507059e+37 }
 0x445   :  { %7291 = vrcp.f32 %v9212_v13 }
 0x446   :  { %v9209_v57 = vpop.eup %7281 }
 0x447   :  { %v7284_v29 = vpop.eup %7283  ;;  %v1343_v39 = vmul.f32 %v9209_v57, %v9202_v18  ;;  %vm1348_vm2 = vweird.f32 %v9209_v57 }
 0x448   :  { %v7286_v23 = vpop.eup %7285  ;;  %v9216_v24 = vadd.f32 1.0, %v7284_v29  ;;  %vm9262_vm5 = vmor %vm1347_vm4, %vm1348_vm2  ;;  %v1304_v29 = vadd.f32 %v6547_v58, %v9192_v4  ;;  %v1381_v4 = vand.u32 2147483647, %v9212_v13 }
 0x449   :  { %v7288_v56 = vpop.eup %7287  ;;  %v9219_v30 = vadd.f32 1.0, %v7286_v23  ;;  %v1344_v61 = vsub.f32 1.0, %v1343_v39 }
 0x44a   :  { %v9221_v60 = vpop.eup %7289  ;;  %v9223_v25 = vadd.f32 1.0, %v7288_v56  ;;  %7293 = vrcp.f32 %v9216_v24  ;;  %v6559_v56 = vunpack.c.h.bf16 %v9233_v46  ;;  %vm1423_vm13 = vweird.f32 %v9216_v24 }
 0x44b   :  { %v9205_v11 = vpop.f32.mrf.mxu3  ;;  %v1358_v48 = vmul.f32 %v9221_v60, %v9207_v55  ;;  %7295 = vrcp.f32 %v9219_v30  ;;  %v9230_v17 = vpop.eup %7291  ;;  %v1345_v27 = vmul.f32 %v9209_v57, %v1344_v61  ;;  %vm1363_vm9 = vweird.f32 %v9221_v60 }
 0x44c   :  { %7297 = vrcp.f32 %v9223_v25  ;;  %v1373_v22 = vmul.f32 %v9230_v17, %v9212_v13  ;;  %vm9287_vm8 = vmor %vm1362_vm7, %vm1363_vm9  ;;  %vm1378_vm12 = vweird.f32 %v9230_v17  ;;  %vm1438_vm4 = vweird.f32 %v9219_v30 }
 0x44d   :  { %v1359_v33 = vsub.f32 1.0, %v1358_v48  ;;  %v1346_v1 = vadd.f32 %v9209_v57, %v1345_v27  ;;  %vm9329_vm3 = vmor %vm1377_vm10, %vm1378_vm12  ;;  %vm1382_vm9 = vcmp.eq.f32.partialorder %v1381_v4, 8.507059e+37 }
 0x44e   :  { %v1374_v45 = vsub.f32 1.0, %v1373_v22 }
 0x44f   :  { %v1360_v47 = vmul.f32 %v9221_v60, %v1359_v33  ;;  %v1350_v37 = vsel %vm9262_vm5, %v9209_v57, %v1346_v1  ;;  %v1429_v33 = vand.u32 2147483648, %v9216_v24  ;;  %v1444_v1 = vand.u32 2147483648, %v9219_v30 }
 0x450   :  { %v9235_v20 = vpop.eup %7293  ;;  %v1375_v57 = vmul.f32 %v9230_v17, %v1374_v45  ;;  %v9283_v39 = vsel %vm9256_vm6, %v1354_v5, %v1350_v37  ;;  %v1459_v45 = vand.u32 2147483648, %v9223_v25  ;;  %vm1453_vm5 = vweird.f32 %v9223_v25 }
 0x451   :  { %v9240_v2 = vpop.eup %7295  ;;  %v1419_v10 = vmul.f32 %v9235_v20, %v9216_v24  ;;  %v9274_v53 = vadd.f32 %v9221_v60, %v1360_v47  ;;  %vm1424_vm14 = vweird.f32 %v9235_v20 }
 0x452   :  { %v9244_v31 = vpop.eup %7297  ;;  %v1434_v36 = vmul.f32 %v9240_v2, %v9219_v30  ;;  %vm1439_vm15 = vweird.f32 %v9240_v2  ;;  %vm9336_vm2 = vmor %vm1423_vm13, %vm1424_vm14  ;;  %v1460_v50 = vor.u32 1.1754944e-38, %v1459_v45 }
 0x453   :  { %v1285_v16 = vpop.f32.mrf.mxu3  ;;  %v1449_v8 = vmul.f32 %v9244_v31, %v9223_v25  ;;  %v1420_v6 = vsub.f32 1.0, %v1419_v10  ;;  %v1365_v61 = vsel %vm9287_vm8, %v9221_v60, %v9274_v53  ;;  %v1376_v60 = vadd.f32 %v9230_v17, %v1375_v57  ;;  %vm9346_vm6 = vmor %vm1438_vm4, %vm1439_vm15 }
 0x454   :  { %v1307_v49 = vadd.f32 %v6554_v52, %v1285_v16  ;;  %v1435_v35 = vsub.f32 1.0, %v1434_v36  ;;  %v1305_v16 = vadd.f32 %v6550_v15, %v9199_v54  ;;  %vm1454_vm1 = vweird.f32 %v9244_v31 }
 0x455   :  { %v1450_v23 = vsub.f32 1.0, %v1449_v8  ;;  %v1421_v54 = vmul.f32 %v9235_v20, %v1420_v6  ;;  %v1380_v26 = vsel %vm9329_vm3, %v9230_v17, %v1376_v60  ;;  %v1430_v8 = vor.u32 1.1754944e-38, %v1429_v33  ;;  %vm9362_vm7 = vmor %vm1453_vm5, %vm1454_vm1 }
 0x456   :  { %v6168_v62 = vmul.f32 -1.442695, %v1307_v49  ;;  %v1383_v49 = vand.u32 2147483648, %v9212_v13  ;;  %v1436_v48 = vmul.f32 %v9240_v2, %v1435_v35  ;;  %v1442_v13 = vand.u32 2147483647, %v9219_v30 }
 0x457   :  { %v1457_v30 = vand.u32 2147483647, %v9223_v25  ;;  %v1445_v17 = vor.u32 1.1754944e-38, %v1444_v1  ;;  %v1370_v25 = vsel %vm9304_vm11, %v9271_v42, %v1365_v61 }
 0x458   :  { %v1437_v12 = vadd.f32 %v9240_v2, %v1436_v48  ;;  %vm1443_vm10 = vcmp.eq.f32.partialorder %v1442_v13, 8.507059e+37 }
 0x459   :  { %vm1458_vm12 = vcmp.eq.f32.partialorder %v1457_v30, 8.507059e+37 }
 0x45a   :  { %v1441_v5 = vsel %vm9346_vm6, %v9240_v2, %v1437_v12 }
 0x45b   :  { %v1287_v34 = vpop.f32.mrf.mxu3 }
 0x45c   :  { %v1308_v63 = vadd.f32 %v6555_v40, %v1287_v34 }
 0x45e   :  { %v6169_v14 = vmul.f32 -1.442695, %v1308_v63  ;;  %v1306_v63 = vadd.f32 %v6551_v19, %v9205_v11  ;;  %v1422_v11 = vadd.f32 %v9235_v20, %v1421_v54 }
 0x460   :  { %7299 = vpow2.f32 %v6169_v14  ;;  %v1427_v14 = vand.u32 2147483647, %v9216_v24  ;;  %v1426_v24 = vsel %vm9336_vm2, %v9235_v20, %v1422_v11  ;;  %v1384_v20 = vor.u32 1.1754944e-38, %v1383_v49 }
 0x461   :  { %7301 = vpow2.f32 %v6168_v62  ;;  %v1451_v62 = vmul.f32 %v9244_v31, %v1450_v23 }
 0x462   :  { %vm1428_vm8 = vcmp.eq.f32.partialorder %v1427_v14, 8.507059e+37  ;;  %v1385_v6 = vsel %vm1382_vm9, %v1384_v20, %v1380_v26 }
 0x463   :  { %v1290_v7 = vpop.f32.mrf.mxu3  ;;  %v1452_v32 = vadd.f32 %v9244_v31, %v1451_v62 }
 0x464   :  { %v1309_v59 = vadd.f32 %v6558_v3, %v1290_v7 }
 0x466   :  { %v7300_v18 = vpop.eup %7299  ;;  %v6170_v0 = vmul.f32 -1.442695, %v1309_v59  ;;  %v1456_v59 = vsel %vm9362_vm7, %v9244_v31, %v1452_v32 }
 0x467   :  { %v7302_v9 = vpop.eup %7301  ;;  %v9293_v40 = vadd.f32 1.0, %v7300_v18  ;;  %v1431_v18 = vsel %vm1428_vm8, %v1430_v8, %v1426_v24  ;;  %v1461_v42 = vsel %vm1458_vm12, %v1460_v50, %v1456_v59 }
 0x468   :  { %7303 = vpow2.f32 %v6170_v0  ;;  %v9301_v55 = vadd.f32 1.0, %v7302_v9  ;;  %v1446_v0 = vsel %vm1443_vm10, %v1445_v17, %v1441_v5  ;;  %v1544_v57 = vmul.f32 %v1431_v18, %v9113_v51 }
 0x469   :  { %7305 = vtanh.f32 %v1304_v29  ;;  %v1546_v52 = vmul.f32 %v1461_v42, %v9118_v21  ;;  %vm1503_vm14 = vweird.f32 %v9293_v40  ;;  %v1509_v12 = vand.u32 2147483648, %v9293_v40  ;;  %v9476_v42 = vld [vmem:[%s12916_s2 + $0x28] sm:$0xff] }
 0x46a   :  { %7307 = vtanh.f32 %v1305_v16  ;;  %vm1488_vm4 = vweird.f32 %v9301_v55  ;;  %v1492_v45 = vand.u32 2147483647, %v9301_v55  ;;  %v1494_v13 = vand.u32 2147483648, %v9301_v55 }
 0x46b   :  { %v1292_v27 = vpop.f32.mrf.mxu3  ;;  %7309 = vrcp.f32 %v9293_v40  ;;  %v1510_v8 = vor.u32 1.1754944e-38, %v1509_v12 }
 0x46c   :  { %v1310_v46 = vadd.f32 %v6559_v56, %v1292_v27  ;;  %7311 = vrcp.f32 %v9301_v55  ;;  %v1545_v56 = vmul.f32 %v1446_v0, %v9116_v41  ;;  %v1495_v17 = vor.u32 1.1754944e-38, %v1494_v13  ;;  %v9441_v0 = vld [vmem:[%s12916_s2] sm:$0xff] }
 0x46d   :  { %7313 = vtanh.f32 %v1306_v63 }
 0x46e   :  { %v7304_v22 = vpop.eup %7303  ;;  %v6171_v38 = vmul.f32 -1.442695, %v1310_v46 }
 0x46f   :  { %v9321_v3 = vadd.f32 1.0, %v7304_v22  ;;  %v7306_v10 = vpop.eup %7305 }
 0x470   :  { %7315 = vpow2.f32 %v6171_v38  ;;  %v7308_v36 = vpop.eup %7307  ;;  %v1548_v53 = vmul.f32 %v7306_v10, %v9283_v39  ;;  %v1507_v38 = vand.u32 2147483647, %v9293_v40 }
 0x471   :  { %7317 = vrcp.f32 %v9321_v3  ;;  %v9358_v7 = vpop.eup %7309  ;;  %v1549_v29 = vmul.f32 %v7308_v36, %v1370_v25  ;;  %v1524_v62 = vand.u32 2147483648, %v9321_v3  ;;  %vm1518_vm1 = vweird.f32 %v9321_v3 }
 0x472   :  { %v9369_v15 = vpop.eup %7311  ;;  %v1499_v9 = vmul.f32 %v9358_v7, %v9293_v40  ;;  %v9385_v39 = vadd.f32 %v1548_v53, %v1544_v57  ;;  %vm1504_vm15 = vweird.f32 %v9358_v7  ;;  %v1522_v60 = vand.u32 2147483647, %v9321_v3 }
 0x473   :  { %v7314_v37 = vpop.eup %7313  ;;  %v1484_v31 = vmul.f32 %v9369_v15, %v9301_v55  ;;  %v9388_v61 = vadd.f32 %v1549_v29, %v1545_v56  ;;  %vm1489_vm13 = vweird.f32 %v9369_v15  ;;  %v1525_v47 = vor.u32 1.1754944e-38, %v1524_v62  ;;  %vm9420_vm6 = vmor %vm1503_vm14, %vm1504_vm15  ;;  %v9469_v29 = vld [vmem:[%s12916_s2 + $0x20] sm:$0xff] }
 0x474   :  { %v1550_v23 = vmul.f32 %v7314_v37, %v1385_v6  ;;  %v1500_v54 = vsub.f32 1.0, %v1499_v9  ;;  %vm1523_vm5 = vcmp.eq.f32.partialorder %v1522_v60, 8.507059e+37  ;;  %vm9426_vm9 = vmor %vm1488_vm4, %vm1489_vm13  ;;  %vm1508_vm12 = vcmp.eq.f32.partialorder %v1507_v38, 8.507059e+37  ;;  %v9455_v9 = vld [vmem:[%s12916_s2 + $0x10] sm:$0xff]  ;;  %v6561_v56 = vld [vmem:[#allocation5 + $0x100] sm:$0xff]  }
 0x475   :  { %v1485_v49 = vsub.f32 1.0, %v1484_v31  ;;  %v9490_v31 = vld [vmem:[%s12916_s2 + $0x38] sm:$0xff]  ;;  %v6563_v13 = vunpack.c.h.bf16 %v6561_v56 }
 0x476   :  { %v7316_v2 = vpop.eup %7315  ;;  %v9390_v48 = vadd.f32 %v1550_v23, %v1546_v52  ;;  %v1501_v51 = vmul.f32 %v9358_v7, %v1500_v54  ;;  %v6562_v52 = vunpack.c.l.bf16 %v6561_v56 }
 0x477   :  { %v7318_v35 = vpop.eup %7317  ;;  %v1482_v19 = vadd.f32 1.0, %v7316_v2  ;;  %v1486_v41 = vmul.f32 %v9369_v15, %v1485_v49  ;;  %v9496_v49 = vld [vmem:[#allocation5 + $0x110] sm:$0xff]  }
 0x478   :  { %v1514_v16 = vmul.f32 %v7318_v35, %v9321_v3  ;;  %vm1519_vm11 = vweird.f32 %v7318_v35  ;;  %v1502_v33 = vadd.f32 %v9358_v7, %v1501_v51  ;;  %v6570_v51 = vunpack.c.l.bf16 %v9496_v49 }
 0x479   :  { %7319 = vrcp.f32 %v1482_v19  ;;  %vm9404_vm3 = vmor %vm1518_vm1, %vm1519_vm11  ;;  %v1539_v22 = vand.u32 2147483648, %v1482_v19  ;;  %v1487_v11 = vadd.f32 %v9369_v15, %v1486_v41  ;;  %v1537_v3 = vand.u32 2147483647, %v1482_v19 }
 0x47a   :  { %v1515_v4 = vsub.f32 1.0, %v1514_v16  ;;  %7321 = vtanh.f32 %v9385_v39  ;;  %vm1533_vm7 = vweird.f32 %v1482_v19  ;;  %v1506_v55 = vsel %vm9420_vm6, %v9358_v7, %v1502_v33 }
 0x47b   :  { %7323 = vtanh.f32 %v9388_v61  ;;  %v1540_v40 = vor.u32 1.1754944e-38, %v1539_v22  ;;  %vm1538_vm10 = vcmp.eq.f32.partialorder %v1537_v3, 8.507059e+37  ;;  %v1491_v5 = vsel %vm9426_vm9, %v9369_v15, %v1487_v11  ;;  %v9448_v15 = vld [vmem:[%s12916_s2 + $0x8] sm:$0xff] }
 0x47c   :  { %v1516_v34 = vmul.f32 %v7318_v35, %v1515_v4  ;;  %7325 = vtanh.f32 %v9390_v48  ;;  %v1511_v25 = vsel %vm1508_vm12, %v1510_v8, %v1506_v55  ;;  %vm1493_vm11 = vcmp.eq.f32.partialorder %v1492_v45, 8.507059e+37  ;;  %v9501_v3 = vld [vmem:[#allocation5 + $0x120] sm:$0xff]   ;;  %v6972_v55 = vld [vmem:[#allocation5 + $0x108] sm:$0xff]  }
 0x47d   :  { %7327 = vtanh.f32 %v9195_v44  ;;  %v1496_v7 = vsel %vm1493_vm11, %v1495_v17, %v1491_v5  ;;  %v6566_v17 = vunpack.c.l.bf16 %v6972_v55 }
 0x47e   :  { %v1517_v27 = vadd.f32 %v7318_v35, %v1516_v34 }
 0x47f   :  { %v7320_v63 = vpop.eup %7319 }
 0x480   :  { %v1529_v21 = vmul.f32 %v7320_v63, %v1482_v19  ;;  %v7322_v1 = vpop.eup %7321  ;;  %v1521_v43 = vsel %vm9404_vm3, %v7318_v35, %v1517_v27  ;;  %vm1534_vm2 = vweird.f32 %v7320_v63  ;;  %v9462_v35 = vld [vmem:[%s12916_s2 + $0x18] sm:$0xff]  ;;  %v9483_v19 = vld [vmem:[%s12916_s2 + $0x30] sm:$0xff] }
 0x481   :  { %v7324_v10 = vpop.eup %7323  ;;  %v1526_v30 = vsel %vm1523_vm5, %v1525_v47, %v1521_v43  ;;  %vm1535_vm8 = vmor %vm1533_vm7, %vm1534_vm2  ;;  %v1560_v18 = vmul.f32 %v7322_v1, %v1511_v25  ;;  %v6578_v47 = vunpack.c.l.bf16 %v9501_v3 }
 0x482   :  { %v1530_v46 = vsub.f32 1.0, %v1529_v21  ;;  %v7326_v58 = vpop.eup %7325  ;;  %v1561_v59 = vmul.f32 %v7324_v10, %v1526_v30 }
 0x483   :  { %v7328_v6 = vpop.eup %7327 }
 0x484   :  { %v1531_v32 = vmul.f32 %v7320_v63, %v1530_v46  ;;  %v1559_v2 = vmul.f32 %v7328_v6, %v1496_v7 }
 0x486   :  { %v1532_v24 = vadd.f32 %v7320_v63, %v1531_v32  ;;  %v1596_v53 = vpack.c.bf16 %v1560_v18, %v1559_v2 }
 0x488   :  { %v1536_v28 = vsel %vm1535_vm8, %v7320_v63, %v1532_v24 }
 0x489   :  { %v1541_v20 = vsel %vm1538_vm10, %v1540_v40, %v1536_v28 }
 0x48a   :  { %v1562_v37 = vmul.f32 %v7326_v58, %v1541_v20 }
 0x48c   :  { %v1597_v50 = vpack.c.bf16 %v1562_v37, %v1561_v59 }
 0x48e   :  { %1604 = vmatpush.bf16.msrb.mxu0 %v1597_v50 }
 0x492   :  { %1605 = vmatpush.bf16.msrb.mxu0 %v1596_v53 }
 0x495   :  { %6172 = vmatmul.msk.bf16.vlgmr.msrb.gmra.mxu0 %vm165_vm0, %v9441_v0 }
 0x4a5   :  { %6173 = vmatmul.msk.bf16.gmra.mxu0 %vm165_vm0, %v9448_v15 }
 0x4b5   :  { %6174 = vmatmul.msk.bf16.gmra.mxu0 %vm165_vm0, %v9455_v9 }
 0x4c5   :  { %6175 = vmatmul.msk.bf16.gmra.mxu0 %vm165_vm0, %v9462_v35 }
 0x4d5   :  { %6176 = vmatmul.msk.bf16.gmra.mxu0 %vm165_vm0, %v9469_v29 }
 0x4e5   :  { %6177 = vmatmul.msk.bf16.gmra.mxu0 %vm165_vm0, %v9476_v42 }
 0x4f5   :  { %6178 = vmatmul.msk.bf16.gmra.mxu0 %vm165_vm0, %v9483_v19 }
 0x505   :  { %6179 = vmatmul.msk.bf16.gmra.mxu0 %vm165_vm0, %v9490_v31 }
 0x512   :  { %v1607_v57 = vpop.f32.mrf.mxu0 }
 0x513   :  { %v1647_v4 = vadd.f32 %v6562_v52, %v1607_v57  ;;  %v6567_v57 = vunpack.c.h.bf16 %v6972_v55  ;;  %v6974_v52 = vld [vmem:[#allocation5 + $0x118] sm:$0xff]  }
 0x515   :  { %v6180_v34 = vmul.f32 -1.442695, %v1647_v4 }
 0x517   :  { %7329 = vpow2.f32 %v6180_v34 }
 0x51a   :  { %v1609_v23 = vpop.f32.mrf.mxu0 }
 0x51b   :  { %v1648_v8 = vadd.f32 %v6563_v13, %v1609_v23 }
 0x51d   :  { %v7330_v21 = vpop.eup %7329  ;;  %v6181_v37 = vmul.f32 -1.442695, %v1648_v8 }
 0x51e   :  { %v1675_v60 = vadd.f32 1.0, %v7330_v21 }
 0x520   :  { %v1690_v28 = vand.u32 2147483648, %v1675_v60  ;;  %vm1684_vm3 = vweird.f32 %v1675_v60  ;;  %v1688_v5 = vand.u32 2147483647, %v1675_v60 }
 0x522   :  { %v1612_v16 = vpop.f32.mrf.mxu0  ;;  %v1691_v7 = vor.u32 1.1754944e-38, %v1690_v28  ;;  %vm1689_vm6 = vcmp.eq.f32.partialorder %v1688_v5, 8.507059e+37 }
 0x523   :  { %v1649_v2 = vadd.f32 %v6566_v17, %v1612_v16 }
 0x525   :  { %v6182_v34 = vmul.f32 -1.442695, %v1649_v2 }
 0x52a   :  { %v9494_v54 = vpop.f32.mrf.mxu0 }
 0x532   :  { %v1617_v63 = vpop.f32.mrf.mxu0 }
 0x533   :  { %v1651_v41 = vadd.f32 %v6570_v51, %v1617_v63  ;;  %v6571_v51 = vunpack.c.h.bf16 %v9496_v49  ;;  %v1650_v63 = vadd.f32 %v6567_v57, %v9494_v54 }
 0x535   :  { %v6184_v27 = vmul.f32 -1.442695, %v1651_v41  ;;  %v6574_v41 = vunpack.c.l.bf16 %v6974_v52 }
 0x537   :  { %7331 = vpow2.f32 %v6184_v27  ;;  %v6575_v27 = vunpack.c.h.bf16 %v6974_v52 }
 0x538   :  { %7333 = vrcp.f32 %v1675_v60 }
 0x53a   :  { %v9499_v62 = vpop.f32.mrf.mxu0 }
 0x53b   :  { %v1652_v16 = vadd.f32 %v6571_v51, %v9499_v62 }
 0x53d   :  { %v7332_v46 = vpop.eup %7331 }
 0x53e   :  { %v1751_v33 = vadd.f32 1.0, %v7332_v46  ;;  %v7334_v22 = vpop.eup %7333  ;;  %v6183_v46 = vmul.f32 -1.442695, %v1650_v63  ;;  %v6976_v63 = vld [vmem:[#allocation5 + $0x128] sm:$0xff]  }
 0x53f   :  { %v1680_v12 = vmul.f32 %v7334_v22, %v1675_v60  ;;  %vm1685_vm15 = vweird.f32 %v7334_v22 }
 0x540   :  { %7335 = vrcp.f32 %v1751_v33  ;;  %v1766_v24 = vand.u32 2147483648, %v1751_v33  ;;  %vm1760_vm14 = vweird.f32 %v1751_v33  ;;  %v1764_v40 = vand.u32 2147483647, %v1751_v33  ;;  %vm1686_vm2 = vmor %vm1684_vm3, %vm1685_vm15 }
 0x541   :  { %v1681_v32 = vsub.f32 1.0, %v1680_v12 }
 0x542   :  { %v1622_v14 = vpop.f32.mrf.mxu0  ;;  %v1767_v25 = vor.u32 1.1754944e-38, %v1766_v24  ;;  %vm1765_vm4 = vcmp.eq.f32.partialorder %v1764_v40, 8.507059e+37 }
 0x543   :  { %v1682_v45 = vmul.f32 %v7334_v22, %v1681_v32 }
 0x545   :  { %v1683_v30 = vadd.f32 %v7334_v22, %v1682_v45 }
 0x546   :  { %v7336_v11 = vpop.eup %7335 }
 0x547   :  { %v1756_v38 = vmul.f32 %v7336_v11, %v1751_v33  ;;  %vm1761_vm13 = vweird.f32 %v7336_v11  ;;  %v1687_v59 = vsel %vm1686_vm2, %v7334_v22, %v1683_v30 }
 0x548   :  { %vm1762_vm1 = vmor %vm1760_vm14, %vm1761_vm13  ;;  %v1692_v53 = vsel %vm1689_vm6, %v1691_v7, %v1687_v59  ;;  %v9545_v7 = vld [vmem:[#allocation5 + $0x138] sm:$0xff]  }
 0x549   :  { %v1757_v1 = vsub.f32 1.0, %v1756_v38  ;;  %v6590_v52 = vunpack.c.l.bf16 %v9545_v7 }
 0x54a   :  { %v1624_v43 = vpop.f32.mrf.mxu0 }
 0x54b   :  { %v1758_v10 = vmul.f32 %v7336_v11, %v1757_v1  ;;  %v1654_v33 = vadd.f32 %v6575_v27, %v1624_v43 }
 0x54d   :  { %v1759_v58 = vadd.f32 %v7336_v11, %v1758_v10  ;;  %v6187_v49 = vmul.f32 -1.442695, %v1654_v33  ;;  %v6977_v10 = vld [vmem:[#allocation5 + $0x130] sm:$0xff]  }
 0x54e   :  { %v6586_v24 = vunpack.c.l.bf16 %v6977_v10  ;;  %v6587_v40 = vunpack.c.h.bf16 %v6977_v10 }
 0x54f   :  { %v1763_v20 = vsel %vm1762_vm1, %v7336_v11, %v1759_v58  ;;  %v6185_v11 = vmul.f32 -1.442695, %v1652_v16 }
 0x550   :  { %v1768_v50 = vsel %vm1765_vm4, %v1767_v25, %v1763_v20 }
 0x551   :  { %v1895_v23 = vmul.f32 %v1768_v50, %v9195_v44  ;;  %v1653_v44 = vadd.f32 %v6574_v41, %v1622_v14 }
 0x552   :  { %v1627_v36 = vpop.f32.mrf.mxu0 }
 0x553   :  { %v1655_v26 = vadd.f32 %v6578_v47, %v1627_v36  ;;  %v6186_v38 = vmul.f32 -1.442695, %v1653_v44  ;;  %v6579_v44 = vunpack.c.h.bf16 %v9501_v3 }
 0x555   :  { %7337 = vtanh.f32 %v1655_v26 }
 0x556   :  { %7339 = vpow2.f32 %v6181_v37 }
 0x557   :  { %7341 = vpow2.f32 %v6182_v34 }
 0x558   :  { %7343 = vpow2.f32 %v6183_v46 }
 0x55a   :  { %v9504_v18 = vpop.f32.mrf.mxu0 }
 0x55b   :  { %v7338_v6 = vpop.eup %7337 }
 0x55c   :  { %v1899_v56 = vmul.f32 %v7338_v6, %v1692_v53  ;;  %v7340_v60 = vpop.eup %7339 }
 0x55d   :  { %v9514_v22 = vadd.f32 1.0, %v7340_v60  ;;  %v7342_v12 = vpop.eup %7341 }
 0x55e   :  { %v9507_v4 = vadd.f32 %v1899_v56, %v1895_v23  ;;  %v9519_v1 = vadd.f32 1.0, %v7342_v12  ;;  %v7344_v62 = vpop.eup %7343 }
 0x55f   :  { %7345 = vrcp.f32 %v9514_v22  ;;  %v9524_v43 = vadd.f32 1.0, %v7344_v62  ;;  %v1703_v57 = vand.u32 2147483647, %v9514_v22  ;;  %v1705_v56 = vand.u32 2147483648, %v9514_v22 }
 0x560   :  { %7347 = vpow2.f32 %v6185_v11  ;;  %v1720_v41 = vand.u32 2147483648, %v9519_v1  ;;  %vm1699_vm7 = vweird.f32 %v9514_v22  ;;  %vm1714_vm10 = vweird.f32 %v9519_v1 }
 0x561   :  { %7349 = vpow2.f32 %v6186_v38  ;;  %vm9568_vm9 = vcmp.eq.f32.partialorder %v1703_v57, 8.507059e+37  ;;  %v1718_v3 = vand.u32 2147483647, %v9519_v1  ;;  %vm1729_vm13 = vweird.f32 %v9524_v43 }
 0x562   :  { %v9511_v21 = vpop.f32.mrf.mxu0  ;;  %7351 = vpow2.f32 %v6187_v49  ;;  %v6582_v49 = vunpack.c.l.bf16 %v6976_v63  ;;  %v9583_v10 = vor.u32 1.1754944e-38, %v1720_v41 }
 0x563   :  { %7353 = vrcp.f32 %v9519_v1  ;;  %vm9616_vm14 = vcmp.eq.f32.partialorder %v1718_v3, 8.507059e+37 }
 0x564   :  { %7355 = vrcp.f32 %v9524_v43 }
 0x565   :  { %v9521_v32 = vpop.eup %7345 }
 0x566   :  { %v7348_v14 = vpop.eup %7347  ;;  %v1695_v36 = vmul.f32 %v9521_v32, %v9514_v22  ;;  %vm1700_vm5 = vweird.f32 %v9521_v32  ;;  %v1706_v22 = vor.u32 1.1754944e-38, %v1705_v56 }
 0x567   :  { %v7350_v47 = vpop.eup %7349  ;;  %v9528_v58 = vadd.f32 1.0, %v7348_v14  ;;  %vm9574_vm8 = vmor %vm1699_vm7, %vm1700_vm5 }
 0x568   :  { %v7352_v13 = vpop.eup %7351  ;;  %v9531_v26 = vadd.f32 1.0, %v7350_v47  ;;  %v1696_v8 = vsub.f32 1.0, %v1695_v36 }
 0x569   :  { %v9533_v55 = vpop.eup %7353  ;;  %v9535_v30 = vadd.f32 1.0, %v7352_v13  ;;  %7357 = vrcp.f32 %v9528_v58  ;;  %vm1775_vm1 = vweird.f32 %v9528_v58  ;;  %v1781_v41 = vand.u32 2147483648, %v9528_v58 }
 0x56a   :  { %v9517_v54 = vpop.f32.mrf.mxu0  ;;  %v1710_v5 = vmul.f32 %v9533_v55, %v9519_v1  ;;  %7359 = vrcp.f32 %v9531_v26  ;;  %v9542_v17 = vpop.eup %7355  ;;  %v1697_v59 = vmul.f32 %v9521_v32, %v1696_v8  ;;  %vm1715_vm12 = vweird.f32 %v9533_v55 }
 0x56b   :  { %7361 = vrcp.f32 %v9535_v30  ;;  %v1725_v53 = vmul.f32 %v9542_v17, %v9524_v43  ;;  %v1656_v8 = vadd.f32 %v6579_v44, %v9504_v18  ;;  %vm9599_vm11 = vmor %vm1714_vm10, %vm1715_vm12  ;;  %v1733_v18 = vand.u32 2147483647, %v9524_v43 }
 0x56c   :  { %v1711_v50 = vsub.f32 1.0, %v1710_v5  ;;  %v1698_v51 = vadd.f32 %v9521_v32, %v1697_v59  ;;  %vm1730_vm15 = vweird.f32 %v9542_v17  ;;  %v1796_v33 = vand.u32 2147483648, %v9531_v26 }
 0x56d   :  { %v1726_v16 = vsub.f32 1.0, %v1725_v53  ;;  %vm9641_vm6 = vmor %vm1729_vm13, %vm1730_vm15  ;;  %vm1790_vm7 = vweird.f32 %v9531_v26  ;;  %vm1734_vm12 = vcmp.eq.f32.partialorder %v1733_v18, 8.507059e+37 }
 0x56e   :  { %v1712_v60 = vmul.f32 %v9533_v55, %v1711_v50  ;;  %v1702_v14 = vsel %vm9574_vm8, %v9521_v32, %v1698_v51  ;;  %vm1805_vm8 = vweird.f32 %v9535_v30 }
 0x56f   :  { %v9547_v2 = vpop.eup %7357  ;;  %v1727_v32 = vmul.f32 %v9542_v17, %v1726_v16  ;;  %v9595_v59 = vsel %vm9568_vm9, %v1706_v22, %v1702_v14 }
 0x570   :  { %v9552_v23 = vpop.eup %7359  ;;  %v1771_v27 = vmul.f32 %v9547_v2, %v9528_v58  ;;  %v9586_v13 = vadd.f32 %v9533_v55, %v1712_v60  ;;  %vm1776_vm3 = vweird.f32 %v9547_v2 }
 0x571   :  { %v9556_v34 = vpop.eup %7361  ;;  %v1786_v46 = vmul.f32 %v9552_v23, %v9531_v26  ;;  %vm1791_vm2 = vweird.f32 %v9552_v23  ;;  %vm9648_vm5 = vmor %vm1775_vm1, %vm1776_vm3 }
 0x572   :  { %v1637_v45 = vpop.f32.mrf.mxu0  ;;  %v1801_v38 = vmul.f32 %v9556_v34, %v9535_v30  ;;  %vm1806_vm4 = vweird.f32 %v9556_v34  ;;  %vm9658_vm9 = vmor %vm1790_vm7, %vm1791_vm2 }
 0x573   :  { %v1659_v28 = vadd.f32 %v6586_v24, %v1637_v45  ;;  %v1772_v45 = vsub.f32 1.0, %v1771_v27  ;;  %v1779_v27 = vand.u32 2147483647, %v9528_v58  ;;  %vm9674_vm10 = vmor %vm1805_vm8, %vm1806_vm4 }
 0x574   :  { %v1802_v5 = vsub.f32 1.0, %v1801_v38 }
 0x575   :  { %v6188_v37 = vmul.f32 -1.442695, %v1659_v28  ;;  %v6583_v28 = vunpack.c.h.bf16 %v6976_v63 }
 0x576   :  { %v1803_v51 = vmul.f32 %v9556_v34, %v1802_v5 }
 0x577   :  { %v1658_v56 = vadd.f32 %v6583_v28, %v9517_v54 }
 0x578   :  { %v1804_v38 = vadd.f32 %v9556_v34, %v1803_v51 }
 0x57a   :  { %v1639_v20 = vpop.f32.mrf.mxu0 }
 0x57b   :  { %v1660_v25 = vadd.f32 %v6587_v40, %v1639_v20  ;;  %v1787_v40 = vsub.f32 1.0, %v1786_v46  ;;  %v1657_v20 = vadd.f32 %v6582_v49, %v9511_v21  ;;  %v1773_v21 = vmul.f32 %v9547_v2, %v1772_v45 }
 0x57c   :  { %v1811_v49 = vand.u32 2147483648, %v9535_v30  ;;  %v1782_v45 = vor.u32 1.1754944e-38, %v1781_v41 }
 0x57d   :  { %v6189_v6 = vmul.f32 -1.442695, %v1660_v25  ;;  %v6591_v25 = vunpack.c.h.bf16 %v9545_v7  ;;  %v1717_v7 = vsel %vm9599_vm11, %v9533_v55, %v9586_v13  ;;  %v1788_v53 = vmul.f32 %v9552_v23, %v1787_v40 }
 0x57e   :  { %v1728_v55 = vadd.f32 %v9542_v17, %v1727_v32  ;;  %v1774_v54 = vadd.f32 %v9547_v2, %v1773_v21  ;;  %vm1780_vm11 = vcmp.eq.f32.partialorder %v1779_v27, 8.507059e+37  ;;  %v1808_v40 = vsel %vm9674_vm10, %v9556_v34, %v1804_v38 }
 0x57f   :  { %7363 = vpow2.f32 %v6189_v6  ;;  %v1735_v6 = vand.u32 2147483648, %v9524_v43  ;;  %v1789_v46 = vadd.f32 %v9552_v23, %v1788_v53  ;;  %v1794_v43 = vand.u32 2147483647, %v9531_v26 }
 0x580   :  { %7365 = vpow2.f32 %v6188_v37  ;;  %v1778_v58 = vsel %vm9648_vm5, %v9547_v2, %v1774_v54  ;;  %v1732_v3 = vsel %vm9641_vm6, %v9542_v17, %v1728_v55  ;;  %v1809_v26 = vand.u32 2147483647, %v9535_v30 }
 0x581   :  { %v1736_v2 = vor.u32 1.1754944e-38, %v1735_v6  ;;  %v1797_v17 = vor.u32 1.1754944e-38, %v1796_v33  ;;  %v1722_v30 = vsel %vm9616_vm14, %v9583_v10, %v1717_v7  ;;  %v1812_v28 = vor.u32 1.1754944e-38, %v1811_v49 }
 0x582   :  { %v1642_v11 = vpop.f32.mrf.mxu0  ;;  %v1783_v32 = vsel %vm1780_vm11, %v1782_v45, %v1778_v58  ;;  %vm1795_vm13 = vcmp.eq.f32.partialorder %v1794_v43, 8.507059e+37  ;;  %vm1810_vm15 = vcmp.eq.f32.partialorder %v1809_v26, 8.507059e+37 }
 0x583   :  { %v1661_v62 = vadd.f32 %v6590_v52, %v1642_v11  ;;  %v1737_v5 = vsel %vm1734_vm12, %v1736_v2, %v1732_v3  ;;  %v1813_v10 = vsel %vm1810_vm15, %v1812_v28, %v1808_v40  ;;  %v1896_v6 = vmul.f32 %v1783_v32, %v9385_v39 }
 0x585   :  { %v7364_v47 = vpop.eup %7363  ;;  %v6190_v36 = vmul.f32 -1.442695, %v1661_v62 }
 0x586   :  { %v7366_v24 = vpop.eup %7365  ;;  %v9605_v50 = vadd.f32 1.0, %v7364_v47 }
 0x587   :  { %7367 = vpow2.f32 %v6190_v36  ;;  %v9613_v1 = vadd.f32 1.0, %v7366_v24  ;;  %v1793_v36 = vsel %vm9658_vm9, %v9552_v23, %v1789_v46 }
 0x588   :  { %7369 = vtanh.f32 %v1656_v8  ;;  %vm1855_vm3 = vweird.f32 %v9605_v50  ;;  %v1859_v43 = vand.u32 2147483647, %v9605_v50 }
 0x589   :  { %7371 = vtanh.f32 %v1657_v20  ;;  %vm1840_vm7 = vweird.f32 %v9613_v1  ;;  %v1844_v13 = vand.u32 2147483647, %v9613_v1 }
 0x58a   :  { %v1644_v52 = vpop.f32.mrf.mxu0  ;;  %7373 = vrcp.f32 %v9605_v50  ;;  %vm1860_vm15 = vcmp.eq.f32.partialorder %v1859_v43, 8.507059e+37 }
 0x58b   :  { %v1662_v63 = vadd.f32 %v6591_v25, %v1644_v52  ;;  %7375 = vrcp.f32 %v9613_v1  ;;  %v1798_v25 = vsel %vm1795_vm13, %v1797_v17, %v1793_v36  ;;  %v1898_v52 = vmul.f32 %v1813_v10, %v9390_v48 }
 0x58c   :  { %7377 = vtanh.f32 %v1658_v56  ;;  %v1897_v56 = vmul.f32 %v1798_v25, %v9388_v61  ;;  %v1846_v36 = vand.u32 2147483648, %v9613_v1 }
 0x58d   :  { %v7368_v60 = vpop.eup %7367  ;;  %v6191_v16 = vmul.f32 -1.442695, %v1662_v63 }
 0x58e   :  { %v9633_v44 = vadd.f32 1.0, %v7368_v60  ;;  %v7370_v12 = vpop.eup %7369 }
 0x58f   :  { %7379 = vpow2.f32 %v6191_v16  ;;  %v7372_v62 = vpop.eup %7371  ;;  %v1900_v20 = vmul.f32 %v7370_v12, %v9595_v59  ;;  %v9773_v12 = vld [vmem:[#allocation5 + $0x160] sm:$0xff]  }
 0x590   :  { %7381 = vrcp.f32 %v9633_v44  ;;  %v9670_v47 = vpop.eup %7373  ;;  %v1901_v21 = vmul.f32 %v7372_v62, %v1722_v30  ;;  %v1876_v46 = vand.u32 2147483648, %v9633_v44  ;;  %vm1870_vm4 = vweird.f32 %v9633_v44 }
 0x591   :  { %v9681_v24 = vpop.eup %7375  ;;  %v1851_v37 = vmul.f32 %v9670_v47, %v9605_v50  ;;  %v9697_v59 = vadd.f32 %v1900_v20, %v1896_v6  ;;  %vm1856_vm2 = vweird.f32 %v9670_v47  ;;  %v1874_v33 = vand.u32 2147483647, %v9633_v44 }
 0x592   :  { %v7378_v8 = vpop.eup %7377  ;;  %v1836_v34 = vmul.f32 %v9681_v24, %v9613_v1  ;;  %v9700_v63 = vadd.f32 %v1901_v21, %v1897_v56  ;;  %vm1841_vm1 = vweird.f32 %v9681_v24  ;;  %v1861_v62 = vand.u32 2147483648, %v9605_v50  ;;  %vm9732_vm9 = vmor %vm1855_vm3, %vm1856_vm2 }
 0x593   :  { %v1902_v53 = vmul.f32 %v7378_v8, %v1737_v5  ;;  %v1852_v55 = vsub.f32 1.0, %v1851_v37  ;;  %v1877_v45 = vor.u32 1.1754944e-38, %v1876_v46  ;;  %vm1875_vm8 = vcmp.eq.f32.partialorder %v1874_v33, 8.507059e+37  ;;  %vm9738_vm12 = vmor %vm1840_vm7, %vm1841_vm1 }
 0x594   :  { %v1837_v41 = vsub.f32 1.0, %v1836_v34  ;;  %v1862_v28 = vor.u32 1.1754944e-38, %v1861_v62  ;;  %v1847_v20 = vor.u32 1.1754944e-38, %v1846_v36 }
 0x595   :  { %v7380_v23 = vpop.eup %7379  ;;  %v9702_v27 = vadd.f32 %v1902_v53, %v1898_v52  ;;  %v1853_v39 = vmul.f32 %v9670_v47, %v1852_v55  ;;  %v6593_v53 = vld [vmem:[#allocation5 + $0x140] sm:$0xff]  }
 0x596   :  { %v7382_v18 = vpop.eup %7381  ;;  %v1834_v7 = vadd.f32 1.0, %v7380_v23  ;;  %v1838_v61 = vmul.f32 %v9681_v24, %v1837_v41  ;;  %v6595_v62 = vunpack.c.h.bf16 %v6593_v53 }
 0x597   :  { %v1866_v57 = vmul.f32 %v7382_v18, %v9633_v44  ;;  %vm1871_vm14 = vweird.f32 %v7382_v18  ;;  %v1854_v38 = vadd.f32 %v9670_v47, %v1853_v39 }
 0x598   :  { %7383 = vrcp.f32 %v1834_v7  ;;  %vm9716_vm6 = vmor %vm1870_vm4, %vm1871_vm14  ;;  %v1891_v22 = vand.u32 2147483648, %v1834_v7  ;;  %v1839_v49 = vadd.f32 %v9681_v24, %v1838_v61  ;;  %v1889_v44 = vand.u32 2147483647, %v1834_v7 }
 0x599   :  { %v1867_v51 = vsub.f32 1.0, %v1866_v57  ;;  %7385 = vtanh.f32 %v9697_v59  ;;  %vm1885_vm10 = vweird.f32 %v1834_v7  ;;  %v1858_v1 = vsel %vm9732_vm9, %v9670_v47, %v1854_v38 }
 0x59a   :  { %7387 = vtanh.f32 %v9700_v63  ;;  %v1892_v50 = vor.u32 1.1754944e-38, %v1891_v22  ;;  %vm1890_vm13 = vcmp.eq.f32.partialorder %v1889_v44, 8.507059e+37  ;;  %v1843_v5 = vsel %vm9738_vm12, %v9681_v24, %v1839_v49 }
 0x59b   :  { %v1868_v60 = vmul.f32 %v7382_v18, %v1867_v51  ;;  %7389 = vtanh.f32 %v9702_v27  ;;  %v1863_v25 = vsel %vm1860_vm15, %v1862_v28, %v1858_v1  ;;  %vm1845_vm14 = vcmp.eq.f32.partialorder %v1844_v13, 8.507059e+37 }
 0x59c   :  { %7391 = vtanh.f32 %v9507_v4  ;;  %v1848_v47 = vsel %vm1845_vm14, %v1847_v20, %v1843_v5  ;;  %v6610_v49 = vunpack.c.l.bf16 %v9773_v12 }
 0x59d   :  { %v1869_v16 = vadd.f32 %v7382_v18, %v1868_v60 }
 0x59e   :  { %v7384_v54 = vpop.eup %7383 }
 0x59f   :  { %v1881_v48 = vmul.f32 %v7384_v54, %v1834_v7  ;;  %v7386_v14 = vpop.eup %7385  ;;  %v1873_v58 = vsel %vm9716_vm6, %v7382_v18, %v1869_v16  ;;  %vm1886_vm5 = vweird.f32 %v7384_v54 }
 0x5a0   :  { %v7388_v26 = vpop.eup %7387  ;;  %v1878_v8 = vsel %vm1875_vm8, %v1877_v45, %v1873_v58  ;;  %vm1887_vm11 = vmor %vm1885_vm10, %vm1886_vm5  ;;  %v1912_v10 = vmul.f32 %v7386_v14, %v1863_v25 }
 0x5a1   :  { %v1882_v11 = vsub.f32 1.0, %v1881_v48  ;;  %v7390_v17 = vpop.eup %7389  ;;  %v1913_v37 = vmul.f32 %v7388_v26, %v1878_v8  ;;  %v6979_v26 = vld [vmem:[#allocation5 + $0x148] sm:$0xff]  }
 0x5a2   :  { %v7392_v7 = vpop.eup %7391  ;;  %v6598_v40 = vunpack.c.l.bf16 %v6979_v26 }
 0x5a3   :  { %v1883_v3 = vmul.f32 %v7384_v54, %v1882_v11  ;;  %v1911_v34 = vmul.f32 %v7392_v7, %v1848_v47 }
 0x5a5   :  { %v1884_v30 = vadd.f32 %v7384_v54, %v1883_v3  ;;  %v1948_v6 = vpack.c.bf16 %v1912_v10, %v1911_v34 }
 0x5a7   :  { %v1888_v32 = vsel %vm1887_vm11, %v7384_v54, %v1884_v30 }
 0x5a8   :  { %v1893_v23 = vsel %vm1890_vm13, %v1892_v50, %v1888_v32 }
 0x5a9   :  { %v1914_v18 = vmul.f32 %v7390_v17, %v1893_v23 }
 0x5ab   :  { %v1949_v21 = vpack.c.bf16 %v1914_v18, %v1913_v37  ;;  %v6599_v37 = vunpack.c.h.bf16 %v6979_v26 }
 0x5ad   :  { %1956 = vmatpush.bf16.msrb.mxu1 %v1949_v21  ;;  %v6981_v21 = vld [vmem:[#allocation5 + $0x158] sm:$0xff]  }
 0x5b1   :  { %1957 = vmatpush.bf16.msrb.mxu1 %v1948_v6 }
 0x5b4   :  { %6192 = vmatmul.msk.bf16.vlgmr.msrb.gmra.mxu1 %vm165_vm0, %v9441_v0 }
 0x5c4   :  { %6193 = vmatmul.msk.bf16.gmra.mxu1 %vm165_vm0, %v9448_v15 }
 0x5d4   :  { %6194 = vmatmul.msk.bf16.gmra.mxu1 %vm165_vm0, %v9455_v9  ;;  %v6594_v9 = vunpack.c.l.bf16 %v6593_v53 }
 0x5e4   :  { %6195 = vmatmul.msk.bf16.gmra.mxu1 %vm165_vm0, %v9462_v35  ;;  %v9768_v35 = vld [vmem:[#allocation5 + $0x150] sm:$0xff]  }
 0x5e5   :  { %v6602_v52 = vunpack.c.l.bf16 %v9768_v35  ;;  %v6603_v34 = vunpack.c.h.bf16 %v9768_v35 }
 0x5f4   :  { %6196 = vmatmul.msk.bf16.gmra.mxu1 %vm165_vm0, %v9469_v29 }
 0x604   :  { %6197 = vmatmul.msk.bf16.gmra.mxu1 %vm165_vm0, %v9476_v42 }
 0x614   :  { %6198 = vmatmul.msk.bf16.gmra.mxu1 %vm165_vm0, %v9483_v19 }
 0x624   :  { %6199 = vmatmul.msk.bf16.gmra.mxu1 %vm165_vm0, %v9490_v31 }
 0x631   :  { %v1959_v0 = vpop.f32.mrf.mxu1 }
 0x632   :  { %v1999_v57 = vadd.f32 %v6594_v9, %v1959_v0  ;;  %v6606_v0 = vunpack.c.l.bf16 %v6981_v21 }
 0x634   :  { %v6200_v29 = vmul.f32 -1.442695, %v1999_v57 }
 0x636   :  { %7393 = vpow2.f32 %v6200_v29 }
 0x639   :  { %v1961_v15 = vpop.f32.mrf.mxu1 }
 0x63a   :  { %v2000_v36 = vadd.f32 %v6595_v62, %v1961_v15  ;;  %v6607_v15 = vunpack.c.h.bf16 %v6981_v21 }
 0x63c   :  { %v7394_v55 = vpop.eup %7393  ;;  %v6201_v50 = vmul.f32 -1.442695, %v2000_v36  ;;  %v9817_v36 = vld [vmem:[#allocation5 + $0x178] sm:$0xff]  }
 0x63d   :  { %v2027_v41 = vadd.f32 1.0, %v7394_v55 }
 0x63f   :  { %v2042_v2 = vand.u32 2147483648, %v2027_v41  ;;  %vm2036_vm6 = vweird.f32 %v2027_v41  ;;  %v2040_v17 = vand.u32 2147483647, %v2027_v41 }
 0x641   :  { %v1964_v24 = vpop.f32.mrf.mxu1  ;;  %v2043_v28 = vor.u32 1.1754944e-38, %v2042_v2  ;;  %vm2041_vm9 = vcmp.eq.f32.partialorder %v2040_v17, 8.507059e+37 }
 0x642   :  { %v2001_v20 = vadd.f32 %v6598_v40, %v1964_v24 }
 0x644   :  { %v6202_v7 = vmul.f32 -1.442695, %v2001_v20  ;;  %v6983_v20 = vld [vmem:[#allocation5 + $0x168] sm:$0xff]  }
 0x649   :  { %v9766_v56 = vpop.f32.mrf.mxu1 }
 0x64a   :  { %v2002_v6 = vadd.f32 %v6599_v37, %v9766_v56 }
 0x64c   :  { %v6203_v57 = vmul.f32 -1.442695, %v2002_v6 }
 0x651   :  { %v1969_v42 = vpop.f32.mrf.mxu1 }
 0x652   :  { %v2003_v51 = vadd.f32 %v6602_v52, %v1969_v42 }
 0x654   :  { %v6204_v19 = vmul.f32 -1.442695, %v2003_v51 }
 0x656   :  { %7395 = vpow2.f32 %v6204_v19 }
 0x657   :  { %7397 = vrcp.f32 %v2027_v41 }
 0x659   :  { %v9771_v31 = vpop.f32.mrf.mxu1 }
 0x65a   :  { %v2004_v24 = vadd.f32 %v6603_v34, %v9771_v31 }
 0x65c   :  { %v7396_v60 = vpop.eup %7395  ;;  %v6205_v42 = vmul.f32 -1.442695, %v2004_v24  ;;  %v6614_v24 = vunpack.c.l.bf16 %v6983_v20 }
 0x65d   :  { %v2103_v39 = vadd.f32 1.0, %v7396_v60  ;;  %v7398_v61 = vpop.eup %7397 }
 0x65e   :  { %v2032_v46 = vmul.f32 %v7398_v61, %v2027_v41  ;;  %vm2037_vm2 = vweird.f32 %v7398_v61 }
 0x65f   :  { %7399 = vrcp.f32 %v2103_v39  ;;  %v2118_v3 = vand.u32 2147483648, %v2103_v39  ;;  %vm2112_vm3 = vweird.f32 %v2103_v39  ;;  %v2116_v13 = vand.u32 2147483647, %v2103_v39  ;;  %vm2038_vm5 = vmor %vm2036_vm6, %vm2037_vm2 }
 0x660   :  { %v2033_v38 = vsub.f32 1.0, %v2032_v46 }
 0x661   :  { %v1974_v54 = vpop.f32.mrf.mxu1  ;;  %v2119_v1 = vor.u32 1.1754944e-38, %v2118_v3  ;;  %vm2117_vm7 = vcmp.eq.f32.partialorder %v2116_v13, 8.507059e+37 }
 0x662   :  { %v2034_v43 = vmul.f32 %v7398_v61, %v2033_v38 }
 0x664   :  { %v2035_v45 = vadd.f32 %v7398_v61, %v2034_v43 }
 0x665   :  { %v7400_v16 = vpop.eup %7399 }
 0x666   :  { %v2108_v48 = vmul.f32 %v7400_v16, %v2103_v39  ;;  %vm2113_vm1 = vweird.f32 %v7400_v16  ;;  %v2039_v8 = vsel %vm2038_vm5, %v7398_v61, %v2035_v45 }
 0x667   :  { %vm2114_vm4 = vmor %vm2112_vm3, %vm2113_vm1  ;;  %v2044_v25 = vsel %vm2041_vm9, %v2043_v28, %v2039_v8  ;;  %v6622_v28 = vunpack.c.l.bf16 %v9817_v36 }
 0x668   :  { %v2109_v33 = vsub.f32 1.0, %v2108_v48 }
 0x669   :  { %v1976_v11 = vpop.f32.mrf.mxu1 }
 0x66a   :  { %v2110_v22 = vmul.f32 %v7400_v16, %v2109_v33  ;;  %v2006_v29 = vadd.f32 %v6607_v15, %v1976_v11 }
 0x66c   :  { %v2111_v58 = vadd.f32 %v7400_v16, %v2110_v22  ;;  %v6207_v35 = vmul.f32 -1.442695, %v2006_v29 }
 0x66e   :  { %v2115_v30 = vsel %vm2114_vm4, %v7400_v16, %v2111_v58 }
 0x66f   :  { %v2120_v32 = vsel %vm2117_vm7, %v2119_v1, %v2115_v30 }
 0x670   :  { %v2247_v18 = vmul.f32 %v2120_v32, %v9507_v4  ;;  %v2005_v4 = vadd.f32 %v6606_v0, %v1974_v54  ;;  %v6984_v54 = vld [vmem:[#allocation5 + $0x170] sm:$0xff]  }
 0x671   :  { %v1979_v14 = vpop.f32.mrf.mxu1  ;;  %v6618_v11 = vunpack.c.l.bf16 %v6984_v54  ;;  %v6619_v43 = vunpack.c.h.bf16 %v6984_v54  ;;  %v6615_v54 = vunpack.c.h.bf16 %v6983_v20 }
 0x672   :  { %v2007_v44 = vadd.f32 %v6610_v49, %v1979_v14  ;;  %v6206_v51 = vmul.f32 -1.442695, %v2005_v4 }
 0x674   :  { %7401 = vtanh.f32 %v2007_v44 }
 0x675   :  { %7403 = vpow2.f32 %v6201_v50 }
 0x676   :  { %7405 = vpow2.f32 %v6202_v7  ;;  %v6611_v7 = vunpack.c.h.bf16 %v9773_v12 }
 0x677   :  { %7407 = vpow2.f32 %v6203_v57 }
 0x679   :  { %v9776_v5 = vpop.f32.mrf.mxu1 }
 0x67a   :  { %v7402_v23 = vpop.eup %7401 }
 0x67b   :  { %v2251_v47 = vmul.f32 %v7402_v23, %v2044_v25  ;;  %v7404_v9 = vpop.eup %7403 }
 0x67c   :  { %v9786_v52 = vadd.f32 1.0, %v7404_v9  ;;  %v7406_v19 = vpop.eup %7405 }
 0x67d   :  { %v9779_v10 = vadd.f32 %v2251_v47, %v2247_v18  ;;  %v9791_v55 = vadd.f32 1.0, %v7406_v19  ;;  %v7408_v31 = vpop.eup %7407 }
 0x67e   :  { %7409 = vrcp.f32 %v9786_v52  ;;  %v9796_v39 = vadd.f32 1.0, %v7408_v31  ;;  %v2055_v1 = vand.u32 2147483647, %v9786_v52  ;;  %v2057_v50 = vand.u32 2147483648, %v9786_v52 }
 0x67f   :  { %7411 = vpow2.f32 %v6205_v42  ;;  %v2072_v25 = vand.u32 2147483648, %v9791_v55  ;;  %vm2051_vm10 = vweird.f32 %v9786_v52  ;;  %vm2066_vm13 = vweird.f32 %v9791_v55 }
 0x680   :  { %7413 = vpow2.f32 %v6206_v51  ;;  %vm9840_vm12 = vcmp.eq.f32.partialorder %v2055_v1, 8.507059e+37  ;;  %v2058_v9 = vor.u32 1.1754944e-38, %v2057_v50  ;;  %v2070_v12 = vand.u32 2147483647, %v9791_v55 }
 0x681   :  { %v9783_v53 = vpop.f32.mrf.mxu1  ;;  %7415 = vpow2.f32 %v6207_v35  ;;  %v9855_v29 = vor.u32 1.1754944e-38, %v2072_v25  ;;  %vm2081_vm1 = vweird.f32 %v9796_v39 }
 0x682   :  { %7417 = vrcp.f32 %v9791_v55  ;;  %vm9888_vm3 = vcmp.eq.f32.partialorder %v2070_v12, 8.507059e+37 }
 0x683   :  { %7419 = vrcp.f32 %v9796_v39 }
 0x684   :  { %v9793_v41 = vpop.eup %7409 }
 0x685   :  { %v7412_v60 = vpop.eup %7411  ;;  %v2047_v46 = vmul.f32 %v9793_v41, %v9786_v52  ;;  %vm2052_vm8 = vweird.f32 %v9793_v41 }
 0x686   :  { %v7414_v61 = vpop.eup %7413  ;;  %v9800_v33 = vadd.f32 1.0, %v7412_v60  ;;  %vm9846_vm11 = vmor %vm2051_vm10, %vm2052_vm8  ;;  %v2008_v60 = vadd.f32 %v6611_v7, %v9776_v5  ;;  %v2085_v5 = vand.u32 2147483647, %v9796_v39 }
 0x687   :  { %v7416_v48 = vpop.eup %7415  ;;  %v9803_v38 = vadd.f32 1.0, %v7414_v61  ;;  %v2048_v62 = vsub.f32 1.0, %v2047_v46 }
 0x688   :  { %v9805_v22 = vpop.eup %7417  ;;  %v9807_v49 = vadd.f32 1.0, %v7416_v48  ;;  %7421 = vrcp.f32 %v9800_v33  ;;  %v6623_v48 = vunpack.c.h.bf16 %v9817_v36  ;;  %vm2127_vm4 = vweird.f32 %v9800_v33 }
 0x689   :  { %v9789_v56 = vpop.f32.mrf.mxu1  ;;  %v2062_v58 = vmul.f32 %v9805_v22, %v9791_v55  ;;  %7423 = vrcp.f32 %v9803_v38  ;;  %v9814_v44 = vpop.eup %7419  ;;  %v2049_v45 = vmul.f32 %v9793_v41, %v2048_v62  ;;  %vm2067_vm15 = vweird.f32 %v9805_v22 }
 0x68a   :  { %7425 = vrcp.f32 %v9807_v49  ;;  %v2077_v40 = vmul.f32 %v9814_v44, %v9796_v39  ;;  %vm9871_vm14 = vmor %vm2066_vm13, %vm2067_vm15  ;;  %vm2082_vm2 = vweird.f32 %v9814_v44  ;;  %vm2142_vm10 = vweird.f32 %v9803_v38 }
 0x68b   :  { %v2063_v2 = vsub.f32 1.0, %v2062_v58  ;;  %v2050_v23 = vadd.f32 %v9793_v41, %v2049_v45  ;;  %vm9913_vm9 = vmor %vm2081_vm1, %vm2082_vm2  ;;  %vm2086_vm15 = vcmp.eq.f32.partialorder %v2085_v5, 8.507059e+37 }
 0x68c   :  { %v2078_v47 = vsub.f32 1.0, %v2077_v40 }
 0x68d   :  { %v2064_v18 = vmul.f32 %v9805_v22, %v2063_v2  ;;  %v2054_v4 = vsel %vm9846_vm11, %v9793_v41, %v2050_v23  ;;  %v2133_v2 = vand.u32 2147483648, %v9800_v33  ;;  %v2148_v23 = vand.u32 2147483648, %v9803_v38 }
 0x68e   :  { %v9819_v30 = vpop.eup %7421  ;;  %v2079_v41 = vmul.f32 %v9814_v44, %v2078_v47  ;;  %v9867_v46 = vsel %vm9840_vm12, %v2058_v9, %v2054_v4  ;;  %v2163_v47 = vand.u32 2147483648, %v9807_v49  ;;  %vm2157_vm11 = vweird.f32 %v9807_v49 }
 0x68f   :  { %v9824_v8 = vpop.eup %7423  ;;  %v2123_v37 = vmul.f32 %v9819_v30, %v9800_v33  ;;  %v9858_v51 = vadd.f32 %v9805_v22, %v2064_v18  ;;  %vm2128_vm6 = vweird.f32 %v9819_v30 }
 0x690   :  { %v9828_v32 = vpop.eup %7425  ;;  %v2138_v21 = vmul.f32 %v9824_v8, %v9803_v38  ;;  %vm2143_vm5 = vweird.f32 %v9824_v8  ;;  %vm9920_vm8 = vmor %vm2127_vm4, %vm2128_vm6  ;;  %v2164_v12 = vor.u32 1.1754944e-38, %v2163_v47 }
 0x691   :  { %v1989_v16 = vpop.f32.mrf.mxu1  ;;  %v2153_v0 = vmul.f32 %v9828_v32, %v9807_v49  ;;  %v2124_v42 = vsub.f32 1.0, %v2123_v37  ;;  %v2069_v62 = vsel %vm9871_vm14, %v9805_v22, %v9858_v51  ;;  %v2080_v22 = vadd.f32 %v9814_v44, %v2079_v41  ;;  %vm9930_vm12 = vmor %vm2142_vm10, %vm2143_vm5 }
 0x692   :  { %v2011_v14 = vadd.f32 %v6618_v11, %v1989_v16  ;;  %v2139_v31 = vsub.f32 1.0, %v2138_v21  ;;  %v2009_v16 = vadd.f32 %v6614_v24, %v9783_v53  ;;  %vm2158_vm7 = vweird.f32 %v9828_v32 }
 0x693   :  { %v2154_v61 = vsub.f32 1.0, %v2153_v0  ;;  %v2125_v53 = vmul.f32 %v9819_v30, %v2124_v42  ;;  %v2084_v34 = vsel %vm9913_vm9, %v9814_v44, %v2080_v22  ;;  %v2134_v0 = vor.u32 1.1754944e-38, %v2133_v2  ;;  %vm9946_vm13 = vmor %vm2157_vm11, %vm2158_vm7 }
 0x694   :  { %v6208_v13 = vmul.f32 -1.442695, %v2011_v14  ;;  %v2087_v14 = vand.u32 2147483648, %v9796_v39  ;;  %v2140_v58 = vmul.f32 %v9824_v8, %v2139_v31  ;;  %v2146_v39 = vand.u32 2147483647, %v9803_v38 }
 0x695   :  { %v2161_v38 = vand.u32 2147483647, %v9807_v49  ;;  %v2149_v44 = vor.u32 1.1754944e-38, %v2148_v23  ;;  %v2074_v49 = vsel %vm9888_vm3, %v9855_v29, %v2069_v62 }
 0x696   :  { %v2141_v50 = vadd.f32 %v9824_v8, %v2140_v58  ;;  %vm2147_vm1 = vcmp.eq.f32.partialorder %v2146_v39, 8.507059e+37 }
 0x697   :  { %vm2162_vm2 = vcmp.eq.f32.partialorder %v2161_v38, 8.507059e+37 }
 0x698   :  { %v2145_v9 = vsel %vm9930_vm12, %v9824_v8, %v2141_v50 }
 0x699   :  { %v1991_v3 = vpop.f32.mrf.mxu1 }
 0x69a   :  { %v2012_v26 = vadd.f32 %v6619_v43, %v1991_v3 }
 0x69c   :  { %v6209_v17 = vmul.f32 -1.442695, %v2012_v26  ;;  %v2010_v26 = vadd.f32 %v6615_v54, %v9789_v56  ;;  %v2126_v56 = vadd.f32 %v9819_v30, %v2125_v53 }
 0x69e   :  { %7427 = vpow2.f32 %v6209_v17  ;;  %v2131_v17 = vand.u32 2147483647, %v9800_v33  ;;  %v2130_v33 = vsel %vm9920_vm8, %v9819_v30, %v2126_v56  ;;  %v2088_v30 = vor.u32 1.1754944e-38, %v2087_v14 }
 0x69f   :  { %7429 = vpow2.f32 %v6208_v13  ;;  %v2155_v13 = vmul.f32 %v9828_v32, %v2154_v61 }
 0x6a0   :  { %vm2132_vm14 = vcmp.eq.f32.partialorder %v2131_v17, 8.507059e+37  ;;  %v2089_v42 = vsel %vm2086_vm15, %v2088_v30, %v2084_v34 }
 0x6a1   :  { %v1994_v6 = vpop.f32.mrf.mxu1  ;;  %v2156_v25 = vadd.f32 %v9828_v32, %v2155_v13 }
 0x6a2   :  { %v2013_v57 = vadd.f32 %v6622_v28, %v1994_v6 }
 0x6a4   :  { %v7428_v52 = vpop.eup %7427  ;;  %v6210_v19 = vmul.f32 -1.442695, %v2013_v57  ;;  %v2160_v57 = vsel %vm9946_vm13, %v9828_v32, %v2156_v25 }
 0x6a5   :  { %v7430_v35 = vpop.eup %7429  ;;  %v9877_v43 = vadd.f32 1.0, %v7428_v52  ;;  %v2135_v52 = vsel %vm2132_vm14, %v2134_v0, %v2130_v33  ;;  %v2165_v29 = vsel %vm2162_vm2, %v2164_v12, %v2160_v57 }
 0x6a6   :  { %7431 = vpow2.f32 %v6210_v19  ;;  %v9885_v55 = vadd.f32 1.0, %v7430_v35  ;;  %v2150_v19 = vsel %vm2147_vm1, %v2149_v44, %v2145_v9  ;;  %v2248_v41 = vmul.f32 %v2135_v52, %v9697_v59 }
 0x6a7   :  { %7433 = vtanh.f32 %v2008_v60  ;;  %v2250_v11 = vmul.f32 %v2165_v29, %v9702_v27  ;;  %vm2207_vm6 = vweird.f32 %v9877_v43  ;;  %v2213_v50 = vand.u32 2147483648, %v9877_v43  ;;  %v10060_v29 = vld [vmem:[%s12916_s2 + $0x28] sm:$0xff] }
 0x6a8   :  { %7435 = vtanh.f32 %v2009_v16  ;;  %vm2192_vm10 = vweird.f32 %v9885_v55  ;;  %v2196_v47 = vand.u32 2147483647, %v9885_v55  ;;  %v2198_v39 = vand.u32 2147483648, %v9885_v55 }
 0x6a9   :  { %v1996_v45 = vpop.f32.mrf.mxu1  ;;  %7437 = vrcp.f32 %v9877_v43  ;;  %v2214_v0 = vor.u32 1.1754944e-38, %v2213_v50 }
 0x6aa   :  { %v2014_v36 = vadd.f32 %v6623_v48, %v1996_v45  ;;  %7439 = vrcp.f32 %v9885_v55  ;;  %v2249_v48 = vmul.f32 %v2150_v19, %v9700_v63  ;;  %v2199_v44 = vor.u32 1.1754944e-38, %v2198_v39  ;;  %v10025_v19 = vld [vmem:[%s12916_s2] sm:$0xff] }
 0x6ab   :  { %7441 = vtanh.f32 %v2010_v26 }
 0x6ac   :  { %v7432_v40 = vpop.eup %7431  ;;  %v6211_v1 = vmul.f32 -1.442695, %v2014_v36 }
 0x6ad   :  { %v9905_v28 = vadd.f32 1.0, %v7432_v40  ;;  %v7434_v37 = vpop.eup %7433 }
 0x6ae   :  { %7443 = vpow2.f32 %v6211_v1  ;;  %v7436_v21 = vpop.eup %7435  ;;  %v2252_v51 = vmul.f32 %v7434_v37, %v9867_v46  ;;  %v2211_v1 = vand.u32 2147483647, %v9877_v43 }
 0x6af   :  { %7445 = vrcp.f32 %v9905_v28  ;;  %v9942_v6 = vpop.eup %7437  ;;  %v2253_v60 = vmul.f32 %v7436_v21, %v2074_v49  ;;  %v2228_v13 = vand.u32 2147483648, %v9905_v28  ;;  %vm2222_vm7 = vweird.f32 %v9905_v28 }
 0x6b0   :  { %v9953_v24 = vpop.eup %7439  ;;  %v2203_v35 = vmul.f32 %v9942_v6, %v9877_v43  ;;  %v9969_v46 = vadd.f32 %v2252_v51, %v2248_v41  ;;  %vm2208_vm5 = vweird.f32 %v9942_v6  ;;  %v2226_v22 = vand.u32 2147483647, %v9905_v28 }
 0x6b1   :  { %v7442_v4 = vpop.eup %7441  ;;  %v2188_v32 = vmul.f32 %v9953_v24, %v9885_v55  ;;  %v9972_v62 = vadd.f32 %v2253_v60, %v2249_v48  ;;  %vm2193_vm4 = vweird.f32 %v9953_v24  ;;  %v2229_v18 = vor.u32 1.1754944e-38, %v2228_v13  ;;  %vm10004_vm12 = vmor %vm2207_vm6, %vm2208_vm5  ;;  %v10053_v60 = vld [vmem:[%s12916_s2 + $0x20] sm:$0xff] }
 0x6b2   :  { %v2254_v61 = vmul.f32 %v7442_v4, %v2089_v42  ;;  %v2204_v53 = vsub.f32 1.0, %v2203_v35  ;;  %vm2227_vm11 = vcmp.eq.f32.partialorder %v2226_v22, 8.507059e+37  ;;  %vm10010_vm15 = vmor %vm2192_vm10, %vm2193_vm4  ;;  %vm2212_vm2 = vcmp.eq.f32.partialorder %v2211_v1, 8.507059e+37  ;;  %v10039_v35 = vld [vmem:[%s12916_s2 + $0x10] sm:$0xff]  ;;  %v6625_v48 = vld [vmem:[#allocation5 + $0x180] sm:$0xff]  }
 0x6b3   :  { %v2189_v14 = vsub.f32 1.0, %v2188_v32  ;;  %v10074_v32 = vld [vmem:[%s12916_s2 + $0x38] sm:$0xff]  ;;  %v6627_v39 = vunpack.c.h.bf16 %v6625_v48 }
 0x6b4   :  { %v7444_v8 = vpop.eup %7443  ;;  %v9974_v58 = vadd.f32 %v2254_v61, %v2250_v11  ;;  %v2205_v59 = vmul.f32 %v9942_v6, %v2204_v53  ;;  %v6626_v11 = vunpack.c.l.bf16 %v6625_v48 }
 0x6b5   :  { %v7446_v31 = vpop.eup %7445  ;;  %v2186_v54 = vadd.f32 1.0, %v7444_v8  ;;  %v2190_v63 = vmul.f32 %v9953_v24, %v2189_v14  ;;  %v10080_v14 = vld [vmem:[#allocation5 + $0x190] sm:$0xff]  }
 0x6b6   :  { %v2218_v16 = vmul.f32 %v7446_v31, %v9905_v28  ;;  %vm2223_vm3 = vweird.f32 %v7446_v31  ;;  %v2206_v2 = vadd.f32 %v9942_v6, %v2205_v59  ;;  %v6634_v59 = vunpack.c.l.bf16 %v10080_v14 }
 0x6b7   :  { %7447 = vrcp.f32 %v2186_v54  ;;  %vm9988_vm9 = vmor %vm2222_vm7, %vm2223_vm3  ;;  %v2243_v40 = vand.u32 2147483648, %v2186_v54  ;;  %v2191_v56 = vadd.f32 %v9953_v24, %v2190_v63  ;;  %v2241_v28 = vand.u32 2147483647, %v2186_v54 }
 0x6b8   :  { %v2219_v5 = vsub.f32 1.0, %v2218_v16  ;;  %7449 = vtanh.f32 %v9969_v46  ;;  %vm2237_vm13 = vweird.f32 %v2186_v54  ;;  %v2210_v55 = vsel %vm10004_vm12, %v9942_v6, %v2206_v2 }
 0x6b9   :  { %7451 = vtanh.f32 %v9972_v62  ;;  %v2244_v43 = vor.u32 1.1754944e-38, %v2243_v40  ;;  %vm2242_vm1 = vcmp.eq.f32.partialorder %v2241_v28, 8.507059e+37  ;;  %v2195_v9 = vsel %vm10010_vm15, %v9953_v24, %v2191_v56  ;;  %v10032_v24 = vld [vmem:[%s12916_s2 + $0x8] sm:$0xff] }
 0x6ba   :  { %v2220_v3 = vmul.f32 %v7446_v31, %v2219_v5  ;;  %7453 = vtanh.f32 %v9974_v58  ;;  %v2215_v49 = vsel %vm2212_vm2, %v2214_v0, %v2210_v55  ;;  %vm2197_vm3 = vcmp.eq.f32.partialorder %v2196_v47, 8.507059e+37  ;;  %v10085_v28 = vld [vmem:[#allocation5 + $0x1a0] sm:$0xff]   ;;  %v6986_v55 = vld [vmem:[#allocation5 + $0x188] sm:$0xff]  }
 0x6bb   :  { %7455 = vtanh.f32 %v9779_v10  ;;  %v2200_v6 = vsel %vm2197_vm3, %v2199_v44, %v2195_v9  ;;  %v6630_v44 = vunpack.c.l.bf16 %v6986_v55 }
 0x6bc   :  { %v2221_v45 = vadd.f32 %v7446_v31, %v2220_v3 }
 0x6bd   :  { %v7448_v26 = vpop.eup %7447 }
 0x6be   :  { %v2233_v27 = vmul.f32 %v7448_v26, %v2186_v54  ;;  %v7450_v23 = vpop.eup %7449  ;;  %v2225_v20 = vsel %vm9988_vm9, %v7446_v31, %v2221_v45  ;;  %vm2238_vm8 = vweird.f32 %v7448_v26  ;;  %v10046_v31 = vld [vmem:[%s12916_s2 + $0x18] sm:$0xff]  ;;  %v10067_v54 = vld [vmem:[%s12916_s2 + $0x30] sm:$0xff] }
 0x6bf   :  { %v7452_v37 = vpop.eup %7451  ;;  %v2230_v38 = vsel %vm2227_vm11, %v2229_v18, %v2225_v20  ;;  %vm2239_vm14 = vmor %vm2237_vm13, %vm2238_vm8  ;;  %v2264_v52 = vmul.f32 %v7450_v23, %v2215_v49  ;;  %v6642_v18 = vunpack.c.l.bf16 %v10085_v28 }
 0x6c0   :  { %v2234_v36 = vsub.f32 1.0, %v2233_v27  ;;  %v7454_v7 = vpop.eup %7453  ;;  %v2265_v57 = vmul.f32 %v7452_v37, %v2230_v38 }
 0x6c1   :  { %v7456_v42 = vpop.eup %7455 }
 0x6c2   :  { %v2235_v25 = vmul.f32 %v7448_v26, %v2234_v36  ;;  %v2263_v8 = vmul.f32 %v7456_v42, %v2200_v6 }
 0x6c4   :  { %v2236_v33 = vadd.f32 %v7448_v26, %v2235_v25  ;;  %v2300_v51 = vpack.c.bf16 %v2264_v52, %v2263_v8 }
 0x6c6   :  { %v2240_v15 = vsel %vm2239_vm14, %v7448_v26, %v2236_v33 }
 0x6c7   :  { %v2245_v30 = vsel %vm2242_vm1, %v2244_v43, %v2240_v15 }
 0x6c8   :  { %v2266_v4 = vmul.f32 %v7454_v7, %v2245_v30 }
 0x6ca   :  { %v2301_v12 = vpack.c.bf16 %v2266_v4, %v2265_v57 }
 0x6cc   :  { %2308 = vmatpush.bf16.msrb.mxu2 %v2301_v12 }
 0x6d0   :  { %2309 = vmatpush.bf16.msrb.mxu2 %v2300_v51 }
 0x6d3   :  { %6212 = vmatmul.msk.bf16.vlgmr.msrb.gmra.mxu2 %vm165_vm0, %v10025_v19 }
 0x6e3   :  { %6213 = vmatmul.msk.bf16.gmra.mxu2 %vm165_vm0, %v10032_v24 }
 0x6f3   :  { %6214 = vmatmul.msk.bf16.gmra.mxu2 %vm165_vm0, %v10039_v35 }
 0x703   :  { %6215 = vmatmul.msk.bf16.gmra.mxu2 %vm165_vm0, %v10046_v31 }
 0x713   :  { %6216 = vmatmul.msk.bf16.gmra.mxu2 %vm165_vm0, %v10053_v60 }
 0x723   :  { %6217 = vmatmul.msk.bf16.gmra.mxu2 %vm165_vm0, %v10060_v29 }
 0x733   :  { %6218 = vmatmul.msk.bf16.gmra.mxu2 %vm165_vm0, %v10067_v54 }
 0x743   :  { %6219 = vmatmul.msk.bf16.gmra.mxu2 %vm165_vm0, %v10074_v32 }
 0x756   :  { %v2311_v41 = vpop.f32.mrf.mxu2 }
 0x757   :  { %v2351_v5 = vadd.f32 %v6626_v11, %v2311_v41  ;;  %v6631_v41 = vunpack.c.h.bf16 %v6986_v55  ;;  %v6988_v11 = vld [vmem:[#allocation5 + $0x198] sm:$0xff]  }
 0x759   :  { %v6220_v3 = vmul.f32 -1.442695, %v2351_v5 }
 0x75b   :  { %7457 = vpow2.f32 %v6220_v3 }
 0x75e   :  { %v2313_v61 = vpop.f32.mrf.mxu2 }
 0x75f   :  { %v2352_v0 = vadd.f32 %v6627_v39, %v2313_v61 }
 0x761   :  { %v7458_v27 = vpop.eup %7457  ;;  %v6221_v4 = vmul.f32 -1.442695, %v2352_v0 }
 0x762   :  { %v2379_v22 = vadd.f32 1.0, %v7458_v27 }
 0x764   :  { %v2394_v15 = vand.u32 2147483648, %v2379_v22  ;;  %vm2388_vm9 = vweird.f32 %v2379_v22  ;;  %v2392_v9 = vand.u32 2147483647, %v2379_v22 }
 0x766   :  { %v2316_v16 = vpop.f32.mrf.mxu2  ;;  %v2395_v6 = vor.u32 1.1754944e-38, %v2394_v15  ;;  %vm2393_vm12 = vcmp.eq.f32.partialorder %v2392_v9, 8.507059e+37 }
 0x767   :  { %v2353_v8 = vadd.f32 %v6630_v44, %v2316_v16 }
 0x769   :  { %v6222_v3 = vmul.f32 -1.442695, %v2353_v8 }
 0x76e   :  { %v10078_v53 = vpop.f32.mrf.mxu2 }
 0x776   :  { %v2321_v26 = vpop.f32.mrf.mxu2 }
 0x777   :  { %v2355_v63 = vadd.f32 %v6634_v59, %v2321_v26  ;;  %v6635_v59 = vunpack.c.h.bf16 %v10080_v14  ;;  %v2354_v26 = vadd.f32 %v6631_v41, %v10078_v53 }
 0x779   :  { %v6224_v45 = vmul.f32 -1.442695, %v2355_v63  ;;  %v6638_v63 = vunpack.c.l.bf16 %v6988_v11 }
 0x77b   :  { %7459 = vpow2.f32 %v6224_v45  ;;  %v6639_v45 = vunpack.c.h.bf16 %v6988_v11 }
 0x77c   :  { %7461 = vrcp.f32 %v2379_v22 }
 0x77e   :  { %v10083_v13 = vpop.f32.mrf.mxu2 }
 0x77f   :  { %v2356_v16 = vadd.f32 %v6635_v59, %v10083_v13 }
 0x781   :  { %v7460_v36 = vpop.eup %7459 }
 0x782   :  { %v2455_v2 = vadd.f32 1.0, %v7460_v36  ;;  %v7462_v40 = vpop.eup %7461  ;;  %v6223_v36 = vmul.f32 -1.442695, %v2354_v26  ;;  %v6990_v26 = vld [vmem:[#allocation5 + $0x1a8] sm:$0xff]  }
 0x783   :  { %v2384_v50 = vmul.f32 %v7462_v40, %v2379_v22  ;;  %vm2389_vm5 = vweird.f32 %v7462_v40 }
 0x784   :  { %7463 = vrcp.f32 %v2455_v2  ;;  %v2470_v33 = vand.u32 2147483648, %v2455_v2  ;;  %vm2464_vm6 = vweird.f32 %v2455_v2  ;;  %v2468_v43 = vand.u32 2147483647, %v2455_v2  ;;  %vm2390_vm8 = vmor %vm2388_vm9, %vm2389_vm5 }
 0x785   :  { %v2385_v25 = vsub.f32 1.0, %v2384_v50 }
 0x786   :  { %v2326_v17 = vpop.f32.mrf.mxu2  ;;  %v2471_v49 = vor.u32 1.1754944e-38, %v2470_v33  ;;  %vm2469_vm10 = vcmp.eq.f32.partialorder %v2468_v43, 8.507059e+37 }
 0x787   :  { %v2386_v47 = vmul.f32 %v7462_v40, %v2385_v25 }
 0x789   :  { %v2387_v38 = vadd.f32 %v7462_v40, %v2386_v47 }
 0x78a   :  { %v7464_v56 = vpop.eup %7463 }
 0x78b   :  { %v2460_v1 = vmul.f32 %v7464_v56, %v2455_v2  ;;  %vm2465_vm4 = vweird.f32 %v7464_v56  ;;  %v2391_v57 = vsel %vm2390_vm8, %v7462_v40, %v2387_v38 }
 0x78c   :  { %vm2466_vm7 = vmor %vm2464_vm6, %vm2465_vm4  ;;  %v2396_v51 = vsel %vm2393_vm12, %v2395_v6, %v2391_v57  ;;  %v10129_v6 = vld [vmem:[#allocation5 + $0x1b8] sm:$0xff]  }
 0x78d   :  { %v2461_v23 = vsub.f32 1.0, %v2460_v1  ;;  %v6654_v11 = vunpack.c.l.bf16 %v10129_v6 }
 0x78e   :  { %v2328_v20 = vpop.f32.mrf.mxu2 }
 0x78f   :  { %v2462_v37 = vmul.f32 %v7464_v56, %v2461_v23  ;;  %v2358_v2 = vadd.f32 %v6639_v45, %v2328_v20 }
 0x791   :  { %v2463_v7 = vadd.f32 %v7464_v56, %v2462_v37  ;;  %v6227_v14 = vmul.f32 -1.442695, %v2358_v2  ;;  %v6991_v37 = vld [vmem:[#allocation5 + $0x1b0] sm:$0xff]  }
 0x792   :  { %v6650_v33 = vunpack.c.l.bf16 %v6991_v37  ;;  %v6651_v43 = vunpack.c.h.bf16 %v6991_v37 }
 0x793   :  { %v2467_v30 = vsel %vm2466_vm7, %v7464_v56, %v2463_v7  ;;  %v6225_v56 = vmul.f32 -1.442695, %v2356_v16 }
 0x794   :  { %v2472_v12 = vsel %vm2469_vm10, %v2471_v49, %v2467_v30 }
 0x795   :  { %v2599_v61 = vmul.f32 %v2472_v12, %v9779_v10  ;;  %v2357_v10 = vadd.f32 %v6638_v63, %v2326_v17 }
 0x796   :  { %v2331_v21 = vpop.f32.mrf.mxu2 }
 0x797   :  { %v2359_v34 = vadd.f32 %v6642_v18, %v2331_v21  ;;  %v6226_v1 = vmul.f32 -1.442695, %v2357_v10  ;;  %v6643_v10 = vunpack.c.h.bf16 %v10085_v28 }
 0x799   :  { %7465 = vtanh.f32 %v2359_v34 }
 0x79a   :  { %7467 = vpow2.f32 %v6221_v4 }
 0x79b   :  { %7469 = vpow2.f32 %v6222_v3 }
 0x79c   :  { %7471 = vpow2.f32 %v6223_v36 }
 0x79e   :  { %v10088_v52 = vpop.f32.mrf.mxu2 }
 0x79f   :  { %v7466_v42 = vpop.eup %7465 }
 0x7a0   :  { %v2603_v48 = vmul.f32 %v7466_v42, %v2396_v51  ;;  %v7468_v22 = vpop.eup %7467 }
 0x7a1   :  { %v10098_v40 = vadd.f32 1.0, %v7468_v22  ;;  %v7470_v50 = vpop.eup %7469 }
 0x7a2   :  { %v10091_v5 = vadd.f32 %v2603_v48, %v2599_v61  ;;  %v10103_v23 = vadd.f32 1.0, %v7470_v50  ;;  %v7472_v13 = vpop.eup %7471 }
 0x7a3   :  { %7473 = vrcp.f32 %v10098_v40  ;;  %v10108_v20 = vadd.f32 1.0, %v7472_v13  ;;  %v2407_v41 = vand.u32 2147483647, %v10098_v40  ;;  %v2409_v48 = vand.u32 2147483648, %v10098_v40 }
 0x7a4   :  { %7475 = vpow2.f32 %v6225_v56  ;;  %v2424_v63 = vand.u32 2147483648, %v10103_v23  ;;  %vm2403_vm13 = vweird.f32 %v10098_v40  ;;  %vm2418_vm1 = vweird.f32 %v10103_v23 }
 0x7a5   :  { %7477 = vpow2.f32 %v6226_v1  ;;  %vm10152_vm15 = vcmp.eq.f32.partialorder %v2407_v41, 8.507059e+37  ;;  %v2422_v28 = vand.u32 2147483647, %v10103_v23  ;;  %vm2433_vm4 = vweird.f32 %v10108_v20 }
 0x7a6   :  { %v10095_v27 = vpop.f32.mrf.mxu2  ;;  %7479 = vpow2.f32 %v6227_v14  ;;  %v6646_v14 = vunpack.c.l.bf16 %v6990_v26  ;;  %v10167_v37 = vor.u32 1.1754944e-38, %v2424_v63 }
 0x7a7   :  { %7481 = vrcp.f32 %v10103_v23  ;;  %vm10200_vm6 = vcmp.eq.f32.partialorder %v2422_v28, 8.507059e+37 }
 0x7a8   :  { %7483 = vrcp.f32 %v10108_v20 }
 0x7a9   :  { %v10105_v25 = vpop.eup %7473 }
 0x7aa   :  { %v7476_v17 = vpop.eup %7475  ;;  %v2399_v21 = vmul.f32 %v10105_v25, %v10098_v40  ;;  %vm2404_vm11 = vweird.f32 %v10105_v25  ;;  %v2410_v40 = vor.u32 1.1754944e-38, %v2409_v48 }
 0x7ab   :  { %v7478_v18 = vpop.eup %7477  ;;  %v10112_v7 = vadd.f32 1.0, %v7476_v17  ;;  %vm10158_vm14 = vmor %vm2403_vm13, %vm2404_vm11 }
 0x7ac   :  { %v7480_v39 = vpop.eup %7479  ;;  %v10115_v34 = vadd.f32 1.0, %v7478_v18  ;;  %v2400_v0 = vsub.f32 1.0, %v2399_v21 }
 0x7ad   :  { %v10117_v55 = vpop.eup %7481  ;;  %v10119_v38 = vadd.f32 1.0, %v7480_v39  ;;  %7485 = vrcp.f32 %v10112_v7  ;;  %vm2479_vm7 = vweird.f32 %v10112_v7  ;;  %v2485_v63 = vand.u32 2147483648, %v10112_v7 }
 0x7ae   :  { %v10101_v53 = vpop.f32.mrf.mxu2  ;;  %v2414_v9 = vmul.f32 %v10117_v55, %v10103_v23  ;;  %7487 = vrcp.f32 %v10115_v34  ;;  %v10126_v44 = vpop.eup %7483  ;;  %v2401_v57 = vmul.f32 %v10105_v25, %v2400_v0  ;;  %vm2419_vm2 = vweird.f32 %v10117_v55 }
 0x7af   :  { %7489 = vrcp.f32 %v10119_v38  ;;  %v2429_v51 = vmul.f32 %v10126_v44, %v10108_v20  ;;  %v2360_v0 = vadd.f32 %v6643_v10, %v10088_v52  ;;  %vm10183_vm3 = vmor %vm2418_vm1, %vm2419_vm2  ;;  %v2437_v52 = vand.u32 2147483647, %v10108_v20 }
 0x7b0   :  { %v2415_v12 = vsub.f32 1.0, %v2414_v9  ;;  %v2402_v59 = vadd.f32 %v10105_v25, %v2401_v57  ;;  %vm2434_vm5 = vweird.f32 %v10126_v44  ;;  %v2500_v2 = vand.u32 2147483648, %v10115_v34 }
 0x7b1   :  { %v2430_v16 = vsub.f32 1.0, %v2429_v51  ;;  %vm10225_vm12 = vmor %vm2433_vm4, %vm2434_vm5  ;;  %vm2494_vm13 = vweird.f32 %v10115_v34  ;;  %vm2438_vm2 = vcmp.eq.f32.partialorder %v2437_v52, 8.507059e+37 }
 0x7b2   :  { %v2416_v22 = vmul.f32 %v10117_v55, %v2415_v12  ;;  %v2406_v17 = vsel %vm10158_vm14, %v10105_v25, %v2402_v59  ;;  %vm2509_vm14 = vweird.f32 %v10119_v38 }
 0x7b3   :  { %v10131_v8 = vpop.eup %7485  ;;  %v2431_v25 = vmul.f32 %v10126_v44, %v2430_v16  ;;  %v10179_v57 = vsel %vm10152_vm15, %v2410_v40, %v2406_v17 }
 0x7b4   :  { %v10136_v61 = vpop.eup %7487  ;;  %v2475_v45 = vmul.f32 %v10131_v8, %v10112_v7  ;;  %v10170_v39 = vadd.f32 %v10117_v55, %v2416_v22  ;;  %vm2480_vm9 = vweird.f32 %v10131_v8 }
 0x7b5   :  { %v10140_v3 = vpop.eup %7489  ;;  %v2490_v36 = vmul.f32 %v10136_v61, %v10115_v34  ;;  %vm2495_vm8 = vweird.f32 %v10136_v61  ;;  %vm10232_vm11 = vmor %vm2479_vm7, %vm2480_vm9 }
 0x7b6   :  { %v2341_v47 = vpop.f32.mrf.mxu2  ;;  %v2505_v1 = vmul.f32 %v10140_v3, %v10119_v38  ;;  %vm2510_vm10 = vweird.f32 %v10140_v3  ;;  %vm10242_vm15 = vmor %vm2494_vm13, %vm2495_vm8 }
 0x7b7   :  { %v2363_v15 = vadd.f32 %v6650_v33, %v2341_v47  ;;  %v2476_v47 = vsub.f32 1.0, %v2475_v45  ;;  %v2483_v45 = vand.u32 2147483647, %v10112_v7  ;;  %vm10258_vm1 = vmor %vm2509_vm14, %vm2510_vm10 }
 0x7b8   :  { %v2506_v9 = vsub.f32 1.0, %v2505_v1 }
 0x7b9   :  { %v6228_v4 = vmul.f32 -1.442695, %v2363_v15  ;;  %v6647_v15 = vunpack.c.h.bf16 %v6990_v26 }
 0x7ba   :  { %v2507_v59 = vmul.f32 %v10140_v3, %v2506_v9 }
 0x7bb   :  { %v2362_v48 = vadd.f32 %v6647_v15, %v10101_v53 }
 0x7bc   :  { %v2508_v1 = vadd.f32 %v10140_v3, %v2507_v59 }
 0x7be   :  { %v2343_v30 = vpop.f32.mrf.mxu2 }
 0x7bf   :  { %v2364_v49 = vadd.f32 %v6651_v43, %v2343_v30  ;;  %v2491_v43 = vsub.f32 1.0, %v2490_v36  ;;  %v2361_v30 = vadd.f32 %v6646_v14, %v10095_v27  ;;  %v2477_v27 = vmul.f32 %v10131_v8, %v2476_v47 }
 0x7c0   :  { %v2515_v14 = vand.u32 2147483648, %v10119_v38  ;;  %v2486_v47 = vor.u32 1.1754944e-38, %v2485_v63 }
 0x7c1   :  { %v6229_v42 = vmul.f32 -1.442695, %v2364_v49  ;;  %v6655_v49 = vunpack.c.h.bf16 %v10129_v6  ;;  %v2421_v6 = vsel %vm10183_vm3, %v10117_v55, %v10170_v39  ;;  %v2492_v51 = vmul.f32 %v10136_v61, %v2491_v43 }
 0x7c2   :  { %v2432_v55 = vadd.f32 %v10126_v44, %v2431_v25  ;;  %v2478_v53 = vadd.f32 %v10131_v8, %v2477_v27  ;;  %vm2484_vm3 = vcmp.eq.f32.partialorder %v2483_v45, 8.507059e+37  ;;  %v2512_v43 = vsel %vm10258_vm1, %v10140_v3, %v2508_v1 }
 0x7c3   :  { %7491 = vpow2.f32 %v6229_v42  ;;  %v2439_v42 = vand.u32 2147483648, %v10108_v20  ;;  %v2493_v36 = vadd.f32 %v10136_v61, %v2492_v51  ;;  %v2498_v20 = vand.u32 2147483647, %v10115_v34 }
 0x7c4   :  { %7493 = vpow2.f32 %v6228_v4  ;;  %v2482_v7 = vsel %vm10232_vm11, %v10131_v8, %v2478_v53  ;;  %v2436_v28 = vsel %vm10225_vm12, %v10126_v44, %v2432_v55  ;;  %v2513_v34 = vand.u32 2147483647, %v10119_v38 }
 0x7c5   :  { %v2440_v8 = vor.u32 1.1754944e-38, %v2439_v42  ;;  %v2501_v44 = vor.u32 1.1754944e-38, %v2500_v2  ;;  %v2426_v38 = vsel %vm10200_vm6, %v10167_v37, %v2421_v6  ;;  %v2516_v15 = vor.u32 1.1754944e-38, %v2515_v14 }
 0x7c6   :  { %v2346_v56 = vpop.f32.mrf.mxu2  ;;  %v2487_v25 = vsel %vm2484_vm3, %v2486_v47, %v2482_v7  ;;  %vm2499_vm4 = vcmp.eq.f32.partialorder %v2498_v20, 8.507059e+37  ;;  %vm2514_vm5 = vcmp.eq.f32.partialorder %v2513_v34, 8.507059e+37 }
 0x7c7   :  { %v2365_v13 = vadd.f32 %v6654_v11, %v2346_v56  ;;  %v2441_v9 = vsel %vm2438_vm2, %v2440_v8, %v2436_v28  ;;  %v2517_v37 = vsel %vm2514_vm5, %v2516_v15, %v2512_v43  ;;  %v2600_v42 = vmul.f32 %v2487_v25, %v9969_v46 }
 0x7c9   :  { %v7492_v18 = vpop.eup %7491  ;;  %v6230_v21 = vmul.f32 -1.442695, %v2365_v13 }
 0x7ca   :  { %v7494_v33 = vpop.eup %7493  ;;  %v10189_v12 = vadd.f32 1.0, %v7492_v18 }
 0x7cb   :  { %7495 = vpow2.f32 %v6230_v21  ;;  %v10197_v23 = vadd.f32 1.0, %v7494_v33  ;;  %v2497_v21 = vsel %vm10242_vm15, %v10136_v61, %v2493_v36 }
 0x7cc   :  { %7497 = vtanh.f32 %v2360_v0  ;;  %vm2559_vm9 = vweird.f32 %v10189_v12  ;;  %v2563_v20 = vand.u32 2147483647, %v10189_v12 }
 0x7cd   :  { %7499 = vtanh.f32 %v2361_v30  ;;  %vm2544_vm13 = vweird.f32 %v10197_v23  ;;  %v2548_v39 = vand.u32 2147483647, %v10197_v23 }
 0x7ce   :  { %v2348_v11 = vpop.f32.mrf.mxu2  ;;  %7501 = vrcp.f32 %v10189_v12  ;;  %vm2564_vm5 = vcmp.eq.f32.partialorder %v2563_v20, 8.507059e+37 }
 0x7cf   :  { %v2366_v26 = vadd.f32 %v6655_v49, %v2348_v11  ;;  %7503 = vrcp.f32 %v10197_v23  ;;  %v2502_v49 = vsel %vm2499_vm4, %v2501_v44, %v2497_v21  ;;  %v2602_v11 = vmul.f32 %v2517_v37, %v9974_v58 }
 0x7d0   :  { %7505 = vtanh.f32 %v2362_v48  ;;  %v2601_v48 = vmul.f32 %v2502_v49, %v9972_v62  ;;  %v2550_v21 = vand.u32 2147483648, %v10197_v23 }
 0x7d1   :  { %v7496_v22 = vpop.eup %7495  ;;  %v6231_v16 = vmul.f32 -1.442695, %v2366_v26 }
 0x7d2   :  { %v10217_v10 = vadd.f32 1.0, %v7496_v22  ;;  %v7498_v50 = vpop.eup %7497 }
 0x7d3   :  { %7507 = vpow2.f32 %v6231_v16  ;;  %v7500_v13 = vpop.eup %7499  ;;  %v2604_v30 = vmul.f32 %v7498_v50, %v10179_v57  ;;  %v10357_v50 = vld [vmem:[#allocation5 + $0x1e0] sm:$0xff]  }
 0x7d4   :  { %7509 = vrcp.f32 %v10217_v10  ;;  %v10254_v18 = vpop.eup %7501  ;;  %v2605_v27 = vmul.f32 %v7500_v13, %v2426_v38  ;;  %v2580_v36 = vand.u32 2147483648, %v10217_v10  ;;  %vm2574_vm10 = vweird.f32 %v10217_v10 }
 0x7d5   :  { %v10265_v33 = vpop.eup %7503  ;;  %v2555_v4 = vmul.f32 %v10254_v18, %v10189_v12  ;;  %v10281_v57 = vadd.f32 %v2604_v30, %v2600_v42  ;;  %vm2560_vm8 = vweird.f32 %v10254_v18  ;;  %v2578_v2 = vand.u32 2147483647, %v10217_v10 }
 0x7d6   :  { %v7506_v0 = vpop.eup %7505  ;;  %v2540_v3 = vmul.f32 %v10265_v33, %v10197_v23  ;;  %v10284_v26 = vadd.f32 %v2605_v27, %v2601_v48  ;;  %vm2545_vm7 = vweird.f32 %v10265_v33  ;;  %v2565_v13 = vand.u32 2147483648, %v10189_v12  ;;  %vm10316_vm15 = vmor %vm2559_vm9, %vm2560_vm8 }
 0x7d7   :  { %v2606_v51 = vmul.f32 %v7506_v0, %v2441_v9  ;;  %v2556_v55 = vsub.f32 1.0, %v2555_v4  ;;  %v2581_v47 = vor.u32 1.1754944e-38, %v2580_v36  ;;  %vm2579_vm14 = vcmp.eq.f32.partialorder %v2578_v2, 8.507059e+37  ;;  %vm10322_vm2 = vmor %vm2544_vm13, %vm2545_vm7 }
 0x7d8   :  { %v2541_v63 = vsub.f32 1.0, %v2540_v3  ;;  %v2566_v15 = vor.u32 1.1754944e-38, %v2565_v13  ;;  %v2551_v30 = vor.u32 1.1754944e-38, %v2550_v21 }
 0x7d9   :  { %v7508_v61 = vpop.eup %7507  ;;  %v10286_v45 = vadd.f32 %v2606_v51, %v2602_v11  ;;  %v2557_v46 = vmul.f32 %v10254_v18, %v2556_v55  ;;  %v6657_v51 = vld [vmem:[#allocation5 + $0x1c0] sm:$0xff]  }
 0x7da   :  { %v7510_v52 = vpop.eup %7509  ;;  %v2538_v6 = vadd.f32 1.0, %v7508_v61  ;;  %v2542_v62 = vmul.f32 %v10265_v33, %v2541_v63  ;;  %v6659_v13 = vunpack.c.h.bf16 %v6657_v51 }
 0x7db   :  { %v2570_v41 = vmul.f32 %v7510_v52, %v10217_v10  ;;  %vm2575_vm6 = vweird.f32 %v7510_v52  ;;  %v2558_v1 = vadd.f32 %v10254_v18, %v2557_v46 }
 0x7dc   :  { %7511 = vrcp.f32 %v2538_v6  ;;  %vm10300_vm12 = vmor %vm2574_vm10, %vm2575_vm6  ;;  %v2595_v40 = vand.u32 2147483648, %v2538_v6  ;;  %v2543_v14 = vadd.f32 %v10265_v33, %v2542_v62  ;;  %v2593_v10 = vand.u32 2147483647, %v2538_v6 }
 0x7dd   :  { %v2571_v59 = vsub.f32 1.0, %v2570_v41  ;;  %7513 = vtanh.f32 %v10281_v57  ;;  %vm2589_vm1 = vweird.f32 %v2538_v6  ;;  %v2562_v23 = vsel %vm10316_vm15, %v10254_v18, %v2558_v1 }
 0x7de   :  { %7515 = vtanh.f32 %v10284_v26  ;;  %v2596_v12 = vor.u32 1.1754944e-38, %v2595_v40  ;;  %vm2594_vm4 = vcmp.eq.f32.partialorder %v2593_v10, 8.507059e+37  ;;  %v2547_v9 = vsel %vm10322_vm2, %v10265_v33, %v2543_v14 }
 0x7df   :  { %v2572_v22 = vmul.f32 %v7510_v52, %v2571_v59  ;;  %7517 = vtanh.f32 %v10286_v45  ;;  %v2567_v49 = vsel %vm2564_vm5, %v2566_v15, %v2562_v23  ;;  %vm2549_vm6 = vcmp.eq.f32.partialorder %v2548_v39, 8.507059e+37 }
 0x7e0   :  { %7519 = vtanh.f32 %v10091_v5  ;;  %v2552_v18 = vsel %vm2549_vm6, %v2551_v30, %v2547_v9  ;;  %v6674_v14 = vunpack.c.l.bf16 %v10357_v50 }
 0x7e1   :  { %v2573_v16 = vadd.f32 %v7510_v52, %v2572_v22 }
 0x7e2   :  { %v7512_v53 = vpop.eup %7511 }
 0x7e3   :  { %v2585_v58 = vmul.f32 %v7512_v53, %v2538_v6  ;;  %v7514_v17 = vpop.eup %7513  ;;  %v2577_v7 = vsel %vm10300_vm12, %v7510_v52, %v2573_v16  ;;  %vm2590_vm11 = vweird.f32 %v7512_v53 }
 0x7e4   :  { %v7516_v34 = vpop.eup %7515  ;;  %v2582_v0 = vsel %vm2579_vm14, %v2581_v47, %v2577_v7  ;;  %vm2591_vm3 = vmor %vm2589_vm1, %vm2590_vm11  ;;  %v2616_v37 = vmul.f32 %v7514_v17, %v2567_v49 }
 0x7e5   :  { %v2586_v56 = vsub.f32 1.0, %v2585_v58  ;;  %v7518_v44 = vpop.eup %7517  ;;  %v2617_v4 = vmul.f32 %v7516_v34, %v2582_v0  ;;  %v6993_v34 = vld [vmem:[#allocation5 + $0x1c8] sm:$0xff]  }
 0x7e6   :  { %v7520_v6 = vpop.eup %7519  ;;  %v6662_v43 = vunpack.c.l.bf16 %v6993_v34 }
 0x7e7   :  { %v2587_v28 = vmul.f32 %v7512_v53, %v2586_v56  ;;  %v2615_v3 = vmul.f32 %v7520_v6, %v2552_v18 }
 0x7e9   :  { %v2588_v38 = vadd.f32 %v7512_v53, %v2587_v28  ;;  %v2652_v42 = vpack.c.bf16 %v2616_v37, %v2615_v3 }
 0x7eb   :  { %v2592_v25 = vsel %vm2591_vm3, %v7512_v53, %v2588_v38 }
 0x7ec   :  { %v2597_v61 = vsel %vm2594_vm4, %v2596_v12, %v2592_v25 }
 0x7ed   :  { %v2618_v52 = vmul.f32 %v7518_v44, %v2597_v61 }
 0x7ef   :  { %v2653_v27 = vpack.c.bf16 %v2618_v52, %v2617_v4  ;;  %v6663_v4 = vunpack.c.h.bf16 %v6993_v34 }
 0x7f1   :  { %2660 = vmatpush.bf16.msrb.mxu3 %v2653_v27  ;;  %v6995_v27 = vld [vmem:[#allocation5 + $0x1d8] sm:$0xff]  }
 0x7f5   :  { %2661 = vmatpush.bf16.msrb.mxu3 %v2652_v42 }
 0x7f8   :  { %6232 = vmatmul.msk.bf16.vlgmr.msrb.gmra.mxu3 %vm165_vm0, %v10025_v19 }
 0x808   :  { %6233 = vmatmul.msk.bf16.gmra.mxu3 %vm165_vm0, %v10032_v24 }
 0x818   :  { %6234 = vmatmul.msk.bf16.gmra.mxu3 %vm165_vm0, %v10039_v35  ;;  %v6658_v35 = vunpack.c.l.bf16 %v6657_v51 }
 0x828   :  { %6235 = vmatmul.msk.bf16.gmra.mxu3 %vm165_vm0, %v10046_v31  ;;  %v10352_v31 = vld [vmem:[#allocation5 + $0x1d0] sm:$0xff]  }
 0x829   :  { %v6666_v11 = vunpack.c.l.bf16 %v10352_v31  ;;  %v6667_v3 = vunpack.c.h.bf16 %v10352_v31 }
 0x838   :  { %6236 = vmatmul.msk.bf16.gmra.mxu3 %vm165_vm0, %v10053_v60 }
 0x848   :  { %6237 = vmatmul.msk.bf16.gmra.mxu3 %vm165_vm0, %v10060_v29 }
 0x858   :  { %6238 = vmatmul.msk.bf16.gmra.mxu3 %vm165_vm0, %v10067_v54 }
 0x868   :  { %6239 = vmatmul.msk.bf16.gmra.mxu3 %vm165_vm0, %v10074_v32 }
 0x87b   :  { %v2663_v19 = vpop.f32.mrf.mxu3 }
 0x87c   :  { %v2703_v41 = vadd.f32 %v6658_v35, %v2663_v19  ;;  %v6670_v19 = vunpack.c.l.bf16 %v6995_v27 }
 0x87e   :  { %v6240_v60 = vmul.f32 -1.442695, %v2703_v41 }
 0x880   :  { %7521 = vpow2.f32 %v6240_v60 }
 0x883   :  { %v2665_v24 = vpop.f32.mrf.mxu3 }
 0x884   :  { %v2704_v21 = vadd.f32 %v6659_v13, %v2665_v24  ;;  %v6671_v24 = vunpack.c.h.bf16 %v6995_v27 }
 0x886   :  { %v7522_v55 = vpop.eup %7521  ;;  %v6241_v12 = vmul.f32 -1.442695, %v2704_v21  ;;  %v10401_v21 = vld [vmem:[#allocation5 + $0x1f8] sm:$0xff]  }
 0x887   :  { %v2731_v63 = vadd.f32 1.0, %v7522_v55 }
 0x889   :  { %v2746_v8 = vand.u32 2147483648, %v2731_v63  ;;  %vm2740_vm12 = vweird.f32 %v2731_v63  ;;  %v2744_v44 = vand.u32 2147483647, %v2731_v63 }
 0x88b   :  { %v2668_v33 = vpop.f32.mrf.mxu3  ;;  %v2747_v15 = vor.u32 1.1754944e-38, %v2746_v8  ;;  %vm2745_vm15 = vcmp.eq.f32.partialorder %v2744_v44, 8.507059e+37 }
 0x88c   :  { %v2705_v30 = vadd.f32 %v6662_v43, %v2668_v33 }
 0x88e   :  { %v6242_v6 = vmul.f32 -1.442695, %v2705_v30  ;;  %v6997_v30 = vld [vmem:[#allocation5 + $0x1e8] sm:$0xff]  }
 0x893   :  { %v10350_v48 = vpop.f32.mrf.mxu3 }
 0x894   :  { %v2706_v42 = vadd.f32 %v6663_v4, %v10350_v48 }
 0x896   :  { %v6243_v41 = vmul.f32 -1.442695, %v2706_v42 }
 0x89b   :  { %v2673_v29 = vpop.f32.mrf.mxu3 }
 0x89c   :  { %v2707_v59 = vadd.f32 %v6666_v11, %v2673_v29 }
 0x89e   :  { %v6244_v54 = vmul.f32 -1.442695, %v2707_v59 }
 0x8a0   :  { %7523 = vpow2.f32 %v6244_v54 }
 0x8a1   :  { %7525 = vrcp.f32 %v2731_v63 }
 0x8a3   :  { %v10355_v32 = vpop.f32.mrf.mxu3 }
 0x8a4   :  { %v2708_v33 = vadd.f32 %v6667_v3, %v10355_v32 }
 0x8a6   :  { %v7524_v22 = vpop.eup %7523  ;;  %v6245_v29 = vmul.f32 -1.442695, %v2708_v33  ;;  %v6678_v33 = vunpack.c.l.bf16 %v6997_v30 }
 0x8a7   :  { %v2807_v46 = vadd.f32 1.0, %v7524_v22  ;;  %v7526_v62 = vpop.eup %7525 }
 0x8a8   :  { %v2736_v36 = vmul.f32 %v7526_v62, %v2731_v63  ;;  %vm2741_vm8 = vweird.f32 %v7526_v62 }
 0x8a9   :  { %7527 = vrcp.f32 %v2807_v46  ;;  %v2822_v28 = vand.u32 2147483648, %v2807_v46  ;;  %vm2816_vm9 = vweird.f32 %v2807_v46  ;;  %v2820_v39 = vand.u32 2147483647, %v2807_v46  ;;  %vm2742_vm11 = vmor %vm2740_vm12, %vm2741_vm8 }
 0x8aa   :  { %v2737_v1 = vsub.f32 1.0, %v2736_v36 }
 0x8ab   :  { %v2678_v53 = vpop.f32.mrf.mxu3  ;;  %v2823_v23 = vor.u32 1.1754944e-38, %v2822_v28  ;;  %vm2821_vm13 = vcmp.eq.f32.partialorder %v2820_v39, 8.507059e+37 }
 0x8ac   :  { %v2738_v20 = vmul.f32 %v7526_v62, %v2737_v1 }
 0x8ae   :  { %v2739_v47 = vadd.f32 %v7526_v62, %v2738_v20 }
 0x8af   :  { %v7528_v16 = vpop.eup %7527 }
 0x8b0   :  { %v2812_v58 = vmul.f32 %v7528_v16, %v2807_v46  ;;  %vm2817_vm7 = vweird.f32 %v7528_v16  ;;  %v2743_v0 = vsel %vm2742_vm11, %v7526_v62, %v2739_v47 }
 0x8b1   :  { %vm2818_vm10 = vmor %vm2816_vm9, %vm2817_vm7  ;;  %v2748_v49 = vsel %vm2745_vm15, %v2747_v15, %v2743_v0  ;;  %v6686_v15 = vunpack.c.l.bf16 %v10401_v21 }
 0x8b2   :  { %v2813_v2 = vsub.f32 1.0, %v2812_v58 }
 0x8b3   :  { %v2680_v56 = vpop.f32.mrf.mxu3 }
 0x8b4   :  { %v2814_v40 = vmul.f32 %v7528_v16, %v2813_v2  ;;  %v2710_v60 = vadd.f32 %v6671_v24, %v2680_v56 }
 0x8b6   :  { %v2815_v7 = vadd.f32 %v7528_v16, %v2814_v40  ;;  %v6247_v31 = vmul.f32 -1.442695, %v2710_v60 }
 0x8b8   :  { %v2819_v38 = vsel %vm2818_vm10, %v7528_v16, %v2815_v7 }
 0x8b9   :  { %v2824_v25 = vsel %vm2821_vm13, %v2823_v23, %v2819_v38 }
 0x8ba   :  { %v2951_v52 = vmul.f32 %v2824_v25, %v10091_v5  ;;  %v2709_v5 = vadd.f32 %v6670_v19, %v2678_v53  ;;  %v6998_v53 = vld [vmem:[#allocation5 + $0x1f0] sm:$0xff]  }
 0x8bb   :  { %v2683_v17 = vpop.f32.mrf.mxu3  ;;  %v6682_v56 = vunpack.c.l.bf16 %v6998_v53  ;;  %v6683_v20 = vunpack.c.h.bf16 %v6998_v53  ;;  %v6679_v53 = vunpack.c.h.bf16 %v6997_v30 }
 0x8bc   :  { %v2711_v10 = vadd.f32 %v6674_v14, %v2683_v17  ;;  %v6246_v59 = vmul.f32 -1.442695, %v2709_v5 }
 0x8be   :  { %7529 = vtanh.f32 %v2711_v10 }
 0x8bf   :  { %7531 = vpow2.f32 %v6241_v12 }
 0x8c0   :  { %7533 = vpow2.f32 %v6242_v6  ;;  %v6675_v6 = vunpack.c.h.bf16 %v10357_v50 }
 0x8c1   :  { %7535 = vpow2.f32 %v6243_v41 }
 0x8c3   :  { %v10360_v9 = vpop.f32.mrf.mxu3 }
 0x8c4   :  { %v7530_v61 = vpop.eup %7529 }
 0x8c5   :  { %v2955_v18 = vmul.f32 %v7530_v61, %v2748_v49  ;;  %v7532_v35 = vpop.eup %7531 }
 0x8c6   :  { %v10370_v11 = vadd.f32 1.0, %v7532_v35  ;;  %v7534_v54 = vpop.eup %7533 }
 0x8c7   :  { %v10363_v37 = vadd.f32 %v2955_v18, %v2951_v52  ;;  %v10375_v55 = vadd.f32 1.0, %v7534_v54  ;;  %v7536_v32 = vpop.eup %7535 }
 0x8c8   :  { %7537 = vrcp.f32 %v10370_v11  ;;  %v10380_v46 = vadd.f32 1.0, %v7536_v32  ;;  %v2759_v23 = vand.u32 2147483647, %v10370_v11  ;;  %v2761_v12 = vand.u32 2147483648, %v10370_v11 }
 0x8c9   :  { %7539 = vpow2.f32 %v6245_v29  ;;  %v2776_v49 = vand.u32 2147483648, %v10375_v55  ;;  %vm2755_vm1 = vweird.f32 %v10370_v11  ;;  %vm2770_vm4 = vweird.f32 %v10375_v55 }
 0x8ca   :  { %7541 = vpow2.f32 %v6246_v59  ;;  %vm10424_vm2 = vcmp.eq.f32.partialorder %v2759_v23, 8.507059e+37  ;;  %v2762_v35 = vor.u32 1.1754944e-38, %v2761_v12  ;;  %v2774_v50 = vand.u32 2147483647, %v10375_v55 }
 0x8cb   :  { %v10367_v51 = vpop.f32.mrf.mxu3  ;;  %7543 = vpow2.f32 %v6247_v31  ;;  %v10439_v60 = vor.u32 1.1754944e-38, %v2776_v49  ;;  %vm2785_vm7 = vweird.f32 %v10380_v46 }
 0x8cc   :  { %7545 = vrcp.f32 %v10375_v55  ;;  %vm10472_vm9 = vcmp.eq.f32.partialorder %v2774_v50, 8.507059e+37 }
 0x8cd   :  { %7547 = vrcp.f32 %v10380_v46 }
 0x8ce   :  { %v10377_v63 = vpop.eup %7537 }
 0x8cf   :  { %v7540_v22 = vpop.eup %7539  ;;  %v2751_v36 = vmul.f32 %v10377_v63, %v10370_v11  ;;  %vm2756_vm14 = vweird.f32 %v10377_v63 }
 0x8d0   :  { %v7542_v62 = vpop.eup %7541  ;;  %v10384_v2 = vadd.f32 1.0, %v7540_v22  ;;  %vm10430_vm3 = vmor %vm2755_vm1, %vm2756_vm14  ;;  %v2712_v22 = vadd.f32 %v6675_v6, %v10360_v9  ;;  %v2789_v9 = vand.u32 2147483647, %v10380_v46 }
 0x8d1   :  { %v7544_v58 = vpop.eup %7543  ;;  %v10387_v1 = vadd.f32 1.0, %v7542_v62  ;;  %v2752_v13 = vsub.f32 1.0, %v2751_v36 }
 0x8d2   :  { %v10389_v40 = vpop.eup %7545  ;;  %v10391_v14 = vadd.f32 1.0, %v7544_v58  ;;  %7549 = vrcp.f32 %v10384_v2  ;;  %v6687_v58 = vunpack.c.h.bf16 %v10401_v21  ;;  %vm2831_vm10 = vweird.f32 %v10384_v2 }
 0x8d3   :  { %v10373_v48 = vpop.f32.mrf.mxu3  ;;  %v2766_v7 = vmul.f32 %v10389_v40, %v10375_v55  ;;  %7551 = vrcp.f32 %v10387_v1  ;;  %v10398_v10 = vpop.eup %7547  ;;  %v2753_v47 = vmul.f32 %v10377_v63, %v2752_v13  ;;  %vm2771_vm5 = vweird.f32 %v10389_v40 }
 0x8d4   :  { %7553 = vrcp.f32 %v10391_v14  ;;  %v2781_v43 = vmul.f32 %v10398_v10, %v10380_v46  ;;  %vm10455_vm6 = vmor %vm2770_vm4, %vm2771_vm5  ;;  %vm2786_vm8 = vweird.f32 %v10398_v10  ;;  %vm2846_vm1 = vweird.f32 %v10387_v1 }
 0x8d5   :  { %v2767_v8 = vsub.f32 1.0, %v2766_v7  ;;  %v2754_v61 = vadd.f32 %v10377_v63, %v2753_v47  ;;  %vm10497_vm15 = vmor %vm2785_vm7, %vm2786_vm8  ;;  %vm2790_vm5 = vcmp.eq.f32.partialorder %v2789_v9, 8.507059e+37 }
 0x8d6   :  { %v2782_v18 = vsub.f32 1.0, %v2781_v43 }
 0x8d7   :  { %v2768_v52 = vmul.f32 %v10389_v40, %v2767_v8  ;;  %v2758_v5 = vsel %vm10430_vm3, %v10377_v63, %v2754_v61  ;;  %v2837_v8 = vand.u32 2147483648, %v10384_v2  ;;  %v2852_v61 = vand.u32 2147483648, %v10387_v1 }
 0x8d8   :  { %v10403_v38 = vpop.eup %7549  ;;  %v2783_v63 = vmul.f32 %v10398_v10, %v2782_v18  ;;  %v10451_v36 = vsel %vm10424_vm2, %v2762_v35, %v2758_v5  ;;  %v2867_v18 = vand.u32 2147483648, %v10391_v14  ;;  %vm2861_vm3 = vweird.f32 %v10391_v14 }
 0x8d9   :  { %v10408_v0 = vpop.eup %7551  ;;  %v2827_v4 = vmul.f32 %v10403_v38, %v10384_v2  ;;  %v10442_v59 = vadd.f32 %v10389_v40, %v2768_v52  ;;  %vm2832_vm12 = vweird.f32 %v10403_v38 }
 0x8da   :  { %v10412_v25 = vpop.eup %7553  ;;  %v2842_v27 = vmul.f32 %v10408_v0, %v10387_v1  ;;  %vm2847_vm11 = vweird.f32 %v10408_v0  ;;  %vm10504_vm14 = vmor %vm2831_vm10, %vm2832_vm12  ;;  %v2868_v50 = vor.u32 1.1754944e-38, %v2867_v18 }
 0x8db   :  { %v2693_v16 = vpop.f32.mrf.mxu3  ;;  %v2857_v19 = vmul.f32 %v10412_v25, %v10391_v14  ;;  %v2828_v29 = vsub.f32 1.0, %v2827_v4  ;;  %v2773_v13 = vsel %vm10455_vm6, %v10389_v40, %v10442_v59  ;;  %v2784_v40 = vadd.f32 %v10398_v10, %v2783_v63  ;;  %vm10514_vm2 = vmor %vm2846_vm1, %vm2847_vm11 }
 0x8dc   :  { %v2715_v17 = vadd.f32 %v6682_v56, %v2693_v16  ;;  %v2843_v32 = vsub.f32 1.0, %v2842_v27  ;;  %v2713_v16 = vadd.f32 %v6678_v33, %v10367_v51  ;;  %vm2862_vm13 = vweird.f32 %v10412_v25 }
 0x8dd   :  { %v2858_v62 = vsub.f32 1.0, %v2857_v19  ;;  %v2829_v51 = vmul.f32 %v10403_v38, %v2828_v29  ;;  %v2788_v3 = vsel %vm10497_vm15, %v10398_v10, %v2784_v40  ;;  %v2838_v19 = vor.u32 1.1754944e-38, %v2837_v8  ;;  %vm10530_vm4 = vmor %vm2861_vm3, %vm2862_vm13 }
 0x8de   :  { %v6248_v39 = vmul.f32 -1.442695, %v2715_v17  ;;  %v2791_v17 = vand.u32 2147483648, %v10380_v46  ;;  %v2844_v7 = vmul.f32 %v10408_v0, %v2843_v32  ;;  %v2850_v46 = vand.u32 2147483647, %v10387_v1 }
 0x8df   :  { %v2865_v1 = vand.u32 2147483647, %v10391_v14  ;;  %v2853_v10 = vor.u32 1.1754944e-38, %v2852_v61  ;;  %v2778_v14 = vsel %vm10472_vm9, %v10439_v60, %v2773_v13 }
 0x8e0   :  { %v2845_v12 = vadd.f32 %v10408_v0, %v2844_v7  ;;  %vm2851_vm7 = vcmp.eq.f32.partialorder %v2850_v46, 8.507059e+37 }
 0x8e1   :  { %vm2866_vm8 = vcmp.eq.f32.partialorder %v2865_v1, 8.507059e+37 }
 0x8e2   :  { %v2849_v35 = vsel %vm10514_vm2, %v10408_v0, %v2845_v12 }
 0x8e3   :  { %v2695_v28 = vpop.f32.mrf.mxu3 }
 0x8e4   :  { %v2716_v34 = vadd.f32 %v6683_v20, %v2695_v28 }
 0x8e6   :  { %v6249_v44 = vmul.f32 -1.442695, %v2716_v34  ;;  %v2714_v34 = vadd.f32 %v6679_v53, %v10373_v48  ;;  %v2830_v48 = vadd.f32 %v10403_v38, %v2829_v51 }
 0x8e8   :  { %7555 = vpow2.f32 %v6249_v44  ;;  %v2835_v44 = vand.u32 2147483647, %v10384_v2  ;;  %v2834_v2 = vsel %vm10504_vm14, %v10403_v38, %v2830_v48  ;;  %v2792_v38 = vor.u32 1.1754944e-38, %v2791_v17 }
 0x8e9   :  { %7557 = vpow2.f32 %v6248_v39  ;;  %v2859_v39 = vmul.f32 %v10412_v25, %v2858_v62 }
 0x8ea   :  { %vm2836_vm6 = vcmp.eq.f32.partialorder %v2835_v44, 8.507059e+37  ;;  %v2793_v29 = vsel %vm2790_vm5, %v2792_v38, %v2788_v3 }
 0x8eb   :  { %v2698_v42 = vpop.f32.mrf.mxu3  ;;  %v2860_v49 = vadd.f32 %v10412_v25, %v2859_v39 }
 0x8ec   :  { %v2717_v41 = vadd.f32 %v6686_v15, %v2698_v42 }
 0x8ee   :  { %v7556_v11 = vpop.eup %7555  ;;  %v6250_v54 = vmul.f32 -1.442695, %v2717_v41  ;;  %v2864_v41 = vsel %vm10530_vm4, %v10412_v25, %v2860_v49 }
 0x8ef   :  { %v7558_v31 = vpop.eup %7557  ;;  %v10461_v20 = vadd.f32 1.0, %v7556_v11  ;;  %v2839_v11 = vsel %vm2836_vm6, %v2838_v19, %v2834_v2  ;;  %v2869_v60 = vsel %vm2866_vm8, %v2868_v50, %v2864_v41 }
 0x8f0   :  { %7559 = vpow2.f32 %v6250_v54  ;;  %v10469_v55 = vadd.f32 1.0, %v7558_v31  ;;  %v2854_v54 = vsel %vm2851_vm7, %v2853_v10, %v2849_v35  ;;  %v2952_v63 = vmul.f32 %v2839_v11, %v10281_v57 }
 0x8f1   :  { %7561 = vtanh.f32 %v2712_v22  ;;  %v2954_v56 = vmul.f32 %v2869_v60, %v10286_v45  ;;  %vm2911_vm12 = vweird.f32 %v10461_v20  ;;  %v2917_v12 = vand.u32 2147483648, %v10461_v20  ;;  %v10644_v60 = vld [vmem:[%s12916_s2 + $0x28] sm:$0xff] }
 0x8f2   :  { %7563 = vtanh.f32 %v2713_v16  ;;  %vm2896_vm1 = vweird.f32 %v10469_v55  ;;  %v2900_v18 = vand.u32 2147483647, %v10469_v55  ;;  %v2902_v46 = vand.u32 2147483648, %v10469_v55 }
 0x8f3   :  { %v2700_v47 = vpop.f32.mrf.mxu3  ;;  %7565 = vrcp.f32 %v10461_v20  ;;  %v2918_v19 = vor.u32 1.1754944e-38, %v2917_v12 }
 0x8f4   :  { %v2718_v21 = vadd.f32 %v6687_v58, %v2700_v47  ;;  %7567 = vrcp.f32 %v10469_v55  ;;  %v2953_v58 = vmul.f32 %v2854_v54, %v10284_v26  ;;  %v2903_v10 = vor.u32 1.1754944e-38, %v2902_v46  ;;  %v10609_v54 = vld [vmem:[%s12916_s2] sm:$0xff] }
 0x8f5   :  { %7569 = vtanh.f32 %v2714_v34 }
 0x8f6   :  { %v7560_v43 = vpop.eup %7559  ;;  %v6251_v23 = vmul.f32 -1.442695, %v2718_v21 }
 0x8f7   :  { %v10489_v15 = vadd.f32 1.0, %v7560_v43  ;;  %v7562_v4 = vpop.eup %7561 }
 0x8f8   :  { %7571 = vpow2.f32 %v6251_v23  ;;  %v7564_v27 = vpop.eup %7563  ;;  %v2956_v59 = vmul.f32 %v7562_v4, %v10451_v36  ;;  %v2915_v23 = vand.u32 2147483647, %v10461_v20 }
 0x8f9   :  { %7573 = vrcp.f32 %v10489_v15  ;;  %v10526_v42 = vpop.eup %7565  ;;  %v2957_v22 = vmul.f32 %v7564_v27, %v2778_v14  ;;  %v2932_v39 = vand.u32 2147483648, %v10489_v15  ;;  %vm2926_vm13 = vweird.f32 %v10489_v15 }
 0x8fa   :  { %v10537_v33 = vpop.eup %7567  ;;  %v2907_v31 = vmul.f32 %v10526_v42, %v10461_v20  ;;  %v10553_v36 = vadd.f32 %v2956_v59, %v2952_v63  ;;  %vm2912_vm11 = vweird.f32 %v10526_v42  ;;  %v2930_v21 = vand.u32 2147483647, %v10489_v15 }
 0x8fb   :  { %v7570_v5 = vpop.eup %7569  ;;  %v2892_v53 = vmul.f32 %v10537_v33, %v10469_v55  ;;  %v10556_v13 = vadd.f32 %v2957_v22, %v2953_v58  ;;  %vm2897_vm10 = vweird.f32 %v10537_v33  ;;  %v2933_v52 = vor.u32 1.1754944e-38, %v2932_v39  ;;  %vm10588_vm2 = vmor %vm2911_vm12, %vm2912_vm11  ;;  %v10637_v22 = vld [vmem:[%s12916_s2 + $0x20] sm:$0xff] }
 0x8fc   :  { %v2958_v62 = vmul.f32 %v7570_v5, %v2793_v29  ;;  %v2908_v9 = vsub.f32 1.0, %v2907_v31  ;;  %vm2931_vm3 = vcmp.eq.f32.partialorder %v2930_v21, 8.507059e+37  ;;  %vm10594_vm5 = vmor %vm2896_vm1, %vm2897_vm10  ;;  %vm2916_vm8 = vcmp.eq.f32.partialorder %v2915_v23, 8.507059e+37  ;;  %v10623_v31 = vld [vmem:[%s12916_s2 + $0x10] sm:$0xff]  ;;  %v6689_v58 = vld [vmem:[#allocation5 + $0x200] sm:$0xff]  }
 0x8fd   :  { %v2893_v17 = vsub.f32 1.0, %v2892_v53  ;;  %v10651_v53 = vld [vmem:[%s12916_s2 + $0x30] sm:$0xff]  ;;  %v6691_v46 = vunpack.c.h.bf16 %v6689_v58 }
 0x8fe   :  { %v7572_v0 = vpop.eup %7571  ;;  %v10558_v7 = vadd.f32 %v2958_v62, %v2954_v56  ;;  %v2909_v57 = vmul.f32 %v10526_v42, %v2908_v9  ;;  %v6690_v56 = vunpack.c.l.bf16 %v6689_v58 }
 0x8ff   :  { %v7574_v32 = vpop.eup %7573  ;;  %v2890_v25 = vadd.f32 1.0, %v7572_v0  ;;  %v2894_v26 = vmul.f32 %v10537_v33, %v2893_v17  ;;  %v10664_v17 = vld [vmem:[#allocation5 + $0x210] sm:$0xff]  }
 0x900   :  { %v2922_v16 = vmul.f32 %v7574_v32, %v10489_v15  ;;  %vm2927_vm9 = vweird.f32 %v7574_v32  ;;  %v2910_v8 = vadd.f32 %v10526_v42, %v2909_v57  ;;  %v6698_v57 = vunpack.c.l.bf16 %v10664_v17 }
 0x901   :  { %7575 = vrcp.f32 %v2890_v25  ;;  %vm10572_vm15 = vmor %vm2926_vm13, %vm2927_vm9  ;;  %v2947_v43 = vand.u32 2147483648, %v2890_v25  ;;  %v2895_v48 = vadd.f32 %v10537_v33, %v2894_v26  ;;  %v2945_v15 = vand.u32 2147483647, %v2890_v25 }
 0x902   :  { %v2923_v51 = vsub.f32 1.0, %v2922_v16  ;;  %7577 = vtanh.f32 %v10553_v36  ;;  %vm2941_vm4 = vweird.f32 %v2890_v25  ;;  %v2914_v55 = vsel %vm10588_vm2, %v10526_v42, %v2910_v8 }
 0x903   :  { %7579 = vtanh.f32 %v10556_v13  ;;  %v2948_v1 = vor.u32 1.1754944e-38, %v2947_v43  ;;  %vm2946_vm7 = vcmp.eq.f32.partialorder %v2945_v15, 8.507059e+37  ;;  %v2899_v35 = vsel %vm10594_vm5, %v10537_v33, %v2895_v48  ;;  %v10616_v33 = vld [vmem:[%s12916_s2 + $0x8] sm:$0xff] }
 0x904   :  { %v2924_v28 = vmul.f32 %v7574_v32, %v2923_v51  ;;  %7581 = vtanh.f32 %v10558_v7  ;;  %v2919_v14 = vsel %vm2916_vm8, %v2918_v19, %v2914_v55  ;;  %vm2901_vm9 = vcmp.eq.f32.partialorder %v2900_v18, 8.507059e+37  ;;  %v10669_v15 = vld [vmem:[#allocation5 + $0x220] sm:$0xff]   ;;  %v7000_v55 = vld [vmem:[#allocation5 + $0x208] sm:$0xff]  }
 0x905   :  { %7583 = vtanh.f32 %v10363_v37  ;;  %v2904_v42 = vsel %vm2901_vm9, %v2903_v10, %v2899_v35  ;;  %v6694_v10 = vunpack.c.l.bf16 %v7000_v55 }
 0x906   :  { %v2925_v47 = vadd.f32 %v7574_v32, %v2924_v28 }
 0x907   :  { %v7576_v34 = vpop.eup %7575 }
 0x908   :  { %v2937_v45 = vmul.f32 %v7576_v34, %v2890_v25  ;;  %v7578_v61 = vpop.eup %7577  ;;  %v2929_v30 = vsel %vm10572_vm15, %v7574_v32, %v2925_v47  ;;  %vm2942_vm14 = vweird.f32 %v7576_v34  ;;  %v10630_v32 = vld [vmem:[%s12916_s2 + $0x18] sm:$0xff] }
 0x909   :  { %v7580_v4 = vpop.eup %7579  ;;  %v2934_v20 = vsel %vm2931_vm3, %v2933_v52, %v2929_v30  ;;  %vm2943_vm6 = vmor %vm2941_vm4, %vm2942_vm14  ;;  %v2968_v11 = vmul.f32 %v7578_v61, %v2919_v14  ;;  %v10658_v25 = vld [vmem:[%s12916_s2 + $0x38] sm:$0xff]  ;;  %v6706_v52 = vunpack.c.l.bf16 %v10669_v15 }
 0x90a   :  { %v2938_v40 = vsub.f32 1.0, %v2937_v45  ;;  %v7582_v6 = vpop.eup %7581  ;;  %v2969_v41 = vmul.f32 %v7580_v4, %v2934_v20 }
 0x90b   :  { %v7584_v29 = vpop.eup %7583 }
 0x90c   :  { %v2939_v49 = vmul.f32 %v7576_v34, %v2938_v40  ;;  %v2967_v0 = vmul.f32 %v7584_v29, %v2904_v42 }
 0x90e   :  { %v2940_v2 = vadd.f32 %v7576_v34, %v2939_v49  ;;  %v3004_v59 = vpack.c.bf16 %v2968_v11, %v2967_v0 }
 0x910   :  { %v2944_v24 = vsel %vm2943_vm6, %v7576_v34, %v2940_v2 }
 0x911   :  { %v2949_v38 = vsel %vm2946_vm7, %v2948_v1, %v2944_v24 }
 0x912   :  { %v2970_v5 = vmul.f32 %v7582_v6, %v2949_v38 }
 0x914   :  { %v3005_v50 = vpack.c.bf16 %v2970_v5, %v2969_v41 }
 0x916   :  { %3012 = vmatpush.bf16.msra.mxu0 %v3005_v50 }
 0x91a   :  { %3013 = vmatpush.bf16.msra.mxu0 %v3004_v59 }
 0x91d   :  { %6252 = vmatmul.msk.bf16.vlgmr.msra.gmra.mxu0 %vm165_vm0, %v10609_v54 }
 0x92d   :  { %6253 = vmatmul.msk.bf16.gmra.mxu0 %vm165_vm0, %v10616_v33 }
 0x93d   :  { %6254 = vmatmul.msk.bf16.gmra.mxu0 %vm165_vm0, %v10623_v31 }
 0x94d   :  { %6255 = vmatmul.msk.bf16.gmra.mxu0 %vm165_vm0, %v10630_v32 }
 0x95d   :  { %6256 = vmatmul.msk.bf16.gmra.mxu0 %vm165_vm0, %v10637_v22 }
 0x96d   :  { %6257 = vmatmul.msk.bf16.gmra.mxu0 %vm165_vm0, %v10644_v60 }
 0x97d   :  { %6258 = vmatmul.msk.bf16.gmra.mxu0 %vm165_vm0, %v10651_v53 }
 0x98d   :  { %6259 = vmatmul.msk.bf16.gmra.mxu0 %vm165_vm0, %v10658_v25 }
 0x99a   :  { %v3015_v63 = vpop.f32.mrf.mxu0 }
 0x99b   :  { %v3055_v9 = vadd.f32 %v6690_v56, %v3015_v63  ;;  %v6695_v63 = vunpack.c.h.bf16 %v7000_v55  ;;  %v7002_v56 = vld [vmem:[#allocation5 + $0x218] sm:$0xff]  }
 0x99d   :  { %v6260_v28 = vmul.f32 -1.442695, %v3055_v9 }
 0x99f   :  { %7585 = vpow2.f32 %v6260_v28 }
 0x9a2   :  { %v3017_v62 = vpop.f32.mrf.mxu0 }
 0x9a3   :  { %v3056_v19 = vadd.f32 %v6691_v46, %v3017_v62 }
 0x9a5   :  { %v7586_v47 = vpop.eup %7585  ;;  %v6261_v5 = vmul.f32 -1.442695, %v3056_v19 }
 0x9a6   :  { %v3083_v40 = vadd.f32 1.0, %v7586_v47 }
 0x9a8   :  { %v3098_v24 = vand.u32 2147483648, %v3083_v40  ;;  %vm3092_vm15 = vweird.f32 %v3083_v40  ;;  %v3096_v35 = vand.u32 2147483647, %v3083_v40 }
 0x9aa   :  { %v3020_v16 = vpop.f32.mrf.mxu0  ;;  %v3099_v42 = vor.u32 1.1754944e-38, %v3098_v24  ;;  %vm3097_vm2 = vcmp.eq.f32.partialorder %v3096_v35, 8.507059e+37 }
 0x9ab   :  { %v3057_v0 = vadd.f32 %v6694_v10, %v3020_v16 }
 0x9ad   :  { %v6262_v28 = vmul.f32 -1.442695, %v3057_v0 }
 0x9b2   :  { %v10662_v51 = vpop.f32.mrf.mxu0 }
 0x9ba   :  { %v3025_v34 = vpop.f32.mrf.mxu0 }
 0x9bb   :  { %v3059_v26 = vadd.f32 %v6698_v57, %v3025_v34  ;;  %v6699_v57 = vunpack.c.h.bf16 %v10664_v17  ;;  %v3058_v34 = vadd.f32 %v6695_v63, %v10662_v51 }
 0x9bd   :  { %v6264_v45 = vmul.f32 -1.442695, %v3059_v26  ;;  %v6702_v26 = vunpack.c.l.bf16 %v7002_v56 }
 0x9bf   :  { %7587 = vpow2.f32 %v6264_v45  ;;  %v6703_v45 = vunpack.c.h.bf16 %v7002_v56 }
 0x9c0   :  { %7589 = vrcp.f32 %v3083_v40 }
 0x9c2   :  { %v10667_v39 = vpop.f32.mrf.mxu0 }
 0x9c3   :  { %v3060_v16 = vadd.f32 %v6699_v57, %v10667_v39 }
 0x9c5   :  { %v7588_v21 = vpop.eup %7587 }
 0x9c6   :  { %v3159_v8 = vadd.f32 1.0, %v7588_v21  ;;  %v7590_v43 = vpop.eup %7589  ;;  %v6263_v21 = vmul.f32 -1.442695, %v3058_v34  ;;  %v7004_v34 = vld [vmem:[#allocation5 + $0x228] sm:$0xff]  }
 0x9c7   :  { %v3088_v12 = vmul.f32 %v7590_v43, %v3083_v40  ;;  %vm3093_vm11 = vweird.f32 %v7590_v43 }
 0x9c8   :  { %7591 = vrcp.f32 %v3159_v8  ;;  %v3174_v2 = vand.u32 2147483648, %v3159_v8  ;;  %vm3168_vm12 = vweird.f32 %v3159_v8  ;;  %v3172_v20 = vand.u32 2147483647, %v3159_v8  ;;  %vm3094_vm14 = vmor %vm3092_vm15, %vm3093_vm11 }
 0x9c9   :  { %v3089_v49 = vsub.f32 1.0, %v3088_v12 }
 0x9ca   :  { %v3030_v44 = vpop.f32.mrf.mxu0  ;;  %v3175_v14 = vor.u32 1.1754944e-38, %v3174_v2  ;;  %vm3173_vm1 = vcmp.eq.f32.partialorder %v3172_v20, 8.507059e+37 }
 0x9cb   :  { %v3090_v18 = vmul.f32 %v7590_v43, %v3089_v49 }
 0x9cd   :  { %v3091_v1 = vadd.f32 %v7590_v43, %v3090_v18 }
 0x9ce   :  { %v7592_v48 = vpop.eup %7591 }
 0x9cf   :  { %v3164_v23 = vmul.f32 %v7592_v48, %v3159_v8  ;;  %vm3169_vm10 = vweird.f32 %v7592_v48  ;;  %v3095_v41 = vsel %vm3094_vm14, %v7590_v43, %v3091_v1 }
 0x9d0   :  { %vm3170_vm13 = vmor %vm3168_vm12, %vm3169_vm10  ;;  %v3100_v59 = vsel %vm3097_vm2, %v3099_v42, %v3095_v41  ;;  %v10713_v42 = vld [vmem:[#allocation5 + $0x238] sm:$0xff]  }
 0x9d1   :  { %v3165_v61 = vsub.f32 1.0, %v3164_v23  ;;  %v6718_v56 = vunpack.c.l.bf16 %v10713_v42 }
 0x9d2   :  { %v3032_v30 = vpop.f32.mrf.mxu0 }
 0x9d3   :  { %v3166_v4 = vmul.f32 %v7592_v48, %v3165_v61  ;;  %v3062_v8 = vadd.f32 %v6703_v45, %v3032_v30 }
 0x9d5   :  { %v3167_v27 = vadd.f32 %v7592_v48, %v3166_v4  ;;  %v6267_v17 = vmul.f32 -1.442695, %v3062_v8  ;;  %v7005_v4 = vld [vmem:[#allocation5 + $0x230] sm:$0xff]  }
 0x9d6   :  { %v6714_v2 = vunpack.c.l.bf16 %v7005_v4  ;;  %v6715_v1 = vunpack.c.h.bf16 %v7005_v4 }
 0x9d7   :  { %v3171_v38 = vsel %vm3170_vm13, %v7592_v48, %v3167_v27  ;;  %v6265_v48 = vmul.f32 -1.442695, %v3060_v16 }
 0x9d8   :  { %v3176_v50 = vsel %vm3173_vm1, %v3175_v14, %v3171_v38 }
 0x9d9   :  { %v3303_v62 = vmul.f32 %v3176_v50, %v10363_v37  ;;  %v3061_v37 = vadd.f32 %v6702_v26, %v3030_v44 }
 0x9da   :  { %v3035_v6 = vpop.f32.mrf.mxu0 }
 0x9db   :  { %v3063_v3 = vadd.f32 %v6706_v52, %v3035_v6  ;;  %v6266_v23 = vmul.f32 -1.442695, %v3061_v37  ;;  %v6707_v37 = vunpack.c.h.bf16 %v10669_v15 }
 0x9dd   :  { %7593 = vtanh.f32 %v3063_v3 }
 0x9de   :  { %7595 = vpow2.f32 %v6261_v5 }
 0x9df   :  { %7597 = vpow2.f32 %v6262_v28 }
 0x9e0   :  { %7599 = vpow2.f32 %v6263_v21 }
 0x9e2   :  { %v10672_v11 = vpop.f32.mrf.mxu0 }
 0x9e3   :  { %v7594_v29 = vpop.eup %7593 }
 0x9e4   :  { %v3307_v58 = vmul.f32 %v7594_v29, %v3100_v59  ;;  %v7596_v40 = vpop.eup %7595 }
 0x9e5   :  { %v10682_v43 = vadd.f32 1.0, %v7596_v40  ;;  %v7598_v12 = vpop.eup %7597 }
 0x9e6   :  { %v10675_v9 = vadd.f32 %v3307_v58, %v3303_v62  ;;  %v10687_v61 = vadd.f32 1.0, %v7598_v12  ;;  %v7600_v39 = vpop.eup %7599 }
 0x9e7   :  { %7601 = vrcp.f32 %v10682_v43  ;;  %v10692_v30 = vadd.f32 1.0, %v7600_v39  ;;  %v3111_v63 = vand.u32 2147483647, %v10682_v43  ;;  %v3113_v58 = vand.u32 2147483648, %v10682_v43 }
 0x9e8   :  { %7603 = vpow2.f32 %v6265_v48  ;;  %v3128_v26 = vand.u32 2147483648, %v10687_v61  ;;  %vm3107_vm4 = vweird.f32 %v10682_v43  ;;  %vm3122_vm7 = vweird.f32 %v10687_v61 }
 0x9e9   :  { %7605 = vpow2.f32 %v6266_v23  ;;  %vm10736_vm5 = vcmp.eq.f32.partialorder %v3111_v63, 8.507059e+37  ;;  %v3126_v15 = vand.u32 2147483647, %v10687_v61  ;;  %vm3137_vm10 = vweird.f32 %v10692_v30 }
 0x9ea   :  { %v10679_v47 = vpop.f32.mrf.mxu0  ;;  %7607 = vpow2.f32 %v6267_v17  ;;  %v3114_v17 = vor.u32 1.1754944e-38, %v3113_v58  ;;  %v10751_v4 = vor.u32 1.1754944e-38, %v3128_v26 }
 0x9eb   :  { %7609 = vrcp.f32 %v10687_v61  ;;  %vm10784_vm12 = vcmp.eq.f32.partialorder %v3126_v15, 8.507059e+37 }
 0x9ec   :  { %7611 = vrcp.f32 %v10692_v30 }
 0x9ed   :  { %v10689_v49 = vpop.eup %7601 }
 0x9ee   :  { %v7604_v44 = vpop.eup %7603  ;;  %v3103_v27 = vmul.f32 %v10689_v49, %v10682_v43  ;;  %vm3108_vm3 = vweird.f32 %v10689_v49  ;;  %v6710_v43 = vunpack.c.l.bf16 %v7004_v34 }
 0x9ef   :  { %v7606_v52 = vpop.eup %7605  ;;  %v10696_v6 = vadd.f32 1.0, %v7604_v44  ;;  %vm10742_vm6 = vmor %vm3107_vm4, %vm3108_vm3 }
 0x9f0   :  { %v7608_v46 = vpop.eup %7607  ;;  %v10699_v3 = vadd.f32 1.0, %v7606_v52  ;;  %v3104_v19 = vsub.f32 1.0, %v3103_v27 }
 0x9f1   :  { %v10701_v55 = vpop.eup %7609  ;;  %v10703_v20 = vadd.f32 1.0, %v7608_v46  ;;  %7613 = vrcp.f32 %v10696_v6  ;;  %vm3183_vm13 = vweird.f32 %v10696_v6  ;;  %v3189_v26 = vand.u32 2147483648, %v10696_v6 }
 0x9f2   :  { %v10685_v51 = vpop.f32.mrf.mxu0  ;;  %v3118_v35 = vmul.f32 %v10701_v55, %v10687_v61  ;;  %7615 = vrcp.f32 %v10699_v3  ;;  %v10710_v10 = vpop.eup %7611  ;;  %v3105_v41 = vmul.f32 %v10689_v49, %v3104_v19  ;;  %vm3123_vm8 = vweird.f32 %v10701_v55 }
 0x9f3   :  { %7617 = vrcp.f32 %v10703_v20  ;;  %v3133_v59 = vmul.f32 %v10710_v10, %v10692_v30  ;;  %v3064_v19 = vadd.f32 %v6707_v37, %v10672_v11  ;;  %vm10767_vm9 = vmor %vm3122_vm7, %vm3123_vm8  ;;  %v3141_v11 = vand.u32 2147483647, %v10692_v30 }
 0x9f4   :  { %v3119_v50 = vsub.f32 1.0, %v3118_v35  ;;  %v3106_v57 = vadd.f32 %v10689_v49, %v3105_v41  ;;  %vm3138_vm11 = vweird.f32 %v10710_v10  ;;  %v3204_v8 = vand.u32 2147483648, %v10699_v3 }
 0x9f5   :  { %v3134_v16 = vsub.f32 1.0, %v3133_v59  ;;  %vm10809_vm2 = vmor %vm3137_vm10, %vm3138_vm11  ;;  %vm3198_vm4 = vweird.f32 %v10699_v3  ;;  %v3217_v15 = vand.u32 2147483647, %v10703_v20  ;;  %vm3142_vm8 = vcmp.eq.f32.partialorder %v3141_v11, 8.507059e+37 }
 0x9f6   :  { %v3120_v45 = vmul.f32 %v10701_v55, %v3119_v50  ;;  %v3110_v44 = vsel %vm10742_vm6, %v10689_v49, %v3106_v57  ;;  %vm3213_vm6 = vweird.f32 %v10703_v20 }
 0x9f7   :  { %v10715_v0 = vpop.eup %7613  ;;  %v3135_v49 = vmul.f32 %v10710_v10, %v3134_v16  ;;  %v10763_v41 = vsel %vm10736_vm5, %v3114_v17, %v3110_v44  ;;  %vm3218_vm11 = vcmp.eq.f32.partialorder %v3217_v15, 8.507059e+37 }
 0x9f8   :  { %v10720_v62 = vpop.eup %7615  ;;  %v3179_v40 = vmul.f32 %v10715_v0, %v10696_v6  ;;  %v10754_v46 = vadd.f32 %v10701_v55, %v3120_v45  ;;  %v3187_v45 = vand.u32 2147483647, %v10696_v6  ;;  %vm3184_vm15 = vweird.f32 %v10715_v0 }
 0x9f9   :  { %v10724_v28 = vpop.eup %7617  ;;  %v3194_v21 = vmul.f32 %v10720_v62, %v10699_v3  ;;  %vm3199_vm14 = vweird.f32 %v10720_v62  ;;  %vm10816_vm3 = vmor %vm3183_vm13, %vm3184_vm15 }
 0x9fa   :  { %v3045_v18 = vpop.f32.mrf.mxu0  ;;  %v3209_v23 = vmul.f32 %v10724_v28, %v10703_v20  ;;  %vm3214_vm1 = vweird.f32 %v10724_v28  ;;  %vm10826_vm5 = vmor %vm3198_vm4, %vm3199_vm14 }
 0x9fb   :  { %v3067_v24 = vadd.f32 %v6714_v2, %v3045_v18  ;;  %v3180_v18 = vsub.f32 1.0, %v3179_v40  ;;  %vm10842_vm7 = vmor %vm3213_vm6, %vm3214_vm1 }
 0x9fc   :  { %v3210_v35 = vsub.f32 1.0, %v3209_v23 }
 0x9fd   :  { %v6268_v5 = vmul.f32 -1.442695, %v3067_v24  ;;  %v6711_v24 = vunpack.c.h.bf16 %v7004_v34 }
 0x9fe   :  { %v3211_v57 = vmul.f32 %v10724_v28, %v3210_v35 }
 0x9ff   :  { %v3066_v58 = vadd.f32 %v6711_v24, %v10685_v51 }
 0xa00   :  { %v3212_v23 = vadd.f32 %v10724_v28, %v3211_v57 }
 0xa02   :  { %v3047_v38 = vpop.f32.mrf.mxu0 }
 0xa03   :  { %v3068_v14 = vadd.f32 %v6715_v1, %v3047_v38  ;;  %v3195_v1 = vsub.f32 1.0, %v3194_v21  ;;  %v3065_v38 = vadd.f32 %v6710_v43, %v10679_v47  ;;  %v3181_v47 = vmul.f32 %v10715_v0, %v3180_v18 }
 0xa04   :  { %v3202_v43 = vand.u32 2147483647, %v10699_v3  ;;  %v3190_v18 = vor.u32 1.1754944e-38, %v3189_v26 }
 0xa05   :  { %v6269_v29 = vmul.f32 -1.442695, %v3068_v14  ;;  %v6719_v14 = vunpack.c.h.bf16 %v10713_v42  ;;  %v3125_v42 = vsel %vm10767_vm9, %v10701_v55, %v10754_v46  ;;  %v3196_v59 = vmul.f32 %v10720_v62, %v3195_v1 }
 0xa06   :  { %v3136_v55 = vadd.f32 %v10710_v10, %v3135_v49  ;;  %v3182_v51 = vadd.f32 %v10715_v0, %v3181_v47  ;;  %vm3188_vm9 = vcmp.eq.f32.partialorder %v3187_v45, 8.507059e+37  ;;  %v3216_v1 = vsel %vm10842_vm7, %v10724_v28, %v3212_v23 }
 0xa07   :  { %7619 = vpow2.f32 %v6269_v29  ;;  %v3143_v29 = vand.u32 2147483648, %v10692_v30  ;;  %v3197_v21 = vadd.f32 %v10720_v62, %v3196_v59  ;;  %v3219_v30 = vand.u32 2147483648, %v10703_v20 }
 0xa08   :  { %7621 = vpow2.f32 %v6268_v5  ;;  %v3186_v6 = vsel %vm10816_vm3, %v10715_v0, %v3182_v51  ;;  %v3140_v3 = vsel %vm10809_vm2, %v10710_v10, %v3136_v55  ;;  %v3205_v10 = vor.u32 1.1754944e-38, %v3204_v8 }
 0xa09   :  { %v3144_v0 = vor.u32 1.1754944e-38, %v3143_v29  ;;  %v3130_v20 = vsel %vm10784_vm12, %v10751_v4, %v3125_v42  ;;  %vm3203_vm10 = vcmp.eq.f32.partialorder %v3202_v43, 8.507059e+37  ;;  %v3220_v24 = vor.u32 1.1754944e-38, %v3219_v30 }
 0xa0a   :  { %v3050_v48 = vpop.f32.mrf.mxu0  ;;  %v3191_v49 = vsel %vm3188_vm9, %v3190_v18, %v3186_v6 }
 0xa0b   :  { %v3069_v39 = vadd.f32 %v6718_v56, %v3050_v48  ;;  %v3145_v35 = vsel %vm3142_vm8, %v3144_v0, %v3140_v3  ;;  %v3221_v4 = vsel %vm3218_vm11, %v3220_v24, %v3216_v1  ;;  %v3304_v29 = vmul.f32 %v3191_v49, %v10553_v36 }
 0xa0d   :  { %v7620_v52 = vpop.eup %7619  ;;  %v6270_v27 = vmul.f32 -1.442695, %v3069_v39 }
 0xa0e   :  { %v7622_v2 = vpop.eup %7621  ;;  %v10773_v50 = vadd.f32 1.0, %v7620_v52 }
 0xa0f   :  { %7623 = vpow2.f32 %v6270_v27  ;;  %v10781_v61 = vadd.f32 1.0, %v7622_v2  ;;  %v3201_v27 = vsel %vm10826_vm5, %v10720_v62, %v3197_v21 }
 0xa10   :  { %7625 = vtanh.f32 %v3064_v19  ;;  %vm3263_vm15 = vweird.f32 %v10773_v50  ;;  %v3267_v30 = vand.u32 2147483647, %v10773_v50 }
 0xa11   :  { %7627 = vtanh.f32 %v3065_v38  ;;  %vm3248_vm4 = vweird.f32 %v10781_v61  ;;  %v3252_v46 = vand.u32 2147483647, %v10781_v61 }
 0xa12   :  { %v3052_v56 = vpop.f32.mrf.mxu0  ;;  %7629 = vrcp.f32 %v10773_v50  ;;  %vm3268_vm11 = vcmp.eq.f32.partialorder %v3267_v30, 8.507059e+37 }
 0xa13   :  { %v3070_v34 = vadd.f32 %v6719_v14, %v3052_v56  ;;  %7631 = vrcp.f32 %v10781_v61  ;;  %v3206_v14 = vsel %vm3203_vm10, %v3205_v10, %v3201_v27  ;;  %v3306_v56 = vmul.f32 %v3221_v4, %v10558_v7 }
 0xa14   :  { %7633 = vtanh.f32 %v3066_v58  ;;  %v3305_v58 = vmul.f32 %v3206_v14, %v10556_v13  ;;  %v3254_v27 = vand.u32 2147483648, %v10781_v61 }
 0xa15   :  { %v7624_v40 = vpop.eup %7623  ;;  %v6271_v16 = vmul.f32 -1.442695, %v3070_v34 }
 0xa16   :  { %v10801_v37 = vadd.f32 1.0, %v7624_v40  ;;  %v7626_v12 = vpop.eup %7625 }
 0xa17   :  { %7635 = vpow2.f32 %v6271_v16  ;;  %v7628_v39 = vpop.eup %7627  ;;  %v3308_v38 = vmul.f32 %v7626_v12, %v10763_v41  ;;  %v10941_v12 = vld [vmem:[#allocation5 + $0x260] sm:$0xff]  }
 0xa18   :  { %7637 = vrcp.f32 %v10801_v37  ;;  %v10838_v52 = vpop.eup %7629  ;;  %v3309_v47 = vmul.f32 %v7628_v39, %v3130_v20  ;;  %v3284_v21 = vand.u32 2147483648, %v10801_v37  ;;  %vm3278_vm1 = vweird.f32 %v10801_v37 }
 0xa19   :  { %v10849_v2 = vpop.eup %7631  ;;  %v3259_v5 = vmul.f32 %v10838_v52, %v10773_v50  ;;  %v10865_v41 = vadd.f32 %v3308_v38, %v3304_v29  ;;  %vm3264_vm14 = vweird.f32 %v10838_v52  ;;  %v3282_v48 = vand.u32 2147483647, %v10801_v37 }
 0xa1a   :  { %v7634_v19 = vpop.eup %7633  ;;  %v3244_v42 = vmul.f32 %v10849_v2, %v10781_v61  ;;  %v10868_v34 = vadd.f32 %v3309_v47, %v3305_v58  ;;  %vm3249_vm13 = vweird.f32 %v10849_v2  ;;  %v3269_v39 = vand.u32 2147483648, %v10773_v50  ;;  %vm10900_vm5 = vmor %vm3263_vm15, %vm3264_vm14 }
 0xa1b   :  { %v3310_v59 = vmul.f32 %v7634_v19, %v3145_v35  ;;  %v3260_v57 = vsub.f32 1.0, %v3259_v5  ;;  %v3285_v18 = vor.u32 1.1754944e-38, %v3284_v21  ;;  %vm3283_vm7 = vcmp.eq.f32.partialorder %v3282_v48, 8.507059e+37  ;;  %vm10906_vm8 = vmor %vm3248_vm4, %vm3249_vm13 }
 0xa1c   :  { %v3245_v26 = vsub.f32 1.0, %v3244_v42  ;;  %v3270_v24 = vor.u32 1.1754944e-38, %v3269_v39  ;;  %v3255_v38 = vor.u32 1.1754944e-38, %v3254_v27 }
 0xa1d   :  { %v7636_v62 = vpop.eup %7635  ;;  %v10870_v45 = vadd.f32 %v3310_v59, %v3306_v56  ;;  %v3261_v36 = vmul.f32 %v10838_v52, %v3260_v57  ;;  %v6721_v59 = vld [vmem:[#allocation5 + $0x240] sm:$0xff]  }
 0xa1e   :  { %v7638_v11 = vpop.eup %7637  ;;  %v3242_v28 = vadd.f32 1.0, %v7636_v62  ;;  %v3246_v13 = vmul.f32 %v10849_v2, %v3245_v26  ;;  %v6723_v39 = vunpack.c.h.bf16 %v6721_v59 }
 0xa1f   :  { %v3274_v63 = vmul.f32 %v7638_v11, %v10801_v37  ;;  %vm3279_vm12 = vweird.f32 %v7638_v11  ;;  %v3262_v23 = vadd.f32 %v10838_v52, %v3261_v36 }
 0xa20   :  { %7639 = vrcp.f32 %v3242_v28  ;;  %vm10884_vm2 = vmor %vm3278_vm1, %vm3279_vm12  ;;  %v3299_v17 = vand.u32 2147483648, %v3242_v28  ;;  %v3247_v43 = vadd.f32 %v10849_v2, %v3246_v13  ;;  %v3297_v37 = vand.u32 2147483647, %v3242_v28 }
 0xa21   :  { %v3275_v55 = vsub.f32 1.0, %v3274_v63  ;;  %7641 = vtanh.f32 %v10865_v41  ;;  %vm3293_vm6 = vweird.f32 %v3242_v28  ;;  %v3266_v61 = vsel %vm10900_vm5, %v10838_v52, %v3262_v23 }
 0xa22   :  { %7643 = vtanh.f32 %v10868_v34  ;;  %v3300_v50 = vor.u32 1.1754944e-38, %v3299_v17  ;;  %vm3298_vm10 = vcmp.eq.f32.partialorder %v3297_v37, 8.507059e+37  ;;  %v3251_v35 = vsel %vm10906_vm8, %v10849_v2, %v3247_v43 }
 0xa23   :  { %v3276_v40 = vmul.f32 %v7638_v11, %v3275_v55  ;;  %7645 = vtanh.f32 %v10870_v45  ;;  %v3271_v14 = vsel %vm3268_vm11, %v3270_v24, %v3266_v61  ;;  %vm3253_vm12 = vcmp.eq.f32.partialorder %v3252_v46, 8.507059e+37 }
 0xa24   :  { %7647 = vtanh.f32 %v10675_v9  ;;  %v3256_v52 = vsel %vm3253_vm12, %v3255_v38, %v3251_v35  ;;  %v6738_v43 = vunpack.c.l.bf16 %v10941_v12 }
 0xa25   :  { %v3277_v16 = vadd.f32 %v7638_v11, %v3276_v40 }
 0xa26   :  { %v7640_v51 = vpop.eup %7639 }
 0xa27   :  { %v3289_v7 = vmul.f32 %v7640_v51, %v3242_v28  ;;  %v7642_v44 = vpop.eup %7641  ;;  %v3281_v3 = vsel %vm10884_vm2, %v7638_v11, %v3277_v16  ;;  %vm3294_vm3 = vweird.f32 %v7640_v51 }
 0xa28   :  { %v7644_v15 = vpop.eup %7643  ;;  %v3286_v19 = vsel %vm3283_vm7, %v3285_v18, %v3281_v3  ;;  %vm3295_vm9 = vmor %vm3293_vm6, %vm3294_vm3  ;;  %v3320_v4 = vmul.f32 %v7642_v44, %v3271_v14 }
 0xa29   :  { %v3290_v8 = vsub.f32 1.0, %v3289_v7  ;;  %v7646_v10 = vpop.eup %7645  ;;  %v3321_v5 = vmul.f32 %v7644_v15, %v3286_v19  ;;  %v7007_v15 = vld [vmem:[#allocation5 + $0x248] sm:$0xff]  }
 0xa2a   :  { %v7648_v42 = vpop.eup %7647  ;;  %v6726_v1 = vunpack.c.l.bf16 %v7007_v15 }
 0xa2b   :  { %v3291_v6 = vmul.f32 %v7640_v51, %v3290_v8  ;;  %v3319_v28 = vmul.f32 %v7648_v42, %v3256_v52 }
 0xa2d   :  { %v3292_v20 = vadd.f32 %v7640_v51, %v3291_v6  ;;  %v3356_v29 = vpack.c.bf16 %v3320_v4, %v3319_v28 }
 0xa2f   :  { %v3296_v49 = vsel %vm3295_vm9, %v7640_v51, %v3292_v20 }
 0xa30   :  { %v3301_v62 = vsel %vm3298_vm10, %v3300_v50, %v3296_v49 }
 0xa31   :  { %v3322_v11 = vmul.f32 %v7646_v10, %v3301_v62 }
 0xa33   :  { %v3357_v47 = vpack.c.bf16 %v3322_v11, %v3321_v5  ;;  %v6727_v5 = vunpack.c.h.bf16 %v7007_v15 }
 0xa35   :  { %3364 = vmatpush.bf16.msra.mxu1 %v3357_v47  ;;  %v7009_v47 = vld [vmem:[#allocation5 + $0x258] sm:$0xff]  }
 0xa39   :  { %3365 = vmatpush.bf16.msra.mxu1 %v3356_v29 }
 0xa3c   :  { %6272 = vmatmul.msk.bf16.vlgmr.msra.gmra.mxu1 %vm165_vm0, %v10609_v54 }
 0xa4c   :  { %6273 = vmatmul.msk.bf16.gmra.mxu1 %vm165_vm0, %v10616_v33 }
 0xa5c   :  { %6274 = vmatmul.msk.bf16.gmra.mxu1 %vm165_vm0, %v10623_v31  ;;  %v6722_v31 = vunpack.c.l.bf16 %v6721_v59 }
 0xa6c   :  { %6275 = vmatmul.msk.bf16.gmra.mxu1 %vm165_vm0, %v10630_v32  ;;  %v10936_v32 = vld [vmem:[#allocation5 + $0x250] sm:$0xff]  }
 0xa6d   :  { %v6730_v56 = vunpack.c.l.bf16 %v10936_v32  ;;  %v6731_v28 = vunpack.c.h.bf16 %v10936_v32 }
 0xa7c   :  { %6276 = vmatmul.msk.bf16.gmra.mxu1 %vm165_vm0, %v10637_v22 }
 0xa8c   :  { %6277 = vmatmul.msk.bf16.gmra.mxu1 %vm165_vm0, %v10644_v60 }
 0xa9c   :  { %6278 = vmatmul.msk.bf16.gmra.mxu1 %vm165_vm0, %v10651_v53 }
 0xaac   :  { %6279 = vmatmul.msk.bf16.gmra.mxu1 %vm165_vm0, %v10658_v25 }
 0xab9   :  { %v3367_v54 = vpop.f32.mrf.mxu1 }
 0xaba   :  { %v3407_v63 = vadd.f32 %v6722_v31, %v3367_v54  ;;  %v6734_v54 = vunpack.c.l.bf16 %v7009_v47 }
 0xabc   :  { %v6280_v22 = vmul.f32 -1.442695, %v3407_v63 }
 0xabe   :  { %7649 = vpow2.f32 %v6280_v22 }
 0xac1   :  { %v3369_v33 = vpop.f32.mrf.mxu1 }
 0xac2   :  { %v3408_v27 = vadd.f32 %v6723_v39, %v3369_v33  ;;  %v6735_v33 = vunpack.c.h.bf16 %v7009_v47 }
 0xac4   :  { %v7650_v55 = vpop.eup %7649  ;;  %v6281_v50 = vmul.f32 -1.442695, %v3408_v27  ;;  %v10985_v27 = vld [vmem:[#allocation5 + $0x278] sm:$0xff]  }
 0xac5   :  { %v3435_v26 = vadd.f32 1.0, %v7650_v55 }
 0xac7   :  { %v3450_v0 = vand.u32 2147483648, %v3435_v26  ;;  %vm3444_vm2 = vweird.f32 %v3435_v26  ;;  %v3448_v10 = vand.u32 2147483647, %v3435_v26 }
 0xac9   :  { %v3372_v2 = vpop.f32.mrf.mxu1  ;;  %v3451_v24 = vor.u32 1.1754944e-38, %v3450_v0  ;;  %vm3449_vm5 = vcmp.eq.f32.partialorder %v3448_v10, 8.507059e+37 }
 0xaca   :  { %v3409_v38 = vadd.f32 %v6726_v1, %v3372_v2 }
 0xacc   :  { %v6282_v42 = vmul.f32 -1.442695, %v3409_v38  ;;  %v7011_v38 = vld [vmem:[#allocation5 + $0x268] sm:$0xff]  }
 0xad1   :  { %v10934_v58 = vpop.f32.mrf.mxu1 }
 0xad2   :  { %v3410_v29 = vadd.f32 %v6727_v5, %v10934_v58 }
 0xad4   :  { %v6283_v63 = vmul.f32 -1.442695, %v3410_v29 }
 0xad9   :  { %v3377_v60 = vpop.f32.mrf.mxu1 }
 0xada   :  { %v3411_v57 = vadd.f32 %v6730_v56, %v3377_v60 }
 0xadc   :  { %v6284_v53 = vmul.f32 -1.442695, %v3411_v57 }
 0xade   :  { %7651 = vpow2.f32 %v6284_v53 }
 0xadf   :  { %7653 = vrcp.f32 %v3435_v26 }
 0xae1   :  { %v10939_v25 = vpop.f32.mrf.mxu1 }
 0xae2   :  { %v3412_v2 = vadd.f32 %v6731_v28, %v10939_v25 }
 0xae4   :  { %v7652_v40 = vpop.eup %7651  ;;  %v6285_v60 = vmul.f32 -1.442695, %v3412_v2  ;;  %v6742_v2 = vunpack.c.l.bf16 %v7011_v38 }
 0xae5   :  { %v3511_v36 = vadd.f32 1.0, %v7652_v40  ;;  %v7654_v13 = vpop.eup %7653 }
 0xae6   :  { %v3440_v21 = vmul.f32 %v7654_v13, %v3435_v26  ;;  %vm3445_vm14 = vweird.f32 %v7654_v13 }
 0xae7   :  { %7655 = vrcp.f32 %v3511_v36  ;;  %v3526_v3 = vand.u32 2147483648, %v3511_v36  ;;  %vm3520_vm15 = vweird.f32 %v3511_v36  ;;  %v3524_v18 = vand.u32 2147483647, %v3511_v36  ;;  %vm3446_vm3 = vmor %vm3444_vm2, %vm3445_vm14 }
 0xae8   :  { %v3441_v23 = vsub.f32 1.0, %v3440_v21 }
 0xae9   :  { %v3382_v51 = vpop.f32.mrf.mxu1  ;;  %v3527_v61 = vor.u32 1.1754944e-38, %v3526_v3  ;;  %vm3525_vm4 = vcmp.eq.f32.partialorder %v3524_v18, 8.507059e+37 }
 0xaea   :  { %v3442_v30 = vmul.f32 %v7654_v13, %v3441_v23 }
 0xaec   :  { %v3443_v46 = vadd.f32 %v7654_v13, %v3442_v30 }
 0xaed   :  { %v7656_v7 = vpop.eup %7655 }
 0xaee   :  { %v3516_v16 = vmul.f32 %v7656_v7, %v3511_v36  ;;  %vm3521_vm13 = vweird.f32 %v7656_v7  ;;  %v3447_v19 = vsel %vm3446_vm3, %v7654_v13, %v3443_v46 }
 0xaef   :  { %vm3522_vm1 = vmor %vm3520_vm15, %vm3521_vm13  ;;  %v3452_v14 = vsel %vm3449_vm5, %v3451_v24, %v3447_v19  ;;  %v6750_v24 = vunpack.c.l.bf16 %v10985_v27 }
 0xaf0   :  { %v3517_v8 = vsub.f32 1.0, %v3516_v16 }
 0xaf1   :  { %v3384_v48 = vpop.f32.mrf.mxu1 }
 0xaf2   :  { %v3518_v17 = vmul.f32 %v7656_v7, %v3517_v8  ;;  %v3414_v22 = vadd.f32 %v6735_v33, %v3384_v48 }
 0xaf4   :  { %v3519_v44 = vadd.f32 %v7656_v7, %v3518_v17  ;;  %v6287_v32 = vmul.f32 -1.442695, %v3414_v22 }
 0xaf6   :  { %v3523_v20 = vsel %vm3522_vm1, %v7656_v7, %v3519_v44 }
 0xaf7   :  { %v3528_v49 = vsel %vm3525_vm4, %v3527_v61, %v3523_v20 }
 0xaf8   :  { %v3655_v11 = vmul.f32 %v3528_v49, %v10675_v9  ;;  %v3413_v9 = vadd.f32 %v6734_v54, %v3382_v51  ;;  %v7012_v51 = vld [vmem:[#allocation5 + $0x270] sm:$0xff]  }
 0xaf9   :  { %v3387_v6 = vpop.f32.mrf.mxu1  ;;  %v6746_v48 = vunpack.c.l.bf16 %v7012_v51  ;;  %v6747_v30 = vunpack.c.h.bf16 %v7012_v51  ;;  %v6743_v51 = vunpack.c.h.bf16 %v7011_v38 }
 0xafa   :  { %v3415_v37 = vadd.f32 %v6738_v43, %v3387_v6  ;;  %v6286_v57 = vmul.f32 -1.442695, %v3413_v9 }
 0xafc   :  { %7657 = vtanh.f32 %v3415_v37 }
 0xafd   :  { %7659 = vpow2.f32 %v6281_v50 }
 0xafe   :  { %7661 = vpow2.f32 %v6282_v42  ;;  %v6739_v42 = vunpack.c.h.bf16 %v10941_v12 }
 0xaff   :  { %7663 = vpow2.f32 %v6283_v63 }
 0xb01   :  { %v10944_v35 = vpop.f32.mrf.mxu1 }
 0xb02   :  { %v7658_v62 = vpop.eup %7657 }
 0xb03   :  { %v3659_v52 = vmul.f32 %v7658_v62, %v3452_v14  ;;  %v7660_v31 = vpop.eup %7659 }
 0xb04   :  { %v10954_v56 = vadd.f32 1.0, %v7660_v31  ;;  %v7662_v53 = vpop.eup %7661 }
 0xb05   :  { %v10947_v4 = vadd.f32 %v3659_v52, %v3655_v11  ;;  %v10959_v55 = vadd.f32 1.0, %v7662_v53  ;;  %v7664_v25 = vpop.eup %7663 }
 0xb06   :  { %7665 = vrcp.f32 %v10954_v56  ;;  %v10964_v36 = vadd.f32 1.0, %v7664_v25  ;;  %v3463_v61 = vand.u32 2147483647, %v10954_v56  ;;  %v3465_v50 = vand.u32 2147483648, %v10954_v56 }
 0xb07   :  { %7667 = vpow2.f32 %v6285_v60  ;;  %v3480_v14 = vand.u32 2147483648, %v10959_v55  ;;  %vm3459_vm7 = vweird.f32 %v10954_v56  ;;  %vm3474_vm10 = vweird.f32 %v10959_v55 }
 0xb08   :  { %7669 = vpow2.f32 %v6286_v57  ;;  %vm11008_vm8 = vcmp.eq.f32.partialorder %v3463_v61, 8.507059e+37  ;;  %v3466_v31 = vor.u32 1.1754944e-38, %v3465_v50  ;;  %v3478_v12 = vand.u32 2147483647, %v10959_v55 }
 0xb09   :  { %v10951_v59 = vpop.f32.mrf.mxu1  ;;  %7671 = vpow2.f32 %v6287_v32  ;;  %v11023_v22 = vor.u32 1.1754944e-38, %v3480_v14  ;;  %vm3489_vm13 = vweird.f32 %v10964_v36 }
 0xb0a   :  { %7673 = vrcp.f32 %v10959_v55  ;;  %vm11056_vm15 = vcmp.eq.f32.partialorder %v3478_v12, 8.507059e+37 }
 0xb0b   :  { %7675 = vrcp.f32 %v10964_v36 }
 0xb0c   :  { %v10961_v26 = vpop.eup %7665 }
 0xb0d   :  { %v7668_v40 = vpop.eup %7667  ;;  %v3455_v21 = vmul.f32 %v10961_v26, %v10954_v56  ;;  %vm3460_vm6 = vweird.f32 %v10961_v26 }
 0xb0e   :  { %v7670_v13 = vpop.eup %7669  ;;  %v10968_v8 = vadd.f32 1.0, %v7668_v40  ;;  %vm11014_vm9 = vmor %vm3459_vm7, %vm3460_vm6  ;;  %v3416_v40 = vadd.f32 %v6739_v42, %v10944_v35  ;;  %v3493_v35 = vand.u32 2147483647, %v10964_v36 }
 0xb0f   :  { %v7672_v16 = vpop.eup %7671  ;;  %v10971_v23 = vadd.f32 1.0, %v7670_v13  ;;  %v3456_v39 = vsub.f32 1.0, %v3455_v21 }
 0xb10   :  { %v10973_v17 = vpop.eup %7673  ;;  %v10975_v43 = vadd.f32 1.0, %v7672_v16  ;;  %7677 = vrcp.f32 %v10968_v8  ;;  %v6751_v16 = vunpack.c.h.bf16 %v10985_v27  ;;  %vm3535_vm1 = vweird.f32 %v10968_v8 }
 0xb11   :  { %v10957_v58 = vpop.f32.mrf.mxu1  ;;  %v3470_v6 = vmul.f32 %v10973_v17, %v10959_v55  ;;  %7679 = vrcp.f32 %v10971_v23  ;;  %v10982_v37 = vpop.eup %7675  ;;  %v3457_v18 = vmul.f32 %v10961_v26, %v3456_v39  ;;  %vm3475_vm11 = vweird.f32 %v10973_v17 }
 0xb12   :  { %7681 = vrcp.f32 %v10975_v43  ;;  %v3485_v1 = vmul.f32 %v10982_v37, %v10964_v36  ;;  %vm11039_vm12 = vmor %vm3474_vm10, %vm3475_vm11  ;;  %vm3490_vm14 = vweird.f32 %v10982_v37  ;;  %vm3550_vm7 = vweird.f32 %v10971_v23 }
 0xb13   :  { %v3471_v0 = vsub.f32 1.0, %v3470_v6  ;;  %v3458_v62 = vadd.f32 %v10961_v26, %v3457_v18  ;;  %vm11080_vm4 = vmor %vm3489_vm13, %vm3490_vm14  ;;  %vm3494_vm10 = vcmp.eq.f32.partialorder %v3493_v35, 8.507059e+37 }
 0xb14   :  { %v3486_v52 = vsub.f32 1.0, %v3485_v1 }
 0xb15   :  { %v3472_v11 = vmul.f32 %v10973_v17, %v3471_v0  ;;  %v3462_v9 = vsel %vm11014_vm9, %v10961_v26, %v3458_v62  ;;  %v3541_v0 = vand.u32 2147483648, %v10968_v8  ;;  %v3556_v62 = vand.u32 2147483648, %v10971_v23 }
 0xb16   :  { %v10987_v20 = vpop.eup %7677  ;;  %v3487_v26 = vmul.f32 %v10982_v37, %v3486_v52  ;;  %v11035_v21 = vsel %vm11008_vm8, %v3466_v31, %v3462_v9  ;;  %v3554_v52 = vand.u32 2147483647, %v10971_v23  ;;  %vm3565_vm9 = vweird.f32 %v10975_v43 }
 0xb17   :  { %v10992_v19 = vpop.eup %7679  ;;  %v3531_v5 = vmul.f32 %v10987_v20, %v10968_v8  ;;  %v11026_v57 = vadd.f32 %v10973_v17, %v3472_v11  ;;  %vm3536_vm2 = vweird.f32 %v10987_v20 }
 0xb18   :  { %v10996_v49 = vpop.eup %7681  ;;  %v3546_v47 = vmul.f32 %v10992_v19, %v10971_v23  ;;  %vm3551_vm3 = vweird.f32 %v10992_v19  ;;  %vm11088_vm6 = vmor %vm3535_vm1, %vm3536_vm2  ;;  %v3569_v23 = vand.u32 2147483647, %v10975_v43  ;;  %vm3555_vm13 = vcmp.eq.f32.partialorder %v3554_v52, 8.507059e+37 }
 0xb19   :  { %v3397_v7 = vpop.f32.mrf.mxu1  ;;  %v3561_v54 = vmul.f32 %v10996_v49, %v10975_v43  ;;  %v3532_v60 = vsub.f32 1.0, %v3531_v5  ;;  %v3477_v39 = vsel %vm11039_vm12, %v10973_v17, %v11026_v57  ;;  %v3488_v17 = vadd.f32 %v10982_v37, %v3487_v26  ;;  %vm11098_vm8 = vmor %vm3550_vm7, %vm3551_vm3 }
 0xb1a   :  { %v3419_v44 = vadd.f32 %v6746_v48, %v3397_v7  ;;  %v3547_v25 = vsub.f32 1.0, %v3546_v47  ;;  %v3417_v7 = vadd.f32 %v6742_v2, %v10951_v59  ;;  %vm3566_vm5 = vweird.f32 %v10996_v49 }
 0xb1b   :  { %v3562_v13 = vsub.f32 1.0, %v3561_v54  ;;  %v3533_v59 = vmul.f32 %v10987_v20, %v3532_v60  ;;  %v3492_v28 = vsel %vm11080_vm4, %v10982_v37, %v3488_v17  ;;  %v3542_v54 = vor.u32 1.1754944e-38, %v3541_v0  ;;  %vm11117_vm11 = vmor %vm3565_vm9, %vm3566_vm5 }
 0xb1c   :  { %v6288_v46 = vmul.f32 -1.442695, %v3419_v44  ;;  %v3495_v44 = vand.u32 2147483648, %v10964_v36  ;;  %v3548_v6 = vmul.f32 %v10992_v19, %v3547_v25  ;;  %v3571_v36 = vand.u32 2147483648, %v10975_v43 }
 0xb1d   :  { %v3557_v37 = vor.u32 1.1754944e-38, %v3556_v62  ;;  %v3482_v43 = vsel %vm11056_vm15, %v11023_v22, %v3477_v39  ;;  %vm3570_vm14 = vcmp.eq.f32.partialorder %v3569_v23, 8.507059e+37 }
 0xb1e   :  { %v3549_v50 = vadd.f32 %v10992_v19, %v3548_v6  ;;  %v3496_v31 = vor.u32 1.1754944e-38, %v3495_v44 }
 0xb20   :  { %v3553_v33 = vsel %vm11098_vm8, %v10992_v19, %v3549_v50  ;;  %v3497_v12 = vsel %vm3494_vm10, %v3496_v31, %v3492_v28 }
 0xb21   :  { %v3399_v3 = vpop.f32.mrf.mxu1 }
 0xb22   :  { %v3420_v15 = vadd.f32 %v6747_v30, %v3399_v3 }
 0xb24   :  { %v6289_v10 = vmul.f32 -1.442695, %v3420_v15  ;;  %v3418_v15 = vadd.f32 %v6743_v51, %v10957_v58  ;;  %v3534_v58 = vadd.f32 %v10987_v20, %v3533_v59 }
 0xb26   :  { %7683 = vpow2.f32 %v6289_v10  ;;  %v3539_v10 = vand.u32 2147483647, %v10968_v8  ;;  %v3538_v8 = vsel %vm11088_vm6, %v10987_v20, %v3534_v58 }
 0xb27   :  { %7685 = vpow2.f32 %v6288_v46  ;;  %v3563_v46 = vmul.f32 %v10996_v49, %v3562_v13 }
 0xb28   :  { %vm3540_vm12 = vcmp.eq.f32.partialorder %v3539_v10, 8.507059e+37 }
 0xb29   :  { %v3402_v29 = vpop.f32.mrf.mxu1  ;;  %v3564_v14 = vadd.f32 %v10996_v49, %v3563_v46  ;;  %v3543_v9 = vsel %vm3540_vm12, %v3542_v54, %v3538_v8 }
 0xb2a   :  { %v3421_v63 = vadd.f32 %v6750_v24, %v3402_v29  ;;  %v3656_v26 = vmul.f32 %v3543_v9, %v10865_v41 }
 0xb2b   :  { %v3568_v19 = vsel %vm11117_vm11, %v10996_v49, %v3564_v14 }
 0xb2c   :  { %v7684_v56 = vpop.eup %7683  ;;  %v6290_v53 = vmul.f32 -1.442695, %v3421_v63 }
 0xb2d   :  { %v7686_v32 = vpop.eup %7685  ;;  %v11045_v30 = vadd.f32 1.0, %v7684_v56  ;;  %v3572_v56 = vor.u32 1.1754944e-38, %v3571_v36 }
 0xb2e   :  { %7687 = vpow2.f32 %v6290_v53  ;;  %v11053_v55 = vadd.f32 1.0, %v7686_v32  ;;  %v3558_v53 = vsel %vm3555_vm13, %v3557_v37, %v3553_v33 }
 0xb2f   :  { %7689 = vtanh.f32 %v3416_v40  ;;  %v3573_v22 = vsel %vm3570_vm14, %v3572_v56, %v3568_v19  ;;  %vm3615_vm2 = vweird.f32 %v11045_v30  ;;  %v3621_v50 = vand.u32 2147483648, %v11045_v30 }
 0xb30   :  { %7691 = vtanh.f32 %v3417_v7  ;;  %v3658_v48 = vmul.f32 %v3573_v22, %v10870_v45  ;;  %vm3600_vm7 = vweird.f32 %v11053_v55  ;;  %v3604_v36 = vand.u32 2147483647, %v11053_v55  ;;  %v11228_v22 = vld [vmem:[%s12916_s2 + $0x28] sm:$0xff] }
 0xb31   :  { %v3404_v18 = vpop.f32.mrf.mxu1  ;;  %7693 = vrcp.f32 %v11045_v30  ;;  %v3606_v52 = vand.u32 2147483648, %v11053_v55  ;;  %v3622_v54 = vor.u32 1.1754944e-38, %v3621_v50 }
 0xb32   :  { %v3422_v27 = vadd.f32 %v6751_v16, %v3404_v18  ;;  %7695 = vrcp.f32 %v11053_v55  ;;  %v3657_v16 = vmul.f32 %v3558_v53, %v10868_v34  ;;  %v11193_v53 = vld [vmem:[%s12916_s2] sm:$0xff] }
 0xb33   :  { %7697 = vtanh.f32 %v3418_v15  ;;  %v3607_v37 = vor.u32 1.1754944e-38, %v3606_v52 }
 0xb34   :  { %v7688_v1 = vpop.eup %7687  ;;  %v6291_v61 = vmul.f32 -1.442695, %v3422_v27 }
 0xb35   :  { %v11073_v24 = vadd.f32 1.0, %v7688_v1  ;;  %v7690_v5 = vpop.eup %7689 }
 0xb36   :  { %7699 = vpow2.f32 %v6291_v61  ;;  %v7692_v47 = vpop.eup %7691  ;;  %v3660_v57 = vmul.f32 %v7690_v5, %v11035_v21  ;;  %v3619_v61 = vand.u32 2147483647, %v11045_v30 }
 0xb37   :  { %7701 = vrcp.f32 %v11073_v24  ;;  %v11110_v29 = vpop.eup %7693  ;;  %v3661_v40 = vmul.f32 %v7692_v47, %v3482_v43  ;;  %v3636_v46 = vand.u32 2147483648, %v11073_v24  ;;  %vm3630_vm4 = vweird.f32 %v11073_v24 }
 0xb38   :  { %v11121_v20 = vpop.eup %7695  ;;  %v3611_v32 = vmul.f32 %v11110_v29, %v11045_v30  ;;  %v11137_v21 = vadd.f32 %v3660_v57, %v3656_v26  ;;  %vm3616_vm3 = vweird.f32 %v11110_v29  ;;  %v3634_v27 = vand.u32 2147483647, %v11073_v24 }
 0xb39   :  { %v7698_v63 = vpop.eup %7697  ;;  %v3596_v51 = vmul.f32 %v11121_v20, %v11053_v55  ;;  %v11140_v39 = vadd.f32 %v3661_v40, %v3657_v16  ;;  %vm3601_vm1 = vweird.f32 %v11121_v20  ;;  %v3637_v11 = vor.u32 1.1754944e-38, %v3636_v46  ;;  %vm11172_vm8 = vmor %vm3615_vm2, %vm3616_vm3  ;;  %v11221_v40 = vld [vmem:[%s12916_s2 + $0x20] sm:$0xff] }
 0xb3a   :  { %v3662_v13 = vmul.f32 %v7698_v63, %v3497_v12  ;;  %v3612_v35 = vsub.f32 1.0, %v3611_v32  ;;  %vm3635_vm10 = vcmp.eq.f32.partialorder %v3634_v27, 8.507059e+37  ;;  %vm11178_vm11 = vmor %vm3600_vm7, %vm3601_vm1  ;;  %vm3620_vm14 = vcmp.eq.f32.partialorder %v3619_v61, 8.507059e+37  ;;  %v11207_v32 = vld [vmem:[%s12916_s2 + $0x10] sm:$0xff]  ;;  %v6753_v16 = vld [vmem:[#allocation5 + $0x280] sm:$0xff]  }
 0xb3b   :  { %v3597_v44 = vsub.f32 1.0, %v3596_v51  ;;  %v11235_v51 = vld [vmem:[%s12916_s2 + $0x30] sm:$0xff]  ;;  %v6755_v52 = vunpack.c.h.bf16 %v6753_v16 }
 0xb3c   :  { %v7700_v60 = vpop.eup %7699  ;;  %v11142_v6 = vadd.f32 %v3662_v13, %v3658_v48  ;;  %v3613_v41 = vmul.f32 %v11110_v29, %v3612_v35  ;;  %v6754_v48 = vunpack.c.l.bf16 %v6753_v16 }
 0xb3d   :  { %v7702_v25 = vpop.eup %7701  ;;  %v3594_v49 = vadd.f32 1.0, %v7700_v60  ;;  %v3598_v34 = vmul.f32 %v11121_v20, %v3597_v44  ;;  %v11248_v44 = vld [vmem:[#allocation5 + $0x290] sm:$0xff]  }
 0xb3e   :  { %v3626_v7 = vmul.f32 %v7702_v25, %v11073_v24  ;;  %vm3631_vm15 = vweird.f32 %v7702_v25  ;;  %v3614_v0 = vadd.f32 %v11110_v29, %v3613_v41  ;;  %v6762_v41 = vunpack.c.l.bf16 %v11248_v44 }
 0xb3f   :  { %7703 = vrcp.f32 %v3594_v49  ;;  %vm11156_vm5 = vmor %vm3630_vm4, %vm3631_vm15  ;;  %v3651_v1 = vand.u32 2147483648, %v3594_v49  ;;  %v3599_v58 = vadd.f32 %v11121_v20, %v3598_v34  ;;  %v3649_v24 = vand.u32 2147483647, %v3594_v49 }
 0xb40   :  { %v3627_v59 = vsub.f32 1.0, %v3626_v7  ;;  %7705 = vtanh.f32 %v11137_v21  ;;  %vm3645_vm9 = vweird.f32 %v3594_v49  ;;  %v3618_v55 = vsel %vm11172_vm8, %v11110_v29, %v3614_v0 }
 0xb41   :  { %7707 = vtanh.f32 %v11140_v39  ;;  %v3652_v30 = vor.u32 1.1754944e-38, %v3651_v1  ;;  %vm3650_vm13 = vcmp.eq.f32.partialorder %v3649_v24, 8.507059e+37  ;;  %v3603_v31 = vsel %vm11178_vm11, %v11121_v20, %v3599_v58  ;;  %v11200_v20 = vld [vmem:[%s12916_s2 + $0x8] sm:$0xff] }
 0xb42   :  { %v3628_v3 = vmul.f32 %v7702_v25, %v3627_v59  ;;  %7709 = vtanh.f32 %v11142_v6  ;;  %v3623_v43 = vsel %vm3620_vm14, %v3622_v54, %v3618_v55  ;;  %vm3605_vm15 = vcmp.eq.f32.partialorder %v3604_v36, 8.507059e+37  ;;  %v11253_v24 = vld [vmem:[#allocation5 + $0x2a0] sm:$0xff]   ;;  %v7014_v55 = vld [vmem:[#allocation5 + $0x288] sm:$0xff]  }
 0xb43   :  { %7711 = vtanh.f32 %v10947_v4  ;;  %v3608_v29 = vsel %vm3605_vm15, %v3607_v37, %v3603_v31  ;;  %v6758_v37 = vunpack.c.l.bf16 %v7014_v55 }
 0xb44   :  { %v3629_v18 = vadd.f32 %v7702_v25, %v3628_v3 }
 0xb45   :  { %v7704_v15 = vpop.eup %7703 }
 0xb46   :  { %v3641_v45 = vmul.f32 %v7704_v15, %v3594_v49  ;;  %v7706_v62 = vpop.eup %7705  ;;  %v3633_v14 = vsel %vm11156_vm5, %v7702_v25, %v3629_v18  ;;  %vm3646_vm6 = vweird.f32 %v7704_v15  ;;  %v11214_v25 = vld [vmem:[%s12916_s2 + $0x18] sm:$0xff] }
 0xb47   :  { %v7708_v5 = vpop.eup %7707  ;;  %v3638_v23 = vsel %vm3635_vm10, %v3637_v11, %v3633_v14  ;;  %vm3647_vm12 = vmor %vm3645_vm9, %vm3646_vm6  ;;  %v3672_v12 = vmul.f32 %v7706_v62, %v3623_v43  ;;  %v11242_v49 = vld [vmem:[%s12916_s2 + $0x38] sm:$0xff]  ;;  %v6770_v11 = vunpack.c.l.bf16 %v11253_v24 }
 0xb48   :  { %v3642_v17 = vsub.f32 1.0, %v3641_v45  ;;  %v7710_v42 = vpop.eup %7709  ;;  %v3673_v19 = vmul.f32 %v7708_v5, %v3638_v23 }
 0xb49   :  { %v7712_v56 = vpop.eup %7711 }
 0xb4a   :  { %v3643_v38 = vmul.f32 %v7704_v15, %v3642_v17  ;;  %v3671_v60 = vmul.f32 %v7712_v56, %v3608_v29 }
 0xb4c   :  { %v3644_v8 = vadd.f32 %v7704_v15, %v3643_v38  ;;  %v3708_v57 = vpack.c.bf16 %v3672_v12, %v3671_v60 }
 0xb4e   :  { %v3648_v33 = vsel %vm3647_vm12, %v7704_v15, %v3644_v8 }
 0xb4f   :  { %v3653_v2 = vsel %vm3650_vm13, %v3652_v30, %v3648_v33 }
 0xb50   :  { %v3674_v63 = vmul.f32 %v7710_v42, %v3653_v2 }
 0xb52   :  { %v3709_v9 = vpack.c.bf16 %v3674_v63, %v3673_v19 }
 0xb54   :  { %3716 = vmatpush.bf16.msra.mxu2 %v3709_v9 }
 0xb58   :  { %3717 = vmatpush.bf16.msra.mxu2 %v3708_v57 }
 0xb5b   :  { %6292 = vmatmul.msk.bf16.vlgmr.msra.gmra.mxu2 %vm165_vm0, %v11193_v53 }
 0xb6b   :  { %6293 = vmatmul.msk.bf16.gmra.mxu2 %vm165_vm0, %v11200_v20 }
 0xb7b   :  { %6294 = vmatmul.msk.bf16.gmra.mxu2 %vm165_vm0, %v11207_v32 }
 0xb8b   :  { %6295 = vmatmul.msk.bf16.gmra.mxu2 %vm165_vm0, %v11214_v25 }
 0xb9b   :  { %6296 = vmatmul.msk.bf16.gmra.mxu2 %vm165_vm0, %v11221_v40 }
 0xbab   :  { %6297 = vmatmul.msk.bf16.gmra.mxu2 %vm165_vm0, %v11228_v22 }
 0xbbb   :  { %6298 = vmatmul.msk.bf16.gmra.mxu2 %vm165_vm0, %v11235_v51 }
 0xbcb   :  { %6299 = vmatmul.msk.bf16.gmra.mxu2 %vm165_vm0, %v11242_v49 }
 0xbde   :  { %v3719_v26 = vpop.f32.mrf.mxu2 }
 0xbdf   :  { %v3759_v35 = vadd.f32 %v6754_v48, %v3719_v26  ;;  %v6759_v26 = vunpack.c.h.bf16 %v7014_v55  ;;  %v7016_v48 = vld [vmem:[#allocation5 + $0x298] sm:$0xff]  }
 0xbe1   :  { %v6300_v3 = vmul.f32 -1.442695, %v3759_v35 }
 0xbe3   :  { %7713 = vpow2.f32 %v6300_v3 }
 0xbe6   :  { %v3721_v13 = vpop.f32.mrf.mxu2 }
 0xbe7   :  { %v3760_v54 = vadd.f32 %v6755_v52, %v3721_v13 }
 0xbe9   :  { %v7714_v18 = vpop.eup %7713  ;;  %v6301_v63 = vmul.f32 -1.442695, %v3760_v54 }
 0xbea   :  { %v3787_v17 = vadd.f32 1.0, %v7714_v18 }
 0xbec   :  { %v3802_v33 = vand.u32 2147483648, %v3787_v17  ;;  %vm3796_vm5 = vweird.f32 %v3787_v17  ;;  %v3800_v31 = vand.u32 2147483647, %v3787_v17 }
 0xbee   :  { %v3724_v7 = vpop.f32.mrf.mxu2  ;;  %v3803_v29 = vor.u32 1.1754944e-38, %v3802_v33  ;;  %vm3801_vm8 = vcmp.eq.f32.partialorder %v3800_v31, 8.507059e+37 }
 0xbef   :  { %v3761_v60 = vadd.f32 %v6758_v37, %v3724_v7 }
 0xbf1   :  { %v6302_v3 = vmul.f32 -1.442695, %v3761_v60 }
 0xbf6   :  { %v11246_v59 = vpop.f32.mrf.mxu2 }
 0xbfe   :  { %v3729_v15 = vpop.f32.mrf.mxu2 }
 0xbff   :  { %v3763_v34 = vadd.f32 %v6762_v41, %v3729_v15  ;;  %v6763_v41 = vunpack.c.h.bf16 %v11248_v44  ;;  %v3762_v15 = vadd.f32 %v6759_v26, %v11246_v59 }
 0xc01   :  { %v6304_v45 = vmul.f32 -1.442695, %v3763_v34  ;;  %v6766_v34 = vunpack.c.l.bf16 %v7016_v48 }
 0xc03   :  { %7715 = vpow2.f32 %v6304_v45  ;;  %v6767_v45 = vunpack.c.h.bf16 %v7016_v48 }
 0xc04   :  { %7717 = vrcp.f32 %v3787_v17 }
 0xc06   :  { %v11251_v46 = vpop.f32.mrf.mxu2 }
 0xc07   :  { %v3764_v7 = vadd.f32 %v6763_v41, %v11251_v46 }
 0xc09   :  { %v7716_v27 = vpop.eup %7715 }
 0xc0a   :  { %v3863_v0 = vadd.f32 1.0, %v7716_v27  ;;  %v7718_v1 = vpop.eup %7717  ;;  %v6303_v27 = vmul.f32 -1.442695, %v3762_v15  ;;  %v7018_v15 = vld [vmem:[#allocation5 + $0x2a8] sm:$0xff]  }
 0xc0b   :  { %v3792_v50 = vmul.f32 %v7718_v1, %v3787_v17  ;;  %vm3797_vm3 = vweird.f32 %v7718_v1 }
 0xc0c   :  { %7719 = vrcp.f32 %v3863_v0  ;;  %v3878_v8 = vand.u32 2147483648, %v3863_v0  ;;  %vm3872_vm2 = vweird.f32 %v3863_v0  ;;  %v3876_v23 = vand.u32 2147483647, %v3863_v0  ;;  %vm3798_vm6 = vmor %vm3796_vm5, %vm3797_vm3 }
 0xc0d   :  { %v3793_v14 = vsub.f32 1.0, %v3792_v50 }
 0xc0e   :  { %v3734_v10 = vpop.f32.mrf.mxu2  ;;  %v3879_v43 = vor.u32 1.1754944e-38, %v3878_v8  ;;  %vm3877_vm7 = vcmp.eq.f32.partialorder %v3876_v23, 8.507059e+37 }
 0xc0f   :  { %v3794_v36 = vmul.f32 %v7718_v1, %v3793_v14 }
 0xc11   :  { %v3795_v30 = vadd.f32 %v7718_v1, %v3794_v36 }
 0xc12   :  { %v7720_v58 = vpop.eup %7719 }
 0xc13   :  { %v3868_v61 = vmul.f32 %v7720_v58, %v3863_v0  ;;  %vm3873_vm1 = vweird.f32 %v7720_v58  ;;  %v3799_v19 = vsel %vm3798_vm6, %v7718_v1, %v3795_v30 }
 0xc14   :  { %vm3874_vm4 = vmor %vm3872_vm2, %vm3873_vm1  ;;  %v3804_v57 = vsel %vm3801_vm8, %v3803_v29, %v3799_v19  ;;  %v11297_v29 = vld [vmem:[#allocation5 + $0x2b8] sm:$0xff]  }
 0xc15   :  { %v3869_v62 = vsub.f32 1.0, %v3868_v61  ;;  %v6782_v48 = vunpack.c.l.bf16 %v11297_v29 }
 0xc16   :  { %v3736_v38 = vpop.f32.mrf.mxu2 }
 0xc17   :  { %v3870_v5 = vmul.f32 %v7720_v58, %v3869_v62  ;;  %v3766_v0 = vadd.f32 %v6767_v45, %v3736_v38 }
 0xc19   :  { %v3871_v47 = vadd.f32 %v7720_v58, %v3870_v5  ;;  %v6307_v44 = vmul.f32 -1.442695, %v3766_v0  ;;  %v7019_v5 = vld [vmem:[#allocation5 + $0x2b0] sm:$0xff]  }
 0xc1a   :  { %v6778_v8 = vunpack.c.l.bf16 %v7019_v5  ;;  %v6779_v30 = vunpack.c.h.bf16 %v7019_v5 }
 0xc1b   :  { %v3875_v2 = vsel %vm3874_vm4, %v7720_v58, %v3871_v47  ;;  %v6305_v58 = vmul.f32 -1.442695, %v3764_v7 }
 0xc1c   :  { %v3880_v9 = vsel %vm3877_vm7, %v3879_v43, %v3875_v2 }
 0xc1d   :  { %v4007_v13 = vmul.f32 %v3880_v9, %v10947_v4  ;;  %v3765_v4 = vadd.f32 %v6766_v34, %v3734_v10 }
 0xc1e   :  { %v3739_v42 = vpop.f32.mrf.mxu2 }
 0xc1f   :  { %v3767_v28 = vadd.f32 %v6770_v11, %v3739_v42  ;;  %v6306_v61 = vmul.f32 -1.442695, %v3765_v4  ;;  %v6771_v4 = vunpack.c.h.bf16 %v11253_v24 }
 0xc21   :  { %7721 = vtanh.f32 %v3767_v28 }
 0xc22   :  { %7723 = vpow2.f32 %v6301_v63 }
 0xc23   :  { %7725 = vpow2.f32 %v6302_v3 }
 0xc24   :  { %7727 = vpow2.f32 %v6303_v27 }
 0xc26   :  { %v11256_v12 = vpop.f32.mrf.mxu2 }
 0xc27   :  { %v7722_v56 = vpop.eup %7721 }
 0xc28   :  { %v4011_v16 = vmul.f32 %v7722_v56, %v3804_v57  ;;  %v7724_v17 = vpop.eup %7723 }
 0xc29   :  { %v11266_v1 = vadd.f32 1.0, %v7724_v17  ;;  %v7726_v50 = vpop.eup %7725 }
 0xc2a   :  { %v11259_v35 = vadd.f32 %v4011_v16, %v4007_v13  ;;  %v11271_v62 = vadd.f32 1.0, %v7726_v50  ;;  %v7728_v46 = vpop.eup %7727 }
 0xc2b   :  { %7729 = vrcp.f32 %v11266_v1  ;;  %v11276_v38 = vadd.f32 1.0, %v7728_v46  ;;  %v3815_v26 = vand.u32 2147483647, %v11266_v1  ;;  %v3817_v16 = vand.u32 2147483648, %v11266_v1 }
 0xc2c   :  { %7731 = vpow2.f32 %v6305_v58  ;;  %v3832_v34 = vand.u32 2147483648, %v11271_v62  ;;  %vm3811_vm10 = vweird.f32 %v11266_v1  ;;  %vm3826_vm13 = vweird.f32 %v11271_v62 }
 0xc2d   :  { %7733 = vpow2.f32 %v6306_v61  ;;  %vm11320_vm11 = vcmp.eq.f32.partialorder %v3815_v26, 8.507059e+37  ;;  %v3830_v24 = vand.u32 2147483647, %v11271_v62  ;;  %vm3841_vm1 = vweird.f32 %v11276_v38 }
 0xc2e   :  { %v11263_v18 = vpop.f32.mrf.mxu2  ;;  %7735 = vpow2.f32 %v6307_v44  ;;  %v3818_v44 = vor.u32 1.1754944e-38, %v3817_v16  ;;  %v11335_v5 = vor.u32 1.1754944e-38, %v3832_v34 }
 0xc2f   :  { %7737 = vrcp.f32 %v11271_v62  ;;  %vm11368_vm2 = vcmp.eq.f32.partialorder %v3830_v24, 8.507059e+37 }
 0xc30   :  { %7739 = vrcp.f32 %v11276_v38 }
 0xc31   :  { %v11273_v14 = vpop.eup %7729 }
 0xc32   :  { %v7732_v10 = vpop.eup %7731  ;;  %v3807_v47 = vmul.f32 %v11273_v14, %v11266_v1  ;;  %vm3812_vm9 = vweird.f32 %v11273_v14  ;;  %v6774_v1 = vunpack.c.l.bf16 %v7018_v15 }
 0xc33   :  { %v7734_v11 = vpop.eup %7733  ;;  %v11280_v42 = vadd.f32 1.0, %v7732_v10  ;;  %vm11326_vm12 = vmor %vm3811_vm10, %vm3812_vm9 }
 0xc34   :  { %v7736_v52 = vpop.eup %7735  ;;  %v11283_v28 = vadd.f32 1.0, %v7734_v11  ;;  %v3808_v54 = vsub.f32 1.0, %v3807_v47 }
 0xc35   :  { %v11285_v55 = vpop.eup %7737  ;;  %v11287_v23 = vadd.f32 1.0, %v7736_v52  ;;  %7741 = vrcp.f32 %v11280_v42  ;;  %vm3887_vm4 = vweird.f32 %v11280_v42  ;;  %v3893_v34 = vand.u32 2147483648, %v11280_v42 }
 0xc36   :  { %v11269_v59 = vpop.f32.mrf.mxu2  ;;  %v3822_v31 = vmul.f32 %v11285_v55, %v11271_v62  ;;  %7743 = vrcp.f32 %v11283_v28  ;;  %v11294_v37 = vpop.eup %7739  ;;  %v3809_v19 = vmul.f32 %v11273_v14, %v3808_v54  ;;  %vm3827_vm14 = vweird.f32 %v11285_v55 }
 0xc37   :  { %7745 = vrcp.f32 %v11287_v23  ;;  %v3837_v57 = vmul.f32 %v11294_v37, %v11276_v38  ;;  %v3768_v54 = vadd.f32 %v6771_v4, %v11256_v12  ;;  %vm11351_vm15 = vmor %vm3826_vm13, %vm3827_vm14  ;;  %v3845_v12 = vand.u32 2147483647, %v11276_v38 }
 0xc38   :  { %v3823_v9 = vsub.f32 1.0, %v3822_v31  ;;  %v3810_v41 = vadd.f32 %v11273_v14, %v3809_v19  ;;  %vm3842_vm3 = vweird.f32 %v11294_v37  ;;  %v3908_v0 = vand.u32 2147483648, %v11283_v28 }
 0xc39   :  { %v3838_v7 = vsub.f32 1.0, %v3837_v57  ;;  %vm11392_vm7 = vmor %vm3841_vm1, %vm3842_vm3  ;;  %vm3902_vm10 = vweird.f32 %v11283_v28  ;;  %v3921_v24 = vand.u32 2147483647, %v11287_v23  ;;  %vm3846_vm13 = vcmp.eq.f32.partialorder %v3845_v12, 8.507059e+37 }
 0xc3a   :  { %v3824_v45 = vmul.f32 %v11285_v55, %v3823_v9  ;;  %v3814_v10 = vsel %vm11326_vm12, %v11273_v14, %v3810_v41  ;;  %vm3917_vm12 = vweird.f32 %v11287_v23 }
 0xc3b   :  { %v11299_v60 = vpop.eup %7741  ;;  %v3839_v14 = vmul.f32 %v11294_v37, %v3838_v7  ;;  %v11347_v19 = vsel %vm11320_vm11, %v3818_v44, %v3814_v10  ;;  %vm3922_vm3 = vcmp.eq.f32.partialorder %v3921_v24, 8.507059e+37 }
 0xc3c   :  { %v11304_v13 = vpop.eup %7743  ;;  %v3883_v17 = vmul.f32 %v11299_v60, %v11280_v42  ;;  %v11338_v52 = vadd.f32 %v11285_v55, %v3824_v45  ;;  %v3891_v45 = vand.u32 2147483647, %v11280_v42  ;;  %vm3888_vm5 = vweird.f32 %v11299_v60 }
 0xc3d   :  { %v11308_v3 = vpop.eup %7745  ;;  %v3898_v27 = vmul.f32 %v11304_v13, %v11283_v28  ;;  %vm3903_vm6 = vweird.f32 %v11304_v13  ;;  %vm11400_vm9 = vmor %vm3887_vm4, %vm3888_vm5 }
 0xc3e   :  { %v3749_v36 = vpop.f32.mrf.mxu2  ;;  %v3913_v61 = vmul.f32 %v11308_v3, %v11287_v23  ;;  %vm3918_vm8 = vweird.f32 %v11308_v3  ;;  %vm11410_vm11 = vmor %vm3902_vm10, %vm3903_vm6 }
 0xc3f   :  { %v3771_v33 = vadd.f32 %v6778_v8, %v3749_v36  ;;  %v3884_v36 = vsub.f32 1.0, %v3883_v17  ;;  %vm11429_vm14 = vmor %vm3917_vm12, %vm3918_vm8 }
 0xc40   :  { %v3914_v31 = vsub.f32 1.0, %v3913_v61 }
 0xc41   :  { %v6308_v63 = vmul.f32 -1.442695, %v3771_v33  ;;  %v6775_v33 = vunpack.c.h.bf16 %v7018_v15 }
 0xc42   :  { %v3915_v41 = vmul.f32 %v11308_v3, %v3914_v31 }
 0xc43   :  { %v3770_v16 = vadd.f32 %v6775_v33, %v11269_v59 }
 0xc44   :  { %v3916_v61 = vadd.f32 %v11308_v3, %v3915_v41 }
 0xc46   :  { %v3751_v2 = vpop.f32.mrf.mxu2 }
 0xc47   :  { %v3772_v43 = vadd.f32 %v6779_v30, %v3751_v2  ;;  %v3899_v30 = vsub.f32 1.0, %v3898_v27  ;;  %v3769_v2 = vadd.f32 %v6774_v1, %v11263_v18  ;;  %v3885_v18 = vmul.f32 %v11299_v60, %v3884_v36 }
 0xc48   :  { %v3923_v1 = vand.u32 2147483648, %v11287_v23  ;;  %v3894_v36 = vor.u32 1.1754944e-38, %v3893_v34 }
 0xc49   :  { %v6309_v56 = vmul.f32 -1.442695, %v3772_v43  ;;  %v6783_v43 = vunpack.c.h.bf16 %v11297_v29  ;;  %v3829_v29 = vsel %vm11351_vm15, %v11285_v55, %v11338_v52  ;;  %v3900_v57 = vmul.f32 %v11304_v13, %v3899_v30 }
 0xc4a   :  { %v3840_v55 = vadd.f32 %v11294_v37, %v3839_v14  ;;  %v3886_v59 = vadd.f32 %v11299_v60, %v3885_v18  ;;  %vm3892_vm15 = vcmp.eq.f32.partialorder %v3891_v45, 8.507059e+37  ;;  %v3834_v23 = vsel %vm11368_vm2, %v11335_v5, %v3829_v29 }
 0xc4b   :  { %7747 = vpow2.f32 %v6309_v56  ;;  %v3847_v56 = vand.u32 2147483648, %v11276_v38  ;;  %v3901_v27 = vadd.f32 %v11304_v13, %v3900_v57  ;;  %v3906_v38 = vand.u32 2147483647, %v11283_v28 }
 0xc4c   :  { %7749 = vpow2.f32 %v6308_v63  ;;  %v3890_v42 = vsel %vm11400_vm9, %v11299_v60, %v3886_v59  ;;  %v3844_v28 = vsel %vm11392_vm7, %v11294_v37, %v3840_v55  ;;  %v3909_v37 = vor.u32 1.1754944e-38, %v3908_v0 }
 0xc4d   :  { %v3905_v52 = vsel %vm11410_vm11, %v11304_v13, %v3901_v27  ;;  %v3920_v13 = vsel %vm11429_vm14, %v11308_v3, %v3916_v61  ;;  %vm3907_vm1 = vcmp.eq.f32.partialorder %v3906_v38, 8.507059e+37  ;;  %v3924_v14 = vor.u32 1.1754944e-38, %v3923_v1 }
 0xc4e   :  { %v3754_v58 = vpop.f32.mrf.mxu2 }
 0xc4f   :  { %v3773_v46 = vadd.f32 %v6782_v48, %v3754_v58  ;;  %v3925_v5 = vsel %vm3922_vm3, %v3924_v14, %v3920_v13 }
 0xc51   :  { %v7748_v11 = vpop.eup %7747  ;;  %v6310_v47 = vmul.f32 -1.442695, %v3773_v46 }
 0xc52   :  { %v7750_v8 = vpop.eup %7749  ;;  %v11357_v9 = vadd.f32 1.0, %v7748_v11 }
 0xc53   :  { %7751 = vpow2.f32 %v6310_v47  ;;  %v11365_v62 = vadd.f32 1.0, %v7750_v8  ;;  %v3848_v47 = vor.u32 1.1754944e-38, %v3847_v56 }
 0xc54   :  { %7753 = vtanh.f32 %v3768_v54  ;;  %v3895_v54 = vsel %vm3892_vm15, %v3894_v36, %v3890_v42  ;;  %vm3967_vm5 = vweird.f32 %v11357_v9  ;;  %v3971_v1 = vand.u32 2147483647, %v11357_v9 }
 0xc55   :  { %7755 = vtanh.f32 %v3769_v2  ;;  %v3849_v33 = vsel %vm3846_vm13, %v3848_v47, %v3844_v28  ;;  %v4008_v56 = vmul.f32 %v3895_v54, %v11137_v21  ;;  %vm3952_vm10 = vweird.f32 %v11365_v62 }
 0xc56   :  { %v3756_v48 = vpop.f32.mrf.mxu2  ;;  %7757 = vrcp.f32 %v11357_v9  ;;  %v3958_v47 = vand.u32 2147483648, %v11365_v62  ;;  %vm3972_vm3 = vcmp.eq.f32.partialorder %v3971_v1, 8.507059e+37 }
 0xc57   :  { %v3774_v15 = vadd.f32 %v6783_v43, %v3756_v48  ;;  %7759 = vrcp.f32 %v11365_v62  ;;  %v3910_v43 = vsel %vm3907_vm1, %v3909_v37, %v3905_v52  ;;  %v4010_v48 = vmul.f32 %v3925_v5, %v11142_v6 }
 0xc58   :  { %7761 = vtanh.f32 %v3770_v16  ;;  %v4009_v16 = vmul.f32 %v3910_v43, %v11140_v39  ;;  %v3956_v52 = vand.u32 2147483647, %v11365_v62 }
 0xc59   :  { %v7752_v17 = vpop.eup %7751  ;;  %v6311_v7 = vmul.f32 -1.442695, %v3774_v15 }
 0xc5a   :  { %v11385_v4 = vadd.f32 1.0, %v7752_v17  ;;  %v7754_v50 = vpop.eup %7753 }
 0xc5b   :  { %7763 = vpow2.f32 %v6311_v7  ;;  %v7756_v46 = vpop.eup %7755  ;;  %v4012_v2 = vmul.f32 %v7754_v50, %v11347_v19  ;;  %v11525_v50 = vld [vmem:[#allocation5 + $0x2e0] sm:$0xff]  }
 0xc5c   :  { %7765 = vrcp.f32 %v11385_v4  ;;  %v11422_v11 = vpop.eup %7757  ;;  %v4013_v18 = vmul.f32 %v7756_v46, %v3834_v23  ;;  %v3988_v27 = vand.u32 2147483648, %v11385_v4  ;;  %vm3982_vm7 = vweird.f32 %v11385_v4 }
 0xc5d   :  { %v11433_v60 = vpop.eup %7759  ;;  %v3963_v63 = vmul.f32 %v11422_v11, %v11357_v9  ;;  %v11449_v19 = vadd.f32 %v4012_v2, %v4008_v56  ;;  %vm3968_vm6 = vweird.f32 %v11422_v11  ;;  %v3986_v58 = vand.u32 2147483647, %v11385_v4 }
 0xc5e   :  { %v7762_v30 = vpop.eup %7761  ;;  %v3948_v29 = vmul.f32 %v11433_v60, %v11365_v62  ;;  %v11452_v15 = vadd.f32 %v4013_v18, %v4009_v16  ;;  %vm3953_vm4 = vweird.f32 %v11433_v60  ;;  %v3973_v46 = vand.u32 2147483648, %v11357_v9  ;;  %vm11484_vm11 = vmor %vm3967_vm5, %vm3968_vm6 }
 0xc5f   :  { %v4014_v57 = vmul.f32 %v7762_v30, %v3849_v33  ;;  %v3964_v41 = vsub.f32 1.0, %v3963_v63  ;;  %v3989_v36 = vor.u32 1.1754944e-38, %v3988_v27  ;;  %vm3987_vm13 = vcmp.eq.f32.partialorder %v3986_v58, 8.507059e+37  ;;  %vm11490_vm14 = vmor %vm3952_vm10, %vm3953_vm4 }
 0xc60   :  { %v3949_v34 = vsub.f32 1.0, %v3948_v29  ;;  %v3974_v54 = vor.u32 1.1754944e-38, %v3973_v46  ;;  %v3959_v2 = vor.u32 1.1754944e-38, %v3958_v47 }
 0xc61   :  { %v7764_v31 = vpop.eup %7763  ;;  %v11454_v45 = vadd.f32 %v4014_v57, %v4010_v48  ;;  %v3965_v21 = vmul.f32 %v11422_v11, %v3964_v41  ;;  %v6785_v57 = vld [vmem:[#allocation5 + $0x2c0] sm:$0xff]  }
 0xc62   :  { %v7766_v12 = vpop.eup %7765  ;;  %v3946_v3 = vadd.f32 1.0, %v7764_v31  ;;  %v3950_v39 = vmul.f32 %v11433_v60, %v3949_v34  ;;  %v6787_v46 = vunpack.c.h.bf16 %v6785_v57 }
 0xc63   :  { %v3978_v26 = vmul.f32 %v7766_v12, %v11385_v4  ;;  %vm3983_vm2 = vweird.f32 %v7766_v12  ;;  %v3966_v61 = vadd.f32 %v11422_v11, %v3965_v21 }
 0xc64   :  { %7767 = vrcp.f32 %v3946_v3  ;;  %vm11468_vm8 = vmor %vm3982_vm7, %vm3983_vm2  ;;  %v4003_v44 = vand.u32 2147483648, %v3946_v3  ;;  %v3951_v38 = vadd.f32 %v11433_v60, %v3950_v39  ;;  %v4001_v4 = vand.u32 2147483647, %v3946_v3 }
 0xc65   :  { %v3979_v55 = vsub.f32 1.0, %v3978_v26  ;;  %7769 = vtanh.f32 %v11449_v19  ;;  %vm3997_vm12 = vweird.f32 %v3946_v3  ;;  %v3970_v62 = vsel %vm11484_vm11, %v11422_v11, %v3966_v61 }
 0xc66   :  { %7771 = vtanh.f32 %v11452_v15  ;;  %v4004_v9 = vor.u32 1.1754944e-38, %v4003_v44  ;;  %vm4002_vm1 = vcmp.eq.f32.partialorder %v4001_v4, 8.507059e+37  ;;  %v3955_v14 = vsel %vm11490_vm14, %v11433_v60, %v3951_v38 }
 0xc67   :  { %v3980_v17 = vmul.f32 %v7766_v12, %v3979_v55  ;;  %7773 = vtanh.f32 %v11454_v45  ;;  %v3975_v43 = vsel %vm3972_vm3, %v3974_v54, %v3970_v62  ;;  %vm3957_vm2 = vcmp.eq.f32.partialorder %v3956_v52, 8.507059e+37 }
 0xc68   :  { %7775 = vtanh.f32 %v11259_v35  ;;  %v3960_v11 = vsel %vm3957_vm2, %v3959_v2, %v3955_v14  ;;  %v6802_v38 = vunpack.c.l.bf16 %v11525_v50 }
 0xc69   :  { %v3981_v7 = vadd.f32 %v7766_v12, %v3980_v17 }
 0xc6a   :  { %v7768_v59 = vpop.eup %7767 }
 0xc6b   :  { %v3993_v6 = vmul.f32 %v7768_v59, %v3946_v3  ;;  %v7770_v10 = vpop.eup %7769  ;;  %v3985_v28 = vsel %vm11468_vm8, %v7766_v12, %v3981_v7  ;;  %vm3998_vm9 = vweird.f32 %v7768_v59 }
 0xc6c   :  { %v7772_v24 = vpop.eup %7771  ;;  %v3990_v30 = vsel %vm3987_vm13, %v3989_v36, %v3985_v28  ;;  %vm3999_vm15 = vmor %vm3997_vm12, %vm3998_vm9  ;;  %v4024_v5 = vmul.f32 %v7770_v10, %v3975_v43 }
 0xc6d   :  { %v3994_v0 = vsub.f32 1.0, %v3993_v6  ;;  %v7774_v37 = vpop.eup %7773  ;;  %v4025_v63 = vmul.f32 %v7772_v24, %v3990_v30  ;;  %v7021_v24 = vld [vmem:[#allocation5 + $0x2c8] sm:$0xff]  }
 0xc6e   :  { %v7776_v29 = vpop.eup %7775  ;;  %v6790_v13 = vunpack.c.l.bf16 %v7021_v24 }
 0xc6f   :  { %v3995_v42 = vmul.f32 %v7768_v59, %v3994_v0  ;;  %v4023_v3 = vmul.f32 %v7776_v29, %v3960_v11 }
 0xc71   :  { %v3996_v23 = vadd.f32 %v7768_v59, %v3995_v42  ;;  %v4060_v56 = vpack.c.bf16 %v4024_v5, %v4023_v3 }
 0xc73   :  { %v4000_v33 = vsel %vm3999_vm15, %v7768_v59, %v3996_v23 }
 0xc74   :  { %v4005_v31 = vsel %vm4002_vm1, %v4004_v9, %v4000_v33 }
 0xc75   :  { %v4026_v12 = vmul.f32 %v7774_v37, %v4005_v31 }
 0xc77   :  { %v4061_v18 = vpack.c.bf16 %v4026_v12, %v4025_v63  ;;  %v6791_v63 = vunpack.c.h.bf16 %v7021_v24 }
 0xc79   :  { %4068 = vmatpush.bf16.msra.mxu3 %v4061_v18  ;;  %v7023_v18 = vld [vmem:[#allocation5 + $0x2d8] sm:$0xff]  }
 0xc7d   :  { %4069 = vmatpush.bf16.msra.mxu3 %v4060_v56 }
 0xc80   :  { %6312 = vmatmul.msk.bf16.vlgmr.msra.gmra.mxu3 %vm165_vm0, %v11193_v53 }
 0xc90   :  { %6313 = vmatmul.msk.bf16.gmra.mxu3 %vm165_vm0, %v11200_v20 }
 0xca0   :  { %6314 = vmatmul.msk.bf16.gmra.mxu3 %vm165_vm0, %v11207_v32  ;;  %v6786_v32 = vunpack.c.l.bf16 %v6785_v57 }
 0xcb0   :  { %6315 = vmatmul.msk.bf16.gmra.mxu3 %vm165_vm0, %v11214_v25  ;;  %v11520_v25 = vld [vmem:[#allocation5 + $0x2d0] sm:$0xff]  }
 0xcb1   :  { %v6794_v48 = vunpack.c.l.bf16 %v11520_v25  ;;  %v6795_v3 = vunpack.c.h.bf16 %v11520_v25 }
 0xcc0   :  { %6316 = vmatmul.msk.bf16.gmra.mxu3 %vm165_vm0, %v11221_v40 }
 0xcd0   :  { %6317 = vmatmul.msk.bf16.gmra.mxu3 %vm165_vm0, %v11228_v22 }
 0xce0   :  { %6318 = vmatmul.msk.bf16.gmra.mxu3 %vm165_vm0, %v11235_v51 }
 0xcf0   :  { %6319 = vmatmul.msk.bf16.gmra.mxu3 %vm165_vm0, %v11242_v49 }
 0xd03   :  { %v4071_v53 = vpop.f32.mrf.mxu3 }
 0xd04   :  { %v4111_v26 = vadd.f32 %v6786_v32, %v4071_v53  ;;  %v6798_v53 = vunpack.c.l.bf16 %v7023_v18 }
 0xd06   :  { %v6320_v40 = vmul.f32 -1.442695, %v4111_v26 }
 0xd08   :  { %7777 = vpow2.f32 %v6320_v40 }
 0xd0b   :  { %v4073_v20 = vpop.f32.mrf.mxu3 }
 0xd0c   :  { %v4112_v47 = vadd.f32 %v6787_v46, %v4073_v20  ;;  %v6799_v20 = vunpack.c.h.bf16 %v7023_v18 }
 0xd0e   :  { %v7778_v55 = vpop.eup %7777  ;;  %v6321_v9 = vmul.f32 -1.442695, %v4112_v47  ;;  %v11569_v47 = vld [vmem:[#allocation5 + $0x2f8] sm:$0xff]  }
 0xd0f   :  { %v4139_v34 = vadd.f32 1.0, %v7778_v55 }
 0xd11   :  { %v4154_v8 = vand.u32 2147483648, %v4139_v34  ;;  %vm4148_vm8 = vweird.f32 %v4139_v34  ;;  %v4152_v37 = vand.u32 2147483647, %v4139_v34 }
 0xd13   :  { %v4076_v60 = vpop.f32.mrf.mxu3  ;;  %v4155_v54 = vor.u32 1.1754944e-38, %v4154_v8  ;;  %vm4153_vm11 = vcmp.eq.f32.partialorder %v4152_v37, 8.507059e+37 }
 0xd14   :  { %v4113_v2 = vadd.f32 %v6790_v13, %v4076_v60 }
 0xd16   :  { %v6322_v29 = vmul.f32 -1.442695, %v4113_v2  ;;  %v7025_v2 = vld [vmem:[#allocation5 + $0x2e8] sm:$0xff]  }
 0xd1b   :  { %v11518_v16 = vpop.f32.mrf.mxu3 }
 0xd1c   :  { %v4114_v56 = vadd.f32 %v6791_v63, %v11518_v16 }
 0xd1e   :  { %v6323_v26 = vmul.f32 -1.442695, %v4114_v56 }
 0xd23   :  { %v4081_v22 = vpop.f32.mrf.mxu3 }
 0xd24   :  { %v4115_v41 = vadd.f32 %v6794_v48, %v4081_v22 }
 0xd26   :  { %v6324_v51 = vmul.f32 -1.442695, %v4115_v41 }
 0xd28   :  { %7779 = vpow2.f32 %v6324_v51 }
 0xd29   :  { %7781 = vrcp.f32 %v4139_v34 }
 0xd2b   :  { %v11523_v49 = vpop.f32.mrf.mxu3 }
 0xd2c   :  { %v4116_v60 = vadd.f32 %v6795_v3, %v11523_v49 }
 0xd2e   :  { %v7780_v17 = vpop.eup %7779  ;;  %v6325_v22 = vmul.f32 -1.442695, %v4116_v60  ;;  %v6806_v60 = vunpack.c.l.bf16 %v7025_v2 }
 0xd2f   :  { %v4215_v21 = vadd.f32 1.0, %v7780_v17  ;;  %v7782_v39 = vpop.eup %7781 }
 0xd30   :  { %v4144_v27 = vmul.f32 %v7782_v39, %v4139_v34  ;;  %vm4149_vm6 = vweird.f32 %v7782_v39 }
 0xd31   :  { %7783 = vrcp.f32 %v4215_v21  ;;  %v4230_v28 = vand.u32 2147483648, %v4215_v21  ;;  %vm4224_vm5 = vweird.f32 %v4215_v21  ;;  %v4228_v36 = vand.u32 2147483647, %v4215_v21  ;;  %vm4150_vm9 = vmor %vm4148_vm8, %vm4149_vm6 }
 0xd32   :  { %v4145_v61 = vsub.f32 1.0, %v4144_v27 }
 0xd33   :  { %v4086_v59 = vpop.f32.mrf.mxu3  ;;  %v4231_v62 = vor.u32 1.1754944e-38, %v4230_v28  ;;  %vm4229_vm10 = vcmp.eq.f32.partialorder %v4228_v36, 8.507059e+37 }
 0xd34   :  { %v4146_v1 = vmul.f32 %v7782_v39, %v4145_v61 }
 0xd36   :  { %v4147_v52 = vadd.f32 %v7782_v39, %v4146_v1 }
 0xd37   :  { %v7784_v6 = vpop.eup %7783 }
 0xd38   :  { %v4220_v7 = vmul.f32 %v7784_v6, %v4215_v21  ;;  %vm4225_vm4 = vweird.f32 %v7784_v6  ;;  %v4151_v30 = vsel %vm4150_vm9, %v7782_v39, %v4147_v52 }
 0xd39   :  { %vm4226_vm7 = vmor %vm4224_vm5, %vm4225_vm4  ;;  %v4156_v43 = vsel %vm4153_vm11, %v4155_v54, %v4151_v30  ;;  %v6814_v54 = vunpack.c.l.bf16 %v11569_v47 }
 0xd3a   :  { %v4221_v0 = vsub.f32 1.0, %v4220_v7 }
 0xd3b   :  { %v4088_v58 = vpop.f32.mrf.mxu3 }
 0xd3c   :  { %v4222_v44 = vmul.f32 %v7784_v6, %v4221_v0  ;;  %v4118_v40 = vadd.f32 %v6799_v20, %v4088_v58 }
 0xd3e   :  { %v4223_v10 = vadd.f32 %v7784_v6, %v4222_v44  ;;  %v6327_v25 = vmul.f32 -1.442695, %v4118_v40 }
 0xd40   :  { %v4227_v23 = vsel %vm4226_vm7, %v7784_v6, %v4223_v10 }
 0xd41   :  { %v4232_v33 = vsel %vm4229_vm10, %v4231_v62, %v4227_v23 }
 0xd42   :  { %v4359_v12 = vmul.f32 %v4232_v33, %v11259_v35  ;;  %v4117_v35 = vadd.f32 %v6798_v53, %v4086_v59  ;;  %v7026_v59 = vld [vmem:[#allocation5 + $0x2f0] sm:$0xff]  }
 0xd43   :  { %v4091_v42 = vpop.f32.mrf.mxu3  ;;  %v6810_v58 = vunpack.c.l.bf16 %v7026_v59  ;;  %v6811_v1 = vunpack.c.h.bf16 %v7026_v59  ;;  %v6807_v59 = vunpack.c.h.bf16 %v7025_v2 }
 0xd44   :  { %v4119_v4 = vadd.f32 %v6802_v38, %v4091_v42  ;;  %v6326_v41 = vmul.f32 -1.442695, %v4117_v35 }
 0xd46   :  { %7785 = vtanh.f32 %v4119_v4 }
 0xd47   :  { %7787 = vpow2.f32 %v6321_v9 }
 0xd48   :  { %7789 = vpow2.f32 %v6322_v29  ;;  %v6803_v29 = vunpack.c.h.bf16 %v11525_v50 }
 0xd49   :  { %7791 = vpow2.f32 %v6323_v26 }
 0xd4b   :  { %v11528_v14 = vpop.f32.mrf.mxu3 }
 0xd4c   :  { %v7786_v31 = vpop.eup %7785 }
 0xd4d   :  { %v4363_v11 = vmul.f32 %v7786_v31, %v4156_v43  ;;  %v7788_v32 = vpop.eup %7787 }
 0xd4e   :  { %v11538_v48 = vadd.f32 1.0, %v7788_v32  ;;  %v7790_v51 = vpop.eup %7789 }
 0xd4f   :  { %v11531_v5 = vadd.f32 %v4363_v11, %v4359_v12  ;;  %v11543_v55 = vadd.f32 1.0, %v7790_v51  ;;  %v7792_v49 = vpop.eup %7791 }
 0xd50   :  { %7793 = vrcp.f32 %v11538_v48  ;;  %v11548_v21 = vadd.f32 1.0, %v7792_v49  ;;  %v4167_v62 = vand.u32 2147483647, %v11538_v48  ;;  %v4169_v9 = vand.u32 2147483648, %v11538_v48 }
 0xd51   :  { %7795 = vpow2.f32 %v6325_v22  ;;  %v4184_v43 = vand.u32 2147483648, %v11543_v55  ;;  %vm4163_vm13 = vweird.f32 %v11538_v48  ;;  %vm4178_vm1 = vweird.f32 %v11543_v55 }
 0xd52   :  { %7797 = vpow2.f32 %v6326_v41  ;;  %vm11592_vm14 = vcmp.eq.f32.partialorder %v4167_v62, 8.507059e+37  ;;  %v4170_v32 = vor.u32 1.1754944e-38, %v4169_v9  ;;  %v4182_v50 = vand.u32 2147483647, %v11543_v55 }
 0xd53   :  { %v11535_v57 = vpop.f32.mrf.mxu3  ;;  %7799 = vpow2.f32 %v6327_v25  ;;  %v11607_v40 = vor.u32 1.1754944e-38, %v4184_v43  ;;  %vm4193_vm4 = vweird.f32 %v11548_v21 }
 0xd54   :  { %7801 = vrcp.f32 %v11543_v55  ;;  %vm11640_vm5 = vcmp.eq.f32.partialorder %v4182_v50, 8.507059e+37 }
 0xd55   :  { %7803 = vrcp.f32 %v11548_v21 }
 0xd56   :  { %v11545_v34 = vpop.eup %7793 }
 0xd57   :  { %v7796_v17 = vpop.eup %7795  ;;  %v4159_v27 = vmul.f32 %v11545_v34, %v11538_v48  ;;  %vm4164_vm12 = vweird.f32 %v11545_v34 }
 0xd58   :  { %v7798_v39 = vpop.eup %7797  ;;  %v11552_v0 = vadd.f32 1.0, %v7796_v17  ;;  %vm11598_vm15 = vmor %vm4163_vm13, %vm4164_vm12  ;;  %v4120_v17 = vadd.f32 %v6803_v29, %v11528_v14  ;;  %v4197_v14 = vand.u32 2147483647, %v11548_v21 }
 0xd59   :  { %v7800_v7 = vpop.eup %7799  ;;  %v11555_v61 = vadd.f32 1.0, %v7798_v39  ;;  %v4160_v46 = vsub.f32 1.0, %v4159_v27 }
 0xd5a   :  { %v11557_v44 = vpop.eup %7801  ;;  %v11559_v38 = vadd.f32 1.0, %v7800_v7  ;;  %7805 = vrcp.f32 %v11552_v0  ;;  %v6815_v7 = vunpack.c.h.bf16 %v11569_v47  ;;  %vm4239_vm7 = vweird.f32 %v11552_v0 }
 0xd5b   :  { %v11541_v16 = vpop.f32.mrf.mxu3  ;;  %v4174_v42 = vmul.f32 %v11557_v44, %v11543_v55  ;;  %7807 = vrcp.f32 %v11555_v61  ;;  %v11566_v4 = vpop.eup %7803  ;;  %v4161_v36 = vmul.f32 %v11545_v34, %v4160_v46  ;;  %vm4179_vm3 = vweird.f32 %v11557_v44 }
 0xd5c   :  { %7809 = vrcp.f32 %v11559_v38  ;;  %v4189_v13 = vmul.f32 %v11566_v4, %v11548_v21  ;;  %vm11623_vm2 = vmor %vm4178_vm1, %vm4179_vm3  ;;  %vm4194_vm6 = vweird.f32 %v11566_v4  ;;  %vm4254_vm13 = vweird.f32 %v11555_v61 }
 0xd5d   :  { %v4175_v8 = vsub.f32 1.0, %v4174_v42  ;;  %v4162_v31 = vadd.f32 %v11545_v34, %v4161_v36  ;;  %vm11664_vm10 = vmor %vm4193_vm4, %vm4194_vm6  ;;  %v4273_v3 = vand.u32 2147483647, %v11559_v38  ;;  %vm4198_vm1 = vcmp.eq.f32.partialorder %v4197_v14, 8.507059e+37 }
 0xd5e   :  { %v4190_v11 = vsub.f32 1.0, %v4189_v13 }
 0xd5f   :  { %v4176_v63 = vmul.f32 %v11557_v44, %v4175_v8  ;;  %v4166_v35 = vsel %vm11598_vm15, %v11545_v34, %v4162_v31  ;;  %v4245_v8 = vand.u32 2147483648, %v11552_v0  ;;  %v4260_v31 = vand.u32 2147483648, %v11555_v61 }
 0xd60   :  { %v11571_v23 = vpop.eup %7805  ;;  %v4191_v34 = vmul.f32 %v11566_v4, %v4190_v11  ;;  %v11619_v27 = vsel %vm11592_vm14, %v4170_v32, %v4166_v35  ;;  %v4275_v11 = vand.u32 2147483648, %v11559_v38  ;;  %vm4269_vm15 = vweird.f32 %v11559_v38 }
 0xd61   :  { %v11576_v30 = vpop.eup %7807  ;;  %v4235_v12 = vmul.f32 %v11571_v23, %v11552_v0  ;;  %v11610_v41 = vadd.f32 %v11557_v44, %v4176_v63  ;;  %vm4240_vm8 = vweird.f32 %v11571_v23  ;;  %vm4274_vm6 = vcmp.eq.f32.partialorder %v4273_v3, 8.507059e+37 }
 0xd62   :  { %v11580_v33 = vpop.eup %7809  ;;  %v4250_v18 = vmul.f32 %v11576_v30, %v11555_v61  ;;  %vm4255_vm9 = vweird.f32 %v11576_v30  ;;  %vm11672_vm12 = vmor %vm4239_vm7, %vm4240_vm8 }
 0xd63   :  { %v4101_v6 = vpop.f32.mrf.mxu3  ;;  %v4265_v53 = vmul.f32 %v11580_v33, %v11559_v38  ;;  %v4236_v22 = vsub.f32 1.0, %v4235_v12  ;;  %v4181_v46 = vsel %vm11623_vm2, %v11557_v44, %v11610_v41  ;;  %v4192_v44 = vadd.f32 %v11566_v4, %v4191_v34  ;;  %vm11682_vm14 = vmor %vm4254_vm13, %vm4255_vm9 }
 0xd64   :  { %v4123_v10 = vadd.f32 %v6810_v58, %v4101_v6  ;;  %v4251_v49 = vsub.f32 1.0, %v4250_v18  ;;  %v4121_v6 = vadd.f32 %v6806_v60, %v11535_v57  ;;  %vm4270_vm11 = vweird.f32 %v11580_v33 }
 0xd65   :  { %v4266_v39 = vsub.f32 1.0, %v4265_v53  ;;  %v4237_v57 = vmul.f32 %v11571_v23, %v4236_v22  ;;  %v4246_v53 = vor.u32 1.1754944e-38, %v4245_v8  ;;  %vm11701_vm3 = vmor %vm4269_vm15, %vm4270_vm11  ;;  %v4186_v38 = vsel %vm11640_vm5, %v11607_v40, %v4181_v46 }
 0xd66   :  { %v6328_v52 = vmul.f32 -1.442695, %v4123_v10  ;;  %v4199_v10 = vand.u32 2147483648, %v11548_v21  ;;  %v4252_v42 = vmul.f32 %v11576_v30, %v4251_v49  ;;  %v4258_v21 = vand.u32 2147483647, %v11555_v61 }
 0xd67   :  { %v4196_v61 = vsel %vm11664_vm10, %v11566_v4, %v4192_v44  ;;  %v4261_v4 = vor.u32 1.1754944e-38, %v4260_v31 }
 0xd68   :  { %v4253_v9 = vadd.f32 %v11576_v30, %v4252_v42  ;;  %v4200_v32 = vor.u32 1.1754944e-38, %v4199_v10  ;;  %vm4259_vm4 = vcmp.eq.f32.partialorder %v4258_v21, 8.507059e+37 }
 0xd6a   :  { %v4257_v20 = vsel %vm11682_vm14, %v11576_v30, %v4253_v9  ;;  %v4201_v50 = vsel %vm4198_vm1, %v4200_v32, %v4196_v61 }
 0xd6b   :  { %v4103_v28 = vpop.f32.mrf.mxu3 }
 0xd6c   :  { %v4124_v24 = vadd.f32 %v6811_v1, %v4103_v28 }
 0xd6e   :  { %v6329_v37 = vmul.f32 -1.442695, %v4124_v24  ;;  %v4122_v24 = vadd.f32 %v6807_v59, %v11541_v16  ;;  %v4238_v16 = vadd.f32 %v11571_v23, %v4237_v57 }
 0xd70   :  { %7811 = vpow2.f32 %v6329_v37  ;;  %v4243_v37 = vand.u32 2147483647, %v11552_v0  ;;  %v4242_v0 = vsel %vm11672_vm12, %v11571_v23, %v4238_v16 }
 0xd71   :  { %7813 = vpow2.f32 %v6328_v52  ;;  %v4267_v52 = vmul.f32 %v11580_v33, %v4266_v39 }
 0xd72   :  { %vm4244_vm2 = vcmp.eq.f32.partialorder %v4243_v37, 8.507059e+37 }
 0xd73   :  { %v4106_v56 = vpop.f32.mrf.mxu3  ;;  %v4268_v43 = vadd.f32 %v11580_v33, %v4267_v52  ;;  %v4247_v35 = vsel %vm4244_vm2, %v4246_v53, %v4242_v0 }
 0xd74   :  { %v4125_v26 = vadd.f32 %v6814_v54, %v4106_v56  ;;  %v4360_v34 = vmul.f32 %v4247_v35, %v11449_v19 }
 0xd75   :  { %v4272_v30 = vsel %vm11701_vm3, %v11580_v33, %v4268_v43 }
 0xd76   :  { %v7812_v48 = vpop.eup %7811  ;;  %v6330_v51 = vmul.f32 -1.442695, %v4125_v26 }
 0xd77   :  { %v7814_v25 = vpop.eup %7813  ;;  %v11629_v1 = vadd.f32 1.0, %v7812_v48  ;;  %v4276_v48 = vor.u32 1.1754944e-38, %v4275_v11 }
 0xd78   :  { %7815 = vpow2.f32 %v6330_v51  ;;  %v11637_v55 = vadd.f32 1.0, %v7814_v25  ;;  %v4262_v51 = vsel %vm4259_vm4, %v4261_v4, %v4257_v20 }
 0xd79   :  { %7817 = vtanh.f32 %v4120_v17  ;;  %v4277_v40 = vsel %vm4274_vm6, %v4276_v48, %v4272_v30  ;;  %vm4319_vm8 = vweird.f32 %v11629_v1  ;;  %v4325_v9 = vand.u32 2147483648, %v11629_v1 }
 0xd7a   :  { %7819 = vtanh.f32 %v4121_v6  ;;  %v4362_v58 = vmul.f32 %v4277_v40, %v11454_v45  ;;  %vm4304_vm13 = vweird.f32 %v11637_v55  ;;  %v4308_v21 = vand.u32 2147483647, %v11637_v55  ;;  %v11812_v40 = vld [vmem:[%s12916_s2 + $0x28] sm:$0xff] }
 0xd7b   :  { %v4108_v36 = vpop.f32.mrf.mxu3  ;;  %7821 = vrcp.f32 %v11629_v1  ;;  %v4310_v11 = vand.u32 2147483648, %v11637_v55  ;;  %v4326_v53 = vor.u32 1.1754944e-38, %v4325_v9 }
 0xd7c   :  { %v4126_v47 = vadd.f32 %v6815_v7, %v4108_v36  ;;  %7823 = vrcp.f32 %v11637_v55  ;;  %v4361_v7 = vmul.f32 %v4262_v51, %v11452_v15  ;;  %v11777_v51 = vld [vmem:[%s12916_s2] sm:$0xff] }
 0xd7d   :  { %7825 = vtanh.f32 %v4122_v24  ;;  %v4311_v4 = vor.u32 1.1754944e-38, %v4310_v11 }
 0xd7e   :  { %v7816_v13 = vpop.eup %7815  ;;  %v6331_v62 = vmul.f32 -1.442695, %v4126_v47 }
 0xd7f   :  { %v11657_v54 = vadd.f32 1.0, %v7816_v13  ;;  %v7818_v63 = vpop.eup %7817 }
 0xd80   :  { %7827 = vpow2.f32 %v6331_v62  ;;  %v7820_v18 = vpop.eup %7819  ;;  %v4364_v41 = vmul.f32 %v7818_v63, %v11619_v27  ;;  %v4323_v62 = vand.u32 2147483647, %v11629_v1 }
 0xd81   :  { %7829 = vrcp.f32 %v11657_v54  ;;  %v11694_v56 = vpop.eup %7821  ;;  %v4365_v17 = vmul.f32 %v7820_v18, %v4186_v38  ;;  %v4340_v52 = vand.u32 2147483648, %v11657_v54  ;;  %vm4334_vm10 = vweird.f32 %v11657_v54 }
 0xd82   :  { %v11705_v23 = vpop.eup %7823  ;;  %v4315_v25 = vmul.f32 %v11694_v56, %v11629_v1  ;;  %v11721_v27 = vadd.f32 %v4364_v41, %v4360_v34  ;;  %vm4320_vm9 = vweird.f32 %v11694_v56  ;;  %v4338_v47 = vand.u32 2147483647, %v11657_v54 }
 0xd83   :  { %v7826_v26 = vpop.eup %7825  ;;  %v4300_v59 = vmul.f32 %v11705_v23, %v11637_v55  ;;  %v11724_v46 = vadd.f32 %v4365_v17, %v4361_v7  ;;  %vm4305_vm7 = vweird.f32 %v11705_v23  ;;  %v4341_v12 = vor.u32 1.1754944e-38, %v4340_v52  ;;  %vm11756_vm14 = vmor %vm4319_vm8, %vm4320_vm9  ;;  %v11805_v17 = vld [vmem:[%s12916_s2 + $0x20] sm:$0xff] }
 0xd84   :  { %v4366_v39 = vmul.f32 %v7826_v26, %v4201_v50  ;;  %v4316_v14 = vsub.f32 1.0, %v4315_v25  ;;  %vm4339_vm1 = vcmp.eq.f32.partialorder %v4338_v47, 8.507059e+37  ;;  %vm11762_vm3 = vmor %vm4304_vm13, %vm4305_vm7  ;;  %vm4324_vm6 = vcmp.eq.f32.partialorder %v4323_v62, 8.507059e+37  ;;  %v11791_v25 = vld [vmem:[%s12916_s2 + $0x10] sm:$0xff] }
 0xd85   :  { %v4301_v10 = vsub.f32 1.0, %v4300_v59  ;;  %v11819_v59 = vld [vmem:[%s12916_s2 + $0x30] sm:$0xff] }
 0xd86   :  { %v7828_v22 = vpop.eup %7827  ;;  %v11726_v42 = vadd.f32 %v4366_v39, %v4362_v58  ;;  %v4317_v19 = vmul.f32 %v11694_v56, %v4316_v14 }
 0xd87   :  { %v7830_v49 = vpop.eup %7829  ;;  %v4298_v33 = vadd.f32 1.0, %v7828_v22  ;;  %v4302_v15 = vmul.f32 %v11705_v23, %v4301_v10  ;;  %v7029_v10 = vld [vmem:[#allocation5 + $0x310] sm:$0xff]  }
 0xd88   :  { %v4330_v6 = vmul.f32 %v7830_v49, %v11657_v54  ;;  %vm4335_vm5 = vweird.f32 %v7830_v49  ;;  %v4318_v8 = vadd.f32 %v11694_v56, %v4317_v19 }
 0xd89   :  { %7831 = vrcp.f32 %v4298_v33  ;;  %vm11740_vm11 = vmor %vm4334_vm10, %vm4335_vm5  ;;  %v4355_v13 = vand.u32 2147483648, %v4298_v33  ;;  %v4303_v16 = vadd.f32 %v11705_v23, %v4302_v15  ;;  %v4353_v54 = vand.u32 2147483647, %v4298_v33 }
 0xd8a   :  { %v4331_v57 = vsub.f32 1.0, %v4330_v6  ;;  %7833 = vtanh.f32 %v11721_v27  ;;  %vm4349_vm15 = vweird.f32 %v4298_v33  ;;  %v4322_v55 = vsel %vm11756_vm14, %v11694_v56, %v4318_v8  ;;  %v6817_v6 = vld [vmem:[#allocation5 + $0x300] sm:$0xff]  }
 0xd8b   :  { %7835 = vtanh.f32 %v11724_v46  ;;  %v4356_v1 = vor.u32 1.1754944e-38, %v4355_v13  ;;  %vm4354_vm4 = vcmp.eq.f32.partialorder %v4353_v54, 8.507059e+37  ;;  %v4307_v32 = vsel %vm11762_vm3, %v11705_v23, %v4303_v16  ;;  %v11784_v23 = vld [vmem:[%s12916_s2 + $0x8] sm:$0xff] }
 0xd8c   :  { %v4332_v28 = vmul.f32 %v7830_v49, %v4331_v57  ;;  %7837 = vtanh.f32 %v11726_v42  ;;  %v4327_v38 = vsel %vm4324_vm6, %v4326_v53, %v4322_v55  ;;  %vm4309_vm5 = vcmp.eq.f32.partialorder %v4308_v21, 8.507059e+37 }
 0xd8d   :  { %7839 = vtanh.f32 %v11531_v5  ;;  %v4312_v56 = vsel %vm4309_vm5, %v4311_v4, %v4307_v32  ;;  %v6818_v58 = vunpack.c.l.bf16 %v6817_v6  ;;  %v6819_v19 = vunpack.c.h.bf16 %v6817_v6 }
 0xd8e   :  { %v4333_v36 = vadd.f32 %v7830_v49, %v4332_v28  ;;  %v6827_v8 = vunpack.c.h.bf16 %v7029_v10 }
 0xd8f   :  { %v7832_v24 = vpop.eup %7831 }
 0xd90   :  { %v4345_v45 = vmul.f32 %v7832_v24, %v4298_v33  ;;  %v7834_v31 = vpop.eup %7833  ;;  %v4337_v43 = vsel %vm11740_vm11, %v7830_v49, %v4333_v36  ;;  %vm4350_vm12 = vweird.f32 %v7832_v24  ;;  %v11798_v49 = vld [vmem:[%s12916_s2 + $0x18] sm:$0xff] }
 0xd91   :  { %v7836_v63 = vpop.eup %7835  ;;  %v4342_v3 = vsel %vm4339_vm1, %v4341_v12, %v4337_v43  ;;  %vm4351_vm2 = vmor %vm4349_vm15, %vm4350_vm12  ;;  %v4376_v50 = vmul.f32 %v7834_v31, %v4327_v38  ;;  %v11826_v33 = vld [vmem:[%s12916_s2 + $0x38] sm:$0xff] }
 0xd92   :  { %v4346_v44 = vsub.f32 1.0, %v4345_v45  ;;  %v7838_v29 = vpop.eup %7837  ;;  %v4377_v30 = vmul.f32 %v7836_v63, %v4342_v3 }
 0xd93   :  { %v7840_v48 = vpop.eup %7839 }
 0xd94   :  { %v4347_v2 = vmul.f32 %v7832_v24, %v4346_v44  ;;  %v4375_v22 = vmul.f32 %v7840_v48, %v4312_v56 }
 0xd96   :  { %v4348_v0 = vadd.f32 %v7832_v24, %v4347_v2  ;;  %v4412_v41 = vpack.c.bf16 %v4376_v50, %v4375_v22 }
 0xd98   :  { %v4352_v20 = vsel %vm4351_vm2, %v7832_v24, %v4348_v0  ;;  %v6826_v24 = vunpack.c.l.bf16 %v7029_v10 }
 0xd99   :  { %v4357_v60 = vsel %vm4354_vm4, %v4356_v1, %v4352_v20  ;;  %v7031_v1 = vld [vmem:[#allocation5 + $0x320] sm:$0xff]  }
 0xd9a   :  { %v4378_v26 = vmul.f32 %v7838_v29, %v4357_v60  ;;  %v6834_v4 = vunpack.c.l.bf16 %v7031_v1 }
 0xd9c   :  { %v4413_v35 = vpack.c.bf16 %v4378_v26, %v4377_v30 }
 0xd9e   :  { %4420 = vmatpush.bf16.msrb.mxu0 %v4413_v35 }
 0xda2   :  { %4421 = vmatpush.bf16.msrb.mxu0 %v4412_v41 }
 0xda5   :  { %6332 = vmatmul.msk.bf16.vlgmr.msrb.gmra.mxu0 %vm165_vm0, %v11777_v51 }
 0xdb5   :  { %6333 = vmatmul.msk.bf16.gmra.mxu0 %vm165_vm0, %v11784_v23 }
 0xdc5   :  { %6334 = vmatmul.msk.bf16.gmra.mxu0 %vm165_vm0, %v11791_v25 }
 0xdd5   :  { %6335 = vmatmul.msk.bf16.gmra.mxu0 %vm165_vm0, %v11798_v49 }
 0xde5   :  { %6336 = vmatmul.msk.bf16.gmra.mxu0 %vm165_vm0, %v11805_v17 }
 0xdf5   :  { %6337 = vmatmul.msk.bf16.gmra.mxu0 %vm165_vm0, %v11812_v40 }
 0xe05   :  { %6338 = vmatmul.msk.bf16.gmra.mxu0 %vm165_vm0, %v11819_v59 }
 0xe15   :  { %6339 = vmatmul.msk.bf16.gmra.mxu0 %vm165_vm0, %v11826_v33 }
 0xe22   :  { %v4423_v34 = vpop.f32.mrf.mxu0 }
 0xe23   :  { %v4463_v14 = vadd.f32 %v6818_v58, %v4423_v34 }
 0xe25   :  { %v6340_v28 = vmul.f32 -1.442695, %v4463_v14 }
 0xe27   :  { %7841 = vpow2.f32 %v6340_v28  ;;  %v6835_v28 = vunpack.c.h.bf16 %v7031_v1 }
 0xe2a   :  { %v4425_v39 = vpop.f32.mrf.mxu0 }
 0xe2b   :  { %v4464_v15 = vadd.f32 %v6819_v19, %v4425_v39 }
 0xe2d   :  { %v6341_v52 = vmul.f32 -1.442695, %v4464_v15  ;;  %v7842_v47 = vpop.eup %7841 }
 0xe2e   :  { %v4491_v37 = vadd.f32 1.0, %v7842_v47 }
 0xe30   :  { %v4506_v34 = vand.u32 2147483648, %v4491_v37  ;;  %vm4500_vm11 = vweird.f32 %v4491_v37  ;;  %v4504_v6 = vand.u32 2147483647, %v4491_v37 }
 0xe32   :  { %v11830_v7 = vpop.f32.mrf.mxu0  ;;  %v4507_v15 = vor.u32 1.1754944e-38, %v4506_v34  ;;  %vm4505_vm15 = vcmp.eq.f32.partialorder %v4504_v6, 8.507059e+37  ;;  %v7033_v6 = vld [vmem:[#allocation5 + $0x330] sm:$0xff]  }
 0xe33   :  { %v6842_v10 = vunpack.c.l.bf16 %v7033_v6 }
 0xe3a   :  { %v11832_v57 = vpop.f32.mrf.mxu0 }
 0xe42   :  { %v4433_v45 = vpop.f32.mrf.mxu0 }
 0xe43   :  { %v4467_v36 = vadd.f32 %v6826_v24, %v4433_v45 }
 0xe45   :  { %v6344_v44 = vmul.f32 -1.442695, %v4467_v36  ;;  %v7028_v36 = vld [vmem:[#allocation5 + $0x308] sm:$0xff]  }
 0xe47   :  { %7843 = vpow2.f32 %v6344_v44 }
 0xe48   :  { %7845 = vpow2.f32 %v6341_v52 }
 0xe49   :  { %7847 = vrcp.f32 %v4491_v37 }
 0xe4a   :  { %v4435_v13 = vpop.f32.mrf.mxu0 }
 0xe4b   :  { %v4468_v16 = vadd.f32 %v6827_v8, %v4435_v13 }
 0xe4d   :  { %v7844_v62 = vpop.eup %7843  ;;  %v6345_v9 = vmul.f32 -1.442695, %v4468_v16 }
 0xe4e   :  { %v4567_v31 = vadd.f32 1.0, %v7844_v62  ;;  %v7846_v2 = vpop.eup %7845 }
 0xe4f   :  { %7849 = vpow2.f32 %v6345_v9  ;;  %v11834_v43 = vadd.f32 1.0, %v7846_v2  ;;  %v7848_v63 = vpop.eup %7847  ;;  %v6822_v2 = vunpack.c.l.bf16 %v7028_v36 }
 0xe50   :  { %7851 = vrcp.f32 %v4567_v31  ;;  %v4496_v29 = vmul.f32 %v7848_v63, %v4491_v37  ;;  %v4582_v50 = vand.u32 2147483648, %v4567_v31  ;;  %vm4576_vm8 = vweird.f32 %v4567_v31 }
 0xe51   :  { %7853 = vrcp.f32 %v11834_v43  ;;  %vm4501_vm9 = vweird.f32 %v7848_v63  ;;  %v4580_v41 = vand.u32 2147483647, %v4567_v31  ;;  %vm4515_vm4 = vweird.f32 %v11834_v43 }
 0xe52   :  { %v11836_v54 = vpop.f32.mrf.mxu0  ;;  %v4497_v3 = vsub.f32 1.0, %v4496_v29  ;;  %v4583_v14 = vor.u32 1.1754944e-38, %v4582_v50  ;;  %vm11853_vm12 = vmor %vm4500_vm11, %vm4501_vm9  ;;  %v6823_v29 = vunpack.c.h.bf16 %v7028_v36 }
 0xe53   :  { %vm4581_vm13 = vcmp.eq.f32.partialorder %v4580_v41, 8.507059e+37 }
 0xe54   :  { %v4498_v38 = vmul.f32 %v7848_v63, %v4497_v3 }
 0xe55   :  { %v7850_v12 = vpop.eup %7849 }
 0xe56   :  { %v7852_v21 = vpop.eup %7851  ;;  %v11839_v11 = vadd.f32 1.0, %v7850_v12  ;;  %v4499_v22 = vadd.f32 %v7848_v63, %v4498_v38  ;;  %v7030_v12 = vld [vmem:[#allocation5 + $0x318] sm:$0xff]  }
 0xe57   :  { %v4572_v18 = vmul.f32 %v7852_v21, %v4567_v31  ;;  %v11844_v55 = vpop.eup %7853  ;;  %vm4577_vm7 = vweird.f32 %v7852_v21  ;;  %v6830_v3 = vunpack.c.l.bf16 %v7030_v12 }
 0xe58   :  { %7855 = vrcp.f32 %v11839_v11  ;;  %v4511_v32 = vmul.f32 %v11844_v55, %v11834_v43  ;;  %vm4578_vm10 = vmor %vm4576_vm8, %vm4577_vm7  ;;  %v4503_v24 = vsel %vm11853_vm12, %v7848_v63, %v4499_v22  ;;  %vm4516_vm1 = vweird.f32 %v11844_v55 }
 0xe59   :  { %v4573_v0 = vsub.f32 1.0, %v4572_v18  ;;  %v4597_v8 = vand.u32 2147483648, %v11839_v11  ;;  %v4508_v37 = vsel %vm4505_vm15, %v4507_v15, %v4503_v24  ;;  %vm4591_vm3 = vweird.f32 %v11839_v11  ;;  %vm4517_vm6 = vmor %vm4515_vm4, %vm4516_vm1 }
 0xe5a   :  { %v11842_v61 = vpop.f32.mrf.mxu0  ;;  %v4512_v35 = vsub.f32 1.0, %v4511_v32  ;;  %v4595_v31 = vand.u32 2147483647, %v11839_v11  ;;  %v6843_v24 = vunpack.c.h.bf16 %v7033_v6 }
 0xe5b   :  { %v4574_v20 = vmul.f32 %v7852_v21, %v4573_v0  ;;  %v4598_v0 = vor.u32 1.1754944e-38, %v4597_v8 }
 0xe5c   :  { %v4513_v19 = vmul.f32 %v11844_v55, %v4512_v35  ;;  %vm4596_vm5 = vcmp.eq.f32.partialorder %v4595_v31, 8.507059e+37  ;;  %v7032_v31 = vld [vmem:[#allocation5 + $0x328] sm:$0xff]  }
 0xe5d   :  { %v4575_v56 = vadd.f32 %v7852_v21, %v4574_v20  ;;  %v6831_v20 = vunpack.c.h.bf16 %v7030_v12 }
 0xe5e   :  { %v11846_v53 = vpop.eup %7855  ;;  %v4514_v16 = vadd.f32 %v11844_v55, %v4513_v19 }
 0xe5f   :  { %v4587_v60 = vmul.f32 %v11846_v53, %v11839_v11  ;;  %v4579_v58 = vsel %vm4578_vm10, %v7852_v21, %v4575_v56  ;;  %vm4592_vm14 = vweird.f32 %v11846_v53  ;;  %v4521_v21 = vand.u32 2147483648, %v11834_v43 }
 0xe60   :  { %v4584_v45 = vsel %vm4581_vm13, %v4583_v14, %v4579_v58  ;;  %vm11870_vm2 = vmor %vm4591_vm3, %vm4592_vm14  ;;  %v4518_v1 = vsel %vm4517_vm6, %v11844_v55, %v4514_v16  ;;  %v4470_v55 = vadd.f32 %v6831_v20, %v11842_v61 }
 0xe61   :  { %v4588_v30 = vsub.f32 1.0, %v4587_v60  ;;  %v4711_v62 = vmul.f32 %v4584_v45, %v11531_v5  ;;  %v4519_v5 = vand.u32 2147483647, %v11834_v43  ;;  %v4522_v32 = vor.u32 1.1754944e-38, %v4521_v21 }
 0xe62   :  { %v4443_v26 = vpop.f32.mrf.mxu0 }
 0xe63   :  { %v4471_v48 = vadd.f32 %v6834_v4, %v4443_v26  ;;  %v4589_v39 = vmul.f32 %v11846_v53, %v4588_v30  ;;  %v4465_v4 = vadd.f32 %v6822_v2, %v11830_v7  ;;  %vm4520_vm7 = vcmp.eq.f32.partialorder %v4519_v5, 8.507059e+37 }
 0xe64   :  { %v4523_v30 = vsel %vm4520_vm7, %v4522_v32, %v4518_v1  ;;  %v4469_v26 = vadd.f32 %v6830_v3, %v11836_v54  ;;  %v6347_v7 = vmul.f32 -1.442695, %v4470_v55  ;;  %v6838_v5 = vunpack.c.l.bf16 %v7032_v31 }
 0xe65   :  { %7857 = vtanh.f32 %v4471_v48  ;;  %v4590_v44 = vadd.f32 %v11846_v53, %v4589_v39  ;;  %v6342_v50 = vmul.f32 -1.442695, %v4465_v4 }
 0xe66   :  { %v6346_v41 = vmul.f32 -1.442695, %v4469_v26 }
 0xe67   :  { %v4594_v11 = vsel %vm11870_vm2, %v11846_v53, %v4590_v44  ;;  %v4466_v53 = vadd.f32 %v6823_v29, %v11832_v57  ;;  %v7034_v44 = vld [vmem:[#allocation5 + $0x338] sm:$0xff]  }
 0xe68   :  { %v4599_v60 = vsel %vm4596_vm5, %v4598_v0, %v4594_v11  ;;  %v6846_v16 = vunpack.c.l.bf16 %v7034_v44 }
 0xe69   :  { %v4712_v56 = vmul.f32 %v4599_v60, %v11721_v27  ;;  %v6343_v22 = vmul.f32 -1.442695, %v4466_v53  ;;  %v6839_v60 = vunpack.c.h.bf16 %v7032_v31  ;;  %v6847_v53 = vunpack.c.h.bf16 %v7034_v44 }
 0xe6a   :  { %v4445_v52 = vpop.f32.mrf.mxu0 }
 0xe6b   :  { %v7858_v47 = vpop.eup %7857  ;;  %v4472_v13 = vadd.f32 %v6835_v28, %v4445_v52 }
 0xe6c   :  { %v4715_v9 = vmul.f32 %v7858_v47, %v4508_v37 }
 0xe6d   :  { %7859 = vtanh.f32 %v4472_v13 }
 0xe6e   :  { %v11875_v18 = vadd.f32 %v4715_v9, %v4711_v62  ;;  %7861 = vpow2.f32 %v6342_v50 }
 0xe6f   :  { %7863 = vpow2.f32 %v6343_v22 }
 0xe70   :  { %7865 = vpow2.f32 %v6346_v41 }
 0xe71   :  { %7867 = vpow2.f32 %v6347_v7 }
 0xe72   :  { %v11886_v43 = vpop.f32.mrf.mxu0 }
 0xe73   :  { %v7860_v38 = vpop.eup %7859 }
 0xe74   :  { %v4716_v35 = vmul.f32 %v7860_v38, %v4523_v30  ;;  %v7862_v57 = vpop.eup %7861  ;;  %v4473_v38 = vadd.f32 %v6838_v5, %v11886_v43 }
 0xe75   :  { %v7864_v39 = vpop.eup %7863  ;;  %v11894_v14 = vadd.f32 1.0, %v7862_v57 }
 0xe76   :  { %v11892_v48 = vadd.f32 %v4716_v35, %v4712_v56  ;;  %v7866_v54 = vpop.eup %7865  ;;  %v11896_v61 = vadd.f32 1.0, %v7864_v39 }
 0xe77   :  { %v7868_v27 = vpop.eup %7867  ;;  %v11898_v28 = vadd.f32 1.0, %v7866_v54  ;;  %7869 = vrcp.f32 %v11894_v14  ;;  %vm4530_vm8 = vweird.f32 %v11894_v14  ;;  %v4534_v56 = vand.u32 2147483647, %v11894_v14 }
 0xe78   :  { %v11900_v19 = vadd.f32 1.0, %v7868_v27  ;;  %7871 = vrcp.f32 %v11896_v61  ;;  %v4536_v43 = vand.u32 2147483648, %v11894_v14  ;;  %vm4545_vm10 = vweird.f32 %v11896_v61 }
 0xe79   :  { %7873 = vrcp.f32 %v11898_v28  ;;  %v4549_v6 = vand.u32 2147483647, %v11896_v61  ;;  %v4551_v54 = vand.u32 2147483648, %v11896_v61  ;;  %vm4606_vm15 = vweird.f32 %v11898_v28 }
 0xe7a   :  { %v4450_v34 = vpop.f32.mrf.mxu0  ;;  %7875 = vrcp.f32 %v11900_v19  ;;  %v4610_v44 = vand.u32 2147483647, %v11898_v28  ;;  %vm4621_vm2 = vweird.f32 %v11900_v19  ;;  %vm4535_vm6 = vcmp.eq.f32.partialorder %v4534_v56, 8.507059e+37 }
 0xe7b   :  { %v4474_v22 = vadd.f32 %v6839_v60, %v4450_v34  ;;  %vm4550_vm7 = vcmp.eq.f32.partialorder %v4549_v6, 8.507059e+37 }
 0xe7c   :  { %vm4611_vm5 = vcmp.eq.f32.partialorder %v4610_v44, 8.507059e+37 }
 0xe7d   :  { %v11906_v47 = vpop.eup %7869 }
 0xe7e   :  { %v11908_v37 = vpop.eup %7871  ;;  %v4526_v9 = vmul.f32 %v11906_v47, %v11894_v14  ;;  %vm4531_vm9 = vweird.f32 %v11906_v47 }
 0xe7f   :  { %v11910_v13 = vpop.eup %7873  ;;  %v4541_v2 = vmul.f32 %v11908_v37, %v11896_v61  ;;  %vm4546_vm11 = vweird.f32 %v11908_v37  ;;  %vm11953_vm14 = vmor %vm4530_vm8, %vm4531_vm9  ;;  %v4625_v61 = vand.u32 2147483647, %v11900_v19 }
 0xe80   :  { %v11912_v62 = vpop.eup %7875  ;;  %v4602_v63 = vmul.f32 %v11910_v13, %v11898_v28  ;;  %v4527_v29 = vsub.f32 1.0, %v4526_v9  ;;  %vm4607_vm12 = vweird.f32 %v11910_v13  ;;  %vm11965_vm1 = vmor %vm4545_vm10, %vm4546_vm11 }
 0xe81   :  { %v4617_v21 = vmul.f32 %v11912_v62, %v11900_v19  ;;  %v4542_v3 = vsub.f32 1.0, %v4541_v2  ;;  %vm4622_vm13 = vweird.f32 %v11912_v62  ;;  %vm11972_vm3 = vmor %vm4606_vm15, %vm4607_vm12  ;;  %v4537_v2 = vor.u32 1.1754944e-38, %v4536_v43 }
 0xe82   :  { %v4453_v58 = vpop.f32.mrf.mxu0  ;;  %v4603_v32 = vsub.f32 1.0, %v4602_v63  ;;  %v4528_v30 = vmul.f32 %v11906_v47, %v4527_v29  ;;  %vm11985_vm4 = vmor %vm4621_vm2, %vm4622_vm13  ;;  %vm4626_vm8 = vcmp.eq.f32.partialorder %v4625_v61, 8.507059e+37 }
 0xe83   :  { %v4475_v15 = vadd.f32 %v6842_v10, %v4453_v58  ;;  %v4618_v4 = vsub.f32 1.0, %v4617_v21  ;;  %v4543_v35 = vmul.f32 %v11908_v37, %v4542_v3  ;;  %v4552_v21 = vor.u32 1.1754944e-38, %v4551_v54 }
 0xe84   :  { %v4604_v50 = vmul.f32 %v11910_v13, %v4603_v32  ;;  %v4529_v39 = vadd.f32 %v11906_v47, %v4528_v30 }
 0xe85   :  { %v6348_v52 = vmul.f32 -1.442695, %v4475_v15  ;;  %v4619_v7 = vmul.f32 %v11912_v62, %v4618_v4  ;;  %v4544_v27 = vadd.f32 %v11908_v37, %v4543_v35  ;;  %v4612_v15 = vand.u32 2147483648, %v11898_v28 }
 0xe86   :  { %v4605_v10 = vadd.f32 %v11910_v13, %v4604_v50  ;;  %v4533_v28 = vsel %vm11953_vm14, %v11906_v47, %v4529_v39 }
 0xe88   :  { %v4609_v63 = vsel %vm11972_vm3, %v11910_v13, %v4605_v10 }
 0xe8a   :  { %v4455_v45 = vpop.f32.mrf.mxu0 }
 0xe8b   :  { %v4476_v36 = vadd.f32 %v6843_v24, %v4455_v45 }
 0xe8d   :  { %v6349_v8 = vmul.f32 -1.442695, %v4476_v36  ;;  %v4620_v36 = vadd.f32 %v11912_v62, %v4619_v7 }
 0xe8f   :  { %7877 = vpow2.f32 %v6349_v8  ;;  %v4624_v5 = vsel %vm11985_vm4, %v11912_v62, %v4620_v36 }
 0xe90   :  { %7879 = vpow2.f32 %v6348_v52  ;;  %v4627_v52 = vand.u32 2147483648, %v11900_v19  ;;  %v4613_v19 = vor.u32 1.1754944e-38, %v4612_v15 }
 0xe92   :  { %v4458_v12 = vpop.f32.mrf.mxu0  ;;  %v4628_v29 = vor.u32 1.1754944e-38, %v4627_v52  ;;  %v4614_v13 = vsel %vm4611_vm5, %v4613_v19, %v4609_v63 }
 0xe93   :  { %v4477_v11 = vadd.f32 %v6846_v16, %v4458_v12  ;;  %v4548_v12 = vsel %vm11965_vm1, %v11908_v37, %v4544_v27  ;;  %v4713_v30 = vmul.f32 %v4614_v13, %v11724_v46 }
 0xe94   :  { %v4629_v60 = vsel %vm4626_vm8, %v4628_v29, %v4624_v5 }
 0xe95   :  { %v7878_v0 = vpop.eup %7877  ;;  %v6350_v1 = vmul.f32 -1.442695, %v4477_v11  ;;  %v4714_v56 = vmul.f32 %v4629_v60, %v11726_v42 }
 0xe96   :  { %v7880_v20 = vpop.eup %7879  ;;  %v11924_v26 = vadd.f32 1.0, %v7878_v0  ;;  %v4538_v0 = vsel %vm4535_vm6, %v4537_v2, %v4533_v28 }
 0xe97   :  { %7881 = vpow2.f32 %v6350_v1  ;;  %v11929_v55 = vadd.f32 1.0, %v7880_v20  ;;  %v4553_v1 = vsel %vm4550_vm7, %v4552_v21, %v4548_v12 }
 0xe98   :  { %7883 = vtanh.f32 %v4473_v38  ;;  %vm4671_vm11 = vweird.f32 %v11924_v26  ;;  %v4675_v36 = vand.u32 2147483647, %v11924_v26  ;;  %v4677_v52 = vand.u32 2147483648, %v11924_v26 }
 0xe99   :  { %7885 = vrcp.f32 %v11924_v26  ;;  %vm4656_vm1 = vweird.f32 %v11929_v55  ;;  %v4660_v61 = vand.u32 2147483647, %v11929_v55  ;;  %v4662_v31 = vand.u32 2147483648, %v11929_v55 }
 0xe9a   :  { %v4460_v41 = vpop.f32.mrf.mxu0  ;;  %7887 = vrcp.f32 %v11929_v55  ;;  %v4678_v5 = vor.u32 1.1754944e-38, %v4677_v52  ;;  %vm4676_vm8 = vcmp.eq.f32.partialorder %v4675_v36, 8.507059e+37 }
 0xe9b   :  { %v4478_v57 = vadd.f32 %v6847_v53, %v4460_v41  ;;  %7889 = vtanh.f32 %v4474_v22 }
 0xe9d   :  { %v7882_v58 = vpop.eup %7881  ;;  %v6351_v34 = vmul.f32 -1.442695, %v4478_v57 }
 0xe9e   :  { %v11945_v24 = vadd.f32 1.0, %v7882_v58  ;;  %v7884_v14 = vpop.eup %7883 }
 0xe9f   :  { %7891 = vpow2.f32 %v6351_v34  ;;  %v11981_v9 = vpop.eup %7885  ;;  %v4717_v32 = vmul.f32 %v7884_v14, %v4538_v0 }
 0xea0   :  { %7893 = vrcp.f32 %v11945_v24  ;;  %v11995_v47 = vpop.eup %7887  ;;  %v4667_v37 = vmul.f32 %v11981_v9, %v11924_v26  ;;  %v4692_v54 = vand.u32 2147483648, %v11945_v24  ;;  %vm4672_vm12 = vweird.f32 %v11981_v9 }
 0xea1   :  { %v7890_v11 = vpop.eup %7889  ;;  %v4652_v4 = vmul.f32 %v11995_v47, %v11929_v55  ;;  %v12007_v43 = vadd.f32 %v4717_v32, %v4713_v30  ;;  %vm4657_vm10 = vweird.f32 %v11995_v47  ;;  %vm4686_vm13 = vweird.f32 %v11945_v24  ;;  %vm12039_vm3 = vmor %vm4671_vm11, %vm4672_vm12  ;;  %v7036_v30 = vld [vmem:[#allocation5 + $0x350] sm:$0xff]  }
 0xea2   :  { %v4718_v62 = vmul.f32 %v7890_v11, %v4553_v1  ;;  %v4668_v35 = vsub.f32 1.0, %v4667_v37  ;;  %v4690_v27 = vand.u32 2147483647, %v11945_v24  ;;  %v4693_v28 = vor.u32 1.1754944e-38, %v4692_v54  ;;  %vm12045_vm6 = vmor %vm4656_vm1, %vm4657_vm10 }
 0xea3   :  { %v4653_v22 = vsub.f32 1.0, %v4652_v4 }
 0xea4   :  { %v12009_v41 = vadd.f32 %v4718_v62, %v4714_v56  ;;  %v4669_v57 = vmul.f32 %v11981_v9, %v4668_v35  ;;  %vm4691_vm4 = vcmp.eq.f32.partialorder %v4690_v27, 8.507059e+37  ;;  %v6858_v35 = vunpack.c.l.bf16 %v7036_v30 }
 0xea5   :  { %v7892_v3 = vpop.eup %7891  ;;  %v4654_v46 = vmul.f32 %v11995_v47, %v4653_v22 }
 0xea6   :  { %v7894_v20 = vpop.eup %7893  ;;  %v4650_v38 = vadd.f32 1.0, %v7892_v3  ;;  %v4670_v34 = vadd.f32 %v11981_v9, %v4669_v57  ;;  %v4663_v3 = vor.u32 1.1754944e-38, %v4662_v31  ;;  %v6859_v57 = vunpack.c.h.bf16 %v7036_v30 }
 0xea7   :  { %v4682_v53 = vmul.f32 %v7894_v20, %v11945_v24  ;;  %vm4687_vm9 = vweird.f32 %v7894_v20  ;;  %v4655_v45 = vadd.f32 %v11995_v47, %v4654_v46 }
 0xea8   :  { %7895 = vrcp.f32 %v4650_v38  ;;  %vm12023_vm14 = vmor %vm4686_vm13, %vm4687_vm9  ;;  %v4707_v15 = vand.u32 2147483648, %v4650_v38  ;;  %v4705_v24 = vand.u32 2147483647, %v4650_v38  ;;  %vm4701_vm2 = vweird.f32 %v4650_v38 }
 0xea9   :  { %v4683_v50 = vsub.f32 1.0, %v4682_v53  ;;  %7897 = vtanh.f32 %v11892_v48  ;;  %v4674_v55 = vsel %vm12039_vm3, %v11981_v9, %v4670_v34  ;;  %v4659_v29 = vsel %vm12045_vm6, %v11995_v47, %v4655_v45  ;;  %v6849_v47 = vld [vmem:[#allocation5 + $0x340] sm:$0xff]  }
 0xeaa   :  { %7899 = vtanh.f32 %v12007_v43  ;;  %v4708_v21 = vor.u32 1.1754944e-38, %v4707_v15  ;;  %vm4706_vm7 = vcmp.eq.f32.partialorder %v4705_v24, 8.507059e+37  ;;  %v4679_v13 = vsel %vm4676_vm8, %v4678_v5, %v4674_v55 }
 0xeab   :  { %v4684_v7 = vmul.f32 %v7894_v20, %v4683_v50  ;;  %7901 = vtanh.f32 %v12009_v41  ;;  %vm4661_vm9 = vcmp.eq.f32.partialorder %v4660_v61, 8.507059e+37  ;;  %v6851_v56 = vunpack.c.h.bf16 %v6849_v47  ;;  %v7038_v61 = vld [vmem:[#allocation5 + $0x360] sm:$0xff]  }
 0xeac   :  { %7903 = vtanh.f32 %v11875_v18  ;;  %v4664_v9 = vsel %vm4661_vm9, %v4663_v3, %v4659_v29  ;;  %v6866_v19 = vunpack.c.l.bf16 %v7038_v61 }
 0xead   :  { %v4685_v6 = vadd.f32 %v7894_v20, %v4684_v7 }
 0xeae   :  { %v7896_v39 = vpop.eup %7895 }
 0xeaf   :  { %v4697_v42 = vmul.f32 %v7896_v39, %v4650_v38  ;;  %v7898_v44 = vpop.eup %7897  ;;  %v4689_v14 = vsel %vm12023_vm14, %v7894_v20, %v4685_v6  ;;  %vm4702_vm15 = vweird.f32 %v7896_v39 }
 0xeb0   :  { %v7900_v16 = vpop.eup %7899  ;;  %v4694_v26 = vsel %vm4691_vm4, %v4693_v28, %v4689_v14  ;;  %vm4703_vm5 = vmor %vm4701_vm2, %vm4702_vm15  ;;  %v4728_v32 = vmul.f32 %v7898_v44, %v4679_v13 }
 0xeb1   :  { %v4698_v58 = vsub.f32 1.0, %v4697_v42  ;;  %v7902_v63 = vpop.eup %7901  ;;  %v4729_v1 = vmul.f32 %v7900_v16, %v4694_v26 }
 0xeb2   :  { %v7904_v60 = vpop.eup %7903 }
 0xeb3   :  { %v4699_v8 = vmul.f32 %v7896_v39, %v4698_v58  ;;  %v4727_v4 = vmul.f32 %v7904_v60, %v4664_v9  ;;  %v7041_v60 = vld [vmem:[#allocation5 + $0x378] sm:$0xff]  }
 0xeb5   :  { %v4700_v12 = vadd.f32 %v7896_v39, %v4699_v8  ;;  %v4764_v38 = vpack.c.bf16 %v4728_v32, %v4727_v4  ;;  %v6867_v4 = vunpack.c.h.bf16 %v7038_v61 }
 0xeb7   :  { %v4704_v11 = vsel %vm4703_vm5, %v7896_v39, %v4700_v12 }
 0xeb8   :  { %v4709_v0 = vsel %vm4706_vm7, %v4708_v21, %v4704_v11 }
 0xeb9   :  { %v4730_v37 = vmul.f32 %v7902_v63, %v4709_v0 }
 0xebb   :  { %v4765_v20 = vpack.c.bf16 %v4730_v37, %v4729_v1 }
 0xebd   :  { %4772 = vmatpush.bf16.msrb.mxu1 %v4765_v20 }
 0xec1   :  { %4773 = vmatpush.bf16.msrb.mxu1 %v4764_v38 }
 0xec4   :  { %6352 = vmatmul.msk.bf16.vlgmr.msrb.gmra.mxu1 %vm165_vm0, %v11777_v51 }
 0xed4   :  { %6353 = vmatmul.msk.bf16.gmra.mxu1 %vm165_vm0, %v11784_v23 }
 0xee4   :  { %6354 = vmatmul.msk.bf16.gmra.mxu1 %vm165_vm0, %v11791_v25  ;;  %v6850_v25 = vunpack.c.l.bf16 %v6849_v47 }
 0xef4   :  { %6355 = vmatmul.msk.bf16.gmra.mxu1 %vm165_vm0, %v11798_v49 }
 0xf04   :  { %6356 = vmatmul.msk.bf16.gmra.mxu1 %vm165_vm0, %v11805_v17 }
 0xf14   :  { %6357 = vmatmul.msk.bf16.gmra.mxu1 %vm165_vm0, %v11812_v40 }
 0xf24   :  { %6358 = vmatmul.msk.bf16.gmra.mxu1 %vm165_vm0, %v11819_v59 }
 0xf34   :  { %6359 = vmatmul.msk.bf16.gmra.mxu1 %vm165_vm0, %v11826_v33 }
 0xf41   :  { %v4775_v51 = vpop.f32.mrf.mxu1 }
 0xf42   :  { %v4815_v53 = vadd.f32 %v6850_v25, %v4775_v51  ;;  %v7035_v25 = vld [vmem:[#allocation5 + $0x348] sm:$0xff]  }
 0xf44   :  { %v6360_v17 = vmul.f32 -1.442695, %v4815_v53 }
 0xf46   :  { %7905 = vpow2.f32 %v6360_v17 }
 0xf49   :  { %v4777_v23 = vpop.f32.mrf.mxu1 }
 0xf4a   :  { %v4816_v40 = vadd.f32 %v6851_v56, %v4777_v23 }
 0xf4c   :  { %v6361_v22 = vmul.f32 -1.442695, %v4816_v40  ;;  %v7906_v33 = vpop.eup %7905 }
 0xf4d   :  { %v4843_v39 = vadd.f32 1.0, %v7906_v33  ;;  %v6854_v33 = vunpack.c.l.bf16 %v7035_v25 }
 0xf4f   :  { %v4858_v1 = vand.u32 2147483648, %v4843_v39  ;;  %vm4852_vm14 = vweird.f32 %v4843_v39  ;;  %v4856_v9 = vand.u32 2147483647, %v4843_v39 }
 0xf51   :  { %v12073_v62 = vpop.f32.mrf.mxu1  ;;  %v4859_v23 = vor.u32 1.1754944e-38, %v4858_v1  ;;  %vm4857_vm2 = vcmp.eq.f32.partialorder %v4856_v9, 8.507059e+37 }
 0xf59   :  { %v12075_v49 = vpop.f32.mrf.mxu1 }
 0xf61   :  { %v4785_v50 = vpop.f32.mrf.mxu1 }
 0xf62   :  { %v4819_v59 = vadd.f32 %v6858_v35, %v4785_v50 }
 0xf64   :  { %v6364_v7 = vmul.f32 -1.442695, %v4819_v59 }
 0xf66   :  { %7907 = vpow2.f32 %v6364_v7 }
 0xf67   :  { %7909 = vpow2.f32 %v6361_v22 }
 0xf68   :  { %7911 = vrcp.f32 %v4843_v39 }
 0xf69   :  { %v4787_v46 = vpop.f32.mrf.mxu1 }
 0xf6a   :  { %v4820_v42 = vadd.f32 %v6859_v57, %v4787_v46 }
 0xf6c   :  { %v7908_v6 = vpop.eup %7907  ;;  %v6365_v54 = vmul.f32 -1.442695, %v4820_v42 }
 0xf6d   :  { %v4919_v58 = vadd.f32 1.0, %v7908_v6  ;;  %v7910_v27 = vpop.eup %7909 }
 0xf6e   :  { %7913 = vpow2.f32 %v6365_v54  ;;  %v12077_v34 = vadd.f32 1.0, %v7910_v27  ;;  %v7912_v15 = vpop.eup %7911  ;;  %v6855_v54 = vunpack.c.h.bf16 %v7035_v25 }
 0xf6f   :  { %7915 = vrcp.f32 %v4919_v58  ;;  %v4848_v8 = vmul.f32 %v7912_v15, %v4843_v39  ;;  %v4934_v29 = vand.u32 2147483648, %v4919_v58  ;;  %vm4928_vm11 = vweird.f32 %v4919_v58  ;;  %v7037_v39 = vld [vmem:[#allocation5 + $0x358] sm:$0xff]  }
 0xf70   :  { %7917 = vrcp.f32 %v12077_v34  ;;  %vm4853_vm12 = vweird.f32 %v7912_v15  ;;  %v4932_v13 = vand.u32 2147483647, %v4919_v58  ;;  %v4873_v46 = vand.u32 2147483648, %v12077_v34 }
 0xf71   :  { %v12079_v10 = vpop.f32.mrf.mxu1  ;;  %v4849_v28 = vsub.f32 1.0, %v4848_v8  ;;  %v4935_v32 = vor.u32 1.1754944e-38, %v4934_v29  ;;  %vm12096_vm15 = vmor %vm4852_vm14, %vm4853_vm12  ;;  %vm4867_vm7 = vweird.f32 %v12077_v34  ;;  %v6862_v27 = vunpack.c.l.bf16 %v7037_v39 }
 0xf72   :  { %vm4933_vm1 = vcmp.eq.f32.partialorder %v4932_v13, 8.507059e+37 }
 0xf73   :  { %v4850_v55 = vmul.f32 %v7912_v15, %v4849_v28  ;;  %v4821_v61 = vadd.f32 %v6862_v27, %v12079_v10 }
 0xf74   :  { %v7914_v45 = vpop.eup %7913 }
 0xf75   :  { %v7916_v36 = vpop.eup %7915  ;;  %v12082_v52 = vadd.f32 1.0, %v7914_v45  ;;  %v4851_v3 = vadd.f32 %v7912_v15, %v4850_v55  ;;  %v6863_v45 = vunpack.c.h.bf16 %v7037_v39  ;;  %v6366_v55 = vmul.f32 -1.442695, %v4821_v61 }
 0xf76   :  { %v4924_v44 = vmul.f32 %v7916_v36, %v4919_v58  ;;  %v12087_v16 = vpop.eup %7917  ;;  %vm4929_vm10 = vweird.f32 %v7916_v36 }
 0xf77   :  { %7919 = vrcp.f32 %v12082_v52  ;;  %v4863_v63 = vmul.f32 %v12087_v16, %v12077_v34  ;;  %vm4930_vm13 = vmor %vm4928_vm11, %vm4929_vm10  ;;  %v4855_v51 = vsel %vm12096_vm15, %v7912_v15, %v4851_v3  ;;  %vm4868_vm4 = vweird.f32 %v12087_v16 }
 0xf78   :  { %v4925_v14 = vsub.f32 1.0, %v4924_v44  ;;  %v4949_v56 = vand.u32 2147483648, %v12082_v52  ;;  %v4860_v35 = vsel %vm4857_vm2, %v4859_v23, %v4855_v51  ;;  %vm4943_vm6 = vweird.f32 %v12082_v52  ;;  %vm4869_vm8 = vmor %vm4867_vm7, %vm4868_vm4 }
 0xf79   :  { %v12085_v24 = vpop.f32.mrf.mxu1  ;;  %v4864_v11 = vsub.f32 1.0, %v4863_v63  ;;  %v4947_v7 = vand.u32 2147483647, %v12082_v52  ;;  %v4817_v44 = vadd.f32 %v6854_v33, %v12073_v62 }
 0xf7a   :  { %v4926_v2 = vmul.f32 %v7916_v36, %v4925_v14  ;;  %v4950_v58 = vor.u32 1.1754944e-38, %v4949_v56  ;;  %v4818_v14 = vadd.f32 %v6855_v54, %v12075_v49 }
 0xf7b   :  { %v4865_v38 = vmul.f32 %v12087_v16, %v4864_v11  ;;  %vm4948_vm9 = vcmp.eq.f32.partialorder %v4947_v7, 8.507059e+37  ;;  %v6362_v63 = vmul.f32 -1.442695, %v4817_v44 }
 0xf7c   :  { %v4927_v5 = vadd.f32 %v7916_v36, %v4926_v2 }
 0xf7d   :  { %v12089_v31 = vpop.eup %7919  ;;  %v4866_v50 = vadd.f32 %v12087_v16, %v4865_v38 }
 0xf7e   :  { %v4939_v12 = vmul.f32 %v12089_v31, %v12082_v52  ;;  %v4931_v20 = vsel %vm4930_vm13, %v7916_v36, %v4927_v5  ;;  %vm4944_vm3 = vweird.f32 %v12089_v31  ;;  %v4874_v36 = vor.u32 1.1754944e-38, %v4873_v46  ;;  %v7040_v5 = vld [vmem:[#allocation5 + $0x370] sm:$0xff]  }
 0xf7f   :  { %v4936_v47 = vsel %vm4933_vm1, %v4935_v32, %v4931_v20  ;;  %vm12113_vm5 = vmor %vm4943_vm6, %vm4944_vm3  ;;  %v4870_v15 = vsel %vm4869_vm8, %v12087_v16, %v4866_v50  ;;  %v4822_v16 = vadd.f32 %v6863_v45, %v12085_v24  ;;  %v6875_v1 = vunpack.c.h.bf16 %v7040_v5 }
 0xf80   :  { %v4940_v26 = vsub.f32 1.0, %v4939_v12  ;;  %v5063_v59 = vmul.f32 %v4936_v47, %v11875_v18  ;;  %v4871_v18 = vand.u32 2147483647, %v12077_v34  ;;  %v6878_v47 = vunpack.c.l.bf16 %v7041_v60 }
 0xf81   :  { %v4795_v21 = vpop.f32.mrf.mxu1  ;;  %v6367_v62 = vmul.f32 -1.442695, %v4822_v16 }
 0xf82   :  { %v4823_v0 = vadd.f32 %v6866_v19, %v4795_v21  ;;  %v4941_v37 = vmul.f32 %v12089_v31, %v4940_v26  ;;  %vm4872_vm10 = vcmp.eq.f32.partialorder %v4871_v18, 8.507059e+37  ;;  %v6363_v19 = vmul.f32 -1.442695, %v4818_v14 }
 0xf83   :  { %v4875_v28 = vsel %vm4872_vm10, %v4874_v36, %v4870_v15 }
 0xf84   :  { %7921 = vtanh.f32 %v4823_v0  ;;  %v4942_v30 = vadd.f32 %v12089_v31, %v4941_v37  ;;  %v6874_v0 = vunpack.c.l.bf16 %v7040_v5 }
 0xf86   :  { %v4946_v6 = vsel %vm12113_vm5, %v12089_v31, %v4942_v30  ;;  %v7039_v30 = vld [vmem:[#allocation5 + $0x368] sm:$0xff]  }
 0xf87   :  { %v4951_v52 = vsel %vm4948_vm9, %v4950_v58, %v4946_v6  ;;  %v6870_v50 = vunpack.c.l.bf16 %v7039_v30  ;;  %v6871_v18 = vunpack.c.h.bf16 %v7039_v30  ;;  %v6879_v58 = vunpack.c.h.bf16 %v7041_v60 }
 0xf88   :  { %v5064_v31 = vmul.f32 %v4951_v52, %v11892_v48 }
 0xf89   :  { %v4797_v53 = vpop.f32.mrf.mxu1 }
 0xf8a   :  { %v7922_v17 = vpop.eup %7921  ;;  %v4824_v40 = vadd.f32 %v6867_v4, %v4797_v53 }
 0xf8b   :  { %v5067_v22 = vmul.f32 %v7922_v17, %v4860_v35 }
 0xf8c   :  { %7923 = vtanh.f32 %v4824_v40 }
 0xf8d   :  { %v12118_v42 = vadd.f32 %v5067_v22, %v5063_v59  ;;  %7925 = vpow2.f32 %v6362_v63 }
 0xf8e   :  { %7927 = vpow2.f32 %v6363_v19 }
 0xf8f   :  { %7929 = vpow2.f32 %v6366_v55 }
 0xf90   :  { %7931 = vpow2.f32 %v6367_v62 }
 0xf91   :  { %v12129_v34 = vpop.f32.mrf.mxu1 }
 0xf92   :  { %v7924_v8 = vpop.eup %7923  ;;  %v4825_v54 = vadd.f32 %v6870_v50, %v12129_v34 }
 0xf93   :  { %v5068_v2 = vmul.f32 %v7924_v8, %v4875_v28  ;;  %v7926_v49 = vpop.eup %7925 }
 0xf94   :  { %v7928_v21 = vpop.eup %7927  ;;  %v12137_v29 = vadd.f32 1.0, %v7926_v49 }
 0xf95   :  { %v12135_v12 = vadd.f32 %v5068_v2, %v5064_v31  ;;  %v7930_v10 = vpop.eup %7929  ;;  %v12139_v24 = vadd.f32 1.0, %v7928_v21 }
 0xf96   :  { %v7932_v48 = vpop.eup %7931  ;;  %v12141_v3 = vadd.f32 1.0, %v7930_v10  ;;  %7933 = vrcp.f32 %v12137_v29  ;;  %vm4882_vm11 = vweird.f32 %v12137_v29  ;;  %v4886_v45 = vand.u32 2147483647, %v12137_v29 }
 0xf97   :  { %v12143_v13 = vadd.f32 1.0, %v7932_v48  ;;  %7935 = vrcp.f32 %v12139_v24  ;;  %v4888_v34 = vand.u32 2147483648, %v12137_v29  ;;  %vm4897_vm13 = vweird.f32 %v12139_v24 }
 0xf98   :  { %7937 = vrcp.f32 %v12141_v3  ;;  %v4901_v2 = vand.u32 2147483647, %v12139_v24  ;;  %v4903_v16 = vand.u32 2147483648, %v12139_v24  ;;  %v4964_v49 = vand.u32 2147483648, %v12141_v3 }
 0xf99   :  { %v4802_v26 = vpop.f32.mrf.mxu1  ;;  %7939 = vrcp.f32 %v12143_v13  ;;  %vm4958_vm2 = vweird.f32 %v12141_v3  ;;  %v4979_v10 = vand.u32 2147483648, %v12143_v13  ;;  %vm4973_vm5 = vweird.f32 %v12143_v13 }
 0xf9a   :  { %v4826_v8 = vadd.f32 %v6871_v18, %v4802_v26  ;;  %vm4887_vm8 = vcmp.eq.f32.partialorder %v4886_v45, 8.507059e+37  ;;  %vm4902_vm10 = vcmp.eq.f32.partialorder %v4901_v2, 8.507059e+37 }
 0xf9c   :  { %v12149_v4 = vpop.eup %7933 }
 0xf9d   :  { %v12151_v51 = vpop.eup %7935  ;;  %v4878_v53 = vmul.f32 %v12149_v4, %v12137_v29  ;;  %vm4883_vm12 = vweird.f32 %v12149_v4 }
 0xf9e   :  { %v12153_v23 = vpop.eup %7937  ;;  %v4893_v17 = vmul.f32 %v12151_v51, %v12139_v24  ;;  %vm4898_vm14 = vweird.f32 %v12151_v51  ;;  %vm12196_vm3 = vmor %vm4882_vm11, %vm4883_vm12  ;;  %v4977_v24 = vand.u32 2147483647, %v12143_v13 }
 0xf9f   :  { %v12155_v25 = vpop.eup %7939  ;;  %v4954_v56 = vmul.f32 %v12153_v23, %v12141_v3  ;;  %v4879_v22 = vsub.f32 1.0, %v4878_v53  ;;  %vm4959_vm15 = vweird.f32 %v12153_v23  ;;  %vm12208_vm4 = vmor %vm4897_vm13, %vm4898_vm14  ;;  %v4980_v53 = vor.u32 1.1754944e-38, %v4979_v10 }
 0xfa0   :  { %v4969_v40 = vmul.f32 %v12155_v25, %v12143_v13  ;;  %v4894_v33 = vsub.f32 1.0, %v4893_v17  ;;  %vm4974_vm1 = vweird.f32 %v12155_v25  ;;  %vm12215_vm6 = vmor %vm4958_vm2, %vm4959_vm15  ;;  %v4965_v13 = vor.u32 1.1754944e-38, %v4964_v49 }
 0xfa1   :  { %v4805_v11 = vpop.f32.mrf.mxu1  ;;  %v4955_v46 = vsub.f32 1.0, %v4954_v56  ;;  %v4880_v27 = vmul.f32 %v12149_v4, %v4879_v22  ;;  %vm12228_vm7 = vmor %vm4973_vm5, %vm4974_vm1  ;;  %vm4978_vm11 = vcmp.eq.f32.partialorder %v4977_v24, 8.507059e+37 }
 0xfa2   :  { %v4827_v37 = vadd.f32 %v6874_v0, %v4805_v11  ;;  %v4970_v6 = vsub.f32 1.0, %v4969_v40  ;;  %v4895_v36 = vmul.f32 %v12151_v51, %v4894_v33  ;;  %v4962_v11 = vand.u32 2147483647, %v12141_v3 }
 0xfa3   :  { %v4956_v44 = vmul.f32 %v12153_v23, %v4955_v46  ;;  %v4881_v31 = vadd.f32 %v12149_v4, %v4880_v27 }
 0xfa4   :  { %v6368_v32 = vmul.f32 -1.442695, %v4827_v37  ;;  %v4971_v28 = vmul.f32 %v12155_v25, %v4970_v6  ;;  %v4896_v19 = vadd.f32 %v12151_v51, %v4895_v36  ;;  %vm4963_vm9 = vcmp.eq.f32.partialorder %v4962_v11, 8.507059e+37 }
 0xfa5   :  { %v4957_v62 = vadd.f32 %v12153_v23, %v4956_v44  ;;  %v4885_v3 = vsel %vm12196_vm3, %v12149_v4, %v4881_v31  ;;  %v4904_v4 = vor.u32 1.1754944e-38, %v4903_v16 }
 0xfa6   :  { %v4972_v5 = vadd.f32 %v12155_v25, %v4971_v28 }
 0xfa9   :  { %v4807_v9 = vpop.f32.mrf.mxu1 }
 0xfaa   :  { %v4828_v20 = vadd.f32 %v6875_v1, %v4807_v9  ;;  %v4889_v9 = vor.u32 1.1754944e-38, %v4888_v34 }
 0xfac   :  { %v6369_v38 = vmul.f32 -1.442695, %v4828_v20  ;;  %v4961_v20 = vsel %vm12215_vm6, %v12153_v23, %v4957_v62  ;;  %v4890_v30 = vsel %vm4887_vm8, %v4889_v9, %v4885_v3 }
 0xfad   :  { %v4966_v23 = vsel %vm4963_vm9, %v4965_v13, %v4961_v20 }
 0xfae   :  { %7941 = vpow2.f32 %v6369_v38  ;;  %v4976_v38 = vsel %vm12228_vm7, %v12155_v25, %v4972_v5  ;;  %v5065_v33 = vmul.f32 %v4966_v23, %v12007_v43  ;;  %v12303_v23 = vld [vmem:[%s12916_s2] sm:$0xff] }
 0xfaf   :  { %7943 = vpow2.f32 %v6368_v32  ;;  %v4900_v32 = vsel %vm12208_vm4, %v12151_v51, %v4896_v19  ;;  %v4981_v50 = vsel %vm4978_vm11, %v4980_v53, %v4976_v38 }
 0xfb0   :  { %v4905_v56 = vsel %vm4902_vm10, %v4904_v4, %v4900_v32 }
 0xfb1   :  { %v4810_v35 = vpop.f32.mrf.mxu1 }
 0xfb2   :  { %v4829_v59 = vadd.f32 %v6878_v47, %v4810_v35 }
 0xfb4   :  { %v7942_v7 = vpop.eup %7941  ;;  %v6370_v57 = vmul.f32 -1.442695, %v4829_v59 }
 0xfb5   :  { %v7944_v39 = vpop.eup %7943  ;;  %v12167_v15 = vadd.f32 1.0, %v7942_v7 }
 0xfb6   :  { %7945 = vpow2.f32 %v6370_v57  ;;  %v12172_v52 = vadd.f32 1.0, %v7944_v39  ;;  %v5066_v57 = vmul.f32 %v4981_v50, %v12009_v41  ;;  %v12345_v50 = vld [vmem:[%s12916_s2 + $0x30] sm:$0xff] }
 0xfb7   :  { %7947 = vtanh.f32 %v4825_v54  ;;  %vm5023_vm14 = vweird.f32 %v12167_v15  ;;  %v5027_v2 = vand.u32 2147483647, %v12167_v15  ;;  %v5029_v16 = vand.u32 2147483648, %v12167_v15 }
 0xfb8   :  { %7949 = vrcp.f32 %v12167_v15  ;;  %vm5008_vm4 = vweird.f32 %v12172_v52  ;;  %v5012_v21 = vand.u32 2147483647, %v12172_v52  ;;  %v5014_v5 = vand.u32 2147483648, %v12172_v52 }
 0xfb9   :  { %v4812_v14 = vpop.f32.mrf.mxu1  ;;  %7951 = vrcp.f32 %v12172_v52  ;;  %v5030_v3 = vor.u32 1.1754944e-38, %v5029_v16  ;;  %vm5028_vm11 = vcmp.eq.f32.partialorder %v5027_v2, 8.507059e+37 }
 0xfba   :  { %v4830_v61 = vadd.f32 %v6879_v58, %v4812_v14  ;;  %7953 = vtanh.f32 %v4826_v8  ;;  %v5015_v20 = vor.u32 1.1754944e-38, %v5014_v5 }
 0xfbc   :  { %v7946_v63 = vpop.eup %7945  ;;  %v6371_v55 = vmul.f32 -1.442695, %v4830_v61 }
 0xfbd   :  { %v12188_v26 = vadd.f32 1.0, %v7946_v63  ;;  %v7948_v29 = vpop.eup %7947 }
 0xfbe   :  { %7955 = vpow2.f32 %v6371_v55  ;;  %v12224_v1 = vpop.eup %7949  ;;  %v5069_v40 = vmul.f32 %v7948_v29, %v4890_v30 }
 0xfbf   :  { %7957 = vrcp.f32 %v12188_v26  ;;  %v12238_v60 = vpop.eup %7951  ;;  %v5019_v51 = vmul.f32 %v12224_v1, %v12167_v15  ;;  %v5044_v44 = vand.u32 2147483648, %v12188_v26  ;;  %vm5024_vm15 = vweird.f32 %v12224_v1 }
 0xfc0   :  { %v7954_v47 = vpop.eup %7953  ;;  %v5004_v59 = vmul.f32 %v12238_v60, %v12172_v52  ;;  %v12250_v18 = vadd.f32 %v5069_v40, %v5065_v33  ;;  %vm5009_vm13 = vweird.f32 %v12238_v60  ;;  %vm5038_vm1 = vweird.f32 %v12188_v26  ;;  %vm12282_vm6 = vmor %vm5023_vm14, %vm5024_vm15  ;;  %v12338_v40 = vld [vmem:[%s12916_s2 + $0x28] sm:$0xff] }
 0xfc1   :  { %v5070_v25 = vmul.f32 %v7954_v47, %v4905_v56  ;;  %v5020_v39 = vsub.f32 1.0, %v5019_v51  ;;  %v5042_v8 = vand.u32 2147483647, %v12188_v26  ;;  %v5045_v49 = vor.u32 1.1754944e-38, %v5044_v44  ;;  %vm12288_vm8 = vmor %vm5008_vm4, %vm5009_vm13  ;;  %v12317_v56 = vld [vmem:[%s12916_s2 + $0x10] sm:$0xff]  ;;  %v12324_v51 = vld [vmem:[%s12916_s2 + $0x18] sm:$0xff] }
 0xfc2   :  { %v5005_v6 = vsub.f32 1.0, %v5004_v59  ;;  %v12352_v59 = vld [vmem:[%s12916_s2 + $0x38] sm:$0xff] }
 0xfc3   :  { %v12252_v54 = vadd.f32 %v5070_v25, %v5066_v57  ;;  %v5021_v27 = vmul.f32 %v12224_v1, %v5020_v39  ;;  %vm5043_vm7 = vcmp.eq.f32.partialorder %v5042_v8, 8.507059e+37 }
 0xfc4   :  { %v7956_v17 = vpop.eup %7955  ;;  %v5006_v43 = vmul.f32 %v12238_v60, %v5005_v6  ;;  %v7043_v6 = vld [vmem:[#allocation5 + $0x390] sm:$0xff]  }
 0xfc5   :  { %v7958_v35 = vpop.eup %7957  ;;  %v5002_v22 = vadd.f32 1.0, %v7956_v17  ;;  %v5022_v14 = vadd.f32 %v12224_v1, %v5021_v27 }
 0xfc6   :  { %v5034_v7 = vmul.f32 %v7958_v35, %v12188_v26  ;;  %vm5039_vm12 = vweird.f32 %v7958_v35  ;;  %v5007_v31 = vadd.f32 %v12238_v60, %v5006_v43 }
 0xfc7   :  { %7959 = vrcp.f32 %v5002_v22  ;;  %vm12266_vm3 = vmor %vm5038_vm1, %vm5039_vm12  ;;  %v5059_v61 = vand.u32 2147483648, %v5002_v22  ;;  %v5057_v62 = vand.u32 2147483647, %v5002_v22  ;;  %vm5053_vm5 = vweird.f32 %v5002_v22 }
 0xfc8   :  { %v5035_v46 = vsub.f32 1.0, %v5034_v7  ;;  %7961 = vtanh.f32 %v12135_v12  ;;  %v5026_v52 = vsel %vm12282_vm6, %v12224_v1, %v5022_v14  ;;  %v5011_v37 = vsel %vm12288_vm8, %v12238_v60, %v5007_v31  ;;  %v12310_v60 = vld [vmem:[%s12916_s2 + $0x8] sm:$0xff] }
 0xfc9   :  { %7963 = vtanh.f32 %v12250_v18  ;;  %v5060_v0 = vor.u32 1.1754944e-38, %v5059_v61  ;;  %vm5058_vm10 = vcmp.eq.f32.partialorder %v5057_v62, 8.507059e+37  ;;  %v5031_v32 = vsel %vm5028_vm11, %v5030_v3, %v5026_v52  ;;  %v6881_v7 = vld [vmem:[#allocation5 + $0x380] sm:$0xff]  }
 0xfca   :  { %v5036_v58 = vmul.f32 %v7958_v35, %v5035_v46  ;;  %7965 = vtanh.f32 %v12252_v54  ;;  %vm5013_vm12 = vcmp.eq.f32.partialorder %v5012_v21, 8.507059e+37  ;;  %v6882_v57 = vunpack.c.l.bf16 %v6881_v7 }
 0xfcb   :  { %7967 = vtanh.f32 %v12118_v42  ;;  %v5016_v1 = vsel %vm5013_vm12, %v5015_v20, %v5011_v37  ;;  %v6883_v27 = vunpack.c.h.bf16 %v6881_v7  ;;  %v6891_v14 = vunpack.c.h.bf16 %v7043_v6 }
 0xfcc   :  { %v5037_v36 = vadd.f32 %v7958_v35, %v5036_v58 }
 0xfcd   :  { %v7960_v45 = vpop.eup %7959 }
 0xfce   :  { %v5049_v41 = vmul.f32 %v7960_v45, %v5002_v22  ;;  %v7962_v63 = vpop.eup %7961  ;;  %v5041_v55 = vsel %vm12266_vm3, %v7958_v35, %v5037_v36  ;;  %vm5054_vm2 = vweird.f32 %v7960_v45  ;;  %v12331_v35 = vld [vmem:[%s12916_s2 + $0x20] sm:$0xff] }
 0xfcf   :  { %v7964_v26 = vpop.eup %7963  ;;  %v5046_v15 = vsel %vm5043_vm7, %v5045_v49, %v5041_v55  ;;  %vm5055_vm9 = vmor %vm5053_vm5, %vm5054_vm2  ;;  %v5080_v47 = vmul.f32 %v7962_v63, %v5031_v32 }
 0xfd0   :  { %v5050_v34 = vsub.f32 1.0, %v5049_v41  ;;  %v7966_v11 = vpop.eup %7965  ;;  %v5081_v13 = vmul.f32 %v7964_v26, %v5046_v15 }
 0xfd1   :  { %v7968_v53 = vpop.eup %7967 }
 0xfd2   :  { %v5051_v19 = vmul.f32 %v7960_v45, %v5050_v34  ;;  %v5079_v30 = vmul.f32 %v7968_v53, %v5016_v1 }
 0xfd4   :  { %v5052_v48 = vadd.f32 %v7960_v45, %v5051_v19  ;;  %v5116_v17 = vpack.c.bf16 %v5080_v47, %v5079_v30 }
 0xfd6   :  { %v5056_v24 = vsel %vm5055_vm9, %v7960_v45, %v5052_v48  ;;  %v6890_v45 = vunpack.c.l.bf16 %v7043_v6 }
 0xfd7   :  { %v5061_v9 = vsel %vm5058_vm10, %v5060_v0, %v5056_v24  ;;  %v7045_v0 = vld [vmem:[#allocation5 + $0x3a0] sm:$0xff]  }
 0xfd8   :  { %v5082_v4 = vmul.f32 %v7966_v11, %v5061_v9  ;;  %v6898_v20 = vunpack.c.l.bf16 %v7045_v0 }
 0xfda   :  { %v5117_v38 = vpack.c.bf16 %v5082_v4, %v5081_v13 }
 0xfdc   :  { %5124 = vmatpush.bf16.msrb.mxu2 %v5117_v38 }
 0xfe0   :  { %5125 = vmatpush.bf16.msrb.mxu2 %v5116_v17 }
 0xfe3   :  { %6372 = vmatmul.msk.bf16.vlgmr.msrb.gmra.mxu2 %vm165_vm0, %v12303_v23 }
 0xff3   :  { %6373 = vmatmul.msk.bf16.gmra.mxu2 %vm165_vm0, %v12310_v60 }
0x1003   :  { %6374 = vmatmul.msk.bf16.gmra.mxu2 %vm165_vm0, %v12317_v56 }
0x1013   :  { %6375 = vmatmul.msk.bf16.gmra.mxu2 %vm165_vm0, %v12324_v51 }
0x1023   :  { %6376 = vmatmul.msk.bf16.gmra.mxu2 %vm165_vm0, %v12331_v35 }
0x1033   :  { %6377 = vmatmul.msk.bf16.gmra.mxu2 %vm165_vm0, %v12338_v40 }
0x1043   :  { %6378 = vmatmul.msk.bf16.gmra.mxu2 %vm165_vm0, %v12345_v50 }
0x1053   :  { %6379 = vmatmul.msk.bf16.gmra.mxu2 %vm165_vm0, %v12352_v59 }
0x1066   :  { %v5127_v22 = vpop.f32.mrf.mxu2 }
0x1067   :  { %v5167_v39 = vadd.f32 %v6882_v57, %v5127_v22 }
0x1069   :  { %v6380_v58 = vmul.f32 -1.442695, %v5167_v39 }
0x106b   :  { %7969 = vpow2.f32 %v6380_v58  ;;  %v6899_v58 = vunpack.c.h.bf16 %v7045_v0 }
0x106e   :  { %v5129_v25 = vpop.f32.mrf.mxu2 }
0x106f   :  { %v5168_v43 = vadd.f32 %v6883_v27, %v5129_v25 }
0x1071   :  { %v6381_v44 = vmul.f32 -1.442695, %v5168_v43  ;;  %v7970_v8 = vpop.eup %7969 }
0x1072   :  { %v5195_v28 = vadd.f32 1.0, %v7970_v8 }
0x1074   :  { %v5210_v22 = vand.u32 2147483648, %v5195_v28  ;;  %vm5204_vm3 = vweird.f32 %v5195_v28  ;;  %v5208_v7 = vand.u32 2147483647, %v5195_v28 }
0x1076   :  { %v12356_v33 = vpop.f32.mrf.mxu2  ;;  %v5211_v43 = vor.u32 1.1754944e-38, %v5210_v22  ;;  %vm5209_vm5 = vcmp.eq.f32.partialorder %v5208_v7, 8.507059e+37  ;;  %v7047_v7 = vld [vmem:[#allocation5 + $0x3b0] sm:$0xff]  }
0x1077   :  { %v6906_v6 = vunpack.c.l.bf16 %v7047_v7 }
0x107e   :  { %v12358_v46 = vpop.f32.mrf.mxu2 }
0x1086   :  { %v5137_v41 = vpop.f32.mrf.mxu2 }
0x1087   :  { %v5171_v36 = vadd.f32 %v6890_v45, %v5137_v41 }
0x1089   :  { %v6384_v34 = vmul.f32 -1.442695, %v5171_v36  ;;  %v7042_v36 = vld [vmem:[#allocation5 + $0x388] sm:$0xff]  }
0x108b   :  { %7971 = vpow2.f32 %v6384_v34 }
0x108c   :  { %7973 = vpow2.f32 %v6381_v44 }
0x108d   :  { %7975 = vrcp.f32 %v5195_v28 }
0x108e   :  { %v5139_v61 = vpop.f32.mrf.mxu2 }
0x108f   :  { %v5172_v31 = vadd.f32 %v6891_v14, %v5139_v61 }
0x1091   :  { %v7972_v2 = vpop.eup %7971  ;;  %v6385_v16 = vmul.f32 -1.442695, %v5172_v31 }
0x1092   :  { %v5271_v63 = vadd.f32 1.0, %v7972_v2  ;;  %v7974_v19 = vpop.eup %7973 }
0x1093   :  { %7977 = vpow2.f32 %v6385_v16  ;;  %v12360_v55 = vadd.f32 1.0, %v7974_v19  ;;  %v7976_v26 = vpop.eup %7975  ;;  %v6886_v19 = vunpack.c.l.bf16 %v7042_v36 }
0x1094   :  { %7979 = vrcp.f32 %v5271_v63  ;;  %v5200_v11 = vmul.f32 %v7976_v26, %v5195_v28  ;;  %v5286_v47 = vand.u32 2147483648, %v5271_v63  ;;  %vm5280_vm14 = vweird.f32 %v5271_v63 }
0x1095   :  { %7981 = vrcp.f32 %v12360_v55  ;;  %vm5205_vm15 = vweird.f32 %v7976_v26  ;;  %v5284_v17 = vand.u32 2147483647, %v5271_v63  ;;  %vm5219_vm10 = vweird.f32 %v12360_v55 }
0x1096   :  { %v12362_v62 = vpop.f32.mrf.mxu2  ;;  %v5201_v15 = vsub.f32 1.0, %v5200_v11  ;;  %v5287_v39 = vor.u32 1.1754944e-38, %v5286_v47  ;;  %vm12379_vm2 = vmor %vm5204_vm3, %vm5205_vm15  ;;  %v6887_v11 = vunpack.c.h.bf16 %v7042_v36 }
0x1097   :  { %vm5285_vm4 = vcmp.eq.f32.partialorder %v5284_v17, 8.507059e+37 }
0x1098   :  { %v5202_v32 = vmul.f32 %v7976_v26, %v5201_v15 }
0x1099   :  { %v7978_v49 = vpop.eup %7977 }
0x109a   :  { %v7980_v21 = vpop.eup %7979  ;;  %v12365_v5 = vadd.f32 1.0, %v7978_v49  ;;  %v5203_v30 = vadd.f32 %v7976_v26, %v5202_v32  ;;  %v7044_v49 = vld [vmem:[#allocation5 + $0x398] sm:$0xff]  }
0x109b   :  { %v5276_v10 = vmul.f32 %v7980_v21, %v5271_v63  ;;  %v12370_v52 = vpop.eup %7981  ;;  %vm5281_vm13 = vweird.f32 %v7980_v21  ;;  %v6894_v15 = vunpack.c.l.bf16 %v7044_v49 }
0x109c   :  { %7983 = vrcp.f32 %v12365_v5  ;;  %v5215_v37 = vmul.f32 %v12370_v52, %v12360_v55  ;;  %vm5282_vm1 = vmor %vm5280_vm14, %vm5281_vm13  ;;  %v5207_v45 = vsel %vm12379_vm2, %v7976_v26, %v5203_v30  ;;  %vm5220_vm7 = vweird.f32 %v12370_v52 }
0x109d   :  { %v5277_v48 = vsub.f32 1.0, %v5276_v10  ;;  %v5301_v14 = vand.u32 2147483648, %v12365_v5  ;;  %v5212_v28 = vsel %vm5209_vm5, %v5211_v43, %v5207_v45  ;;  %vm5295_vm8 = vweird.f32 %v12365_v5  ;;  %vm5221_vm11 = vmor %vm5219_vm10, %vm5220_vm7 }
0x109e   :  { %v12368_v29 = vpop.f32.mrf.mxu2  ;;  %v5216_v38 = vsub.f32 1.0, %v5215_v37  ;;  %v5299_v63 = vand.u32 2147483647, %v12365_v5  ;;  %v6907_v45 = vunpack.c.h.bf16 %v7047_v7 }
0x109f   :  { %v5278_v24 = vmul.f32 %v7980_v21, %v5277_v48  ;;  %v5302_v48 = vor.u32 1.1754944e-38, %v5301_v14 }
0x10a0   :  { %v5217_v27 = vmul.f32 %v12370_v52, %v5216_v38  ;;  %vm5300_vm12 = vcmp.eq.f32.partialorder %v5299_v63, 8.507059e+37  ;;  %v7046_v63 = vld [vmem:[#allocation5 + $0x3a8] sm:$0xff]  }
0x10a1   :  { %v5279_v1 = vadd.f32 %v7980_v21, %v5278_v24  ;;  %v6895_v24 = vunpack.c.h.bf16 %v7044_v49 }
0x10a2   :  { %v12372_v3 = vpop.eup %7983  ;;  %v5218_v31 = vadd.f32 %v12370_v52, %v5217_v27 }
0x10a3   :  { %v5291_v9 = vmul.f32 %v12372_v3, %v12365_v5  ;;  %v5283_v57 = vsel %vm5282_vm1, %v7980_v21, %v5279_v1  ;;  %vm5296_vm6 = vweird.f32 %v12372_v3  ;;  %v5225_v21 = vand.u32 2147483648, %v12360_v55 }
0x10a4   :  { %v5288_v41 = vsel %vm5285_vm4, %v5287_v39, %v5283_v57  ;;  %vm12396_vm9 = vmor %vm5295_vm8, %vm5296_vm6  ;;  %v5222_v0 = vsel %vm5221_vm11, %v12370_v52, %v5218_v31  ;;  %v5174_v52 = vadd.f32 %v6895_v24, %v12368_v29 }
0x10a5   :  { %v5292_v13 = vsub.f32 1.0, %v5291_v9  ;;  %v5415_v2 = vmul.f32 %v5288_v41, %v12118_v42  ;;  %v5223_v42 = vand.u32 2147483647, %v12360_v55  ;;  %v5226_v37 = vor.u32 1.1754944e-38, %v5225_v21 }
0x10a6   :  { %v5147_v4 = vpop.f32.mrf.mxu2 }
0x10a7   :  { %v5175_v53 = vadd.f32 %v6898_v20, %v5147_v4  ;;  %v5293_v25 = vmul.f32 %v12372_v3, %v5292_v13  ;;  %v5169_v20 = vadd.f32 %v6886_v19, %v12356_v33  ;;  %vm5224_vm13 = vcmp.eq.f32.partialorder %v5223_v42, 8.507059e+37 }
0x10a8   :  { %v5227_v13 = vsel %vm5224_vm13, %v5226_v37, %v5222_v0  ;;  %v5173_v4 = vadd.f32 %v6894_v15, %v12362_v62  ;;  %v6387_v33 = vmul.f32 -1.442695, %v5174_v52  ;;  %v6902_v42 = vunpack.c.l.bf16 %v7046_v63 }
0x10a9   :  { %7985 = vtanh.f32 %v5175_v53  ;;  %v5294_v34 = vadd.f32 %v12372_v3, %v5293_v25  ;;  %v6382_v47 = vmul.f32 -1.442695, %v5169_v20 }
0x10aa   :  { %v6386_v17 = vmul.f32 -1.442695, %v5173_v4 }
0x10ab   :  { %v5298_v5 = vsel %vm12396_vm9, %v12372_v3, %v5294_v34  ;;  %v5170_v3 = vadd.f32 %v6887_v11, %v12358_v46  ;;  %v7048_v34 = vld [vmem:[#allocation5 + $0x3b8] sm:$0xff]  }
0x10ac   :  { %v5303_v9 = vsel %vm5300_vm12, %v5302_v48, %v5298_v5  ;;  %v6910_v31 = vunpack.c.l.bf16 %v7048_v34 }
0x10ad   :  { %v5416_v1 = vmul.f32 %v5303_v9, %v12135_v12  ;;  %v6383_v30 = vmul.f32 -1.442695, %v5170_v3  ;;  %v6903_v9 = vunpack.c.h.bf16 %v7046_v63  ;;  %v6911_v3 = vunpack.c.h.bf16 %v7048_v34 }
0x10ae   :  { %v5149_v44 = vpop.f32.mrf.mxu2 }
0x10af   :  { %v7986_v8 = vpop.eup %7985  ;;  %v5176_v61 = vadd.f32 %v6899_v58, %v5149_v44 }
0x10b0   :  { %v5419_v16 = vmul.f32 %v7986_v8, %v5212_v28 }
0x10b1   :  { %7987 = vtanh.f32 %v5176_v61 }
0x10b2   :  { %v12401_v10 = vadd.f32 %v5419_v16, %v5415_v2  ;;  %7989 = vpow2.f32 %v6382_v47 }
0x10b3   :  { %7991 = vpow2.f32 %v6383_v30 }
0x10b4   :  { %7993 = vpow2.f32 %v6386_v17 }
0x10b5   :  { %7995 = vpow2.f32 %v6387_v33 }
0x10b6   :  { %v12412_v55 = vpop.f32.mrf.mxu2 }
0x10b7   :  { %v7988_v32 = vpop.eup %7987 }
0x10b8   :  { %v5420_v38 = vmul.f32 %v7988_v32, %v5227_v13  ;;  %v7990_v46 = vpop.eup %7989  ;;  %v5177_v32 = vadd.f32 %v6902_v42, %v12412_v55 }
0x10b9   :  { %v7992_v25 = vpop.eup %7991  ;;  %v12420_v39 = vadd.f32 1.0, %v7990_v46 }
0x10ba   :  { %v12418_v53 = vadd.f32 %v5420_v38, %v5416_v1  ;;  %v7994_v62 = vpop.eup %7993  ;;  %v12422_v29 = vadd.f32 1.0, %v7992_v25 }
0x10bb   :  { %v7996_v12 = vpop.eup %7995  ;;  %v12424_v58 = vadd.f32 1.0, %v7994_v62  ;;  %7997 = vrcp.f32 %v12420_v39  ;;  %vm5234_vm14 = vweird.f32 %v12420_v39  ;;  %v5238_v1 = vand.u32 2147483647, %v12420_v39 }
0x10bc   :  { %v12426_v27 = vadd.f32 1.0, %v7996_v12  ;;  %7999 = vrcp.f32 %v12422_v29  ;;  %v5240_v55 = vand.u32 2147483648, %v12420_v39  ;;  %vm5249_vm1 = vweird.f32 %v12422_v29 }
0x10bd   :  { %8001 = vrcp.f32 %v12424_v58  ;;  %v5253_v7 = vand.u32 2147483647, %v12422_v29  ;;  %v5255_v62 = vand.u32 2147483648, %v12422_v29  ;;  %vm5310_vm5 = vweird.f32 %v12424_v58 }
0x10be   :  { %v5154_v22 = vpop.f32.mrf.mxu2  ;;  %8003 = vrcp.f32 %v12426_v27  ;;  %v5314_v34 = vand.u32 2147483647, %v12424_v58  ;;  %vm5325_vm9 = vweird.f32 %v12426_v27  ;;  %vm5239_vm11 = vcmp.eq.f32.partialorder %v5238_v1, 8.507059e+37 }
0x10bf   :  { %v5178_v30 = vadd.f32 %v6903_v9, %v5154_v22  ;;  %vm5254_vm13 = vcmp.eq.f32.partialorder %v5253_v7, 8.507059e+37 }
0x10c0   :  { %vm5315_vm12 = vcmp.eq.f32.partialorder %v5314_v34, 8.507059e+37 }
0x10c1   :  { %v12432_v8 = vpop.eup %7997 }
0x10c2   :  { %v12434_v28 = vpop.eup %7999  ;;  %v5230_v16 = vmul.f32 %v12432_v8, %v12420_v39  ;;  %vm5235_vm15 = vweird.f32 %v12432_v8 }
0x10c3   :  { %v12436_v61 = vpop.eup %8001  ;;  %v5245_v19 = vmul.f32 %v12434_v28, %v12422_v29  ;;  %vm5250_vm3 = vweird.f32 %v12434_v28  ;;  %vm12479_vm6 = vmor %vm5234_vm14, %vm5235_vm15  ;;  %v5329_v29 = vand.u32 2147483647, %v12426_v27 }
0x10c4   :  { %v12438_v2 = vpop.eup %8003  ;;  %v5306_v26 = vmul.f32 %v12436_v61, %v12424_v58  ;;  %v5231_v11 = vsub.f32 1.0, %v5230_v16  ;;  %vm5311_vm2 = vweird.f32 %v12436_v61  ;;  %vm12491_vm7 = vmor %vm5249_vm1, %vm5250_vm3 }
0x10c5   :  { %v5321_v21 = vmul.f32 %v12438_v2, %v12426_v27  ;;  %v5246_v15 = vsub.f32 1.0, %v5245_v19  ;;  %vm5326_vm4 = vweird.f32 %v12438_v2  ;;  %vm12498_vm8 = vmor %vm5310_vm5, %vm5311_vm2  ;;  %v5241_v19 = vor.u32 1.1754944e-38, %v5240_v55 }
0x10c6   :  { %v5157_v57 = vpop.f32.mrf.mxu2  ;;  %v5307_v37 = vsub.f32 1.0, %v5306_v26  ;;  %v5232_v13 = vmul.f32 %v12432_v8, %v5231_v11  ;;  %vm12511_vm10 = vmor %vm5325_vm9, %vm5326_vm4  ;;  %vm5330_vm14 = vcmp.eq.f32.partialorder %v5329_v29, 8.507059e+37 }
0x10c7   :  { %v5179_v43 = vadd.f32 %v6906_v6, %v5157_v57  ;;  %v5322_v20 = vsub.f32 1.0, %v5321_v21  ;;  %v5247_v38 = vmul.f32 %v12434_v28, %v5246_v15  ;;  %v5256_v21 = vor.u32 1.1754944e-38, %v5255_v62 }
0x10c8   :  { %v5308_v47 = vmul.f32 %v12436_v61, %v5307_v37  ;;  %v5233_v25 = vadd.f32 %v12432_v8, %v5232_v13 }
0x10c9   :  { %v6388_v44 = vmul.f32 -1.442695, %v5179_v43  ;;  %v5323_v33 = vmul.f32 %v12438_v2, %v5322_v20  ;;  %v5248_v12 = vadd.f32 %v12434_v28, %v5247_v38  ;;  %v5316_v43 = vand.u32 2147483648, %v12424_v58 }
0x10ca   :  { %v5309_v6 = vadd.f32 %v12436_v61, %v5308_v47  ;;  %v5237_v58 = vsel %vm12479_vm6, %v12432_v8, %v5233_v25 }
0x10cc   :  { %v5313_v26 = vsel %vm12498_vm8, %v12436_v61, %v5309_v6 }
0x10ce   :  { %v5159_v41 = vpop.f32.mrf.mxu2 }
0x10cf   :  { %v5180_v36 = vadd.f32 %v6907_v45, %v5159_v41 }
0x10d1   :  { %v6389_v14 = vmul.f32 -1.442695, %v5180_v36  ;;  %v5324_v36 = vadd.f32 %v12438_v2, %v5323_v33 }
0x10d3   :  { %8005 = vpow2.f32 %v6389_v14  ;;  %v5328_v42 = vsel %vm12511_vm10, %v12438_v2, %v5324_v36 }
0x10d4   :  { %8007 = vpow2.f32 %v6388_v44  ;;  %v5331_v44 = vand.u32 2147483648, %v12426_v27  ;;  %v5317_v27 = vor.u32 1.1754944e-38, %v5316_v43 }
0x10d6   :  { %v5162_v49 = vpop.f32.mrf.mxu2  ;;  %v5332_v11 = vor.u32 1.1754944e-38, %v5331_v44  ;;  %v5318_v61 = vsel %vm5315_vm12, %v5317_v27, %v5313_v26 }
0x10d7   :  { %v5181_v5 = vadd.f32 %v6910_v31, %v5162_v49  ;;  %v5252_v49 = vsel %vm12491_vm7, %v12434_v28, %v5248_v12  ;;  %v5417_v13 = vmul.f32 %v5318_v61, %v12250_v18 }
0x10d8   :  { %v5333_v9 = vsel %vm5330_vm14, %v5332_v11, %v5328_v42 }
0x10d9   :  { %v8006_v48 = vpop.eup %8005  ;;  %v6390_v0 = vmul.f32 -1.442695, %v5181_v5  ;;  %v5418_v1 = vmul.f32 %v5333_v9, %v12252_v54 }
0x10da   :  { %v8008_v24 = vpop.eup %8007  ;;  %v12450_v4 = vadd.f32 1.0, %v8006_v48  ;;  %v5242_v48 = vsel %vm5239_vm11, %v5241_v19, %v5237_v58 }
0x10db   :  { %8009 = vpow2.f32 %v6390_v0  ;;  %v12455_v52 = vadd.f32 1.0, %v8008_v24  ;;  %v5257_v0 = vsel %vm5254_vm13, %v5256_v21, %v5252_v49 }
0x10dc   :  { %8011 = vtanh.f32 %v5177_v32  ;;  %vm5375_vm3 = vweird.f32 %v12450_v4  ;;  %v5379_v36 = vand.u32 2147483647, %v12450_v4  ;;  %v5381_v44 = vand.u32 2147483648, %v12450_v4 }
0x10dd   :  { %8013 = vrcp.f32 %v12450_v4  ;;  %vm5360_vm7 = vweird.f32 %v12455_v52  ;;  %v5364_v29 = vand.u32 2147483647, %v12455_v52  ;;  %v5366_v63 = vand.u32 2147483648, %v12455_v52 }
0x10de   :  { %v5164_v17 = vpop.f32.mrf.mxu2  ;;  %8015 = vrcp.f32 %v12455_v52  ;;  %v5382_v42 = vor.u32 1.1754944e-38, %v5381_v44  ;;  %vm5380_vm14 = vcmp.eq.f32.partialorder %v5379_v36, 8.507059e+37 }
0x10df   :  { %v5182_v46 = vadd.f32 %v6911_v3, %v5164_v17  ;;  %8017 = vtanh.f32 %v5178_v30 }
0x10e1   :  { %v8010_v57 = vpop.eup %8009  ;;  %v6391_v22 = vmul.f32 -1.442695, %v5182_v46 }
0x10e2   :  { %v12471_v45 = vadd.f32 1.0, %v8010_v57  ;;  %v8012_v39 = vpop.eup %8011 }
0x10e3   :  { %8019 = vpow2.f32 %v6391_v22  ;;  %v12507_v16 = vpop.eup %8013  ;;  %v5421_v37 = vmul.f32 %v8012_v39, %v5242_v48 }
0x10e4   :  { %8021 = vrcp.f32 %v12471_v45  ;;  %v12521_v8 = vpop.eup %8015  ;;  %v5371_v28 = vmul.f32 %v12507_v16, %v12450_v4  ;;  %v5396_v62 = vand.u32 2147483648, %v12471_v45  ;;  %vm5376_vm2 = vweird.f32 %v12507_v16 }
0x10e5   :  { %v8018_v5 = vpop.eup %8017  ;;  %v5356_v20 = vmul.f32 %v12521_v8, %v12455_v52  ;;  %v12533_v55 = vadd.f32 %v5421_v37, %v5417_v13  ;;  %vm5361_vm1 = vweird.f32 %v12521_v8  ;;  %vm5390_vm4 = vweird.f32 %v12471_v45  ;;  %vm12565_vm8 = vmor %vm5375_vm3, %vm5376_vm2  ;;  %v7050_v13 = vld [vmem:[#allocation5 + $0x3d0] sm:$0xff]  }
0x10e6   :  { %v5422_v2 = vmul.f32 %v8018_v5, %v5257_v0  ;;  %v5372_v38 = vsub.f32 1.0, %v5371_v28  ;;  %v5394_v12 = vand.u32 2147483647, %v12471_v45  ;;  %v5397_v58 = vor.u32 1.1754944e-38, %v5396_v62  ;;  %vm12571_vm11 = vmor %vm5360_vm7, %vm5361_vm1 }
0x10e7   :  { %v5357_v30 = vsub.f32 1.0, %v5356_v20 }
0x10e8   :  { %v12535_v17 = vadd.f32 %v5422_v2, %v5418_v1  ;;  %v5373_v46 = vmul.f32 %v12507_v16, %v5372_v38  ;;  %vm5395_vm10 = vcmp.eq.f32.partialorder %v5394_v12, 8.507059e+37  ;;  %v6922_v38 = vunpack.c.l.bf16 %v7050_v13 }
0x10e9   :  { %v8020_v15 = vpop.eup %8019  ;;  %v5358_v18 = vmul.f32 %v12521_v8, %v5357_v30 }
0x10ea   :  { %v8022_v24 = vpop.eup %8021  ;;  %v5354_v32 = vadd.f32 1.0, %v8020_v15  ;;  %v5374_v22 = vadd.f32 %v12507_v16, %v5373_v46  ;;  %v5367_v15 = vor.u32 1.1754944e-38, %v5366_v63  ;;  %v6923_v46 = vunpack.c.h.bf16 %v7050_v13 }
0x10eb   :  { %v5386_v3 = vmul.f32 %v8022_v24, %v12471_v45  ;;  %vm5391_vm15 = vweird.f32 %v8022_v24  ;;  %v5359_v41 = vadd.f32 %v12521_v8, %v5358_v18 }
0x10ec   :  { %8023 = vrcp.f32 %v5354_v32  ;;  %vm12549_vm6 = vmor %vm5390_vm4, %vm5391_vm15  ;;  %v5411_v43 = vand.u32 2147483648, %v5354_v32  ;;  %v5409_v45 = vand.u32 2147483647, %v5354_v32  ;;  %vm5405_vm9 = vweird.f32 %v5354_v32 }
0x10ed   :  { %v5387_v47 = vsub.f32 1.0, %v5386_v3  ;;  %8025 = vtanh.f32 %v12418_v53  ;;  %v5378_v52 = vsel %vm12565_vm8, %v12507_v16, %v5374_v22  ;;  %v5363_v11 = vsel %vm12571_vm11, %v12521_v8, %v5359_v41  ;;  %v6913_v8 = vld [vmem:[#allocation5 + $0x3c0] sm:$0xff]  }
0x10ee   :  { %8027 = vtanh.f32 %v12533_v55  ;;  %v5412_v21 = vor.u32 1.1754944e-38, %v5411_v43  ;;  %vm5410_vm13 = vcmp.eq.f32.partialorder %v5409_v45, 8.507059e+37  ;;  %v5383_v61 = vsel %vm5380_vm14, %v5382_v42, %v5378_v52 }
0x10ef   :  { %v5388_v33 = vmul.f32 %v8022_v24, %v5387_v47  ;;  %8029 = vtanh.f32 %v12535_v17  ;;  %vm5365_vm15 = vcmp.eq.f32.partialorder %v5364_v29, 8.507059e+37  ;;  %v6915_v1 = vunpack.c.h.bf16 %v6913_v8  ;;  %v7052_v29 = vld [vmem:[#allocation5 + $0x3e0] sm:$0xff]  }
0x10f0   :  { %8031 = vtanh.f32 %v12401_v10  ;;  %v5368_v16 = vsel %vm5365_vm15, %v5367_v15, %v5363_v11  ;;  %v6930_v27 = vunpack.c.l.bf16 %v7052_v29 }
0x10f1   :  { %v5389_v7 = vadd.f32 %v8022_v24, %v5388_v33 }
0x10f2   :  { %v8024_v25 = vpop.eup %8023 }
0x10f3   :  { %v5401_v54 = vmul.f32 %v8024_v25, %v5354_v32  ;;  %v8026_v34 = vpop.eup %8025  ;;  %v5393_v39 = vsel %vm12549_vm6, %v8022_v24, %v5389_v7  ;;  %vm5406_vm5 = vweird.f32 %v8024_v25 }
0x10f4   :  { %v8028_v31 = vpop.eup %8027  ;;  %v5398_v4 = vsel %vm5395_vm10, %v5397_v58, %v5393_v39  ;;  %vm5407_vm12 = vmor %vm5405_vm9, %vm5406_vm5  ;;  %v5432_v37 = vmul.f32 %v8026_v34, %v5383_v61 }
0x10f5   :  { %v5402_v57 = vsub.f32 1.0, %v5401_v54  ;;  %v8030_v26 = vpop.eup %8029  ;;  %v5433_v0 = vmul.f32 %v8028_v31, %v5398_v4 }
0x10f6   :  { %v8032_v9 = vpop.eup %8031 }
0x10f7   :  { %v5403_v14 = vmul.f32 %v8024_v25, %v5402_v57  ;;  %v5431_v20 = vmul.f32 %v8032_v9, %v5368_v16  ;;  %v6931_v9 = vunpack.c.h.bf16 %v7052_v29 }
0x10f9   :  { %v5404_v49 = vadd.f32 %v8024_v25, %v5403_v14  ;;  %v5468_v32 = vpack.c.bf16 %v5432_v37, %v5431_v20 }
0x10fb   :  { %v5408_v5 = vsel %vm5407_vm12, %v8024_v25, %v5404_v49 }
0x10fc   :  { %v5413_v48 = vsel %vm5410_vm13, %v5412_v21, %v5408_v5 }
0x10fd   :  { %v5434_v28 = vmul.f32 %v8030_v26, %v5413_v48 }
0x10ff   :  { %v5469_v24 = vpack.c.bf16 %v5434_v28, %v5433_v0 }
0x1101   :  { %5476 = vmatpush.bf16.msrb.mxu3 %v5469_v24 }
0x1105   :  { %5477 = vmatpush.bf16.msrb.mxu3 %v5468_v32 }
0x1108   :  { %6392 = vmatmul.msk.bf16.vlgmr.msrb.gmra.mxu3 %vm165_vm0, %v12303_v23 }
0x1118   :  { %6393 = vmatmul.msk.bf16.gmra.mxu3 %vm165_vm0, %v12310_v60 }
0x1128   :  { %6394 = vmatmul.msk.bf16.gmra.mxu3 %vm165_vm0, %v12317_v56  ;;  %v6914_v56 = vunpack.c.l.bf16 %v6913_v8 }
0x1138   :  { %6395 = vmatmul.msk.bf16.gmra.mxu3 %vm165_vm0, %v12324_v51 }
0x1148   :  { %6396 = vmatmul.msk.bf16.gmra.mxu3 %vm165_vm0, %v12331_v35 }
0x1158   :  { %6397 = vmatmul.msk.bf16.gmra.mxu3 %vm165_vm0, %v12338_v40 }
0x1168   :  { %6398 = vmatmul.msk.bf16.gmra.mxu3 %vm165_vm0, %v12345_v50 }
0x1178   :  { %6399 = vmatmul.msk.bf16.gmra.mxu3 %vm165_vm0, %v12352_v59 }
0x118b   :  { %v5479_v23 = vpop.f32.mrf.mxu3 }
0x118c   :  { %v5519_v3 = vadd.f32 %v6914_v56, %v5479_v23 }
0x118e   :  { %v6400_v35 = vmul.f32 -1.442695, %v5519_v3 }
0x1190   :  { %8033 = vpow2.f32 %v6400_v35 }
0x1193   :  { %v5481_v60 = vpop.f32.mrf.mxu3 }
0x1194   :  { %v5520_v40 = vadd.f32 %v6915_v1, %v5481_v60 }
0x1196   :  { %v6401_v30 = vmul.f32 -1.442695, %v5520_v40  ;;  %v8034_v59 = vpop.eup %8033  ;;  %v7049_v40 = vld [vmem:[#allocation5 + $0x3c8] sm:$0xff]  }
0x1197   :  { %v5547_v25 = vadd.f32 1.0, %v8034_v59 }
0x1199   :  { %v5562_v0 = vand.u32 2147483648, %v5547_v25  ;;  %vm5556_vm6 = vweird.f32 %v5547_v25  ;;  %v5560_v16 = vand.u32 2147483647, %v5547_v25 }
0x119b   :  { %v12599_v2 = vpop.f32.mrf.mxu3  ;;  %v5563_v23 = vor.u32 1.1754944e-38, %v5562_v0  ;;  %vm5561_vm9 = vcmp.eq.f32.partialorder %v5560_v16, 8.507059e+37 }
0x11a3   :  { %v12601_v51 = vpop.f32.mrf.mxu3 }
0x11ab   :  { %v5489_v47 = vpop.f32.mrf.mxu3 }
0x11ac   :  { %v5523_v50 = vadd.f32 %v6922_v38, %v5489_v47 }
0x11ae   :  { %v6404_v33 = vmul.f32 -1.442695, %v5523_v50 }
0x11b0   :  { %8035 = vpow2.f32 %v6404_v33 }
0x11b1   :  { %8037 = vpow2.f32 %v6401_v30 }
0x11b2   :  { %8039 = vrcp.f32 %v5547_v25 }
0x11b3   :  { %v5491_v18 = vpop.f32.mrf.mxu3 }
0x11b4   :  { %v5524_v54 = vadd.f32 %v6923_v46, %v5491_v18  ;;  %v7051_v46 = vld [vmem:[#allocation5 + $0x3d8] sm:$0xff]  }
0x11b6   :  { %v8036_v7 = vpop.eup %8035  ;;  %v6405_v62 = vmul.f32 -1.442695, %v5524_v54  ;;  %v6918_v54 = vunpack.c.l.bf16 %v7049_v40 }
0x11b7   :  { %v5623_v57 = vadd.f32 1.0, %v8036_v7  ;;  %v8038_v12 = vpop.eup %8037 }
0x11b8   :  { %8041 = vpow2.f32 %v6405_v62  ;;  %v12603_v22 = vadd.f32 1.0, %v8038_v12  ;;  %v8040_v43 = vpop.eup %8039  ;;  %v6919_v62 = vunpack.c.h.bf16 %v7049_v40  ;;  %v6926_v12 = vunpack.c.l.bf16 %v7051_v46 }
0x11b9   :  { %8043 = vrcp.f32 %v5623_v57  ;;  %v5552_v14 = vmul.f32 %v8040_v43, %v5547_v25  ;;  %v5638_v11 = vand.u32 2147483648, %v5623_v57  ;;  %vm5632_vm3 = vweird.f32 %v5623_v57 }
0x11ba   :  { %8045 = vrcp.f32 %v12603_v22  ;;  %vm5557_vm2 = vweird.f32 %v8040_v43  ;;  %v5636_v61 = vand.u32 2147483647, %v5623_v57  ;;  %v5577_v59 = vand.u32 2147483648, %v12603_v22 }
0x11bb   :  { %v12605_v6 = vpop.f32.mrf.mxu3  ;;  %v5553_v58 = vsub.f32 1.0, %v5552_v14  ;;  %v5639_v37 = vor.u32 1.1754944e-38, %v5638_v11  ;;  %vm5558_vm5 = vmor %vm5556_vm6, %vm5557_vm2  ;;  %vm5571_vm13 = vweird.f32 %v12603_v22  ;;  %v5575_v18 = vand.u32 2147483647, %v12603_v22 }
0x11bc   :  { %vm5637_vm7 = vcmp.eq.f32.partialorder %v5636_v61, 8.507059e+37 }
0x11bd   :  { %v5554_v52 = vmul.f32 %v8040_v43, %v5553_v58 }
0x11be   :  { %v8042_v41 = vpop.eup %8041 }
0x11bf   :  { %v8044_v36 = vpop.eup %8043  ;;  %v12608_v44 = vadd.f32 1.0, %v8042_v41  ;;  %v5555_v15 = vadd.f32 %v8040_v43, %v5554_v52 }
0x11c0   :  { %v5628_v34 = vmul.f32 %v8044_v36, %v5623_v57  ;;  %v12613_v31 = vpop.eup %8045  ;;  %vm5633_vm1 = vweird.f32 %v8044_v36 }
0x11c1   :  { %8047 = vrcp.f32 %v12608_v44  ;;  %v5567_v26 = vmul.f32 %v12613_v31, %v12603_v22  ;;  %vm5634_vm4 = vmor %vm5632_vm3, %vm5633_vm1  ;;  %v5559_v32 = vsel %vm5558_vm5, %v8040_v43, %v5555_v15  ;;  %vm5572_vm10 = vweird.f32 %v12613_v31 }
0x11c2   :  { %v5629_v39 = vsub.f32 1.0, %v5628_v34  ;;  %v5653_v13 = vand.u32 2147483648, %v12608_v44  ;;  %v5564_v35 = vsel %vm5561_vm9, %v5563_v23, %v5559_v32  ;;  %vm5647_vm11 = vweird.f32 %v12608_v44  ;;  %vm5573_vm14 = vmor %vm5571_vm13, %vm5572_vm10 }
0x11c3   :  { %v12611_v45 = vpop.f32.mrf.mxu3  ;;  %v5568_v5 = vsub.f32 1.0, %v5567_v26  ;;  %v5651_v30 = vand.u32 2147483647, %v12608_v44  ;;  %v5578_v43 = vor.u32 1.1754944e-38, %v5577_v59  ;;  %vm5576_vm1 = vcmp.eq.f32.partialorder %v5575_v18, 8.507059e+37 }
0x11c4   :  { %v5630_v19 = vmul.f32 %v8044_v36, %v5629_v39  ;;  %v5654_v7 = vor.u32 1.1754944e-38, %v5653_v13  ;;  %v5521_v34 = vadd.f32 %v6918_v54, %v12599_v2  ;;  %v5522_v39 = vadd.f32 %v6919_v62, %v12601_v51  ;;  %v7054_v51 = vld [vmem:[#allocation5 + $0x3f0] sm:$0xff]  }
0x11c5   :  { %v5569_v20 = vmul.f32 %v12613_v31, %v5568_v5  ;;  %vm5652_vm15 = vcmp.eq.f32.partialorder %v5651_v30, 8.507059e+37  ;;  %v6939_v61 = vunpack.c.h.bf16 %v7054_v51 }
0x11c6   :  { %v5631_v42 = vadd.f32 %v8044_v36, %v5630_v19  ;;  %v6402_v26 = vmul.f32 -1.442695, %v5521_v34 }
0x11c7   :  { %v12615_v63 = vpop.eup %8047  ;;  %v5570_v38 = vadd.f32 %v12613_v31, %v5569_v20 }
0x11c8   :  { %v5643_v49 = vmul.f32 %v12615_v63, %v12608_v44  ;;  %v5635_v24 = vsel %vm5634_vm4, %v8044_v36, %v5631_v42  ;;  %vm5648_vm8 = vweird.f32 %v12615_v63  ;;  %v6927_v36 = vunpack.c.h.bf16 %v7051_v46 }
0x11c9   :  { %v5640_v60 = vsel %vm5637_vm7, %v5639_v37, %v5635_v24  ;;  %vm12633_vm12 = vmor %vm5647_vm11, %vm5648_vm8  ;;  %v5574_v57 = vsel %vm5573_vm14, %v12613_v31, %v5570_v38  ;;  %v7055_v37 = vld [vmem:[#allocation5 + $0x3f8] sm:$0xff]  }
0x11ca   :  { %v5644_v4 = vsub.f32 1.0, %v5643_v49  ;;  %v5767_v47 = vmul.f32 %v5640_v60, %v12401_v10  ;;  %v5579_v14 = vsel %vm5576_vm1, %v5578_v43, %v5574_v57  ;;  %v5526_v31 = vadd.f32 %v6927_v36, %v12611_v45 }
0x11cb   :  { %v5499_v21 = vpop.f32.mrf.mxu3  ;;  %v6403_v49 = vmul.f32 -1.442695, %v5522_v39  ;;  %v6938_v45 = vunpack.c.l.bf16 %v7054_v51  ;;  %v6942_v23 = vunpack.c.l.bf16 %v7055_v37 }
0x11cc   :  { %v5527_v48 = vadd.f32 %v6930_v27, %v5499_v21  ;;  %v5645_v28 = vmul.f32 %v12615_v63, %v5644_v4  ;;  %v6407_v52 = vmul.f32 -1.442695, %v5526_v31 }
0x11ce   :  { %8049 = vtanh.f32 %v5527_v48  ;;  %v5646_v56 = vadd.f32 %v12615_v63, %v5645_v28 }
0x11d0   :  { %v5650_v10 = vsel %vm12633_vm12, %v12615_v63, %v5646_v56  ;;  %v5525_v63 = vadd.f32 %v6926_v12, %v12605_v6 }
0x11d1   :  { %v5655_v41 = vsel %vm5652_vm15, %v5654_v7, %v5650_v10  ;;  %v6943_v7 = vunpack.c.h.bf16 %v7055_v37 }
0x11d2   :  { %v5768_v58 = vmul.f32 %v5655_v41, %v12418_v53  ;;  %v6406_v27 = vmul.f32 -1.442695, %v5525_v63 }
0x11d3   :  { %v5501_v8 = vpop.f32.mrf.mxu3 }
0x11d4   :  { %v8050_v3 = vpop.eup %8049  ;;  %v5528_v1 = vadd.f32 %v6931_v9, %v5501_v8  ;;  %v7053_v8 = vld [vmem:[#allocation5 + $0x3e8] sm:$0xff]  }
0x11d5   :  { %v5771_v50 = vmul.f32 %v8050_v3, %v5564_v35  ;;  %v6934_v38 = vunpack.c.l.bf16 %v7053_v8 }
0x11d6   :  { %8051 = vtanh.f32 %v5528_v1 }
0x11d7   :  { %v12638_v25 = vadd.f32 %v5771_v50, %v5767_v47  ;;  %8053 = vpow2.f32 %v6402_v26  ;;  %v6935_v50 = vunpack.c.h.bf16 %v7053_v8 }
0x11d8   :  { %8055 = vpow2.f32 %v6403_v49 }
0x11d9   :  { %8057 = vpow2.f32 %v6406_v27 }
0x11da   :  { %8059 = vpow2.f32 %v6407_v52 }
0x11db   :  { %v12648_v44 = vpop.f32.mrf.mxu3 }
0x11dc   :  { %v8052_v22 = vpop.eup %8051  ;;  %v5529_v54 = vadd.f32 %v6934_v38, %v12648_v44 }
0x11dd   :  { %v5772_v29 = vmul.f32 %v8052_v22, %v5579_v14  ;;  %v8054_v2 = vpop.eup %8053 }
0x11de   :  { %v8056_v21 = vpop.eup %8055  ;;  %v12657_v6 = vadd.f32 1.0, %v8054_v2  ;;  %v5805_v2 = vld [vmem:[%s12918_s4 + $0x18] sm:$0xff] }
0x11df   :  { %v12655_v19 = vadd.f32 %v5772_v29, %v5768_v58  ;;  %v8058_v42 = vpop.eup %8057  ;;  %v12659_v11 = vadd.f32 1.0, %v8056_v21 }
0x11e0   :  { %v8060_v5 = vpop.eup %8059  ;;  %v12661_v48 = vadd.f32 1.0, %v8058_v42  ;;  %8061 = vrcp.f32 %v12657_v6  ;;  %vm5586_vm3 = vweird.f32 %v12657_v6  ;;  %v5590_v41 = vand.u32 2147483647, %v12657_v6 }
0x11e1   :  { %v12663_v15 = vadd.f32 1.0, %v8060_v5  ;;  %8063 = vrcp.f32 %v12659_v11  ;;  %v5592_v36 = vand.u32 2147483648, %v12657_v6  ;;  %vm5601_vm4 = vweird.f32 %v12659_v11 }
0x11e2   :  { %8065 = vrcp.f32 %v12661_v48  ;;  %v5607_v31 = vand.u32 2147483648, %v12659_v11  ;;  %v5668_v51 = vand.u32 2147483648, %v12661_v48  ;;  %vm5662_vm9 = vweird.f32 %v12661_v48 }
0x11e3   :  { %v5506_v4 = vpop.f32.mrf.mxu3  ;;  %8067 = vrcp.f32 %v12663_v15  ;;  %v5683_v5 = vand.u32 2147483648, %v12663_v15  ;;  %vm5677_vm12 = vweird.f32 %v12663_v15  ;;  %vm5591_vm14 = vcmp.eq.f32.partialorder %v5590_v41, 8.507059e+37 }
0x11e4   :  { %v5530_v57 = vadd.f32 %v6935_v50, %v5506_v4  ;;  %v8209_v4 = vmov 0   ;;  %v5669_v8 = vor.u32 1.1754944e-38, %v5668_v51 }
0x11e5   :  { %7071 = vset.pattern.permute.xlu1 %v8209_v4  ;;  %7070 = vset.pattern.permute.xlu0 %v8209_v4 }
0x11e6   :  { %v12669_v20 = vpop.eup %8061  ;;  %5823 = vperm.xlu0 %7070, %v5805_v2   ;;  %7072 = vset.pattern.permute.xlu2 %v8209_v4  ;;  %v5871_v2 = vld [vmem:[%s12919_s5] sm:$0xff] }
0x11e7   :  { %v12671_v32 = vpop.eup %8063  ;;  %v5582_v3 = vmul.f32 %v12669_v20, %v12657_v6  ;;  %vm5587_vm2 = vweird.f32 %v12669_v20 }
0x11e8   :  { %v12673_v60 = vpop.eup %8065  ;;  %v5597_v13 = vmul.f32 %v12671_v32, %v12659_v11  ;;  %vm5602_vm6 = vweird.f32 %v12671_v32  ;;  %vm12718_vm8 = vmor %vm5586_vm3, %vm5587_vm2 }
0x11e9   :  { %v12675_v56 = vpop.eup %8067  ;;  %v5658_v1 = vmul.f32 %v12673_v60, %v12661_v48  ;;  %v5583_v30 = vsub.f32 1.0, %v5582_v3  ;;  %vm5663_vm5 = vweird.f32 %v12673_v60  ;;  %vm12731_vm10 = vmor %vm5601_vm4, %vm5602_vm6  ;;  %v5608_v3 = vor.u32 1.1754944e-38, %v5607_v31 }
0x11ea   :  { %v5673_v47 = vmul.f32 %v12675_v56, %v12663_v15  ;;  %v5598_v46 = vsub.f32 1.0, %v5597_v13  ;;  %vm5678_vm7 = vweird.f32 %v12675_v56  ;;  %vm12738_vm11 = vmor %vm5662_vm9, %vm5663_vm5 }
0x11eb   :  { %v5509_v53 = vpop.f32.mrf.mxu3  ;;  %v5659_v10 = vsub.f32 1.0, %v5658_v1  ;;  %v5584_v12 = vmul.f32 %v12669_v20, %v5583_v30  ;;  %vm12754_vm13 = vmor %vm5677_vm12, %vm5678_vm7  ;;  %v5684_v1 = vor.u32 1.1754944e-38, %v5683_v5 }
0x11ec   :  { %v5531_v0 = vadd.f32 %v6938_v45, %v5509_v53  ;;  %v5674_v62 = vsub.f32 1.0, %v5673_v47  ;;  %v5599_v44 = vmul.f32 %v12671_v32, %v5598_v46  ;;  %v5666_v45 = vand.u32 2147483647, %v12661_v48 }
0x11ed   :  { %v5660_v14 = vmul.f32 %v12673_v60, %v5659_v10  ;;  %v5585_v63 = vadd.f32 %v12669_v20, %v5584_v12 }
0x11ee   :  { %v6408_v24 = vmul.f32 -1.442695, %v5531_v0  ;;  %v5675_v58 = vmul.f32 %v12675_v56, %v5674_v62  ;;  %v5600_v52 = vadd.f32 %v12671_v32, %v5599_v44  ;;  %vm5667_vm15 = vcmp.eq.f32.partialorder %v5666_v45, 8.507059e+37  ;;  %v5802_v62 = vld [vmem:[%s12918_s4] sm:$0xff] }
0x11ef   :  { %v5661_v27 = vadd.f32 %v12673_v60, %v5660_v14  ;;  %v5589_v48 = vsel %vm12718_vm8, %v12669_v20, %v5585_v63 }
0x11f0   :  { %8069 = vpow2.f32 %v6408_v24  ;;  %v5676_v53 = vadd.f32 %v12675_v56, %v5675_v58  ;;  %v5803_v24 = vld [vmem:[%s12918_s4 + $0x8] sm:$0xff] }
0x11f1   :  { %5813 = vperm.xlu1 %7071, %v5803_v24   ;;  %v5998_v24 = vld [vmem:[%s12922_s8 + $0x8] sm:$0xff] }
0x11f2   :  { %v5680_v13 = vsel %vm12754_vm13, %v12675_v56, %v5676_v53  ;;  %v5804_v56 = vld [vmem:[%s12918_s4 + $0x10] sm:$0xff] }
0x11f3   :  { %v5511_v28 = vpop.f32.mrf.mxu3  ;;  %5818 = vperm.xlu0 %7070, %v5804_v56   ;;  %v5876_v56 = vld [vmem:[%s12915_s1 + $0x8] sm:$0xff] }
0x11f4   :  { %v5532_v16 = vadd.f32 %v6939_v61, %v5511_v28  ;;  %v5605_v61 = vand.u32 2147483647, %v12659_v11 }
0x11f6   :  { %v6409_v9 = vmul.f32 -1.442695, %v5532_v16  ;;  %v8070_v59 = vpop.eup %8069  ;;  %v5681_v16 = vand.u32 2147483647, %v12663_v15  ;;  %v5604_v15 = vsel %vm12731_vm10, %v12671_v32, %v5600_v52  ;;  %vm5606_vm1 = vcmp.eq.f32.partialorder %v5605_v61, 8.507059e+37 }
0x11f7   :  { %v12687_v43 = vadd.f32 1.0, %v8070_v59  ;;  %v5609_v47 = vsel %vm5606_vm1, %v5608_v3, %v5604_v15 }
0x11f8   :  { %8071 = vpow2.f32 %v6409_v9  ;;  %v5593_v9 = vor.u32 1.1754944e-38, %v5592_v36  ;;  %vm5682_vm3 = vcmp.eq.f32.partialorder %v5681_v16, 8.507059e+37 }
0x11f9   :  { %v5685_v30 = vsel %vm5682_vm3, %v5684_v1, %v5680_v13  ;;  %5808 = vperm.xlu1 %7071, %v5802_v62   ;;  %vm5712_vm2 = vweird.f32 %v12687_v43  ;;  %v5718_v28 = vand.u32 2147483648, %v12687_v43  ;;  %v5968_v13 = vld [vmem:[%s12921_s7 + $0x18] sm:$0xff] }
0x11fa   :  { %v5594_v38 = vsel %vm5591_vm14, %v5593_v9, %v5589_v48 }
0x11fb   :  { %v5514_v35 = vpop.f32.mrf.mxu3  ;;  %v5719_v3 = vor.u32 1.1754944e-38, %v5718_v28 }
0x11fc   :  { %v5533_v40 = vadd.f32 %v6942_v23, %v5514_v35  ;;  %v5665_v23 = vsel %vm12738_vm11, %v12673_v60, %v5661_v27 }
0x11fe   :  { %v6410_v33 = vmul.f32 -1.442695, %v5533_v40  ;;  %v8072_v18 = vpop.eup %8071  ;;  %v5670_v40 = vsel %vm5667_vm15, %v5669_v8, %v5665_v23 }
0x11ff   :  { %v12692_v22 = vadd.f32 1.0, %v8072_v18  ;;  %v5769_v10 = vmul.f32 %v5670_v40, %v12533_v55  ;;  %v5999_v40 = vld [vmem:[%s12922_s8 + $0x10] sm:$0xff] }
0x1200   :  { %8073 = vpow2.f32 %v6410_v33 }
0x1201   :  { %8075 = vtanh.f32 %v5529_v54  ;;  %vm5727_vm9 = vweird.f32 %v12692_v22  ;;  %v5731_v51 = vand.u32 2147483647, %v12692_v22  ;;  %v5733_v21 = vand.u32 2147483648, %v12692_v22  ;;  %5986 = vperm.xlu1 %7071, %v5968_v13  }
0x1202   :  { %8077 = vtanh.f32 %v5530_v57 }
0x1203   :  { %v5516_v34 = vpop.f32.mrf.mxu3  ;;  %8079 = vrcp.f32 %v12687_v43  ;;  %v5734_v23 = vor.u32 1.1754944e-38, %v5733_v21  ;;  %vm5732_vm3 = vcmp.eq.f32.partialorder %v5731_v51, 8.507059e+37  ;;  %v6000_v51 = vld [vmem:[%s12922_s8 + $0x18] sm:$0xff] }
0x1204   :  { %v5534_v39 = vadd.f32 %v6943_v7, %v5516_v34  ;;  %8081 = vrcp.f32 %v12692_v22  ;;  %v5770_v7 = vmul.f32 %v5685_v30, %v12535_v17  ;;  %v5967_v17 = vld [vmem:[%s12921_s7 + $0x10] sm:$0xff]  ;;  %v5878_v30 = vld [vmem:[%s12915_s1 + $0x18] sm:$0xff] }
0x1205   :  { %5981 = vperm.xlu0 %7070, %v5967_v17   ;;  %7060 = vmatpush.msra.mxu2 %v5878_v30  ;;  %v5882_v21 = vld [vmem:[%s12920_s6 + $0x18] sm:$0xff] }
0x1206   :  { %v8074_v29 = vpop.eup %8073  ;;  %v6411_v26 = vmul.f32 -1.442695, %v5534_v39 }
0x1207   :  { %v12704_v49 = vadd.f32 1.0, %v8074_v29  ;;  %v8076_v42 = vpop.eup %8075 }
0x1208   :  { %8083 = vpow2.f32 %v6411_v26  ;;  %v8078_v0 = vpop.eup %8077  ;;  %v5773_v50 = vmul.f32 %v8076_v42, %v5594_v38 }
0x1209   :  { %8085 = vrcp.f32 %v12704_v49  ;;  %v12750_v11 = vpop.eup %8079  ;;  %v5774_v46 = vmul.f32 %v8078_v0, %v5609_v47  ;;  %vm5742_vm5 = vweird.f32 %v12704_v49  ;;  %v5746_v63 = vand.u32 2147483647, %v12704_v49  ;;  %6013 = vperm.xlu1 %7071, %v5999_v40   ;;  %v5799_v47 = vld [vmem:[%s12917_s3 + $0x8] sm:$0xff] }
0x120a   :  { %v12764_v20 = vpop.eup %8081  ;;  %v5708_v18 = vmul.f32 %v12750_v11, %v12687_v43  ;;  %v5777_v57 = vadd.f32 %v5773_v50, %v5769_v10  ;;  %v5748_v31 = vand.u32 2147483648, %v12704_v49  ;;  %vm5713_vm10 = vweird.f32 %v12750_v11  ;;  %v5801_v50 = vld [vmem:[%s12917_s3 + $0x18] sm:$0xff] }
0x120b   :  { %v5723_v33 = vmul.f32 %v12764_v20, %v12692_v22  ;;  %v5778_v41 = vadd.f32 %v5774_v46, %v5770_v7  ;;  %vm5728_vm6 = vweird.f32 %v12764_v20  ;;  %v5716_v0 = vand.u32 2147483647, %v12687_v43  ;;  %vm5714_vm1 = vmor %vm5712_vm2, %vm5713_vm10  ;;  %v6034_v43 = vld [vmem:[#allocation4] sm:$0x1] }
0x120c   :  { %v5709_v36 = vsub.f32 1.0, %v5708_v18  ;;  %vm12813_vm12 = vmor %vm5727_vm9, %vm5728_vm6  ;;  %v5749_v61 = vor.u32 1.1754944e-38, %v5748_v31  ;;  %vm5747_vm15 = vcmp.eq.f32.partialorder %v5746_v63, 8.507059e+37  ;;  %v5875_v46 = vld [vmem:[%s12915_s1] sm:$0xff]  ;;  %v5872_v18 = vld [vmem:[%s12919_s5 + $0x8] sm:$0xff] }
0x120d   :  { %v5724_v12 = vsub.f32 1.0, %v5723_v33  ;;  %6008 = vperm.xlu0 %7070, %v5998_v24   ;;  %v5877_v33 = vld [vmem:[%s12915_s1 + $0x10] sm:$0xff] }
0x120e   :  { %v8084_v35 = vpop.eup %8083  ;;  %v5710_v39 = vmul.f32 %v12750_v11, %v5709_v36  ;;  %7061 = vmatpush.msra.mxu2 %v5877_v33 }
0x120f   :  { %v12769_v60 = vpop.eup %8085  ;;  %v5706_v32 = vadd.f32 1.0, %v8084_v35  ;;  %v5725_v55 = vmul.f32 %v12764_v20, %v5724_v12  ;;  %v5965_v12 = vld [vmem:[%s12921_s7] sm:$0xff] }
0x1210   :  { %v5738_v59 = vmul.f32 %v12769_v60, %v12704_v49  ;;  %vm5743_vm4 = vweird.f32 %v12769_v60  ;;  %v5711_v45 = vadd.f32 %v12750_v11, %v5710_v39  ;;  %7062 = vmatpush.msra.mxu2 %v5876_v56  ;;  %5971 = vperm.xlu2 %7072, %v5965_v12  }
0x1211   :  { %8087 = vrcp.f32 %v5706_v32  ;;  %v5761_v27 = vand.u32 2147483647, %v5706_v32  ;;  %v5726_v52 = vadd.f32 %v12764_v20, %v5725_v55  ;;  %vm12800_vm8 = vmor %vm5742_vm5, %vm5743_vm4  ;;  %vm5757_vm11 = vweird.f32 %v5706_v32  ;;  %v5966_v55 = vld [vmem:[%s12921_s7 + $0x8] sm:$0xff] }
0x1212   :  { %v5739_v54 = vsub.f32 1.0, %v5738_v59  ;;  %8089 = vtanh.f32 %v12655_v19  ;;  %v5763_v19 = vand.u32 2147483648, %v5706_v32  ;;  %v5715_v8 = vsel %vm5714_vm1, %v12750_v11, %v5711_v45  ;;  %v5798_v11 = vld [vmem:[%s12917_s3] sm:$0xff]  ;;  %7063 = vmatpush.msra.mxu2 %v5875_v46 }
0x1213   :  { %8091 = vtanh.f32 %v5777_v57  ;;  %vm5762_vm14 = vcmp.eq.f32.partialorder %v5761_v27, 8.507059e+37  ;;  %v5730_v16 = vsel %vm12813_vm12, %v12764_v20, %v5726_v52  ;;  %vm5717_vm4 = vcmp.eq.f32.partialorder %v5716_v0, 8.507059e+37  ;;  %6421 = vmatmul.msk.f32.vlgmr.msra.gmra.mxu2 %vm165_vm0, %v5872_v18  ;;  %v5880_v27 = vld [vmem:[%s12920_s6 + $0x8] sm:$0xff]  ;;  %v5997_v52 = vld [vmem:[%s12922_s8] sm:$0xff] }
0x1214   :  { %v5740_v34 = vmul.f32 %v12769_v60, %v5739_v54  ;;  %8093 = vtanh.f32 %v5778_v41  ;;  %v5764_v22 = vor.u32 1.1754944e-38, %v5763_v19  ;;  %v5735_v20 = vsel %vm5732_vm3, %v5734_v23, %v5730_v16  ;;  %v5873_v54 = vld [vmem:[%s12919_s5 + $0x10] sm:$0xff]  ;;  %v5874_v41 = vld [vmem:[%s12919_s5 + $0x18] sm:$0xff]  ;;  %s8210_s5 = smov [#allocation8]  }
0x1215   :  { %8095 = vtanh.f32 %v12638_v25  ;;  %v5720_v35 = vsel %vm5717_vm4, %v5719_v3, %v5715_v8  ;;  %6037 = vperm.xlu0 %7070, %v6034_v43  }
0x1216   :  { %v5741_v29 = vadd.f32 %v12769_v60, %v5740_v34 }
0x1217   :  { %v8088_v14 = vpop.eup %8087 }
0x1218   :  { %v5753_v44 = vmul.f32 %v8088_v14, %v5706_v32  ;;  %vm5758_vm7 = vweird.f32 %v8088_v14  ;;  %v8090_v4 = vpop.eup %8089  ;;  %v5745_v42 = vsel %vm12800_vm8, %v12769_v60, %v5741_v29  ;;  %v5800_v32 = vld [vmem:[%s12917_s3 + $0x10] sm:$0xff]  ;;  %5976 = vperm.xlu2 %7072, %v5966_v55  }
0x1219   :  { %v8092_v53 = vpop.eup %8091  ;;  %vm5759_vm13 = vmor %vm5757_vm11, %vm5758_vm7  ;;  %v5750_v9 = vsel %vm5747_vm15, %v5749_v61, %v5745_v42  ;;  %v5784_v1 = vmul.f32 %v8090_v4, %v5735_v20  ;;  %v5881_v4 = vld [vmem:[%s12920_s6 + $0x10] sm:$0xff] }
0x121a   :  { %v5754_v58 = vsub.f32 1.0, %v5753_v44  ;;  %v8094_v6 = vpop.eup %8093  ;;  %v5785_v25 = vmul.f32 %v8092_v53, %v5750_v9 }
0x121b   :  { %v8096_v38 = vpop.eup %8095  ;;  %6422 = vmatmul.msk.f32.gmra.mxu2 %vm165_vm0, %v5873_v54 }
0x121c   :  { %v5755_v26 = vmul.f32 %v8088_v14, %v5754_v58  ;;  %v5783_v60 = vmul.f32 %v8096_v38, %v5720_v35 }
0x121e   :  { %v5756_v49 = vadd.f32 %v8088_v14, %v5755_v26  ;;  %v5879_v26 = vld [vmem:[%s12920_s6] sm:$0xff]  ;;  %s6048_s6 = sshll.u32 %s8210_s5, 4  ;;  %s6049_s6 = int_to_ptr.vmem [resolvable:$true] %s6048_s6 }
0x1220   :  { %v5760_v48 = vsel %vm5759_vm13, %v8088_v14, %v5756_v49  ;;  %6003 = vperm.xlu2 %7072, %v5997_v52  }
0x1221   :  { %v5765_v37 = vsel %vm5762_vm14, %v5764_v22, %v5760_v48 }
0x1222   :  { %v5786_v15 = vmul.f32 %v8094_v6, %v5765_v37 }
0x1223   :  { %6423 = vmatmul.msk.f32.gmra.mxu2 %vm165_vm0, %v5874_v41 }
0x1224   :  { %5850 = vmatpush.msra.mxu0 %v5786_v15 }
0x1226   :  { %5851 = vmatpush.msra.mxu0 %v5785_v25 }
0x1228   :  { %5852 = vmatpush.msra.mxu0 %v5784_v1  ;;  %6018 = vperm.xlu2 %7072, %v6000_v51  }
0x122a   :  { %5853 = vmatpush.msra.mxu0 %v5783_v60 }
0x122b   :  { %6412 = vmatmul.msk.f32.vlgmr.msra.gmra.mxu0 %vm165_vm0, %v5798_v11 }
0x1233   :  { %6413 = vmatmul.msk.f32.gmra.mxu0 %vm165_vm0, %v5799_v47 }
0x123b   :  { %6414 = vmatmul.msk.f32.gmra.mxu0 %vm165_vm0, %v5800_v32 }
0x1243   :  { %6415 = vmatmul.msk.f32.gmra.mxu0 %vm165_vm0, %v5801_v50 }
0x1258   :  { %v5824_v7 = vpop.permute.xlu0 %5823 }
0x1263   :  { %v5814_v62 = vpop.permute.xlu1 %5813 }
0x1265   :  { %v5819_v36 = vpop.permute.xlu0 %5818 }
0x126a   :  { %v5972_v53 = vpop.permute.xlu2 %5971 }
0x126b   :  { %v5809_v17 = vpop.permute.xlu1 %5808 }
0x1272   :  { %v5977_v45 = vpop.permute.xlu2 %5976 }
0x1273   :  { %v5987_v48 = vpop.permute.xlu1 %5986 }
0x1277   :  { %v5982_v0 = vpop.permute.xlu0 %5981 }
0x127a   :  { %v6004_v15 = vpop.permute.xlu2 %6003 }
0x127b   :  { %v6014_v38 = vpop.permute.xlu1 %6013 }
0x127f   :  { %v6009_v43 = vpop.permute.xlu0 %6008 }
0x1282   :  { %v6019_v50 = vpop.permute.xlu2 %6018 }
0x1287   :  { %v6038_v54 = vpop.permute.xlu0 %6037 }
0x1296   :  { %v5956_v42 = vpop.f32.mrf.mxu2 }
0x129e   :  { %v5959_v22 = vpop.f32.mrf.mxu2 }
0x12a6   :  { %v5962_v20 = vpop.f32.mrf.mxu2 }
0x12a8   :  { %v5855_v59 = vpop.f32.mrf.mxu0 }
0x12a9   :  { %v5856_v29 = vadd.f32 %v5855_v59, %v5809_v17 }
0x12ab   :  { %v5867_v31 = vmax.f32 %v5856_v29, 0.0 }
0x12b0   :  { %v5858_v10 = vpop.f32.mrf.mxu0 }
0x12b1   :  { %v5859_v39 = vadd.f32 %v5858_v10, %v5814_v62  ;;  %v6040_v62 = vperm.slane %v6038_v54, 0 }
0x12b3   :  { %v5868_v63 = vmax.f32 %v5859_v39, 0.0 }
0x12b8   :  { %v5861_v57 = vpop.f32.mrf.mxu0 }
0x12b9   :  { %v5862_v14 = vadd.f32 %v5861_v57, %v5819_v36 }
0x12bb   :  { %v5869_v19 = vmax.f32 %v5862_v14, 0.0 }
0x12c0   :  { %v5864_v34 = vpop.f32.mrf.mxu0 }
0x12c1   :  { %v5865_v44 = vadd.f32 %v5864_v34, %v5824_v7 }
0x12c3   :  { %v5870_v58 = vmax.f32 %v5865_v44, 0.0 }
0x12c5   :  { %5907 = vmatpush.msra.mxu1 %v5870_v58  ;;  %7056 = vmatpush.msra.mxu3 %v5870_v58 }
0x12c7   :  { %5908 = vmatpush.msra.mxu1 %v5869_v19  ;;  %7057 = vmatpush.msra.mxu3 %v5869_v19 }
0x12c9   :  { %5909 = vmatpush.msra.mxu1 %v5868_v63  ;;  %7058 = vmatpush.msra.mxu3 %v5868_v63 }
0x12cb   :  { %5910 = vmatpush.msra.mxu1 %v5867_v31  ;;  %7059 = vmatpush.msra.mxu3 %v5867_v31 }
0x12cc   :  { %6416 = vmatmul.msk.f32.vlgmr.msra.gmra.mxu1 %vm165_vm0, %v5879_v26  ;;  %6417 = vmatmul.msk.f32.vlgmr.msra.gmra.mxu3 %vm165_vm0, %v5880_v27 }
0x12cd   :  { %5948 = vmatpush.msrb.mxu1 %v5878_v30 }
0x12cf   :  { %5949 = vmatpush.msrb.mxu1 %v5877_v33 }
0x12d1   :  { %5950 = vmatpush.msrb.mxu1 %v5876_v56 }
0x12d3   :  { %5951 = vmatpush.msrb.mxu1 %v5875_v46 }
0x12d4   :  { %6418 = vmatmul.msk.f32.gmra.mxu3 %vm165_vm0, %v5881_v4  ;;  %6420 = vmatmul.msk.f32.vlgmr.msrb.gmra.mxu1 %vm165_vm0, %v5871_v2 }
0x12dc   :  { %6419 = vmatmul.msk.f32.gmra.mxu3 %vm165_vm0, %v5882_v21 }
0x1349   :  { %v5912_v49 = vpop.f32.mrf.mxu1 }
0x134f   :  { %v5915_v5 = vpop.f32.mrf.mxu3 }
0x1350   :  { %v5957_v28 = vadd.f32 %v5956_v42, %v5915_v5 }
0x1351   :  { %v5953_v6 = vpop.f32.mrf.mxu1 }
0x1352   :  { %v5954_v61 = vadd.f32 %v5953_v6, %v5912_v49  ;;  %v5990_v9 = vadd.f32 %v5977_v45, %v5957_v28 }
0x1354   :  { %v5989_v24 = vadd.f32 %v5972_v53, %v5954_v61  ;;  %v5994_v3 = vmax.f32 %v5990_v9, 0.0 }
0x1356   :  { %v5993_v8 = vmax.f32 %v5989_v24, 0.0  ;;  %v6022_v60 = vmul.f32 %v6009_v43, %v5994_v3 }
0x1357   :  { %v5918_v16 = vpop.f32.mrf.mxu3 }
0x1358   :  { %v5960_v37 = vadd.f32 %v5959_v22, %v5918_v16  ;;  %v6021_v35 = vmul.f32 %v6004_v15, %v5993_v8 }
0x135a   :  { %v5991_v23 = vadd.f32 %v5982_v0, %v5960_v37  ;;  %v6025_v47 = vadd.f32 %v6022_v60, %v6021_v35 }
0x135c   :  { %v5995_v13 = vmax.f32 %v5991_v23, 0.0 }
0x135e   :  { %v6023_v11 = vmul.f32 %v6014_v38, %v5995_v13 }
0x135f   :  { %v5921_v25 = vpop.f32.mrf.mxu3 }
0x1360   :  { %v5963_v1 = vadd.f32 %v5962_v20, %v5921_v25  ;;  %v6026_v33 = vadd.f32 %v6025_v47, %v6023_v11 }
0x1362   :  { %v5992_v40 = vadd.f32 %v5987_v48, %v5963_v1 }
0x1364   :  { %v5996_v32 = vmax.f32 %v5992_v40, 0.0 }
0x1366   :  { %v6024_v30 = vmul.f32 %v6019_v50, %v5996_v32 }
0x1368   :  { %v6027_v59 = vadd.f32 %v6026_v33, %v6024_v30 }
0x136a   :  { %v6028_v56 = vrot.slane %v6027_v59, 4 }
0x136c   :  { %v6029_v46 = vadd.f32 %v6028_v56, %v6027_v59 }
0x136e   :  { %v6030_v18 = vrot.slane %v6029_v46, 2 }
0x1370   :  { %v6031_v10 = vadd.f32 %v6030_v18, %v6029_v46 }
0x1372   :  { %v6032_v7 = vrot.slane %v6031_v10, 1 }
0x1374   :  { %v6033_v57 = vadd.f32 %v6032_v7, %v6031_v10 }
0x1376   :  { %v6041_v12 = vadd.f32 %v6040_v62, %v6033_v57 }
0x1378   :  { %6042 = vst [vmem:[#allocation8] sm:$0x1] %v6041_v12 }
0x1379   :  { %6053 = dma.vmem_to_hbm [thread:$0]  %s6049_s6, 16, %s6051_s22, [#allocation7]  }
0x137a   :  { %8203 = dma.done.wait [#allocation7], 16  }
0x137b   :  { %8204 = vsyncadd [#allocation7], 4294967280 }
0x137c   :  { %6058 = vsyncpa [#allocation6], 1 }
0x137d   :  { %6059 = vsyncpa [#allocation7], 1 }

</bundles_post_ra>
